<compile_context>
chip_gen: v7x
topology: tpu7x:2x2x1
jax: 0.10.0
libtpu: 0.0.40
codegen_flags: <defaults>
</compile_context>

<pallas_src>
import math

import numpy as np

import jax
import jax.numpy as jnp
from jax.experimental import pallas as pl
from jax.experimental.pallas import tpu as pltpu

# --- hyperparameters (small but consistent with the module __init__) ------------
VOCAB_SIZE = 100        # used only by WindowEncoder (not used in TimeSeriesBERTCLS.forward)
NAME_EMBED_DIM = 8      # unused in forward
VALUE_DIM = 8           # unused in forward
HIDDEN_DIM = 32
NUM_LAYERS = 2
NUM_HEADS = 4
MAX_SEQ_LEN = 16
DIM_FF = 2048           # nn.TransformerEncoderLayer default dim_feedforward
HEAD_DIM = HIDDEN_DIM // NUM_HEADS
LN_EPS = 1e-5
SEQ_LEN = 8             # number of window embeddings fed into forward()
BATCH = 4               # number of sequences processed per pallas_call (demo)
FF_CHUNK = 1024         # feed-forward chunk width over DIM_FF

# TODO(synk): nn.Dropout is implemented as identity (eval / inference semantics).


def _layer_norm(x, w, b):
    mu = jnp.mean(x, axis=-1, keepdims=True)
    xc = x - mu
    var = jnp.mean(xc * xc, axis=-1, keepdims=True)
    inv = jax.lax.rsqrt(var + LN_EPS)
    return xc * inv * w + b


def bert_cls_kernel(win_ref, cls_ref, pos_ref, mask_ref,
                    in_w_ref, in_b_ref, out_w_ref, out_b_ref,
                    ff1_w_ref, ff1_b_ref, ff2_w_ref, ff2_b_ref,
                    ln1_w_ref, ln1_b_ref, ln2_w_ref, ln2_b_ref,
                    head_w_ref, head_b_ref,
                    o_ref):
    B, SL, H = win_ref.shape
    S = SL + 1                                    # sequence length incl. CLS token
    L, NH, HD, _ = out_w_ref.shape                # head-major out-proj weights
    NCH = ff1_w_ref.shape[1]                      # number of feed-forward chunks

    # ---- assemble x = [CLS; windows] + pos for every sequence, flattened (B*S, H) ----
    cls = cls_ref[...]                            # (1, H)
    pos_seq = pos_ref[0:S, :]                     # (S, H)
    pieces = []
    for b in range(B):                            # static unroll over the (small) batch
        pieces.append(cls)
        pieces.append(win_ref[b])                 # (SL, H)
    x = jnp.concatenate(pieces, axis=0) + jnp.concatenate([pos_seq] * B, axis=0)
    mask = mask_ref[...]                          # (B*S, B*S) additive block-diagonal mask

    for l in range(L):                            # static unrolled layer loop
        # ---- multi-head self-attention (1/sqrt(HD) already folded into Q weights) ----
        qkv = jnp.dot(x, in_w_ref[l], preferred_element_type=jnp.float32) + in_b_ref[l]
        attn = out_b_ref[l]                       # (1, H) — broadcasts on add
        for h in range(NH):
            q_h = qkv[:, h * HD:(h + 1) * HD]                 # (B*S, HD)
            k_h = qkv[:, H + h * HD:H + (h + 1) * HD]
            v_h = qkv[:, 2 * H + h * HD:2 * H + (h + 1) * HD]
            s = jnp.einsum("qd,kd->qk", q_h, k_h,
                           preferred_element_type=jnp.float32) + mask   # (B*S, B*S)
            s = s - jnp.max(s, axis=-1, keepdims=True)
            p = jnp.exp(s)
            p = p * pl.reciprocal(jnp.sum(p, axis=-1, keepdims=True), approx=True)
            o_h = jnp.dot(p, v_h, preferred_element_type=jnp.float32)  # (B*S, HD)
            attn = attn + jnp.dot(o_h, out_w_ref[l, h],
                                  preferred_element_type=jnp.float32)  # (B*S, H)

        # ---- residual + LayerNorm 1 ----
        y = _layer_norm(x + attn, ln1_w_ref[l], ln1_b_ref[l])

        # ---- feed-forward (ReLU), chunk-major bf16 weights, f32 accumulate ----
        yb = y.astype(jnp.bfloat16)
        ff = ff2_b_ref[l]                         # (1, H) — broadcasts on add
        for c in range(NCH):
            h1 = jnp.dot(yb, ff1_w_ref[l, c], preferred_element_type=jnp.float32)
            h1 = jnp.maximum(h1 + ff1_b_ref[l, c], 0.0)
            ff = ff + jnp.dot(h1.astype(jnp.bfloat16), ff2_w_ref[l, c],
                              preferred_element_type=jnp.float32)

        # ---- residual + LayerNorm 2 ----
        x = _layer_norm(y + ff, ln2_w_ref[l], ln2_b_ref[l])

    # ---- gather the B CLS rows (positions b*S) and apply the head Linear ----
    cls_rows = jnp.concatenate([x[b * S:b * S + 1, :] for b in range(B)], axis=0)  # (B, H)
    o_ref[...] = (jnp.dot(cls_rows, head_w_ref[...],
                          preferred_element_type=jnp.float32) + head_b_ref[...])


def _resident_spec(arr):
    """Full-array block with a constant index_map -> stays resident in VMEM."""
    zeros = (0,) * arr.ndim
    return pl.BlockSpec(arr.shape, lambda i, _z=zeros: _z)


@jax.jit
def bert_cls_forward_batched(window_embeddings_batch, kparams):
    """Batched TimeSeriesBERTCLS.forward (eval mode): (B, seq_len, H) -> (B, H)."""
    B, SL, H = window_embeddings_batch.shape
    S = SL + 1
    BS = B * S

    # Block-diagonal additive attention mask (compile-time constant, tiny):
    # token i may only attend to token j if they belong to the same sequence.
    grp = np.arange(BS) // S
    attn_mask = jnp.asarray(np.where(grp[:, None] == grp[None, :], 0.0, -1e30),
                            dtype=jnp.float32)

    inputs = (
        window_embeddings_batch,
        kparams["cls_token"], kparams["pos_emb"], attn_mask,
        kparams["in_proj_w"], kparams["in_proj_b"],
        kparams["out_proj_w"], kparams["out_proj_b"],
        kparams["ff1_w"], kparams["ff1_b"],
        kparams["ff2_w"], kparams["ff2_b"],
        kparams["ln1_w"], kparams["ln1_b"],
        kparams["ln2_w"], kparams["ln2_b"],
        kparams["head_w"], kparams["head_b"],
    )

    return pl.pallas_call(
        bert_cls_kernel,
        grid=(1,),                                # single step: whole batch fused
        out_shape=jax.ShapeDtypeStruct((B, H), jnp.float32),
        in_specs=[_resident_spec(a) for a in inputs],
        out_specs=pl.BlockSpec((B, H), lambda i: (0, 0)),
        compiler_params=pltpu.CompilerParams(
            dimension_semantics=("arbitrary",)),  # single-TC; trivial grid axis
    )(*inputs)


def bert_cls_forward(window_embeddings, kparams):
    """Single-sequence forward matching the PyTorch module signature."""
    return bert_cls_forward_batched(window_embeddings[None], kparams)[0]


def prepare_kernel_params(params):
    """One-time parameter prep: fold softmax scale into Q, head-major out-proj,
    chunk-major bf16 feed-forward weights."""
    H, L = HIDDEN_DIM, NUM_LAYERS
    NCH = DIM_FF // FF_CHUNK
    kp = dict(params)
    scale = 1.0 / math.sqrt(HEAD_DIM)
    kp["in_proj_w"] = params["in_proj_w"].at[:, :, :H].multiply(scale)
    kp["in_proj_b"] = params["in_proj_b"].at[:, :, :H].multiply(scale)
    # head-major output projection: (L, H, H) -> (L, NH, HD, H)
    kp["out_proj_w"] = params["out_proj_w"].reshape(L, NUM_HEADS, HEAD_DIM, H)
    # chunk-major feed-forward weights / biases, bf16 weights
    kp["ff1_w"] = (params["ff1_w"].reshape(L, H, NCH, FF_CHUNK)
                   .transpose(0, 2, 1, 3).astype(jnp.bfloat16))          # (L, NCH, H, FCH)
    kp["ff1_b"] = params["ff1_b"].reshape(L, NCH, 1, FF_CHUNK)           # (L, NCH, 1, FCH)
    kp["ff2_w"] = params["ff2_w"].reshape(L, NCH, FF_CHUNK, H).astype(jnp.bfloat16)  # (L, NCH, FCH, H)
    return kp


# --------------------------- pure-JAX reference ---------------------------------
def reference_forward(window_embeddings, params):
    H = HIDDEN_DIM
    x = jnp.concatenate([params["cls_token"], window_embeddings], axis=0)
    x = x + params["pos_emb"][: x.shape[0]]
    S = x.shape[0]
    scale = 1.0 / math.sqrt(HEAD_DIM)
    for l in range(NUM_LAYERS):
        qkv = x @ params["in_proj_w"][l] + params["in_proj_b"][l]
        q, k, v = qkv[:, :H], qkv[:, H:2 * H], qkv[:, 2 * H:]
        qh = q.reshape(S, NUM_HEADS, HEAD_DIM).transpose(1, 0, 2)
        kh = k.reshape(S, NUM_HEADS, HEAD_DIM).transpose(1, 0, 2)
        vh = v.reshape(S, NUM_HEADS, HEAD_DIM).transpose(1, 0, 2)
        s = jnp.einsum("hqd,hkd->hqk", qh, kh) * scale
        p = jax.nn.softmax(s, axis=-1)
        o = jnp.einsum("hqk,hkd->hqd", p, vh).transpose(1, 0, 2).reshape(S, H)
        o = o @ params["out_proj_w"][l] + params["out_proj_b"][l]
        x = _layer_norm(x + o, params["ln1_w"][l], params["ln1_b"][l])
        h = jax.nn.relu(x @ params["ff1_w"][l] + params["ff1_b"][l])
        h = h @ params["ff2_w"][l] + params["ff2_b"][l]
        x = _layer_norm(x + h, params["ln2_w"][l], params["ln2_b"][l])
    return x[0] @ params["head_w"] + params["head_b"][0]


# --------------------------- deterministic params --------------------------------
def make_params(key):
    H, L, FF = HIDDEN_DIM, NUM_LAYERS, DIM_FF
    keys = iter(jax.random.split(key, 8 + 8 * L))

    def nrm(k, shape, std):
        return jax.random.normal(k, shape, jnp.float32) * std

    params = {
        "cls_token": jax.random.normal(next(keys), (1, H), jnp.float32),        # nn.Parameter randn
        "pos_emb": nrm(next(keys), (MAX_SEQ_LEN + 1, H), 0.02),                 # nn.Embedding weight
        "head_w": nrm(next(keys), (H, H), 0.05).T,                              # Linear (out,in) -> (in,out)
        "head_b": nrm(next(keys), (1, H), 0.05),
    }
    in_w, in_b, out_w, out_b = [], [], [], []
    f1_w, f1_b, f2_w, f2_b = [], [], [], []
    for _ in range(L):
        in_w.append(nrm(next(keys), (3 * H, H), 0.05).T)     # (H, 3H)
        in_b.append(nrm(next(keys), (1, 3 * H), 0.05))
        out_w.append(nrm(next(keys), (H, H), 0.05).T)        # (H, H)
        out_b.append(nrm(next(keys), (1, H), 0.05))
        f1_w.append(nrm(next(keys), (FF, H), 0.05).T)        # (H, FF)
        f1_b.append(nrm(next(keys), (1, FF), 0.05))
        f2_w.append(nrm(next(keys), (H, FF), 0.02).T)        # (FF, H)
        f2_b.append(nrm(next(keys), (1, H), 0.02))
    params.update({
        "in_proj_w": jnp.stack(in_w), "in_proj_b": jnp.stack(in_b),
        "out_proj_w": jnp.stack(out_w), "out_proj_b": jnp.stack(out_b),
        "ff1_w": jnp.stack(f1_w), "ff1_b": jnp.stack(f1_b),
        "ff2_w": jnp.stack(f2_w), "ff2_b": jnp.stack(f2_b),
        # LayerNorm affine params: PyTorch default init (ones / zeros)
        "ln1_w": jnp.ones((L, 1, H), jnp.float32), "ln1_b": jnp.zeros((L, 1, H), jnp.float32),
        "ln2_w": jnp.ones((L, 1, H), jnp.float32), "ln2_b": jnp.zeros((L, 1, H), jnp.float32),
    })
    return params


if __name__ == "__main__":
    key = jax.random.PRNGKey(0)
    pkey, xkey = jax.random.split(key)
    params = make_params(pkey)                   # raw (f32) params -> reference
    kparams = prepare_kernel_params(params)      # kernel params (scaled Q, head-major, bf16 FF)

    # batch of sequences of window embeddings, each (seq_len, hidden_dim)
    batch = jax.random.normal(xkey, (BATCH, SEQ_LEN, HIDDEN_DIM), jnp.float32)

    out = bert_cls_forward_batched(batch, kparams)
    out = jax.block_until_ready(out)

    ref = jnp.stack([reference_forward(batch[i], params) for i in range(BATCH)])
    assert out.shape == (BATCH, HIDDEN_DIM)
    # bf16 FF weights + approximate softmax reciprocal => bf16-level tolerance.
    max_err = float(jnp.max(jnp.abs(out - ref)))
    assert jnp.allclose(out, ref, atol=5e-3, rtol=5e-3), f"max abs err = {max_err}"

    print("KERNEL_OK")
</pallas_src>

<mosaic_0001>
module attributes {stable_mosaic.version = 11 : i64} {
  func.func @bert_cls_kernel(%arg0: i32, %arg1: memref<4x8x32xf32, #tpu.memory_space<vmem>>, %arg2: memref<1x32xf32, #tpu.memory_space<vmem>>, %arg3: memref<17x32xf32, #tpu.memory_space<vmem>>, %arg4: memref<36x36xf32, #tpu.memory_space<vmem>>, %arg5: memref<2x32x96xf32, #tpu.memory_space<vmem>>, %arg6: memref<2x1x96xf32, #tpu.memory_space<vmem>>, %arg7: memref<2x4x8x32xf32, #tpu.memory_space<vmem>>, %arg8: memref<2x1x32xf32, #tpu.memory_space<vmem>>, %arg9: memref<2x2x32x1024xbf16, #tpu.memory_space<vmem>>, %arg10: memref<2x2x1x1024xf32, #tpu.memory_space<vmem>>, %arg11: memref<2x2x1024x32xbf16, #tpu.memory_space<vmem>>, %arg12: memref<2x1x32xf32, #tpu.memory_space<vmem>>, %arg13: memref<2x1x32xf32, #tpu.memory_space<vmem>>, %arg14: memref<2x1x32xf32, #tpu.memory_space<vmem>>, %arg15: memref<2x1x32xf32, #tpu.memory_space<vmem>>, %arg16: memref<2x1x32xf32, #tpu.memory_space<vmem>>, %arg17: memref<32x32xf32, #tpu.memory_space<vmem>>, %arg18: memref<1x32xf32, #tpu.memory_space<vmem>>, %arg19: memref<4x32xf32, #tpu.memory_space<vmem>>) attributes {dimension_semantics = [#tpu.dimension_semantics<arbitrary>], iteration_bounds = array<i64: 1>, scalar_prefetch = 0 : i64, scratch_operands = 0 : i64, tpu.core_type = #tpu.core_type<tc>, window_params = [{pipeline_mode = #tpu.pipeline_mode<synchronous>, transform_indices = @transform_0, window_bounds = array<i64: 4, 8, 32>}, {pipeline_mode = #tpu.pipeline_mode<synchronous>, transform_indices = @transform_1, window_bounds = array<i64: 1, 32>}, {pipeline_mode = #tpu.pipeline_mode<synchronous>, transform_indices = @transform_2, window_bounds = array<i64: 17, 32>}, {pipeline_mode = #tpu.pipeline_mode<synchronous>, transform_indices = @transform_3, window_bounds = array<i64: 36, 36>}, {pipeline_mode = #tpu.pipeline_mode<synchronous>, transform_indices = @transform_4, window_bounds = array<i64: 2, 32, 96>}, {pipeline_mode = #tpu.pipeline_mode<synchronous>, transform_indices = @transform_5, window_bounds = array<i64: 2, 1, 96>}, {pipeline_mode = #tpu.pipeline_mode<synchronous>, transform_indices = @transform_6, window_bounds = array<i64: 2, 4, 8, 32>}, {pipeline_mode = #tpu.pipeline_mode<synchronous>, transform_indices = @transform_7, window_bounds = array<i64: 2, 1, 32>}, {pipeline_mode = #tpu.pipeline_mode<synchronous>, transform_indices = @transform_8, window_bounds = array<i64: 2, 2, 32, 1024>}, {pipeline_mode = #tpu.pipeline_mode<synchronous>, transform_indices = @transform_9, window_bounds = array<i64: 2, 2, 1, 1024>}, {pipeline_mode = #tpu.pipeline_mode<synchronous>, transform_indices = @transform_10, window_bounds = array<i64: 2, 2, 1024, 32>}, {pipeline_mode = #tpu.pipeline_mode<synchronous>, transform_indices = @transform_11, window_bounds = array<i64: 2, 1, 32>}, {pipeline_mode = #tpu.pipeline_mode<synchronous>, transform_indices = @transform_12, window_bounds = array<i64: 2, 1, 32>}, {pipeline_mode = #tpu.pipeline_mode<synchronous>, transform_indices = @transform_13, window_bounds = array<i64: 2, 1, 32>}, {pipeline_mode = #tpu.pipeline_mode<synchronous>, transform_indices = @transform_14, window_bounds = array<i64: 2, 1, 32>}, {pipeline_mode = #tpu.pipeline_mode<synchronous>, transform_indices = @transform_15, window_bounds = array<i64: 2, 1, 32>}, {pipeline_mode = #tpu.pipeline_mode<synchronous>, transform_indices = @transform_16, window_bounds = array<i64: 32, 32>}, {pipeline_mode = #tpu.pipeline_mode<synchronous>, transform_indices = @transform_17, window_bounds = array<i64: 1, 32>}, {pipeline_mode = #tpu.pipeline_mode<synchronous>, transform_indices = @transform_18, window_bounds = array<i64: 4, 32>}]} {
    %c0 = arith.constant 0 : index
    %c0_0 = arith.constant 0 : index
    %0 = vector.load %arg2[%c0, %c0_0] : memref<1x32xf32, #tpu.memory_space<vmem>>, vector<1x32xf32>
    %c0_1 = arith.constant 0 : index
    %c0_2 = arith.constant 0 : index
    %1 = vector.load %arg3[%c0_1, %c0_2] : memref<17x32xf32, #tpu.memory_space<vmem>>, vector<9x32xf32>
    %c0_3 = arith.constant 0 : index
    %c0_4 = arith.constant 0 : index
    %c0_5 = arith.constant 0 : index
    %2 = vector.load %arg1[%c0_3, %c0_4, %c0_5] : memref<4x8x32xf32, #tpu.memory_space<vmem>>, vector<1x8x32xf32>
    %3 = vector.shape_cast %2 : vector<1x8x32xf32> to vector<8x32xf32>
    %c1 = arith.constant 1 : index
    %c0_6 = arith.constant 0 : index
    %c0_7 = arith.constant 0 : index
    %4 = vector.load %arg1[%c1, %c0_6, %c0_7] : memref<4x8x32xf32, #tpu.memory_space<vmem>>, vector<1x8x32xf32>
    %5 = vector.shape_cast %4 : vector<1x8x32xf32> to vector<8x32xf32>
    %c2 = arith.constant 2 : index
    %c0_8 = arith.constant 0 : index
    %c0_9 = arith.constant 0 : index
    %6 = vector.load %arg1[%c2, %c0_8, %c0_9] : memref<4x8x32xf32, #tpu.memory_space<vmem>>, vector<1x8x32xf32>
    %7 = vector.shape_cast %6 : vector<1x8x32xf32> to vector<8x32xf32>
    %c3 = arith.constant 3 : index
    %c0_10 = arith.constant 0 : index
    %c0_11 = arith.constant 0 : index
    %8 = vector.load %arg1[%c3, %c0_10, %c0_11] : memref<4x8x32xf32, #tpu.memory_space<vmem>>, vector<1x8x32xf32>
    %9 = vector.shape_cast %8 : vector<1x8x32xf32> to vector<8x32xf32>
    %10 = tpu.concatenate %0, %3, %0, %5, %0, %7, %0, %9 in 0 : vector<1x32xf32>, vector<8x32xf32>, vector<1x32xf32>, vector<8x32xf32>, vector<1x32xf32>, vector<8x32xf32>, vector<1x32xf32>, vector<8x32xf32> -> vector<36x32xf32>
    %11 = tpu.concatenate %1, %1, %1, %1 in 0 : vector<9x32xf32>, vector<9x32xf32>, vector<9x32xf32>, vector<9x32xf32> -> vector<36x32xf32>
    %12 = arith.addf %10, %11 : vector<36x32xf32>
    %c0_12 = arith.constant 0 : index
    %c0_13 = arith.constant 0 : index
    %13 = vector.load %arg4[%c0_12, %c0_13] : memref<36x36xf32, #tpu.memory_space<vmem>>, vector<36x36xf32>
    %c0_14 = arith.constant 0 : index
    %c0_15 = arith.constant 0 : index
    %c0_16 = arith.constant 0 : index
    %14 = vector.load %arg5[%c0_14, %c0_15, %c0_16] : memref<2x32x96xf32, #tpu.memory_space<vmem>>, vector<1x32x96xf32>
    %15 = vector.shape_cast %14 : vector<1x32x96xf32> to vector<32x96xf32>
    %cst = arith.constant dense<0.000000e+00> : vector<36x96xf32>
    %16 = tpu.matmul %12, %15, %cst {dimension_numbers = #tpu.dot_dimension_numbers<[1], [0], [0], [1], [0, 0, 1, 1], [], []>} : vector<36x32xf32>, vector<32x96xf32>, vector<36x96xf32> -> vector<36x96xf32>
    %c0_17 = arith.constant 0 : index
    %c0_18 = arith.constant 0 : index
    %c0_19 = arith.constant 0 : index
    %17 = vector.load %arg6[%c0_17, %c0_18, %c0_19] : memref<2x1x96xf32, #tpu.memory_space<vmem>>, vector<1x1x96xf32>
    %18 = vector.shape_cast %17 : vector<1x1x96xf32> to vector<1x96xf32>
    %19 = vector.broadcast %18 : vector<1x96xf32> to vector<36x96xf32>
    %20 = arith.addf %16, %19 : vector<36x96xf32>
    %c0_20 = arith.constant 0 : index
    %c0_21 = arith.constant 0 : index
    %c0_22 = arith.constant 0 : index
    %21 = vector.load %arg8[%c0_20, %c0_21, %c0_22] : memref<2x1x32xf32, #tpu.memory_space<vmem>>, vector<1x1x32xf32>
    %22 = vector.shape_cast %21 : vector<1x1x32xf32> to vector<1x32xf32>
    %23 = vector.extract_strided_slice %20 {offsets = [0, 0], sizes = [36, 8], strides = [1, 1]} : vector<36x96xf32> to vector<36x8xf32>
    %24 = vector.extract_strided_slice %20 {offsets = [0, 32], sizes = [36, 8], strides = [1, 1]} : vector<36x96xf32> to vector<36x8xf32>
    %25 = vector.extract_strided_slice %20 {offsets = [0, 64], sizes = [36, 8], strides = [1, 1]} : vector<36x96xf32> to vector<36x8xf32>
    "tpu.trace_start"() <{level = 10 : i32, message = "qd,kd->qk"}> : () -> ()
    %cst_23 = arith.constant dense<0.000000e+00> : vector<36x36xf32>
    %26 = tpu.matmul %23, %24, %cst_23 {dimension_numbers = #tpu.dot_dimension_numbers<[1], [1], [0], [0], [0, 0, 1, 0], [], []>} : vector<36x8xf32>, vector<36x8xf32>, vector<36x36xf32> -> vector<36x36xf32>
    "tpu.trace_stop"() : () -> ()
    %27 = arith.addf %26, %13 : vector<36x36xf32>
    %cst_24 = arith.constant dense<0xFF800000> : vector<36xf32>
    %28 = vector.multi_reduction <maximumf>, %27, %cst_24 [1] : vector<36x36xf32> to vector<36xf32>
    %29 = vector.shape_cast %28 : vector<36xf32> to vector<36x1xf32>
    %30 = vector.broadcast %29 : vector<36x1xf32> to vector<36x36xf32>
    %31 = arith.subf %27, %30 : vector<36x36xf32>
    %32 = math.exp %31 : vector<36x36xf32>
    %cst_25 = arith.constant dense<0.000000e+00> : vector<36xf32>
    %33 = vector.multi_reduction <add>, %32, %cst_25 [1] : vector<36x36xf32> to vector<36xf32>
    %34 = vector.shape_cast %33 : vector<36xf32> to vector<36x1xf32>
    %35 = tpu.reciprocal %34 {approx = true} : vector<36x1xf32> -> vector<36x1xf32>
    %36 = vector.broadcast %35 : vector<36x1xf32> to vector<36x36xf32>
    %37 = arith.mulf %32, %36 : vector<36x36xf32>
    %cst_26 = arith.constant dense<0.000000e+00> : vector<36x8xf32>
    %38 = tpu.matmul %37, %25, %cst_26 {dimension_numbers = #tpu.dot_dimension_numbers<[1], [0], [0], [1], [0, 0, 1, 1], [], []>} : vector<36x36xf32>, vector<36x8xf32>, vector<36x8xf32> -> vector<36x8xf32>
    %c0_27 = arith.constant 0 : index
    %c0_28 = arith.constant 0 : index
    %c0_29 = arith.constant 0 : index
    %c0_30 = arith.constant 0 : index
    %39 = vector.load %arg7[%c0_27, %c0_28, %c0_29, %c0_30] : memref<2x4x8x32xf32, #tpu.memory_space<vmem>>, vector<1x1x8x32xf32>
    %40 = vector.shape_cast %39 : vector<1x1x8x32xf32> to vector<8x32xf32>
    %cst_31 = arith.constant dense<0.000000e+00> : vector<36x32xf32>
    %41 = tpu.matmul %38, %40, %cst_31 {dimension_numbers = #tpu.dot_dimension_numbers<[1], [0], [0], [1], [0, 0, 1, 1], [], []>} : vector<36x8xf32>, vector<8x32xf32>, vector<36x32xf32> -> vector<36x32xf32>
    %42 = vector.broadcast %22 : vector<1x32xf32> to vector<36x32xf32>
    %43 = arith.addf %42, %41 : vector<36x32xf32>
    %44 = vector.extract_strided_slice %20 {offsets = [0, 8], sizes = [36, 8], strides = [1, 1]} : vector<36x96xf32> to vector<36x8xf32>
    %45 = vector.extract_strided_slice %20 {offsets = [0, 40], sizes = [36, 8], strides = [1, 1]} : vector<36x96xf32> to vector<36x8xf32>
    %46 = vector.extract_strided_slice %20 {offsets = [0, 72], sizes = [36, 8], strides = [1, 1]} : vector<36x96xf32> to vector<36x8xf32>
    "tpu.trace_start"() <{level = 10 : i32, message = "qd,kd->qk"}> : () -> ()
    %cst_32 = arith.constant dense<0.000000e+00> : vector<36x36xf32>
    %47 = tpu.matmul %44, %45, %cst_32 {dimension_numbers = #tpu.dot_dimension_numbers<[1], [1], [0], [0], [0, 0, 1, 0], [], []>} : vector<36x8xf32>, vector<36x8xf32>, vector<36x36xf32> -> vector<36x36xf32>
    "tpu.trace_stop"() : () -> ()
    %48 = arith.addf %47, %13 : vector<36x36xf32>
    %cst_33 = arith.constant dense<0xFF800000> : vector<36xf32>
    %49 = vector.multi_reduction <maximumf>, %48, %cst_33 [1] : vector<36x36xf32> to vector<36xf32>
    %50 = vector.shape_cast %49 : vector<36xf32> to vector<36x1xf32>
    %51 = vector.broadcast %50 : vector<36x1xf32> to vector<36x36xf32>
    %52 = arith.subf %48, %51 : vector<36x36xf32>
    %53 = math.exp %52 : vector<36x36xf32>
    %cst_34 = arith.constant dense<0.000000e+00> : vector<36xf32>
    %54 = vector.multi_reduction <add>, %53, %cst_34 [1] : vector<36x36xf32> to vector<36xf32>
    %55 = vector.shape_cast %54 : vector<36xf32> to vector<36x1xf32>
    %56 = tpu.reciprocal %55 {approx = true} : vector<36x1xf32> -> vector<36x1xf32>
    %57 = vector.broadcast %56 : vector<36x1xf32> to vector<36x36xf32>
    %58 = arith.mulf %53, %57 : vector<36x36xf32>
    %cst_35 = arith.constant dense<0.000000e+00> : vector<36x8xf32>
    %59 = tpu.matmul %58, %46, %cst_35 {dimension_numbers = #tpu.dot_dimension_numbers<[1], [0], [0], [1], [0, 0, 1, 1], [], []>} : vector<36x36xf32>, vector<36x8xf32>, vector<36x8xf32> -> vector<36x8xf32>
    %c0_36 = arith.constant 0 : index
    %c1_37 = arith.constant 1 : index
    %c0_38 = arith.constant 0 : index
    %c0_39 = arith.constant 0 : index
    %60 = vector.load %arg7[%c0_36, %c1_37, %c0_38, %c0_39] : memref<2x4x8x32xf32, #tpu.memory_space<vmem>>, vector<1x1x8x32xf32>
    %61 = vector.shape_cast %60 : vector<1x1x8x32xf32> to vector<8x32xf32>
    %cst_40 = arith.constant dense<0.000000e+00> : vector<36x32xf32>
    %62 = tpu.matmul %59, %61, %cst_40 {dimension_numbers = #tpu.dot_dimension_numbers<[1], [0], [0], [1], [0, 0, 1, 1], [], []>} : vector<36x8xf32>, vector<8x32xf32>, vector<36x32xf32> -> vector<36x32xf32>
    %63 = arith.addf %43, %62 : vector<36x32xf32>
    %64 = vector.extract_strided_slice %20 {offsets = [0, 16], sizes = [36, 8], strides = [1, 1]} : vector<36x96xf32> to vector<36x8xf32>
    %65 = vector.extract_strided_slice %20 {offsets = [0, 48], sizes = [36, 8], strides = [1, 1]} : vector<36x96xf32> to vector<36x8xf32>
    %66 = vector.extract_strided_slice %20 {offsets = [0, 80], sizes = [36, 8], strides = [1, 1]} : vector<36x96xf32> to vector<36x8xf32>
    "tpu.trace_start"() <{level = 10 : i32, message = "qd,kd->qk"}> : () -> ()
    %cst_41 = arith.constant dense<0.000000e+00> : vector<36x36xf32>
    %67 = tpu.matmul %64, %65, %cst_41 {dimension_numbers = #tpu.dot_dimension_numbers<[1], [1], [0], [0], [0, 0, 1, 0], [], []>} : vector<36x8xf32>, vector<36x8xf32>, vector<36x36xf32> -> vector<36x36xf32>
    "tpu.trace_stop"() : () -> ()
    %68 = arith.addf %67, %13 : vector<36x36xf32>
    %cst_42 = arith.constant dense<0xFF800000> : vector<36xf32>
    %69 = vector.multi_reduction <maximumf>, %68, %cst_42 [1] : vector<36x36xf32> to vector<36xf32>
    %70 = vector.shape_cast %69 : vector<36xf32> to vector<36x1xf32>
    %71 = vector.broadcast %70 : vector<36x1xf32> to vector<36x36xf32>
    %72 = arith.subf %68, %71 : vector<36x36xf32>
    %73 = math.exp %72 : vector<36x36xf32>
    %cst_43 = arith.constant dense<0.000000e+00> : vector<36xf32>
    %74 = vector.multi_reduction <add>, %73, %cst_43 [1] : vector<36x36xf32> to vector<36xf32>
    %75 = vector.shape_cast %74 : vector<36xf32> to vector<36x1xf32>
    %76 = tpu.reciprocal %75 {approx = true} : vector<36x1xf32> -> vector<36x1xf32>
    %77 = vector.broadcast %76 : vector<36x1xf32> to vector<36x36xf32>
    %78 = arith.mulf %73, %77 : vector<36x36xf32>
    %cst_44 = arith.constant dense<0.000000e+00> : vector<36x8xf32>
    %79 = tpu.matmul %78, %66, %cst_44 {dimension_numbers = #tpu.dot_dimension_numbers<[1], [0], [0], [1], [0, 0, 1, 1], [], []>} : vector<36x36xf32>, vector<36x8xf32>, vector<36x8xf32> -> vector<36x8xf32>
    %c0_45 = arith.constant 0 : index
    %c2_46 = arith.constant 2 : index
    %c0_47 = arith.constant 0 : index
    %c0_48 = arith.constant 0 : index
    %80 = vector.load %arg7[%c0_45, %c2_46, %c0_47, %c0_48] : memref<2x4x8x32xf32, #tpu.memory_space<vmem>>, vector<1x1x8x32xf32>
    %81 = vector.shape_cast %80 : vector<1x1x8x32xf32> to vector<8x32xf32>
    %cst_49 = arith.constant dense<0.000000e+00> : vector<36x32xf32>
    %82 = tpu.matmul %79, %81, %cst_49 {dimension_numbers = #tpu.dot_dimension_numbers<[1], [0], [0], [1], [0, 0, 1, 1], [], []>} : vector<36x8xf32>, vector<8x32xf32>, vector<36x32xf32> -> vector<36x32xf32>
    %83 = arith.addf %63, %82 : vector<36x32xf32>
    %84 = vector.extract_strided_slice %20 {offsets = [0, 24], sizes = [36, 8], strides = [1, 1]} : vector<36x96xf32> to vector<36x8xf32>
    %85 = vector.extract_strided_slice %20 {offsets = [0, 56], sizes = [36, 8], strides = [1, 1]} : vector<36x96xf32> to vector<36x8xf32>
    %86 = vector.extract_strided_slice %20 {offsets = [0, 88], sizes = [36, 8], strides = [1, 1]} : vector<36x96xf32> to vector<36x8xf32>
    "tpu.trace_start"() <{level = 10 : i32, message = "qd,kd->qk"}> : () -> ()
    %cst_50 = arith.constant dense<0.000000e+00> : vector<36x36xf32>
    %87 = tpu.matmul %84, %85, %cst_50 {dimension_numbers = #tpu.dot_dimension_numbers<[1], [1], [0], [0], [0, 0, 1, 0], [], []>} : vector<36x8xf32>, vector<36x8xf32>, vector<36x36xf32> -> vector<36x36xf32>
    "tpu.trace_stop"() : () -> ()
    %88 = arith.addf %87, %13 : vector<36x36xf32>
    %cst_51 = arith.constant dense<0xFF800000> : vector<36xf32>
    %89 = vector.multi_reduction <maximumf>, %88, %cst_51 [1] : vector<36x36xf32> to vector<36xf32>
    %90 = vector.shape_cast %89 : vector<36xf32> to vector<36x1xf32>
    %91 = vector.broadcast %90 : vector<36x1xf32> to vector<36x36xf32>
    %92 = arith.subf %88, %91 : vector<36x36xf32>
    %93 = math.exp %92 : vector<36x36xf32>
    %cst_52 = arith.constant dense<0.000000e+00> : vector<36xf32>
    %94 = vector.multi_reduction <add>, %93, %cst_52 [1] : vector<36x36xf32> to vector<36xf32>
    %95 = vector.shape_cast %94 : vector<36xf32> to vector<36x1xf32>
    %96 = tpu.reciprocal %95 {approx = true} : vector<36x1xf32> -> vector<36x1xf32>
    %97 = vector.broadcast %96 : vector<36x1xf32> to vector<36x36xf32>
    %98 = arith.mulf %93, %97 : vector<36x36xf32>
    %cst_53 = arith.constant dense<0.000000e+00> : vector<36x8xf32>
    %99 = tpu.matmul %98, %86, %cst_53 {dimension_numbers = #tpu.dot_dimension_numbers<[1], [0], [0], [1], [0, 0, 1, 1], [], []>} : vector<36x36xf32>, vector<36x8xf32>, vector<36x8xf32> -> vector<36x8xf32>
    %c0_54 = arith.constant 0 : index
    %c3_55 = arith.constant 3 : index
    %c0_56 = arith.constant 0 : index
    %c0_57 = arith.constant 0 : index
    %100 = vector.load %arg7[%c0_54, %c3_55, %c0_56, %c0_57] : memref<2x4x8x32xf32, #tpu.memory_space<vmem>>, vector<1x1x8x32xf32>
    %101 = vector.shape_cast %100 : vector<1x1x8x32xf32> to vector<8x32xf32>
    %cst_58 = arith.constant dense<0.000000e+00> : vector<36x32xf32>
    %102 = tpu.matmul %99, %101, %cst_58 {dimension_numbers = #tpu.dot_dimension_numbers<[1], [0], [0], [1], [0, 0, 1, 1], [], []>} : vector<36x8xf32>, vector<8x32xf32>, vector<36x32xf32> -> vector<36x32xf32>
    %103 = arith.addf %83, %102 : vector<36x32xf32>
    %104 = arith.addf %12, %103 : vector<36x32xf32>
    %c0_59 = arith.constant 0 : index
    %c0_60 = arith.constant 0 : index
    %c0_61 = arith.constant 0 : index
    %105 = vector.load %arg13[%c0_59, %c0_60, %c0_61] : memref<2x1x32xf32, #tpu.memory_space<vmem>>, vector<1x1x32xf32>
    %106 = vector.shape_cast %105 : vector<1x1x32xf32> to vector<1x32xf32>
    %c0_62 = arith.constant 0 : index
    %c0_63 = arith.constant 0 : index
    %c0_64 = arith.constant 0 : index
    %107 = vector.load %arg14[%c0_62, %c0_63, %c0_64] : memref<2x1x32xf32, #tpu.memory_space<vmem>>, vector<1x1x32xf32>
    %108 = vector.shape_cast %107 : vector<1x1x32xf32> to vector<1x32xf32>
    %cst_65 = arith.constant dense<0.000000e+00> : vector<36xf32>
    %109 = vector.multi_reduction <add>, %104, %cst_65 [1] : vector<36x32xf32> to vector<36xf32>
    %110 = vector.shape_cast %109 : vector<36xf32> to vector<36x1xf32>
    %cst_66 = arith.constant 3.200000e+01 : f32
    %111 = vector.broadcast %cst_66 : f32 to vector<36x1xf32>
    %112 = arith.divf %110, %111 : vector<36x1xf32>
    %113 = vector.broadcast %112 : vector<36x1xf32> to vector<36x32xf32>
    %114 = arith.subf %104, %113 : vector<36x32xf32>
    %115 = arith.mulf %114, %114 : vector<36x32xf32>
    %cst_67 = arith.constant dense<0.000000e+00> : vector<36xf32>
    %116 = vector.multi_reduction <add>, %115, %cst_67 [1] : vector<36x32xf32> to vector<36xf32>
    %117 = vector.shape_cast %116 : vector<36xf32> to vector<36x1xf32>
    %cst_68 = arith.constant 3.200000e+01 : f32
    %118 = vector.broadcast %cst_68 : f32 to vector<36x1xf32>
    %119 = arith.divf %117, %118 : vector<36x1xf32>
    %cst_69 = arith.constant 9.99999974E-6 : f32
    %120 = vector.broadcast %cst_69 : f32 to vector<36x1xf32>
    %121 = arith.addf %119, %120 : vector<36x1xf32>
    %122 = math.rsqrt %121 : vector<36x1xf32>
    %123 = vector.broadcast %122 : vector<36x1xf32> to vector<36x32xf32>
    %124 = arith.mulf %114, %123 : vector<36x32xf32>
    %125 = vector.broadcast %106 : vector<1x32xf32> to vector<36x32xf32>
    %126 = arith.mulf %124, %125 : vector<36x32xf32>
    %127 = vector.broadcast %108 : vector<1x32xf32> to vector<36x32xf32>
    %128 = arith.addf %126, %127 : vector<36x32xf32>
    %129 = arith.truncf %128 : vector<36x32xf32> to vector<36x32xbf16>
    %c0_70 = arith.constant 0 : index
    %c0_71 = arith.constant 0 : index
    %c0_72 = arith.constant 0 : index
    %130 = vector.load %arg12[%c0_70, %c0_71, %c0_72] : memref<2x1x32xf32, #tpu.memory_space<vmem>>, vector<1x1x32xf32>
    %131 = vector.shape_cast %130 : vector<1x1x32xf32> to vector<1x32xf32>
    %c0_73 = arith.constant 0 : index
    %c0_74 = arith.constant 0 : index
    %c0_75 = arith.constant 0 : index
    %c0_76 = arith.constant 0 : index
    %132 = vector.load %arg9[%c0_73, %c0_74, %c0_75, %c0_76] : memref<2x2x32x1024xbf16, #tpu.memory_space<vmem>>, vector<1x1x32x1024xbf16>
    %133 = vector.shape_cast %132 : vector<1x1x32x1024xbf16> to vector<32x1024xbf16>
    %cst_77 = arith.constant dense<0.000000e+00> : vector<36x1024xf32>
    %134 = tpu.matmul %129, %133, %cst_77 {dimension_numbers = #tpu.dot_dimension_numbers<[1], [0], [0], [1], [0, 0, 1, 1], [], []>} : vector<36x32xbf16>, vector<32x1024xbf16>, vector<36x1024xf32> -> vector<36x1024xf32>
    %c0_78 = arith.constant 0 : index
    %c0_79 = arith.constant 0 : index
    %c0_80 = arith.constant 0 : index
    %c0_81 = arith.constant 0 : index
    %135 = vector.load %arg10[%c0_78, %c0_79, %c0_80, %c0_81] : memref<2x2x1x1024xf32, #tpu.memory_space<vmem>>, vector<1x1x1x1024xf32>
    %136 = vector.shape_cast %135 : vector<1x1x1x1024xf32> to vector<1x1024xf32>
    %137 = vector.broadcast %136 : vector<1x1024xf32> to vector<36x1024xf32>
    %138 = arith.addf %134, %137 : vector<36x1024xf32>
    %cst_82 = arith.constant 0.000000e+00 : f32
    %139 = vector.broadcast %cst_82 : f32 to vector<36x1024xf32>
    %140 = arith.maximumf %138, %139 : vector<36x1024xf32>
    %141 = arith.truncf %140 : vector<36x1024xf32> to vector<36x1024xbf16>
    %c0_83 = arith.constant 0 : index
    %c0_84 = arith.constant 0 : index
    %c0_85 = arith.constant 0 : index
    %c0_86 = arith.constant 0 : index
    %142 = vector.load %arg11[%c0_83, %c0_84, %c0_85, %c0_86] : memref<2x2x1024x32xbf16, #tpu.memory_space<vmem>>, vector<1x1x1024x32xbf16>
    %143 = vector.shape_cast %142 : vector<1x1x1024x32xbf16> to vector<1024x32xbf16>
    %cst_87 = arith.constant dense<0.000000e+00> : vector<36x32xf32>
    %144 = tpu.matmul %141, %143, %cst_87 {dimension_numbers = #tpu.dot_dimension_numbers<[1], [0], [0], [1], [0, 0, 1, 1], [], []>} : vector<36x1024xbf16>, vector<1024x32xbf16>, vector<36x32xf32> -> vector<36x32xf32>
    %145 = vector.broadcast %131 : vector<1x32xf32> to vector<36x32xf32>
    %146 = arith.addf %145, %144 : vector<36x32xf32>
    %c0_88 = arith.constant 0 : index
    %c1_89 = arith.constant 1 : index
    %c0_90 = arith.constant 0 : index
    %c0_91 = arith.constant 0 : index
    %147 = vector.load %arg9[%c0_88, %c1_89, %c0_90, %c0_91] : memref<2x2x32x1024xbf16, #tpu.memory_space<vmem>>, vector<1x1x32x1024xbf16>
    %148 = vector.shape_cast %147 : vector<1x1x32x1024xbf16> to vector<32x1024xbf16>
    %cst_92 = arith.constant dense<0.000000e+00> : vector<36x1024xf32>
    %149 = tpu.matmul %129, %148, %cst_92 {dimension_numbers = #tpu.dot_dimension_numbers<[1], [0], [0], [1], [0, 0, 1, 1], [], []>} : vector<36x32xbf16>, vector<32x1024xbf16>, vector<36x1024xf32> -> vector<36x1024xf32>
    %c0_93 = arith.constant 0 : index
    %c1_94 = arith.constant 1 : index
    %c0_95 = arith.constant 0 : index
    %c0_96 = arith.constant 0 : index
    %150 = vector.load %arg10[%c0_93, %c1_94, %c0_95, %c0_96] : memref<2x2x1x1024xf32, #tpu.memory_space<vmem>>, vector<1x1x1x1024xf32>
    %151 = vector.shape_cast %150 : vector<1x1x1x1024xf32> to vector<1x1024xf32>
    %152 = vector.broadcast %151 : vector<1x1024xf32> to vector<36x1024xf32>
    %153 = arith.addf %149, %152 : vector<36x1024xf32>
    %cst_97 = arith.constant 0.000000e+00 : f32
    %154 = vector.broadcast %cst_97 : f32 to vector<36x1024xf32>
    %155 = arith.maximumf %153, %154 : vector<36x1024xf32>
    %156 = arith.truncf %155 : vector<36x1024xf32> to vector<36x1024xbf16>
    %c0_98 = arith.constant 0 : index
    %c1_99 = arith.constant 1 : index
    %c0_100 = arith.constant 0 : index
    %c0_101 = arith.constant 0 : index
    %157 = vector.load %arg11[%c0_98, %c1_99, %c0_100, %c0_101] : memref<2x2x1024x32xbf16, #tpu.memory_space<vmem>>, vector<1x1x1024x32xbf16>
    %158 = vector.shape_cast %157 : vector<1x1x1024x32xbf16> to vector<1024x32xbf16>
    %cst_102 = arith.constant dense<0.000000e+00> : vector<36x32xf32>
    %159 = tpu.matmul %156, %158, %cst_102 {dimension_numbers = #tpu.dot_dimension_numbers<[1], [0], [0], [1], [0, 0, 1, 1], [], []>} : vector<36x1024xbf16>, vector<1024x32xbf16>, vector<36x32xf32> -> vector<36x32xf32>
    %160 = arith.addf %146, %159 : vector<36x32xf32>
    %161 = arith.addf %128, %160 : vector<36x32xf32>
    %c0_103 = arith.constant 0 : index
    %c0_104 = arith.constant 0 : index
    %c0_105 = arith.constant 0 : index
    %162 = vector.load %arg15[%c0_103, %c0_104, %c0_105] : memref<2x1x32xf32, #tpu.memory_space<vmem>>, vector<1x1x32xf32>
    %163 = vector.shape_cast %162 : vector<1x1x32xf32> to vector<1x32xf32>
    %c0_106 = arith.constant 0 : index
    %c0_107 = arith.constant 0 : index
    %c0_108 = arith.constant 0 : index
    %164 = vector.load %arg16[%c0_106, %c0_107, %c0_108] : memref<2x1x32xf32, #tpu.memory_space<vmem>>, vector<1x1x32xf32>
    %165 = vector.shape_cast %164 : vector<1x1x32xf32> to vector<1x32xf32>
    %cst_109 = arith.constant dense<0.000000e+00> : vector<36xf32>
    %166 = vector.multi_reduction <add>, %161, %cst_109 [1] : vector<36x32xf32> to vector<36xf32>
    %167 = vector.shape_cast %166 : vector<36xf32> to vector<36x1xf32>
    %cst_110 = arith.constant 3.200000e+01 : f32
    %168 = vector.broadcast %cst_110 : f32 to vector<36x1xf32>
    %169 = arith.divf %167, %168 : vector<36x1xf32>
    %170 = vector.broadcast %169 : vector<36x1xf32> to vector<36x32xf32>
    %171 = arith.subf %161, %170 : vector<36x32xf32>
    %172 = arith.mulf %171, %171 : vector<36x32xf32>
    %cst_111 = arith.constant dense<0.000000e+00> : vector<36xf32>
    %173 = vector.multi_reduction <add>, %172, %cst_111 [1] : vector<36x32xf32> to vector<36xf32>
    %174 = vector.shape_cast %173 : vector<36xf32> to vector<36x1xf32>
    %cst_112 = arith.constant 3.200000e+01 : f32
    %175 = vector.broadcast %cst_112 : f32 to vector<36x1xf32>
    %176 = arith.divf %174, %175 : vector<36x1xf32>
    %cst_113 = arith.constant 9.99999974E-6 : f32
    %177 = vector.broadcast %cst_113 : f32 to vector<36x1xf32>
    %178 = arith.addf %176, %177 : vector<36x1xf32>
    %179 = math.rsqrt %178 : vector<36x1xf32>
    %180 = vector.broadcast %179 : vector<36x1xf32> to vector<36x32xf32>
    %181 = arith.mulf %171, %180 : vector<36x32xf32>
    %182 = vector.broadcast %163 : vector<1x32xf32> to vector<36x32xf32>
    %183 = arith.mulf %181, %182 : vector<36x32xf32>
    %184 = vector.broadcast %165 : vector<1x32xf32> to vector<36x32xf32>
    %185 = arith.addf %183, %184 : vector<36x32xf32>
    %c1_114 = arith.constant 1 : index
    %c0_115 = arith.constant 0 : index
    %c0_116 = arith.constant 0 : index
    %186 = vector.load %arg5[%c1_114, %c0_115, %c0_116] : memref<2x32x96xf32, #tpu.memory_space<vmem>>, vector<1x32x96xf32>
    %187 = vector.shape_cast %186 : vector<1x32x96xf32> to vector<32x96xf32>
    %cst_117 = arith.constant dense<0.000000e+00> : vector<36x96xf32>
    %188 = tpu.matmul %185, %187, %cst_117 {dimension_numbers = #tpu.dot_dimension_numbers<[1], [0], [0], [1], [0, 0, 1, 1], [], []>} : vector<36x32xf32>, vector<32x96xf32>, vector<36x96xf32> -> vector<36x96xf32>
    %c1_118 = arith.constant 1 : index
    %c0_119 = arith.constant 0 : index
    %c0_120 = arith.constant 0 : index
    %189 = vector.load %arg6[%c1_118, %c0_119, %c0_120] : memref<2x1x96xf32, #tpu.memory_space<vmem>>, vector<1x1x96xf32>
    %190 = vector.shape_cast %189 : vector<1x1x96xf32> to vector<1x96xf32>
    %191 = vector.broadcast %190 : vector<1x96xf32> to vector<36x96xf32>
    %192 = arith.addf %188, %191 : vector<36x96xf32>
    %c1_121 = arith.constant 1 : index
    %c0_122 = arith.constant 0 : index
    %c0_123 = arith.constant 0 : index
    %193 = vector.load %arg8[%c1_121, %c0_122, %c0_123] : memref<2x1x32xf32, #tpu.memory_space<vmem>>, vector<1x1x32xf32>
    %194 = vector.shape_cast %193 : vector<1x1x32xf32> to vector<1x32xf32>
    %195 = vector.extract_strided_slice %192 {offsets = [0, 0], sizes = [36, 8], strides = [1, 1]} : vector<36x96xf32> to vector<36x8xf32>
    %196 = vector.extract_strided_slice %192 {offsets = [0, 32], sizes = [36, 8], strides = [1, 1]} : vector<36x96xf32> to vector<36x8xf32>
    %197 = vector.extract_strided_slice %192 {offsets = [0, 64], sizes = [36, 8], strides = [1, 1]} : vector<36x96xf32> to vector<36x8xf32>
    "tpu.trace_start"() <{level = 10 : i32, message = "qd,kd->qk"}> : () -> ()
    %cst_124 = arith.constant dense<0.000000e+00> : vector<36x36xf32>
    %198 = tpu.matmul %195, %196, %cst_124 {dimension_numbers = #tpu.dot_dimension_numbers<[1], [1], [0], [0], [0, 0, 1, 0], [], []>} : vector<36x8xf32>, vector<36x8xf32>, vector<36x36xf32> -> vector<36x36xf32>
    "tpu.trace_stop"() : () -> ()
    %199 = arith.addf %198, %13 : vector<36x36xf32>
    %cst_125 = arith.constant dense<0xFF800000> : vector<36xf32>
    %200 = vector.multi_reduction <maximumf>, %199, %cst_125 [1] : vector<36x36xf32> to vector<36xf32>
    %201 = vector.shape_cast %200 : vector<36xf32> to vector<36x1xf32>
    %202 = vector.broadcast %201 : vector<36x1xf32> to vector<36x36xf32>
    %203 = arith.subf %199, %202 : vector<36x36xf32>
    %204 = math.exp %203 : vector<36x36xf32>
    %cst_126 = arith.constant dense<0.000000e+00> : vector<36xf32>
    %205 = vector.multi_reduction <add>, %204, %cst_126 [1] : vector<36x36xf32> to vector<36xf32>
    %206 = vector.shape_cast %205 : vector<36xf32> to vector<36x1xf32>
    %207 = tpu.reciprocal %206 {approx = true} : vector<36x1xf32> -> vector<36x1xf32>
    %208 = vector.broadcast %207 : vector<36x1xf32> to vector<36x36xf32>
    %209 = arith.mulf %204, %208 : vector<36x36xf32>
    %cst_127 = arith.constant dense<0.000000e+00> : vector<36x8xf32>
    %210 = tpu.matmul %209, %197, %cst_127 {dimension_numbers = #tpu.dot_dimension_numbers<[1], [0], [0], [1], [0, 0, 1, 1], [], []>} : vector<36x36xf32>, vector<36x8xf32>, vector<36x8xf32> -> vector<36x8xf32>
    %c1_128 = arith.constant 1 : index
    %c0_129 = arith.constant 0 : index
    %c0_130 = arith.constant 0 : index
    %c0_131 = arith.constant 0 : index
    %211 = vector.load %arg7[%c1_128, %c0_129, %c0_130, %c0_131] : memref<2x4x8x32xf32, #tpu.memory_space<vmem>>, vector<1x1x8x32xf32>
    %212 = vector.shape_cast %211 : vector<1x1x8x32xf32> to vector<8x32xf32>
    %cst_132 = arith.constant dense<0.000000e+00> : vector<36x32xf32>
    %213 = tpu.matmul %210, %212, %cst_132 {dimension_numbers = #tpu.dot_dimension_numbers<[1], [0], [0], [1], [0, 0, 1, 1], [], []>} : vector<36x8xf32>, vector<8x32xf32>, vector<36x32xf32> -> vector<36x32xf32>
    %214 = vector.broadcast %194 : vector<1x32xf32> to vector<36x32xf32>
    %215 = arith.addf %214, %213 : vector<36x32xf32>
    %216 = vector.extract_strided_slice %192 {offsets = [0, 8], sizes = [36, 8], strides = [1, 1]} : vector<36x96xf32> to vector<36x8xf32>
    %217 = vector.extract_strided_slice %192 {offsets = [0, 40], sizes = [36, 8], strides = [1, 1]} : vector<36x96xf32> to vector<36x8xf32>
    %218 = vector.extract_strided_slice %192 {offsets = [0, 72], sizes = [36, 8], strides = [1, 1]} : vector<36x96xf32> to vector<36x8xf32>
    "tpu.trace_start"() <{level = 10 : i32, message = "qd,kd->qk"}> : () -> ()
    %cst_133 = arith.constant dense<0.000000e+00> : vector<36x36xf32>
    %219 = tpu.matmul %216, %217, %cst_133 {dimension_numbers = #tpu.dot_dimension_numbers<[1], [1], [0], [0], [0, 0, 1, 0], [], []>} : vector<36x8xf32>, vector<36x8xf32>, vector<36x36xf32> -> vector<36x36xf32>
    "tpu.trace_stop"() : () -> ()
    %220 = arith.addf %219, %13 : vector<36x36xf32>
    %cst_134 = arith.constant dense<0xFF800000> : vector<36xf32>
    %221 = vector.multi_reduction <maximumf>, %220, %cst_134 [1] : vector<36x36xf32> to vector<36xf32>
    %222 = vector.shape_cast %221 : vector<36xf32> to vector<36x1xf32>
    %223 = vector.broadcast %222 : vector<36x1xf32> to vector<36x36xf32>
    %224 = arith.subf %220, %223 : vector<36x36xf32>
    %225 = math.exp %224 : vector<36x36xf32>
    %cst_135 = arith.constant dense<0.000000e+00> : vector<36xf32>
    %226 = vector.multi_reduction <add>, %225, %cst_135 [1] : vector<36x36xf32> to vector<36xf32>
    %227 = vector.shape_cast %226 : vector<36xf32> to vector<36x1xf32>
    %228 = tpu.reciprocal %227 {approx = true} : vector<36x1xf32> -> vector<36x1xf32>
    %229 = vector.broadcast %228 : vector<36x1xf32> to vector<36x36xf32>
    %230 = arith.mulf %225, %229 : vector<36x36xf32>
    %cst_136 = arith.constant dense<0.000000e+00> : vector<36x8xf32>
    %231 = tpu.matmul %230, %218, %cst_136 {dimension_numbers = #tpu.dot_dimension_numbers<[1], [0], [0], [1], [0, 0, 1, 1], [], []>} : vector<36x36xf32>, vector<36x8xf32>, vector<36x8xf32> -> vector<36x8xf32>
    %c1_137 = arith.constant 1 : index
    %c1_138 = arith.constant 1 : index
    %c0_139 = arith.constant 0 : index
    %c0_140 = arith.constant 0 : index
    %232 = vector.load %arg7[%c1_137, %c1_138, %c0_139, %c0_140] : memref<2x4x8x32xf32, #tpu.memory_space<vmem>>, vector<1x1x8x32xf32>
    %233 = vector.shape_cast %232 : vector<1x1x8x32xf32> to vector<8x32xf32>
    %cst_141 = arith.constant dense<0.000000e+00> : vector<36x32xf32>
    %234 = tpu.matmul %231, %233, %cst_141 {dimension_numbers = #tpu.dot_dimension_numbers<[1], [0], [0], [1], [0, 0, 1, 1], [], []>} : vector<36x8xf32>, vector<8x32xf32>, vector<36x32xf32> -> vector<36x32xf32>
    %235 = arith.addf %215, %234 : vector<36x32xf32>
    %236 = vector.extract_strided_slice %192 {offsets = [0, 16], sizes = [36, 8], strides = [1, 1]} : vector<36x96xf32> to vector<36x8xf32>
    %237 = vector.extract_strided_slice %192 {offsets = [0, 48], sizes = [36, 8], strides = [1, 1]} : vector<36x96xf32> to vector<36x8xf32>
    %238 = vector.extract_strided_slice %192 {offsets = [0, 80], sizes = [36, 8], strides = [1, 1]} : vector<36x96xf32> to vector<36x8xf32>
    "tpu.trace_start"() <{level = 10 : i32, message = "qd,kd->qk"}> : () -> ()
    %cst_142 = arith.constant dense<0.000000e+00> : vector<36x36xf32>
    %239 = tpu.matmul %236, %237, %cst_142 {dimension_numbers = #tpu.dot_dimension_numbers<[1], [1], [0], [0], [0, 0, 1, 0], [], []>} : vector<36x8xf32>, vector<36x8xf32>, vector<36x36xf32> -> vector<36x36xf32>
    "tpu.trace_stop"() : () -> ()
    %240 = arith.addf %239, %13 : vector<36x36xf32>
    %cst_143 = arith.constant dense<0xFF800000> : vector<36xf32>
    %241 = vector.multi_reduction <maximumf>, %240, %cst_143 [1] : vector<36x36xf32> to vector<36xf32>
    %242 = vector.shape_cast %241 : vector<36xf32> to vector<36x1xf32>
    %243 = vector.broadcast %242 : vector<36x1xf32> to vector<36x36xf32>
    %244 = arith.subf %240, %243 : vector<36x36xf32>
    %245 = math.exp %244 : vector<36x36xf32>
    %cst_144 = arith.constant dense<0.000000e+00> : vector<36xf32>
    %246 = vector.multi_reduction <add>, %245, %cst_144 [1] : vector<36x36xf32> to vector<36xf32>
    %247 = vector.shape_cast %246 : vector<36xf32> to vector<36x1xf32>
    %248 = tpu.reciprocal %247 {approx = true} : vector<36x1xf32> -> vector<36x1xf32>
    %249 = vector.broadcast %248 : vector<36x1xf32> to vector<36x36xf32>
    %250 = arith.mulf %245, %249 : vector<36x36xf32>
    %cst_145 = arith.constant dense<0.000000e+00> : vector<36x8xf32>
    %251 = tpu.matmul %250, %238, %cst_145 {dimension_numbers = #tpu.dot_dimension_numbers<[1], [0], [0], [1], [0, 0, 1, 1], [], []>} : vector<36x36xf32>, vector<36x8xf32>, vector<36x8xf32> -> vector<36x8xf32>
    %c1_146 = arith.constant 1 : index
    %c2_147 = arith.constant 2 : index
    %c0_148 = arith.constant 0 : index
    %c0_149 = arith.constant 0 : index
    %252 = vector.load %arg7[%c1_146, %c2_147, %c0_148, %c0_149] : memref<2x4x8x32xf32, #tpu.memory_space<vmem>>, vector<1x1x8x32xf32>
    %253 = vector.shape_cast %252 : vector<1x1x8x32xf32> to vector<8x32xf32>
    %cst_150 = arith.constant dense<0.000000e+00> : vector<36x32xf32>
    %254 = tpu.matmul %251, %253, %cst_150 {dimension_numbers = #tpu.dot_dimension_numbers<[1], [0], [0], [1], [0, 0, 1, 1], [], []>} : vector<36x8xf32>, vector<8x32xf32>, vector<36x32xf32> -> vector<36x32xf32>
    %255 = arith.addf %235, %254 : vector<36x32xf32>
    %256 = vector.extract_strided_slice %192 {offsets = [0, 24], sizes = [36, 8], strides = [1, 1]} : vector<36x96xf32> to vector<36x8xf32>
    %257 = vector.extract_strided_slice %192 {offsets = [0, 56], sizes = [36, 8], strides = [1, 1]} : vector<36x96xf32> to vector<36x8xf32>
    %258 = vector.extract_strided_slice %192 {offsets = [0, 88], sizes = [36, 8], strides = [1, 1]} : vector<36x96xf32> to vector<36x8xf32>
    "tpu.trace_start"() <{level = 10 : i32, message = "qd,kd->qk"}> : () -> ()
    %cst_151 = arith.constant dense<0.000000e+00> : vector<36x36xf32>
    %259 = tpu.matmul %256, %257, %cst_151 {dimension_numbers = #tpu.dot_dimension_numbers<[1], [1], [0], [0], [0, 0, 1, 0], [], []>} : vector<36x8xf32>, vector<36x8xf32>, vector<36x36xf32> -> vector<36x36xf32>
    "tpu.trace_stop"() : () -> ()
    %260 = arith.addf %259, %13 : vector<36x36xf32>
    %cst_152 = arith.constant dense<0xFF800000> : vector<36xf32>
    %261 = vector.multi_reduction <maximumf>, %260, %cst_152 [1] : vector<36x36xf32> to vector<36xf32>
    %262 = vector.shape_cast %261 : vector<36xf32> to vector<36x1xf32>
    %263 = vector.broadcast %262 : vector<36x1xf32> to vector<36x36xf32>
    %264 = arith.subf %260, %263 : vector<36x36xf32>
    %265 = math.exp %264 : vector<36x36xf32>
    %cst_153 = arith.constant dense<0.000000e+00> : vector<36xf32>
    %266 = vector.multi_reduction <add>, %265, %cst_153 [1] : vector<36x36xf32> to vector<36xf32>
    %267 = vector.shape_cast %266 : vector<36xf32> to vector<36x1xf32>
    %268 = tpu.reciprocal %267 {approx = true} : vector<36x1xf32> -> vector<36x1xf32>
    %269 = vector.broadcast %268 : vector<36x1xf32> to vector<36x36xf32>
    %270 = arith.mulf %265, %269 : vector<36x36xf32>
    %cst_154 = arith.constant dense<0.000000e+00> : vector<36x8xf32>
    %271 = tpu.matmul %270, %258, %cst_154 {dimension_numbers = #tpu.dot_dimension_numbers<[1], [0], [0], [1], [0, 0, 1, 1], [], []>} : vector<36x36xf32>, vector<36x8xf32>, vector<36x8xf32> -> vector<36x8xf32>
    %c1_155 = arith.constant 1 : index
    %c3_156 = arith.constant 3 : index
    %c0_157 = arith.constant 0 : index
    %c0_158 = arith.constant 0 : index
    %272 = vector.load %arg7[%c1_155, %c3_156, %c0_157, %c0_158] : memref<2x4x8x32xf32, #tpu.memory_space<vmem>>, vector<1x1x8x32xf32>
    %273 = vector.shape_cast %272 : vector<1x1x8x32xf32> to vector<8x32xf32>
    %cst_159 = arith.constant dense<0.000000e+00> : vector<36x32xf32>
    %274 = tpu.matmul %271, %273, %cst_159 {dimension_numbers = #tpu.dot_dimension_numbers<[1], [0], [0], [1], [0, 0, 1, 1], [], []>} : vector<36x8xf32>, vector<8x32xf32>, vector<36x32xf32> -> vector<36x32xf32>
    %275 = arith.addf %255, %274 : vector<36x32xf32>
    %276 = arith.addf %185, %275 : vector<36x32xf32>
    %c1_160 = arith.constant 1 : index
    %c0_161 = arith.constant 0 : index
    %c0_162 = arith.constant 0 : index
    %277 = vector.load %arg13[%c1_160, %c0_161, %c0_162] : memref<2x1x32xf32, #tpu.memory_space<vmem>>, vector<1x1x32xf32>
    %278 = vector.shape_cast %277 : vector<1x1x32xf32> to vector<1x32xf32>
    %c1_163 = arith.constant 1 : index
    %c0_164 = arith.constant 0 : index
    %c0_165 = arith.constant 0 : index
    %279 = vector.load %arg14[%c1_163, %c0_164, %c0_165] : memref<2x1x32xf32, #tpu.memory_space<vmem>>, vector<1x1x32xf32>
    %280 = vector.shape_cast %279 : vector<1x1x32xf32> to vector<1x32xf32>
    %cst_166 = arith.constant dense<0.000000e+00> : vector<36xf32>
    %281 = vector.multi_reduction <add>, %276, %cst_166 [1] : vector<36x32xf32> to vector<36xf32>
    %282 = vector.shape_cast %281 : vector<36xf32> to vector<36x1xf32>
    %cst_167 = arith.constant 3.200000e+01 : f32
    %283 = vector.broadcast %cst_167 : f32 to vector<36x1xf32>
    %284 = arith.divf %282, %283 : vector<36x1xf32>
    %285 = vector.broadcast %284 : vector<36x1xf32> to vector<36x32xf32>
    %286 = arith.subf %276, %285 : vector<36x32xf32>
    %287 = arith.mulf %286, %286 : vector<36x32xf32>
    %cst_168 = arith.constant dense<0.000000e+00> : vector<36xf32>
    %288 = vector.multi_reduction <add>, %287, %cst_168 [1] : vector<36x32xf32> to vector<36xf32>
    %289 = vector.shape_cast %288 : vector<36xf32> to vector<36x1xf32>
    %cst_169 = arith.constant 3.200000e+01 : f32
    %290 = vector.broadcast %cst_169 : f32 to vector<36x1xf32>
    %291 = arith.divf %289, %290 : vector<36x1xf32>
    %cst_170 = arith.constant 9.99999974E-6 : f32
    %292 = vector.broadcast %cst_170 : f32 to vector<36x1xf32>
    %293 = arith.addf %291, %292 : vector<36x1xf32>
    %294 = math.rsqrt %293 : vector<36x1xf32>
    %295 = vector.broadcast %294 : vector<36x1xf32> to vector<36x32xf32>
    %296 = arith.mulf %286, %295 : vector<36x32xf32>
    %297 = vector.broadcast %278 : vector<1x32xf32> to vector<36x32xf32>
    %298 = arith.mulf %296, %297 : vector<36x32xf32>
    %299 = vector.broadcast %280 : vector<1x32xf32> to vector<36x32xf32>
    %300 = arith.addf %298, %299 : vector<36x32xf32>
    %301 = arith.truncf %300 : vector<36x32xf32> to vector<36x32xbf16>
    %c1_171 = arith.constant 1 : index
    %c0_172 = arith.constant 0 : index
    %c0_173 = arith.constant 0 : index
    %302 = vector.load %arg12[%c1_171, %c0_172, %c0_173] : memref<2x1x32xf32, #tpu.memory_space<vmem>>, vector<1x1x32xf32>
    %303 = vector.shape_cast %302 : vector<1x1x32xf32> to vector<1x32xf32>
    %c1_174 = arith.constant 1 : index
    %c0_175 = arith.constant 0 : index
    %c0_176 = arith.constant 0 : index
    %c0_177 = arith.constant 0 : index
    %304 = vector.load %arg9[%c1_174, %c0_175, %c0_176, %c0_177] : memref<2x2x32x1024xbf16, #tpu.memory_space<vmem>>, vector<1x1x32x1024xbf16>
    %305 = vector.shape_cast %304 : vector<1x1x32x1024xbf16> to vector<32x1024xbf16>
    %cst_178 = arith.constant dense<0.000000e+00> : vector<36x1024xf32>
    %306 = tpu.matmul %301, %305, %cst_178 {dimension_numbers = #tpu.dot_dimension_numbers<[1], [0], [0], [1], [0, 0, 1, 1], [], []>} : vector<36x32xbf16>, vector<32x1024xbf16>, vector<36x1024xf32> -> vector<36x1024xf32>
    %c1_179 = arith.constant 1 : index
    %c0_180 = arith.constant 0 : index
    %c0_181 = arith.constant 0 : index
    %c0_182 = arith.constant 0 : index
    %307 = vector.load %arg10[%c1_179, %c0_180, %c0_181, %c0_182] : memref<2x2x1x1024xf32, #tpu.memory_space<vmem>>, vector<1x1x1x1024xf32>
    %308 = vector.shape_cast %307 : vector<1x1x1x1024xf32> to vector<1x1024xf32>
    %309 = vector.broadcast %308 : vector<1x1024xf32> to vector<36x1024xf32>
    %310 = arith.addf %306, %309 : vector<36x1024xf32>
    %cst_183 = arith.constant 0.000000e+00 : f32
    %311 = vector.broadcast %cst_183 : f32 to vector<36x1024xf32>
    %312 = arith.maximumf %310, %311 : vector<36x1024xf32>
    %313 = arith.truncf %312 : vector<36x1024xf32> to vector<36x1024xbf16>
    %c1_184 = arith.constant 1 : index
    %c0_185 = arith.constant 0 : index
    %c0_186 = arith.constant 0 : index
    %c0_187 = arith.constant 0 : index
    %314 = vector.load %arg11[%c1_184, %c0_185, %c0_186, %c0_187] : memref<2x2x1024x32xbf16, #tpu.memory_space<vmem>>, vector<1x1x1024x32xbf16>
    %315 = vector.shape_cast %314 : vector<1x1x1024x32xbf16> to vector<1024x32xbf16>
    %cst_188 = arith.constant dense<0.000000e+00> : vector<36x32xf32>
    %316 = tpu.matmul %313, %315, %cst_188 {dimension_numbers = #tpu.dot_dimension_numbers<[1], [0], [0], [1], [0, 0, 1, 1], [], []>} : vector<36x1024xbf16>, vector<1024x32xbf16>, vector<36x32xf32> -> vector<36x32xf32>
    %317 = vector.broadcast %303 : vector<1x32xf32> to vector<36x32xf32>
    %318 = arith.addf %317, %316 : vector<36x32xf32>
    %c1_189 = arith.constant 1 : index
    %c1_190 = arith.constant 1 : index
    %c0_191 = arith.constant 0 : index
    %c0_192 = arith.constant 0 : index
    %319 = vector.load %arg9[%c1_189, %c1_190, %c0_191, %c0_192] : memref<2x2x32x1024xbf16, #tpu.memory_space<vmem>>, vector<1x1x32x1024xbf16>
    %320 = vector.shape_cast %319 : vector<1x1x32x1024xbf16> to vector<32x1024xbf16>
    %cst_193 = arith.constant dense<0.000000e+00> : vector<36x1024xf32>
    %321 = tpu.matmul %301, %320, %cst_193 {dimension_numbers = #tpu.dot_dimension_numbers<[1], [0], [0], [1], [0, 0, 1, 1], [], []>} : vector<36x32xbf16>, vector<32x1024xbf16>, vector<36x1024xf32> -> vector<36x1024xf32>
    %c1_194 = arith.constant 1 : index
    %c1_195 = arith.constant 1 : index
    %c0_196 = arith.constant 0 : index
    %c0_197 = arith.constant 0 : index
    %322 = vector.load %arg10[%c1_194, %c1_195, %c0_196, %c0_197] : memref<2x2x1x1024xf32, #tpu.memory_space<vmem>>, vector<1x1x1x1024xf32>
    %323 = vector.shape_cast %322 : vector<1x1x1x1024xf32> to vector<1x1024xf32>
    %324 = vector.broadcast %323 : vector<1x1024xf32> to vector<36x1024xf32>
    %325 = arith.addf %321, %324 : vector<36x1024xf32>
    %cst_198 = arith.constant 0.000000e+00 : f32
    %326 = vector.broadcast %cst_198 : f32 to vector<36x1024xf32>
    %327 = arith.maximumf %325, %326 : vector<36x1024xf32>
    %328 = arith.truncf %327 : vector<36x1024xf32> to vector<36x1024xbf16>
    %c1_199 = arith.constant 1 : index
    %c1_200 = arith.constant 1 : index
    %c0_201 = arith.constant 0 : index
    %c0_202 = arith.constant 0 : index
    %329 = vector.load %arg11[%c1_199, %c1_200, %c0_201, %c0_202] : memref<2x2x1024x32xbf16, #tpu.memory_space<vmem>>, vector<1x1x1024x32xbf16>
    %330 = vector.shape_cast %329 : vector<1x1x1024x32xbf16> to vector<1024x32xbf16>
    %cst_203 = arith.constant dense<0.000000e+00> : vector<36x32xf32>
    %331 = tpu.matmul %328, %330, %cst_203 {dimension_numbers = #tpu.dot_dimension_numbers<[1], [0], [0], [1], [0, 0, 1, 1], [], []>} : vector<36x1024xbf16>, vector<1024x32xbf16>, vector<36x32xf32> -> vector<36x32xf32>
    %332 = arith.addf %318, %331 : vector<36x32xf32>
    %333 = arith.addf %300, %332 : vector<36x32xf32>
    %c1_204 = arith.constant 1 : index
    %c0_205 = arith.constant 0 : index
    %c0_206 = arith.constant 0 : index
    %334 = vector.load %arg15[%c1_204, %c0_205, %c0_206] : memref<2x1x32xf32, #tpu.memory_space<vmem>>, vector<1x1x32xf32>
    %335 = vector.shape_cast %334 : vector<1x1x32xf32> to vector<1x32xf32>
    %c1_207 = arith.constant 1 : index
    %c0_208 = arith.constant 0 : index
    %c0_209 = arith.constant 0 : index
    %336 = vector.load %arg16[%c1_207, %c0_208, %c0_209] : memref<2x1x32xf32, #tpu.memory_space<vmem>>, vector<1x1x32xf32>
    %337 = vector.shape_cast %336 : vector<1x1x32xf32> to vector<1x32xf32>
    %cst_210 = arith.constant dense<0.000000e+00> : vector<36xf32>
    %338 = vector.multi_reduction <add>, %333, %cst_210 [1] : vector<36x32xf32> to vector<36xf32>
    %339 = vector.shape_cast %338 : vector<36xf32> to vector<36x1xf32>
    %cst_211 = arith.constant 3.200000e+01 : f32
    %340 = vector.broadcast %cst_211 : f32 to vector<36x1xf32>
    %341 = arith.divf %339, %340 : vector<36x1xf32>
    %342 = vector.broadcast %341 : vector<36x1xf32> to vector<36x32xf32>
    %343 = arith.subf %333, %342 : vector<36x32xf32>
    %344 = arith.mulf %343, %343 : vector<36x32xf32>
    %cst_212 = arith.constant dense<0.000000e+00> : vector<36xf32>
    %345 = vector.multi_reduction <add>, %344, %cst_212 [1] : vector<36x32xf32> to vector<36xf32>
    %346 = vector.shape_cast %345 : vector<36xf32> to vector<36x1xf32>
    %cst_213 = arith.constant 3.200000e+01 : f32
    %347 = vector.broadcast %cst_213 : f32 to vector<36x1xf32>
    %348 = arith.divf %346, %347 : vector<36x1xf32>
    %cst_214 = arith.constant 9.99999974E-6 : f32
    %349 = vector.broadcast %cst_214 : f32 to vector<36x1xf32>
    %350 = arith.addf %348, %349 : vector<36x1xf32>
    %351 = math.rsqrt %350 : vector<36x1xf32>
    %352 = vector.broadcast %351 : vector<36x1xf32> to vector<36x32xf32>
    %353 = arith.mulf %343, %352 : vector<36x32xf32>
    %354 = vector.broadcast %335 : vector<1x32xf32> to vector<36x32xf32>
    %355 = arith.mulf %353, %354 : vector<36x32xf32>
    %356 = vector.broadcast %337 : vector<1x32xf32> to vector<36x32xf32>
    %357 = arith.addf %355, %356 : vector<36x32xf32>
    %358 = vector.extract_strided_slice %357 {offsets = [0, 0], sizes = [1, 32], strides = [1, 1]} : vector<36x32xf32> to vector<1x32xf32>
    %359 = vector.extract_strided_slice %357 {offsets = [9, 0], sizes = [1, 32], strides = [1, 1]} : vector<36x32xf32> to vector<1x32xf32>
    %360 = vector.extract_strided_slice %357 {offsets = [18, 0], sizes = [1, 32], strides = [1, 1]} : vector<36x32xf32> to vector<1x32xf32>
    %361 = vector.extract_strided_slice %357 {offsets = [27, 0], sizes = [1, 32], strides = [1, 1]} : vector<36x32xf32> to vector<1x32xf32>
    %362 = tpu.concatenate %358, %359, %360, %361 in 0 : vector<1x32xf32>, vector<1x32xf32>, vector<1x32xf32>, vector<1x32xf32> -> vector<4x32xf32>
    %c0_215 = arith.constant 0 : index
    %c0_216 = arith.constant 0 : index
    %363 = vector.load %arg17[%c0_215, %c0_216] : memref<32x32xf32, #tpu.memory_space<vmem>>, vector<32x32xf32>
    %cst_217 = arith.constant dense<0.000000e+00> : vector<4x32xf32>
    %364 = tpu.matmul %362, %363, %cst_217 {dimension_numbers = #tpu.dot_dimension_numbers<[1], [0], [0], [1], [0, 0, 1, 1], [], []>} : vector<4x32xf32>, vector<32x32xf32>, vector<4x32xf32> -> vector<4x32xf32>
    %c0_218 = arith.constant 0 : index
    %c0_219 = arith.constant 0 : index
    %365 = vector.load %arg18[%c0_218, %c0_219] : memref<1x32xf32, #tpu.memory_space<vmem>>, vector<1x32xf32>
    %366 = vector.broadcast %365 : vector<1x32xf32> to vector<4x32xf32>
    %367 = arith.addf %364, %366 : vector<4x32xf32>
    %c0_220 = arith.constant 0 : index
    %c0_221 = arith.constant 0 : index
    %368 = vector.load %arg19[%c0_220, %c0_221] : memref<4x32xf32, #tpu.memory_space<vmem>>, vector<4x32xf32>
    tpu.vector_store %arg19[%c0_220, %c0_221], %367 {strides = array<i32>} : memref<4x32xf32, #tpu.memory_space<vmem>>, vector<4x32xf32>,
    return
  }
  func.func @transform_0(%arg0: i32) -> (i32, i32, i32) {
    %c0_i32 = arith.constant 0 : i32
    %c0_i32_0 = arith.constant 0 : i32
    %c0_i32_1 = arith.constant 0 : i32
    %c0_i32_2 = arith.constant 0 : i32
    return %c0_i32, %c0_i32_0, %c0_i32_1 : i32, i32, i32
  }
  func.func @transform_1(%arg0: i32) -> (i32, i32) {
    %c0_i32 = arith.constant 0 : i32
    %c0_i32_0 = arith.constant 0 : i32
    %c0_i32_1 = arith.constant 0 : i32
    return %c0_i32, %c0_i32_0 : i32, i32
  }
  func.func @transform_2(%arg0: i32) -> (i32, i32) {
    %c0_i32 = arith.constant 0 : i32
    %c0_i32_0 = arith.constant 0 : i32
    %c0_i32_1 = arith.constant 0 : i32
    return %c0_i32, %c0_i32_0 : i32, i32
  }
  func.func @transform_3(%arg0: i32) -> (i32, i32) {
    %c0_i32 = arith.constant 0 : i32
    %c0_i32_0 = arith.constant 0 : i32
    %c0_i32_1 = arith.constant 0 : i32
    return %c0_i32, %c0_i32_0 : i32, i32
  }
  func.func @transform_4(%arg0: i32) -> (i32, i32, i32) {
    %c0_i32 = arith.constant 0 : i32
    %c0_i32_0 = arith.constant 0 : i32
    %c0_i32_1 = arith.constant 0 : i32
    %c0_i32_2 = arith.constant 0 : i32
    return %c0_i32, %c0_i32_0, %c0_i32_1 : i32, i32, i32
  }
  func.func @transform_5(%arg0: i32) -> (i32, i32, i32) {
    %c0_i32 = arith.constant 0 : i32
    %c0_i32_0 = arith.constant 0 : i32
    %c0_i32_1 = arith.constant 0 : i32
    %c0_i32_2 = arith.constant 0 : i32
    return %c0_i32, %c0_i32_0, %c0_i32_1 : i32, i32, i32
  }
  func.func @transform_6(%arg0: i32) -> (i32, i32, i32, i32) {
    %c0_i32 = arith.constant 0 : i32
    %c0_i32_0 = arith.constant 0 : i32
    %c0_i32_1 = arith.constant 0 : i32
    %c0_i32_2 = arith.constant 0 : i32
    %c0_i32_3 = arith.constant 0 : i32
    return %c0_i32, %c0_i32_0, %c0_i32_1, %c0_i32_2 : i32, i32, i32, i32
  }
  func.func @transform_7(%arg0: i32) -> (i32, i32, i32) {
    %c0_i32 = arith.constant 0 : i32
    %c0_i32_0 = arith.constant 0 : i32
    %c0_i32_1 = arith.constant 0 : i32
    %c0_i32_2 = arith.constant 0 : i32
    return %c0_i32, %c0_i32_0, %c0_i32_1 : i32, i32, i32
  }
  func.func @transform_8(%arg0: i32) -> (i32, i32, i32, i32) {
    %c0_i32 = arith.constant 0 : i32
    %c0_i32_0 = arith.constant 0 : i32
    %c0_i32_1 = arith.constant 0 : i32
    %c0_i32_2 = arith.constant 0 : i32
    %c0_i32_3 = arith.constant 0 : i32
    return %c0_i32, %c0_i32_0, %c0_i32_1, %c0_i32_2 : i32, i32, i32, i32
  }
  func.func @transform_9(%arg0: i32) -> (i32, i32, i32, i32) {
    %c0_i32 = arith.constant 0 : i32
    %c0_i32_0 = arith.constant 0 : i32
    %c0_i32_1 = arith.constant 0 : i32
    %c0_i32_2 = arith.constant 0 : i32
    %c0_i32_3 = arith.constant 0 : i32
    return %c0_i32, %c0_i32_0, %c0_i32_1, %c0_i32_2 : i32, i32, i32, i32
  }
  func.func @transform_10(%arg0: i32) -> (i32, i32, i32, i32) {
    %c0_i32 = arith.constant 0 : i32
    %c0_i32_0 = arith.constant 0 : i32
    %c0_i32_1 = arith.constant 0 : i32
    %c0_i32_2 = arith.constant 0 : i32
    %c0_i32_3 = arith.constant 0 : i32
    return %c0_i32, %c0_i32_0, %c0_i32_1, %c0_i32_2 : i32, i32, i32, i32
  }
  func.func @transform_11(%arg0: i32) -> (i32, i32, i32) {
    %c0_i32 = arith.constant 0 : i32
    %c0_i32_0 = arith.constant 0 : i32
    %c0_i32_1 = arith.constant 0 : i32
    %c0_i32_2 = arith.constant 0 : i32
    return %c0_i32, %c0_i32_0, %c0_i32_1 : i32, i32, i32
  }
  func.func @transform_12(%arg0: i32) -> (i32, i32, i32) {
    %c0_i32 = arith.constant 0 : i32
    %c0_i32_0 = arith.constant 0 : i32
    %c0_i32_1 = arith.constant 0 : i32
    %c0_i32_2 = arith.constant 0 : i32
    return %c0_i32, %c0_i32_0, %c0_i32_1 : i32, i32, i32
  }
  func.func @transform_13(%arg0: i32) -> (i32, i32, i32) {
    %c0_i32 = arith.constant 0 : i32
    %c0_i32_0 = arith.constant 0 : i32
    %c0_i32_1 = arith.constant 0 : i32
    %c0_i32_2 = arith.constant 0 : i32
    return %c0_i32, %c0_i32_0, %c0_i32_1 : i32, i32, i32
  }
  func.func @transform_14(%arg0: i32) -> (i32, i32, i32) {
    %c0_i32 = arith.constant 0 : i32
    %c0_i32_0 = arith.constant 0 : i32
    %c0_i32_1 = arith.constant 0 : i32
    %c0_i32_2 = arith.constant 0 : i32
    return %c0_i32, %c0_i32_0, %c0_i32_1 : i32, i32, i32
  }
  func.func @transform_15(%arg0: i32) -> (i32, i32, i32) {
    %c0_i32 = arith.constant 0 : i32
    %c0_i32_0 = arith.constant 0 : i32
    %c0_i32_1 = arith.constant 0 : i32
    %c0_i32_2 = arith.constant 0 : i32
    return %c0_i32, %c0_i32_0, %c0_i32_1 : i32, i32, i32
  }
  func.func @transform_16(%arg0: i32) -> (i32, i32) {
    %c0_i32 = arith.constant 0 : i32
    %c0_i32_0 = arith.constant 0 : i32
    %c0_i32_1 = arith.constant 0 : i32
    return %c0_i32, %c0_i32_0 : i32, i32
  }
  func.func @transform_17(%arg0: i32) -> (i32, i32) {
    %c0_i32 = arith.constant 0 : i32
    %c0_i32_0 = arith.constant 0 : i32
    %c0_i32_1 = arith.constant 0 : i32
    return %c0_i32, %c0_i32_0 : i32, i32
  }
  func.func @transform_18(%arg0: i32) -> (i32, i32) {
    %c0_i32 = arith.constant 0 : i32
    %c0_i32_0 = arith.constant 0 : i32
    %c0_i32_1 = arith.constant 0 : i32
    return %c0_i32, %c0_i32_0 : i32, i32
  }
}

</mosaic_0001>

<bundles_post_ra>
// kernel: bert_cls_forward_batched.1
= control target key start
LH: loop header
LB: loop body
LE: loop exit
PB: predicated region body
PF: predicated region fallthrough
CT: control target
= control target key end

     0   :  { %s15209_s0 = inlined_call_operand.vmem [shape: f32[4,8,32], index: 0, kind: input, shape index: {}]   ;;  %s15210_s1 = inlined_call_operand.vmem [shape: f32[1,32], index: 1, kind: input, shape index: {}]   ;;  %s15211_s2 = inlined_call_operand.vmem [shape: f32[17,32], index: 2, kind: input, shape index: {}]   ;;  %s15212_s3 = inlined_call_operand.vmem [shape: f32[36,36], index: 3, kind: input, shape index: {}]   ;;  %s15213_s4 = inlined_call_operand.vmem [shape: f32[2,32,96], index: 4, kind: input, shape index: {}]   ;;  %s15214_s5 = inlined_call_operand.vmem [shape: f32[2,1,96], index: 5, kind: input, shape index: {}]   ;;  %s15215_s6 = inlined_call_operand.vmem [shape: f32[2,4,8,32], index: 6, kind: input, shape index: {}]   ;;  %s15216_s7 = inlined_call_operand.vmem [shape: f32[2,1,32], index: 7, kind: input, shape index: {}]   ;;  %s15217_s8 = inlined_call_operand.vmem [shape: bf16[2,2,32,1024], index: 8, kind: input, shape index: {}]   ;;  %s15218_s9 = inlined_call_operand.vmem [shape: f32[2,2,1,1024], index: 9, kind: input, shape index: {}]   ;;  %s15219_s10 = inlined_call_operand.vmem [shape: bf16[2,2,1024,32], index: 10, kind: input, shape index: {}]   ;;  %s15220_s11 = inlined_call_operand.vmem [shape: f32[2,1,32], index: 11, kind: input, shape index: {}]   ;;  %s15221_s12 = inlined_call_operand.vmem [shape: f32[2,1,32], index: 12, kind: input, shape index: {}]   ;;  %s15222_s13 = inlined_call_operand.vmem [shape: f32[2,1,32], index: 13, kind: input, shape index: {}]   ;;  %s15223_s14 = inlined_call_operand.vmem [shape: f32[2,1,32], index: 14, kind: input, shape index: {}]   ;;  %s15224_s15 = inlined_call_operand.vmem [shape: f32[2,1,32], index: 15, kind: input, shape index: {}]   ;;  %s15225_s16 = inlined_call_operand.vmem [shape: f32[32,32], index: 16, kind: input, shape index: {}]   ;;  %s15226_s17 = inlined_call_operand.vmem [shape: f32[1,32], index: 17, kind: input, shape index: {}]   ;;  %s15227_s18 = inlined_call_operand.hbm [shape: f32[4,32], index: 18, kind: output, shape index: {}]  }
   0x1   :  { %15242 = sst [smem:[#allocation5_spill]] %s15209_s0 }
   0x2   :  { %15243 = sst [smem:[#allocation6_spill]] %s15210_s1 }
   0x3   :  { %15244 = sst [smem:[#allocation7_spill]] %s15211_s2 }
   0x4   :  { %v130_v0 = vld [vmem:[%s15213_s4] sm:$0xff]  ;;  %v131_v1 = vld [vmem:[%s15213_s4 + $0x8] sm:$0xff]  ;;  %v132_v2 = vld [vmem:[%s15213_s4 + $0x10] sm:$0xff]  ;;  %v75_v3 = vlaneseq  ;;  %v12161_v4 = vmov 0.0|0.0   ;;  %vm12162_vm0 = vmmov 0   ;;  %v12163_v7 = vmov 0.0  }
   0x5   :  { %11356 = vmatprep.subr.bf16.mxu0 %v12161_v4  ;;  %v11357_v5 = vpack.c.bf16 %v131_v1, %v130_v0  ;;  %v133_v6 = vld [vmem:[%s15213_s4 + $0x18] sm:$0xff]  ;;  %10771 = vmatprep.mubr.msk.f32.mxu0 %vm12162_vm0, %v12163_v7  ;;  %s15245_s2 = sld [smem:[#allocation6_spill]]  ;;  %s15246_s25 = sld [smem:[#allocation7_spill]]  ;;  %vm89_vm1 = vcmask 1040384   ;;  %vm141_vm2 = vcmask 261120   ;;  %vm92_vm3 = vcmask 1041408  }
   0x6   :  { %v11360_v10 = vpack.c.bf16 %v133_v6, %v132_v2  ;;  %s15247_s28 = sld [smem:[#allocation5_spill]]  ;;  %v12296_v12 = vshrl.u32 %v75_v3, 7  ;;  %11362 = vmatprep.subr.bf16.mxu1 %v12161_v4  ;;  %10796 = vmatprep.mubr.msk.f32.mxu1 %vm12162_vm0, %v12163_v7  ;;  %vm95_vm4 = vcmask 1042432   ;;  %vm98_vm5 = vcmask 1043456  }
   0x7   :  { %11358 = vmatpush3.bf16.msra.mxu0 %v11357_v5 }
   0x8   :  { %11359 = vmatprep.subr.bf16.mxu0 %v12161_v4  ;;  %v12315_v20 = vsub.s32 0, %v12296_v12 }
   0xb   :  { %v61_v8 = vld [vmem:[%s15245_s2] sm:$0x1]  ;;  %v63_v13 = vld [vmem:[%s15246_s25 + $0x8] sm:$0x1]  ;;  %11361 = vmatpush3.bf16.msra.mxu0 %v11360_v10 }
   0xc   :  { %v62_v9 = vld [vmem:[%s15246_s25] sm:$0xff]  ;;  %v8970_v14 = vld [vmem:[%s15247_s28 + $0x8] sm:$0xff]  ;;  %v8971_v18 = vld [vmem:[%s15247_s28 + $0x10] sm:$0xff]  ;;  %v103_v22 = vrot.slane %v63_v13, 7  ;;  %v78_v26 = vrot.slane %v61_v8, %v12315_v20  ;;  %v108_v28 = vrot.slane %v63_v13, 6  ;;  %v113_v31 = vrot.slane %v63_v13, 5  ;;  %11370 = vmatprep.subr.bf16.mxu0 %v12161_v4 }
   0xd   :  { %v64_v11 = vld [vmem:[%s15247_s28] sm:$0xff]  ;;  %v81_v16 = vrot.slane %v8970_v14, 6  ;;  %v102_v17 = vrot.slane %v62_v9, 7  ;;  %v8972_v19 = vld [vmem:[%s15247_s28 + $0x18] sm:$0xff]  ;;  %v84_v21 = vrot.slane %v8971_v18, 5  ;;  %v107_v24 = vrot.slane %v62_v9, 6 }
   0xe   :  { %v72_v15 = vrot.slane %v64_v11, 7  ;;  %v87_v25 = vrot.slane %v8972_v19, 4  ;;  %v112_v30 = vrot.slane %v62_v9, 5 }
   0xf   :  { %v117_v29 = vsel %vm89_vm1, %v63_v13, %v102_v17  ;;  %v94_v33 = vsel %vm92_vm3, %v81_v16, %v78_v26  ;;  %v104_v34 = vsel %vm89_vm1, %v102_v17, %v103_v22  ;;  %v97_v39 = vsel %vm95_vm4, %v84_v21, %v78_v26 }
  0x10   :  { %v90_v23 = vsel %vm89_vm1, %v61_v8, %v72_v15  ;;  %v91_v32 = vsel %vm89_vm1, %v72_v15, %v78_v26  ;;  %v96_v37 = vsel %vm95_vm4, %v94_v33, %v84_v21  ;;  %v118_v38 = vsel %vm92_vm3, %v104_v34, %v107_v24 }
  0x11   :  { %v12319_v27 = vadd.f32 %v90_v23, %v62_v9  ;;  %v93_v35 = vsel %vm92_vm3, %v91_v32, %v81_v16  ;;  %v109_v40 = vsel %vm92_vm3, %v107_v24, %v108_v28  ;;  %v12339_v41 = vadd.f32 %v118_v38, %v96_v37 }
  0x12   :  { %v12329_v36 = vadd.f32 %v117_v29, %v93_v35  ;;  %v99_v42 = vsel %vm98_vm5, %v97_v39, %v87_v25  ;;  %v119_v43 = vsel %vm95_vm4, %v109_v40, %v112_v30  ;;  %v114_v45 = vsel %vm95_vm4, %v112_v30, %v113_v31 }
  0x13   :  { %10772 = vmatmul.mubr.msk.f32.vlgmr.msra.gmra.mrb[0].mxu0 %vm141_vm2, %v12319_v27  ;;  %v12347_v44 = vadd.f32 %v119_v43, %v99_v42  ;;  %v12354_v46 = vadd.f32 %v114_v45, %v87_v25 }
  0x14   :  { %10774 = vmatprep.mubr.msk.f32.mxu0 %vm12162_vm0, %v12163_v7 }
  0x17   :  { %10775 = vmatmul.mubr.msk.f32.gmra.mrb[2].mxu0 %vm141_vm2, %v12329_v36 }
  0x18   :  { %10777 = vmatprep.mubr.msk.f32.mxu0 %vm12162_vm0, %v12163_v7 }
  0x1b   :  { %10778 = vmatmul.mubr.msk.f32.gmra.mrb[4].mxu0 %vm141_vm2, %v12339_v41 }
  0x1c   :  { %10780 = vmatprep.mubr.msk.f32.mxu0 %vm12162_vm0, %v12163_v7 }
  0x1f   :  { %10781 = vmatmul.mubr.msk.f32.gmra.mrb[6].mxu0 %vm141_vm2, %v12347_v44 }
  0x20   :  { %10783 = vmatprep.mubr.msk.f32.mxu0 %vm12162_vm0, %v12163_v7 }
  0x23   :  { %10784 = vmatmul.mubr.msk.f32.gmra.mrb[8].mxu0 %vm141_vm2, %v12354_v46 }
  0x24   :  { %10821 = vmatprep.mubr.msk.f32.mxu0 %vm12162_vm0, %v12163_v7 }
  0x25   :  { %23 = vsyncpa [#allocation3], 0  ;;  %v8973_v49 = vld [vmem:[%s15214_s5] ss:$0 sm:$0xff]  ;;  %s12164_s24 = smov 96   ;;  %vm263_vm6 = vcmask 64512  }
  0x26   :  { %vm12391_vm7 = vmpackc.low %vm263_vm6, %vm263_vm6  ;;  %v12426_v14 = vld [vmem:[%s15212_s3] sm:$0xff]  ;;  %vm374_vm8 = vcmask 293888   ;;  %v12432_v18 = vld [vmem:[%s15212_s3 + $0x8] sm:$0xff]  ;;  %vm387_vm9 = vcmask 289792   ;;  %s12165_s21 = smov 64   ;;  %s12166_s22 = smov 88  }
  0x27   :  { %v12439_v24 = vld [vmem:[%s15212_s3 + $0x10] sm:$0xff]  ;;  %v12446_v30 = vld [vmem:[%s15212_s3 + $0x18] sm:$0xff]  ;;  %v12453_v35 = vld [vmem:[%s15212_s3 + $0x20] sm:$0xf]  ;;  %s12167_s2 = smov 120   ;;  %s12168_s26 = smov 56  }
  0x28   :  { %s15238_s27 = smov 80   ;;  %s15240_s28 = smov 112   ;;  %vm1942_vm10 = vcmask 257024  }
  0x29   :  { %s15236_s0 = smov 48   ;;  %s15230_s20 = smov 72  }
  0x2a   :  { %s15234_s23 = smov 104   ;;  %s15251_s25 = smov 80  }
  0x2b   :  { %s15254_s30 = smov 72   ;;  %s15255_s29 = smov 40  }
  0xe6   :  { %v223_v47 = vpop.f32.mrb[0].mxu0 }
  0xe7   :  { %v10773_v48 = vpop.f32.mrb[1].mxu0  ;;  %v12365_v51 = vadd.f32 %v8973_v49, %v223_v47 }
  0xea   :  { %v228_v50 = vpop.f32.mrb[2].mxu0 }
  0xeb   :  { %v12367_v52 = vadd.f32 %v8973_v49, %v228_v50  ;;  %v10776_v53 = vpop.f32.mrb[3].mxu0 }
  0xed   :  { %v12371_v54 = vpack.i.bf16 %v12367_v52, %v12365_v51 }
  0xee   :  { %v233_v55 = vpop.f32.mrb[4].mxu0 }
  0xef   :  { %11509 = vrot.lane.b32.xlu0 %v12371_v54, %s12164_s24  ;;  %v10779_v56 = vpop.f32.mrb[5].mxu0  ;;  %v12375_v58 = vadd.f32 %v8973_v49, %v233_v55 }
  0xf2   :  { %v238_v57 = vpop.f32.mrb[6].mxu0 }
  0xf3   :  { %v12377_v59 = vadd.f32 %v8973_v49, %v238_v57  ;;  %v10782_v60 = vpop.f32.mrb[7].mxu0 }
  0xf5   :  { %v12381_v61 = vpack.i.bf16 %v12377_v59, %v12375_v58 }
  0xf6   :  { %v243_v62 = vpop.f32.mrb[8].mxu0 }
  0xf7   :  { %11514 = vrot.lane.b32.xlu0 %v12381_v61, %s12164_s24  ;;  %v12385_v63 = vadd.f32 %v8973_v49, %v243_v62  ;;  %v10785_v0 = vpop.f32.mrb[9].mxu0 }
  0xf9   :  { %261 = vrot.lane.b32.xlu1 %v12385_v63, %s12164_s24 }
 0x161   :  { %v11510_v1 = vpop.permute.xlu0 %11509 }
 0x162   :  { %v11512_v2 = vunpack.i.h.bf16 %v11510_v1  ;;  %v11511_v3 = vunpack.i.l.bf16 %v11510_v1 }
 0x164   :  { %v11363_v6 = vpack.c.bf16 %v11512_v2, %v11511_v3 }
 0x166   :  { %11365 = vmatpush3.bf16.xpose.msk.msra.mxu1 %vm12391_vm7, %v11363_v6 }
 0x167   :  { %11366 = vmatprep.subr.bf16.mxu1 %v12161_v4 }
 0x169   :  { %v11515_v8 = vpop.permute.xlu0 %11514 }
 0x16a   :  { %v11517_v9 = vunpack.i.h.bf16 %v11515_v8  ;;  %v11516_v10 = vunpack.i.l.bf16 %v11515_v8 }
 0x16b   :  { %v262_v13 = vpop.permute.xlu1 %261 }
 0x16c   :  { %v11367_v11 = vpack.c.bf16 %v11517_v9, %v11516_v10 }
 0x16e   :  { %11369 = vmatpush3.bf16.xpose.msk.msra.mxu1 %vm12391_vm7, %v11367_v11 }
 0x16f   :  { %10794 = vmatprep.subr.mxu1 %v12163_v7 }
 0x176   :  { %10795 = vmatpush3.xpose.msk.msra.mxu1 %vm263_vm6, %v262_v13 }
 0x177   :  { %10836 = vmatprep.subr.mxu1 %v12163_v7 }
 0x179   :  { %10797 = vmatmul.mubr.msk.f32.vlgmr.msra.gmra.mrb[0].mxu1 %vm263_vm6, %v12365_v51 }
 0x17a   :  { %10799 = vmatprep.mubr.msk.f32.mxu1 %vm12162_vm0, %v12163_v7 }
 0x17d   :  { %10800 = vmatmul.mubr.msk.f32.gmra.mrb[2].mxu1 %vm263_vm6, %v12367_v52 }
 0x17e   :  { %10802 = vmatprep.mubr.msk.f32.mxu1 %vm12162_vm0, %v12163_v7 }
 0x181   :  { %10803 = vmatmul.mubr.msk.f32.gmra.mrb[4].mxu1 %vm263_vm6, %v12375_v58 }
 0x182   :  { %10805 = vmatprep.mubr.msk.f32.mxu1 %vm12162_vm0, %v12163_v7 }
 0x185   :  { %10806 = vmatmul.mubr.msk.f32.gmra.mrb[6].mxu1 %vm263_vm6, %v12377_v59 }
 0x186   :  { %10808 = vmatprep.mubr.msk.f32.mxu1 %vm12162_vm0, %v12163_v7 }
 0x189   :  { %10809 = vmatmul.mubr.msk.f32.gmra.mrb[8].mxu1 %vm263_vm6, %v12385_v63 }
 0x18a   :  { %10838 = vmatprep.mubr.msk.f32.mxu1 %vm12162_vm0, %v12163_v7 }
 0x24c   :  { %v350_v15 = vpop.f32.mrb[0].mxu1 }
 0x24d   :  { %v10798_v16 = vpop.f32.mrb[1].mxu1  ;;  %v351_v17 = vadd.f32 %v350_v15, %v12426_v14 }
 0x24f   :  { %v375_v19 = vsel %vm374_vm8, %v351_v17, -inf }
 0x250   :  { %376 = vmax.xlane.f32.xlu1 %v375_v19  ;;  %v355_v21 = vpop.f32.mrb[2].mxu1 }
 0x251   :  { %v10801_v22 = vpop.f32.mrb[3].mxu1  ;;  %v356_v23 = vadd.f32 %v355_v21, %v12432_v18 }
 0x253   :  { %v378_v25 = vsel %vm374_vm8, %v356_v23, -inf }
 0x254   :  { %379 = vmax.xlane.f32.xlu0 %v378_v25  ;;  %v360_v26 = vpop.f32.mrb[4].mxu1 }
 0x255   :  { %v10804_v28 = vpop.f32.mrb[5].mxu1  ;;  %v361_v29 = vadd.f32 %v360_v26, %v12439_v24 }
 0x257   :  { %v381_v31 = vsel %vm374_vm8, %v361_v29, -inf }
 0x258   :  { %382 = vmax.xlane.f32.xlu0 %v381_v31  ;;  %v365_v32 = vpop.f32.mrb[6].mxu1 }
 0x259   :  { %v10807_v33 = vpop.f32.mrb[7].mxu1  ;;  %v366_v34 = vadd.f32 %v365_v32, %v12446_v30 }
 0x25b   :  { %v384_v37 = vsel %vm374_vm8, %v366_v34, -inf }
 0x25c   :  { %385 = vmax.xlane.f32.xlu1 %v384_v37  ;;  %v370_v38 = vpop.f32.mrb[8].mxu1 }
 0x25d   :  { %v10810_v39 = vpop.f32.mrb[9].mxu1  ;;  %v371_v40 = vadd.f32 %v370_v38, %v12453_v35 }
 0x25f   :  { %v388_v42 = vsel %vm387_vm9, %v371_v40, -inf }
 0x260   :  { %389 = vmax.xlane.f32.xlu0 %v388_v42 }
 0x2dd   :  { %v377_v43 = vpop.xlane.xlu1 %376 }
 0x2de   :  { %v391_v45 = vsub.f32 %v351_v17, %v377_v43 }
 0x2e0   :  { %v396_v47 = vmul.f32 1.442695, %v391_v45 }
 0x2e1   :  { %v380_v48 = vpop.xlane.xlu0 %379 }
 0x2e2   :  { %11924 = vpow2.f32 %v396_v47  ;;  %v392_v49 = vsub.f32 %v356_v23, %v380_v48 }
 0x2e4   :  { %v398_v50 = vmul.f32 1.442695, %v392_v49 }
 0x2e5   :  { %v383_v60 = vpop.xlane.xlu0 %382 }
 0x2e6   :  { %11926 = vpow2.f32 %v398_v50  ;;  %v393_v62 = vsub.f32 %v361_v29, %v383_v60 }
 0x2e8   :  { %v400_v3 = vmul.f32 1.442695, %v393_v62 }
 0x2e9   :  { %v386_v0 = vpop.xlane.xlu1 %385 }
 0x2ea   :  { %v394_v2 = vsub.f32 %v366_v34, %v386_v0  ;;  %11928 = vpow2.f32 %v400_v3 }
 0x2ec   :  { %v11925_v53 = vpop.eup %11924  ;;  %v402_v8 = vmul.f32 1.442695, %v394_v2 }
 0x2ed   :  { %v406_v55 = vsel %vm374_vm8, %v11925_v53, 0.0  ;;  %v390_v1 = vpop.xlane.xlu0 %389 }
 0x2ee   :  { %407 = vadd.xlane.f32.xlu1 %v406_v55  ;;  %v395_v6 = vsub.f32 %v371_v40, %v390_v1  ;;  %11930 = vpow2.f32 %v402_v8 }
 0x2f0   :  { %v12459_v56 = vpop.eup %11926  ;;  %v404_v9 = vmul.f32 1.442695, %v395_v6 }
 0x2f1   :  { %v409_v57 = vsel %vm374_vm8, %v12459_v56, 0.0 }
 0x2f2   :  { %410 = vadd.xlane.f32.xlu0 %v409_v57  ;;  %11932 = vpow2.f32 %v404_v9 }
 0x2f4   :  { %v11929_v10 = vpop.eup %11928 }
 0x2f5   :  { %v412_v13 = vsel %vm374_vm8, %v11929_v10, 0.0 }
 0x2f8   :  { %v12467_v11 = vpop.eup %11930 }
 0x2f9   :  { %v415_v16 = vsel %vm374_vm8, %v12467_v11, 0.0 }
 0x2fc   :  { %v12470_v15 = vpop.eup %11932 }
 0x2fd   :  { %v418_v17 = vsel %vm387_vm9, %v12470_v15, 0.0 }
 0x2ff   :  { %11524 = vrot.lane.b32.xlu1 %v12381_v61, %s12165_s21 }
 0x308   :  { %11519 = vrot.lane.b32.xlu0 %v12371_v54, %s12165_s21 }
 0x323   :  { %413 = vadd.xlane.f32.xlu1 %v412_v13  ;;  %v552_v13 = vld [vmem:[%s15215_s6] sm:$0xff] }
 0x324   :  { %10837 = vmatpush3.msra.mxu1 %v552_v13 }
 0x325   :  { %11384 = vmatprep.subr.bf16.mxu1 %v12161_v4 }
 0x327   :  { %416 = vadd.xlane.f32.xlu1 %v415_v16  ;;  %419 = vadd.xlane.f32.xlu0 %v418_v17 }
 0x338   :  { %439 = vrot.lane.b32.xlu1 %v12385_v63, %s12165_s21 }
 0x33c   :  { %11529 = vrot.lane.b32.xlu1 %v12371_v54, %s12166_s22 }
 0x33d   :  { %677 = vrot.lane.b32.xlu0 %v12385_v63, %s12167_s2 }
 0x340   :  { %11534 = vrot.lane.b32.xlu1 %v12381_v61, %s12166_s22 }
 0x344   :  { %687 = vrot.lane.b32.xlu1 %v12385_v63, %s12166_s22 }
 0x348   :  { %669 = vrot.lane.b32.xlu1 %v12365_v51, %s12167_s2 }
 0x34c   :  { %671 = vrot.lane.b32.xlu1 %v12367_v52, %s12167_s2 }
 0x350   :  { %673 = vrot.lane.b32.xlu1 %v12375_v58, %s12167_s2 }
 0x354   :  { %675 = vrot.lane.b32.xlu1 %v12377_v59, %s12167_s2 }
 0x37b   :  { %v408_v19 = vpop.xlane.xlu1 %407 }
 0x37c   :  { %11934 = vrcp.f32 %v408_v19 }
 0x37f   :  { %v411_v21 = vpop.xlane.xlu0 %410  ;;  %v11525_v22 = vpop.permute.xlu1 %11524 }
 0x380   :  { %v11527_v28 = vunpack.i.h.bf16 %v11525_v22  ;;  %v11526_v29 = vunpack.i.l.bf16 %v11525_v22  ;;  %11936 = vrcp.f32 %v411_v21 }
 0x382   :  { %v11374_v32 = vpack.c.bf16 %v11527_v28, %v11526_v29 }
 0x383   :  { %v11520_v23 = vpop.permute.xlu0 %11519 }
 0x384   :  { %v11522_v25 = vunpack.i.h.bf16 %v11520_v23  ;;  %v11521_v26 = vunpack.i.l.bf16 %v11520_v23 }
 0x386   :  { %v11371_v31 = vpack.c.bf16 %v11522_v25, %v11521_v26  ;;  %v11935_v37 = vpop.eup %11934 }
 0x387   :  { %v426_v38 = vmul.f32 %v11935_v37, %v11925_v53 }
 0x388   :  { %11372 = vmatpush3.bf16.msra.mxu0 %v11371_v31 }
 0x389   :  { %11373 = vmatprep.subr.bf16.mxu0 %v12161_v4 }
 0x38a   :  { %v11937_v42 = vpop.eup %11936 }
 0x38b   :  { %v427_v45 = vmul.f32 %v11937_v42, %v12459_v56 }
 0x38c   :  { %11375 = vmatpush3.bf16.msra.mxu0 %v11374_v32 }
 0x38d   :  { %10819 = vmatprep.subr.mxu0 %v12163_v7 }
 0x3b0   :  { %v414_v33 = vpop.xlane.xlu1 %413 }
 0x3b1   :  { %11938 = vrcp.f32 %v414_v33 }
 0x3b4   :  { %v417_v34 = vpop.xlane.xlu1 %416  ;;  %v420_v39 = vpop.xlane.xlu0 %419 }
 0x3b5   :  { %11940 = vrcp.f32 %v417_v34 }
 0x3b6   :  { %11942 = vrcp.f32 %v420_v39 }
 0x3b8   :  { %v440_v40 = vpop.permute.xlu1 %439 }
 0x3b9   :  { %10820 = vmatpush3.msk.msra.mxu0 %vm98_vm5, %v440_v40 }
 0x3ba   :  { %10822 = vmatmul.mubr.msk.f32.vlgmr.msra.gmra.mrb[10].mxu0 %vm374_vm8, %v426_v38  ;;  %11376 = vmatprep.subr.bf16.mxu0 %v12161_v4 }
 0x3bb   :  { %10824 = vmatprep.mubr.msk.f32.mxu0 %vm12162_vm0, %v12163_v7  ;;  %v11939_v47 = vpop.eup %11938 }
 0x3bc   :  { %v11530_v43 = vpop.permute.xlu1 %11529  ;;  %v428_v55 = vmul.f32 %v11939_v47, %v11929_v10 }
 0x3bd   :  { %v11532_v48 = vunpack.i.h.bf16 %v11530_v43  ;;  %v11531_v49 = vunpack.i.l.bf16 %v11530_v43 }
 0x3be   :  { %10825 = vmatmul.mubr.msk.f32.gmra.mrb[12].mxu0 %vm374_vm8, %v427_v45 }
 0x3bf   :  { %v11377_v50 = vpack.c.bf16 %v11532_v48, %v11531_v49  ;;  %10827 = vmatprep.mubr.msk.f32.mxu0 %vm12162_vm0, %v12163_v7  ;;  %v11941_v57 = vpop.eup %11940 }
 0x3c0   :  { %v11535_v53 = vpop.permute.xlu1 %11534  ;;  %v429_v62 = vmul.f32 %v11941_v57, %v12467_v11  ;;  %v11943_v0 = vpop.eup %11942 }
 0x3c1   :  { %11379 = vmatpush3.bf16.xpose.msk.msra.mxu0 %vm12391_vm7, %v11377_v50  ;;  %v11537_v56 = vunpack.i.h.bf16 %v11535_v53  ;;  %v11536_v60 = vunpack.i.l.bf16 %v11535_v53  ;;  %v430_v3 = vmul.f32 %v11943_v0, %v12470_v15  ;;  %v678_v11 = vpop.permute.xlu0 %677 }
 0x3c2   :  { %10828 = vmatmul.mubr.msk.f32.gmra.mrb[14].mxu0 %vm374_vm8, %v428_v55  ;;  %11380 = vmatprep.subr.bf16.mxu0 %v12161_v4 }
 0x3c3   :  { %10830 = vmatprep.mubr.msk.f32.mxu0 %vm12162_vm0, %v12163_v7  ;;  %v11381_v1 = vpack.c.bf16 %v11537_v56, %v11536_v60 }
 0x3c4   :  { %v688_v2 = vpop.permute.xlu1 %687 }
 0x3c6   :  { %10831 = vmatmul.mubr.msk.f32.gmra.mrb[16].mxu0 %vm374_vm8, %v429_v62 }
 0x3c7   :  { %10833 = vmatprep.mubr.msk.f32.mxu0 %vm12162_vm0, %v12163_v7 }
 0x3c8   :  { %v670_v6 = vpop.permute.xlu1 %669 }
 0x3c9   :  { %11383 = vmatpush3.bf16.xpose.msk.msra.mxu0 %vm12391_vm7, %v11381_v1 }
 0x3ca   :  { %10834 = vmatmul.mubr.msk.f32.gmra.mrb[18].mxu0 %vm374_vm8, %v430_v3  ;;  %10861 = vmatprep.subr.mxu0 %v12163_v7 }
 0x3cb   :  { %10863 = vmatprep.mubr.msk.f32.mxu0 %vm12162_vm0, %v12163_v7 }
 0x3cc   :  { %v672_v8 = vpop.permute.xlu1 %671 }
 0x3d0   :  { %v674_v9 = vpop.permute.xlu1 %673 }
 0x3d1   :  { %10862 = vmatpush3.xpose.msk.msra.mxu0 %vm263_vm6, %v688_v2 }
 0x3d2   :  { %10903 = vmatprep.subr.mxu0 %v12163_v7 }
 0x3d4   :  { %10864 = vmatmul.mubr.msk.f32.vlgmr.msra.gmra.mrb[20].mxu0 %vm263_vm6, %v670_v6  ;;  %v676_v10 = vpop.permute.xlu1 %675 }
 0x3d5   :  { %10866 = vmatprep.mubr.msk.f32.mxu0 %vm12162_vm0, %v12163_v7 }
 0x3d8   :  { %10867 = vmatmul.mubr.msk.f32.gmra.mrb[22].mxu0 %vm263_vm6, %v672_v8 }
 0x3d9   :  { %10869 = vmatprep.mubr.msk.f32.mxu0 %vm12162_vm0, %v12163_v7 }
 0x3dc   :  { %10870 = vmatmul.mubr.msk.f32.gmra.mrb[24].mxu0 %vm263_vm6, %v674_v9 }
 0x3dd   :  { %10872 = vmatprep.mubr.msk.f32.mxu0 %vm12162_vm0, %v12163_v7 }
 0x3e0   :  { %10873 = vmatmul.mubr.msk.f32.gmra.mrb[26].mxu0 %vm263_vm6, %v676_v10 }
 0x3e1   :  { %10875 = vmatprep.mubr.msk.f32.mxu0 %vm12162_vm0, %v12163_v7 }
 0x3e4   :  { %10876 = vmatmul.mubr.msk.f32.gmra.mrb[28].mxu0 %vm263_vm6, %v678_v11 }
 0x3e5   :  { %10905 = vmatprep.mubr.msk.f32.mxu0 %vm12162_vm0, %v12163_v7 }
 0x48d   :  { %v528_v15 = vpop.f32.mrb[10].mxu0 }
 0x48e   :  { %v10823_v16 = vpop.f32.mrb[11].mxu0  ;;  %10839 = vmatmul.mubr.msk.f32.vlgmr.msra.gmra.mrb[10].mxu1 %vm263_vm6, %v528_v15 }
 0x48f   :  { %10841 = vmatprep.mubr.msk.f32.mxu1 %vm12162_vm0, %v12163_v7 }
 0x491   :  { %v533_v17 = vpop.f32.mrb[12].mxu0 }
 0x492   :  { %v10826_v19 = vpop.f32.mrb[13].mxu0  ;;  %10842 = vmatmul.mubr.msk.f32.gmra.mrb[12].mxu1 %vm263_vm6, %v533_v17 }
 0x493   :  { %10844 = vmatprep.mubr.msk.f32.mxu1 %vm12162_vm0, %v12163_v7 }
 0x495   :  { %v538_v21 = vpop.f32.mrb[14].mxu0 }
 0x496   :  { %v10829_v22 = vpop.f32.mrb[15].mxu0  ;;  %10845 = vmatmul.mubr.msk.f32.gmra.mrb[14].mxu1 %vm263_vm6, %v538_v21 }
 0x497   :  { %10847 = vmatprep.mubr.msk.f32.mxu1 %vm12162_vm0, %v12163_v7 }
 0x499   :  { %v543_v23 = vpop.f32.mrb[16].mxu0 }
 0x49a   :  { %v10832_v25 = vpop.f32.mrb[17].mxu0  ;;  %10848 = vmatmul.mubr.msk.f32.gmra.mrb[16].mxu1 %vm263_vm6, %v543_v23 }
 0x49b   :  { %10850 = vmatprep.mubr.msk.f32.mxu1 %vm12162_vm0, %v12163_v7 }
 0x49d   :  { %v548_v26 = vpop.f32.mrb[18].mxu0 }
 0x49e   :  { %v10835_v28 = vpop.f32.mrb[19].mxu0  ;;  %10851 = vmatmul.mubr.msk.f32.gmra.mrb[18].mxu1 %vm263_vm6, %v548_v26 }
 0x49f   :  { %10888 = vmatprep.mubr.msk.f32.mxu1 %vm12162_vm0, %v12163_v7 }
 0x4a7   :  { %v775_v29 = vpop.f32.mrb[20].mxu0 }
 0x4a8   :  { %v10865_v31 = vpop.f32.mrb[21].mxu0  ;;  %v776_v32 = vadd.f32 %v775_v29, %v12426_v14 }
 0x4aa   :  { %v799_v33 = vsel %vm374_vm8, %v776_v32, -inf }
 0x4ab   :  { %800 = vmax.xlane.f32.xlu1 %v799_v33  ;;  %v780_v34 = vpop.f32.mrb[22].mxu0 }
 0x4ac   :  { %v10868_v37 = vpop.f32.mrb[23].mxu0  ;;  %v781_v38 = vadd.f32 %v780_v34, %v12432_v18 }
 0x4ae   :  { %v802_v39 = vsel %vm374_vm8, %v781_v38, -inf }
 0x4af   :  { %803 = vmax.xlane.f32.xlu0 %v802_v39  ;;  %v785_v40 = vpop.f32.mrb[24].mxu0 }
 0x4b0   :  { %v10871_v42 = vpop.f32.mrb[25].mxu0  ;;  %v786_v43 = vadd.f32 %v785_v40, %v12439_v24 }
 0x4b2   :  { %v805_v45 = vsel %vm374_vm8, %v786_v43, -inf }
 0x4b3   :  { %806 = vmax.xlane.f32.xlu1 %v805_v45  ;;  %v790_v47 = vpop.f32.mrb[26].mxu0 }
 0x4b4   :  { %v10874_v48 = vpop.f32.mrb[27].mxu0  ;;  %v791_v49 = vadd.f32 %v790_v47, %v12446_v30 }
 0x4b6   :  { %v808_v50 = vsel %vm374_vm8, %v791_v49, -inf }
 0x4b7   :  { %809 = vmax.xlane.f32.xlu1 %v808_v50  ;;  %v795_v53 = vpop.f32.mrb[28].mxu0 }
 0x4b8   :  { %v10877_v55 = vpop.f32.mrb[29].mxu0  ;;  %v796_v57 = vadd.f32 %v795_v53, %v12453_v35 }
 0x4ba   :  { %v811_v56 = vsel %vm387_vm9, %v796_v57, -inf }
 0x4bb   :  { %812 = vmax.xlane.f32.xlu1 %v811_v56 }
 0x4c5   :  { %11539 = vrot.lane.b32.xlu0 %v12371_v54, %s12168_s26 }
 0x538   :  { %v801_v60 = vpop.xlane.xlu1 %800 }
 0x539   :  { %v814_v62 = vsub.f32 %v776_v32, %v801_v60 }
 0x53b   :  { %v819_v0 = vmul.f32 1.442695, %v814_v62 }
 0x53c   :  { %v804_v1 = vpop.xlane.xlu0 %803 }
 0x53d   :  { %11944 = vpow2.f32 %v819_v0  ;;  %v815_v2 = vsub.f32 %v781_v38, %v804_v1 }
 0x53f   :  { %v821_v3 = vmul.f32 1.442695, %v815_v2 }
 0x540   :  { %v11540_v6 = vpop.permute.xlu0 %11539  ;;  %v807_v17 = vpop.xlane.xlu1 %806 }
 0x541   :  { %11946 = vpow2.f32 %v821_v3  ;;  %v11542_v8 = vunpack.i.h.bf16 %v11540_v6  ;;  %v11541_v9 = vunpack.i.l.bf16 %v11540_v6  ;;  %v816_v26 = vsub.f32 %v786_v43, %v807_v17 }
 0x543   :  { %v11385_v10 = vpack.c.bf16 %v11542_v8, %v11541_v9  ;;  %v823_v31 = vmul.f32 1.442695, %v816_v26 }
 0x544   :  { %v810_v25 = vpop.xlane.xlu1 %809 }
 0x545   :  { %11386 = vmatpush3.bf16.msra.mxu1 %v11385_v10  ;;  %v817_v32 = vsub.f32 %v791_v49, %v810_v25  ;;  %11948 = vpow2.f32 %v823_v31 }
 0x546   :  { %11387 = vmatprep.subr.bf16.mxu1 %v12161_v4 }
 0x547   :  { %v11945_v11 = vpop.eup %11944  ;;  %v825_v38 = vmul.f32 1.442695, %v817_v32 }
 0x548   :  { %v829_v13 = vsel %vm374_vm8, %v11945_v11, 0.0  ;;  %v813_v33 = vpop.xlane.xlu1 %812 }
 0x549   :  { %830 = vadd.xlane.f32.xlu1 %v829_v13  ;;  %v818_v39 = vsub.f32 %v796_v57, %v813_v33  ;;  %11950 = vpow2.f32 %v825_v38 }
 0x54b   :  { %v12572_v15 = vpop.eup %11946  ;;  %v827_v43 = vmul.f32 1.442695, %v818_v39 }
 0x54c   :  { %v832_v16 = vsel %vm374_vm8, %v12572_v15, 0.0 }
 0x54d   :  { %833 = vadd.xlane.f32.xlu0 %v832_v16  ;;  %11952 = vpow2.f32 %v827_v43 }
 0x54f   :  { %v11949_v45 = vpop.eup %11948 }
 0x550   :  { %v835_v47 = vsel %vm374_vm8, %v11949_v45, 0.0 }
 0x553   :  { %v11951_v48 = vpop.eup %11950 }
 0x554   :  { %v838_v49 = vsel %vm374_vm8, %v11951_v48, 0.0 }
 0x557   :  { %v11953_v50 = vpop.eup %11952 }
 0x558   :  { %v841_v53 = vsel %vm387_vm9, %v11953_v50, 0.0 }
 0x55a   :  { %11544 = vrot.lane.b32.xlu1 %v12381_v61, %s12168_s26 }
 0x561   :  { %v12578_v19 = vpop.f32.mrb[10].mxu1 }
 0x562   :  { %v10840_v21 = vpop.f32.mrb[11].mxu1 }
 0x563   :  { %862 = vrot.lane.b32.xlu0 %v12385_v63, %s12168_s26 }
 0x565   :  { %v12582_v22 = vpop.f32.mrb[12].mxu1 }
 0x566   :  { %v10843_v23 = vpop.f32.mrb[13].mxu1 }
 0x567   :  { %11549 = vrot.lane.b32.xlu0 %v12371_v54, %s15238_s27 }
 0x569   :  { %v12586_v28 = vpop.f32.mrb[14].mxu1 }
 0x56a   :  { %v10846_v29 = vpop.f32.mrb[15].mxu1 }
 0x56b   :  { %11554 = vrot.lane.b32.xlu0 %v12381_v61, %s15238_s27 }
 0x56d   :  { %v12590_v34 = vpop.f32.mrb[16].mxu1 }
 0x56e   :  { %v10849_v37 = vpop.f32.mrb[17].mxu1 }
 0x56f   :  { %1105 = vrot.lane.b32.xlu0 %v12385_v63, %s15238_s27 }
 0x571   :  { %v12594_v40 = vpop.f32.mrb[18].mxu1 }
 0x572   :  { %v10852_v42 = vpop.f32.mrb[19].mxu1 }
 0x573   :  { %1087 = vrot.lane.b32.xlu0 %v12365_v51, %s15240_s28 }
 0x577   :  { %1089 = vrot.lane.b32.xlu0 %v12367_v52, %s15240_s28 }
 0x57b   :  { %1091 = vrot.lane.b32.xlu0 %v12375_v58, %s15240_s28 }
 0x57e   :  { %836 = vadd.xlane.f32.xlu1 %v835_v47 }
 0x57f   :  { %1093 = vrot.lane.b32.xlu0 %v12377_v59, %s15240_s28 }
 0x582   :  { %839 = vadd.xlane.f32.xlu1 %v838_v49  ;;  %v9017_v49 = vld [vmem:[%s15215_s6 + $0x8] sm:$0xff] }
 0x583   :  { %1095 = vrot.lane.b32.xlu0 %v12385_v63, %s15240_s28  ;;  %10904 = vmatpush3.msra.mxu0 %v9017_v49 }
 0x584   :  { %11398 = vmatprep.subr.bf16.mxu0 %v12161_v4 }
 0x586   :  { %842 = vadd.xlane.f32.xlu1 %v841_v53 }
 0x5d6   :  { %v831_v55 = vpop.xlane.xlu1 %830 }
 0x5d7   :  { %11954 = vrcp.f32 %v831_v55 }
 0x5da   :  { %v834_v57 = vpop.xlane.xlu0 %833  ;;  %v11545_v56 = vpop.permute.xlu1 %11544 }
 0x5db   :  { %11956 = vrcp.f32 %v834_v57  ;;  %v11547_v60 = vunpack.i.h.bf16 %v11545_v56  ;;  %v11546_v62 = vunpack.i.l.bf16 %v11545_v56 }
 0x5dd   :  { %v11388_v0 = vpack.c.bf16 %v11547_v60, %v11546_v62 }
 0x5de   :  { %v863_v1 = vpop.permute.xlu0 %862 }
 0x5df   :  { %11389 = vmatpush3.bf16.msra.mxu1 %v11388_v0 }
 0x5e0   :  { %10886 = vmatprep.subr.mxu1 %v12163_v7 }
 0x5e1   :  { %v11955_v2 = vpop.eup %11954 }
 0x5e2   :  { %v849_v3 = vmul.f32 %v11955_v2, %v11945_v11  ;;  %v11550_v6 = vpop.permute.xlu0 %11549 }
 0x5e3   :  { %10887 = vmatpush3.msk.msra.mxu1 %vm98_vm5, %v863_v1  ;;  %v11552_v8 = vunpack.i.h.bf16 %v11550_v6  ;;  %v11551_v9 = vunpack.i.l.bf16 %v11550_v6 }
 0x5e4   :  { %10889 = vmatmul.mubr.msk.f32.vlgmr.msra.gmra.mrb[20].mxu1 %vm374_vm8, %v849_v3  ;;  %11390 = vmatprep.subr.bf16.mxu1 %v12161_v4 }
 0x5e5   :  { %v11957_v10 = vpop.eup %11956  ;;  %10891 = vmatprep.mubr.msk.f32.mxu1 %vm12162_vm0, %v12163_v7  ;;  %v11391_v16 = vpack.c.bf16 %v11552_v8, %v11551_v9 }
 0x5e6   :  { %v850_v13 = vmul.f32 %v11957_v10, %v12572_v15  ;;  %v11555_v17 = vpop.permute.xlu0 %11554 }
 0x5e7   :  { %v11557_v11 = vunpack.i.h.bf16 %v11555_v17  ;;  %v11556_v21 = vunpack.i.l.bf16 %v11555_v17 }
 0x5e8   :  { %10892 = vmatmul.mubr.msk.f32.gmra.mrb[22].mxu1 %vm374_vm8, %v850_v13 }
 0x5e9   :  { %10894 = vmatprep.mubr.msk.f32.mxu1 %vm12162_vm0, %v12163_v7  ;;  %v11395_v23 = vpack.c.bf16 %v11557_v11, %v11556_v21 }
 0x5ea   :  { %11393 = vmatpush3.bf16.xpose.msk.msra.mxu1 %vm12391_vm7, %v11391_v16  ;;  %v1106_v15 = vpop.permute.xlu0 %1105 }
 0x5eb   :  { %11394 = vmatprep.subr.bf16.mxu1 %v12161_v4 }
 0x5ee   :  { %v1088_v38 = vpop.permute.xlu0 %1087 }
 0x5f2   :  { %11397 = vmatpush3.bf16.xpose.msk.msra.mxu1 %vm12391_vm7, %v11395_v23  ;;  %v1090_v43 = vpop.permute.xlu0 %1089 }
 0x5f3   :  { %10928 = vmatprep.subr.mxu1 %v12163_v7 }
 0x5fa   :  { %10929 = vmatpush3.xpose.msk.msra.mxu1 %vm263_vm6, %v1106_v15 }
 0x5fb   :  { %10970 = vmatprep.subr.mxu1 %v12163_v7 }
 0x60b   :  { %v837_v25 = vpop.xlane.xlu1 %836 }
 0x60c   :  { %11958 = vrcp.f32 %v837_v25 }
 0x60f   :  { %v840_v26 = vpop.xlane.xlu1 %839 }
 0x610   :  { %11960 = vrcp.f32 %v840_v26 }
 0x613   :  { %v843_v29 = vpop.xlane.xlu1 %842 }
 0x614   :  { %11962 = vrcp.f32 %v843_v29 }
 0x616   :  { %v11959_v31 = vpop.eup %11958 }
 0x617   :  { %v851_v32 = vmul.f32 %v11959_v31, %v11949_v45  ;;  %v1092_v45 = vpop.permute.xlu0 %1091 }
 0x619   :  { %10895 = vmatmul.mubr.msk.f32.gmra.mrb[24].mxu1 %vm374_vm8, %v851_v32 }
 0x61a   :  { %v11961_v33 = vpop.eup %11960  ;;  %10897 = vmatprep.mubr.msk.f32.mxu1 %vm12162_vm0, %v12163_v7 }
 0x61b   :  { %v852_v37 = vmul.f32 %v11961_v33, %v11951_v48  ;;  %v1094_v47 = vpop.permute.xlu0 %1093 }
 0x61d   :  { %10898 = vmatmul.mubr.msk.f32.gmra.mrb[26].mxu1 %vm374_vm8, %v852_v37 }
 0x61e   :  { %v11963_v39 = vpop.eup %11962  ;;  %10900 = vmatprep.mubr.msk.f32.mxu1 %vm12162_vm0, %v12163_v7 }
 0x61f   :  { %v853_v42 = vmul.f32 %v11963_v39, %v11953_v50  ;;  %v1096_v48 = vpop.permute.xlu0 %1095 }
 0x621   :  { %10901 = vmatmul.mubr.msk.f32.gmra.mrb[28].mxu1 %vm374_vm8, %v853_v42 }
 0x622   :  { %10930 = vmatprep.mubr.msk.f32.mxu1 %vm12162_vm0, %v12163_v7 }
 0x625   :  { %10931 = vmatmul.mubr.msk.f32.vlgmr.msra.gmra.mrb[30].mxu1 %vm263_vm6, %v1088_v38 }
 0x626   :  { %10933 = vmatprep.mubr.msk.f32.mxu1 %vm12162_vm0, %v12163_v7 }
 0x629   :  { %10934 = vmatmul.mubr.msk.f32.gmra.mrb[32].mxu1 %vm263_vm6, %v1090_v43 }
 0x62a   :  { %10936 = vmatprep.mubr.msk.f32.mxu1 %vm12162_vm0, %v12163_v7 }
 0x62d   :  { %10937 = vmatmul.mubr.msk.f32.gmra.mrb[34].mxu1 %vm263_vm6, %v1092_v45 }
 0x62e   :  { %10939 = vmatprep.mubr.msk.f32.mxu1 %vm12162_vm0, %v12163_v7 }
 0x631   :  { %10940 = vmatmul.mubr.msk.f32.gmra.mrb[36].mxu1 %vm263_vm6, %v1094_v47 }
 0x632   :  { %10942 = vmatprep.mubr.msk.f32.mxu1 %vm12162_vm0, %v12163_v7 }
 0x635   :  { %10943 = vmatmul.mubr.msk.f32.gmra.mrb[38].mxu1 %vm263_vm6, %v1096_v48 }
 0x636   :  { %10972 = vmatprep.mubr.msk.f32.mxu1 %vm12162_vm0, %v12163_v7 }
 0x6b7   :  { %v951_v50 = vpop.f32.mrb[20].mxu1 }
 0x6b8   :  { %v10890_v53 = vpop.f32.mrb[21].mxu1  ;;  %10906 = vmatmul.mubr.msk.f32.vlgmr.msra.gmra.mrb[30].mxu0 %vm263_vm6, %v951_v50 }
 0x6b9   :  { %10908 = vmatprep.mubr.msk.f32.mxu0 %vm12162_vm0, %v12163_v7 }
 0x6bb   :  { %v956_v55 = vpop.f32.mrb[22].mxu1 }
 0x6bc   :  { %v10893_v57 = vpop.f32.mrb[23].mxu1  ;;  %10909 = vmatmul.mubr.msk.f32.gmra.mrb[32].mxu0 %vm263_vm6, %v956_v55 }
 0x6bd   :  { %10911 = vmatprep.mubr.msk.f32.mxu0 %vm12162_vm0, %v12163_v7 }
 0x6ec   :  { %v961_v56 = vpop.f32.mrb[24].mxu1 }
 0x6ed   :  { %v10896_v60 = vpop.f32.mrb[25].mxu1  ;;  %10912 = vmatmul.mubr.msk.f32.gmra.mrb[34].mxu0 %vm263_vm6, %v961_v56 }
 0x6ee   :  { %10914 = vmatprep.mubr.msk.f32.mxu0 %vm12162_vm0, %v12163_v7 }
 0x6f0   :  { %v966_v62 = vpop.f32.mrb[26].mxu1 }
 0x6f1   :  { %v10899_v0 = vpop.f32.mrb[27].mxu1  ;;  %10915 = vmatmul.mubr.msk.f32.gmra.mrb[36].mxu0 %vm263_vm6, %v966_v62 }
 0x6f2   :  { %10917 = vmatprep.mubr.msk.f32.mxu0 %vm12162_vm0, %v12163_v7 }
 0x6f4   :  { %v971_v1 = vpop.f32.mrb[28].mxu1 }
 0x6f5   :  { %v10902_v2 = vpop.f32.mrb[29].mxu1  ;;  %10918 = vmatmul.mubr.msk.f32.gmra.mrb[38].mxu0 %vm263_vm6, %v971_v1 }
 0x6f6   :  { %10955 = vmatprep.mubr.msk.f32.mxu0 %vm12162_vm0, %v12163_v7 }
 0x6f8   :  { %v1193_v3 = vpop.f32.mrb[30].mxu1 }
 0x6f9   :  { %v10932_v6 = vpop.f32.mrb[31].mxu1  ;;  %v1194_v8 = vadd.f32 %v1193_v3, %v12426_v14 }
 0x6fb   :  { %v1217_v9 = vsel %vm374_vm8, %v1194_v8, -inf }
 0x6fc   :  { %1218 = vmax.xlane.f32.xlu1 %v1217_v9  ;;  %v1198_v10 = vpop.f32.mrb[32].mxu1 }
 0x6fd   :  { %v10935_v13 = vpop.f32.mrb[33].mxu1  ;;  %v1199_v16 = vadd.f32 %v1198_v10, %v12432_v18 }
 0x6ff   :  { %v1220_v17 = vsel %vm374_vm8, %v1199_v16, -inf }
 0x700   :  { %1221 = vmax.xlane.f32.xlu0 %v1220_v17  ;;  %v1203_v11 = vpop.f32.mrb[34].mxu1 }
 0x701   :  { %v10938_v21 = vpop.f32.mrb[35].mxu1  ;;  %v1204_v23 = vadd.f32 %v1203_v11, %v12439_v24  ;;  %v9000_v24 = vld [vmem:[%s15216_s7] ss:$0 sm:$0xff] }
 0x702   :  { %v665_v47 = vadd.f32 %v9000_v24, %v12582_v22 }
 0x703   :  { %v1223_v15 = vsel %vm374_vm8, %v1204_v23, -inf }
 0x704   :  { %1224 = vmax.xlane.f32.xlu1 %v1223_v15  ;;  %v1208_v25 = vpop.f32.mrb[36].mxu1  ;;  %v667_v15 = vadd.f32 %v9000_v24, %v12590_v34 }
 0x705   :  { %v10941_v26 = vpop.f32.mrb[37].mxu1  ;;  %v1209_v14 = vadd.f32 %v1208_v25, %v12446_v30  ;;  %v664_v30 = vadd.f32 %v9000_v24, %v12578_v19 }
 0x707   :  { %v1226_v29 = vsel %vm374_vm8, %v1209_v14, -inf }
 0x708   :  { %1227 = vmax.xlane.f32.xlu1 %v1226_v29  ;;  %v1213_v31 = vpop.f32.mrb[38].mxu1 }
 0x709   :  { %v10944_v32 = vpop.f32.mrb[39].mxu1  ;;  %v1214_v18 = vadd.f32 %v1213_v31, %v12453_v35 }
 0x70b   :  { %v1229_v33 = vsel %vm387_vm9, %v1214_v18, -inf }
 0x70c   :  { %1230 = vmax.xlane.f32.xlu1 %v1229_v33 }
 0x716   :  { %11564 = vrot.lane.b32.xlu0 %v12381_v61, %s15236_s0 }
 0x789   :  { %v1219_v37 = vpop.xlane.xlu1 %1218 }
 0x78a   :  { %v1232_v38 = vsub.f32 %v1194_v8, %v1219_v37 }
 0x78b   :  { %v1058_v39 = vpop.f32.mrb[30].mxu0 }
 0x78c   :  { %v1237_v42 = vmul.f32 1.442695, %v1232_v38  ;;  %v12686_v43 = vadd.f32 %v1058_v39, %v664_v30  ;;  %v10907_v35 = vpop.f32.mrb[31].mxu0 }
 0x78d   :  { %v1222_v45 = vpop.xlane.xlu0 %1221 }
 0x78e   :  { %11964 = vpow2.f32 %v1237_v42  ;;  %v1233_v48 = vsub.f32 %v1199_v16, %v1222_v45  ;;  %v666_v16 = vadd.f32 %v9000_v24, %v12586_v28  ;;  %v668_v28 = vadd.f32 %v9000_v24, %v12594_v40 }
 0x78f   :  { %v1063_v49 = vpop.f32.mrb[32].mxu0 }
 0x790   :  { %v1239_v50 = vmul.f32 1.442695, %v1233_v48  ;;  %v12689_v53 = vadd.f32 %v1063_v49, %v665_v47  ;;  %v10910_v55 = vpop.f32.mrb[33].mxu0 }
 0x791   :  { %v1225_v57 = vpop.xlane.xlu1 %1224  ;;  %v11565_v24 = vpop.permute.xlu0 %11564 }
 0x792   :  { %11966 = vpow2.f32 %v1239_v50  ;;  %v1234_v56 = vsub.f32 %v1204_v23, %v1225_v57  ;;  %v11566_v42 = vunpack.i.l.bf16 %v11565_v24 }
 0x794   :  { %v1241_v19 = vmul.f32 1.442695, %v1234_v56 }
 0x795   :  { %v1228_v60 = vpop.xlane.xlu1 %1227 }
 0x796   :  { %11968 = vpow2.f32 %v1241_v19  ;;  %v1235_v62 = vsub.f32 %v1209_v14, %v1228_v60 }
 0x798   :  { %v12691_v0 = vpop.eup %11964  ;;  %v1243_v1 = vmul.f32 1.442695, %v1235_v62 }
 0x799   :  { %v1247_v22 = vsel %vm374_vm8, %v12691_v0, 0.0  ;;  %v1231_v13 = vpop.xlane.xlu1 %1230 }
 0x79a   :  { %11970 = vpow2.f32 %v1243_v1  ;;  %1248 = vadd.xlane.f32.xlu1 %v1247_v22  ;;  %v1236_v11 = vsub.f32 %v1214_v18, %v1231_v13 }
 0x79c   :  { %v12695_v2 = vpop.eup %11966  ;;  %v1245_v26 = vmul.f32 1.442695, %v1236_v11 }
 0x79d   :  { %v1250_v3 = vsel %vm374_vm8, %v12695_v2, 0.0 }
 0x79e   :  { %1251 = vadd.xlane.f32.xlu1 %v1250_v3  ;;  %11972 = vpow2.f32 %v1245_v26 }
 0x7a0   :  { %v12699_v6 = vpop.eup %11968 }
 0x7a1   :  { %v1253_v8 = vsel %vm374_vm8, %v12699_v6, 0.0 }
 0x7a2   :  { %1254 = vadd.xlane.f32.xlu1 %v1253_v8 }
 0x7a4   :  { %v12703_v9 = vpop.eup %11970 }
 0x7a5   :  { %v1256_v10 = vsel %vm374_vm8, %v12703_v9, 0.0 }
 0x7a6   :  { %1257 = vadd.xlane.f32.xlu0 %v1256_v10 }
 0x7a8   :  { %v12730_v34 = vpop.eup %11972 }
 0x7a9   :  { %v1259_v40 = vsel %vm387_vm9, %v12730_v34, 0.0 }
 0x7b3   :  { %11559 = vrot.lane.b32.xlu1 %v12371_v54, %s15236_s0 }
 0x7bc   :  { %1280 = vrot.lane.b32.xlu0 %v12385_v63, %s15236_s0 }
 0x7c0   :  { %11569 = vrot.lane.b32.xlu0 %v12371_v54, %s15230_s20  ;;  %v1068_v17 = vpop.f32.mrb[34].mxu0 }
 0x7c1   :  { %v12714_v21 = vadd.f32 %v1068_v17, %v666_v16  ;;  %v10913_v23 = vpop.f32.mrb[35].mxu0 }
 0x7c4   :  { %11574 = vrot.lane.b32.xlu0 %v12381_v61, %s15230_s20  ;;  %v1073_v25 = vpop.f32.mrb[36].mxu0 }
 0x7c5   :  { %v12719_v14 = vadd.f32 %v1073_v25, %v667_v15  ;;  %v10916_v29 = vpop.f32.mrb[37].mxu0  ;;  %v9039_v25 = vld [vmem:[%s15215_s6 + $0x10] sm:$0xff] }
 0x7c6   :  { %10971 = vmatpush3.msra.mxu1 %v9039_v25 }
 0x7c7   :  { %11486 = vmatprep.subr.bf16.mxu1 %v12161_v4 }
 0x7c8   :  { %1523 = vrot.lane.b32.xlu0 %v12385_v63, %s15230_s20  ;;  %v1078_v31 = vpop.f32.mrb[38].mxu0  ;;  %s15232_s20 = smov 40  }
 0x7c9   :  { %v12724_v32 = vadd.f32 %v1078_v31, %v668_v28  ;;  %v10919_v18 = vpop.f32.mrb[39].mxu0 }
 0x7cc   :  { %1505 = vrot.lane.b32.xlu0 %v12365_v51, %s15234_s23 }
 0x7d0   :  { %1507 = vrot.lane.b32.xlu0 %v12367_v52, %s15234_s23 }
 0x7d4   :  { %1511 = vrot.lane.b32.xlu0 %v12377_v59, %s15234_s23  ;;  %v11567_v59 = vunpack.i.h.bf16 %v11565_v24 }
 0x7d6   :  { %v11402_v47 = vpack.c.bf16 %v11567_v59, %v11566_v42 }
 0x7d7   :  { %1260 = vadd.xlane.f32.xlu1 %v1259_v40 }
 0x7d8   :  { %1513 = vrot.lane.b32.xlu0 %v12385_v63, %s15234_s23 }
 0x7e8   :  { %1509 = vrot.lane.b32.xlu1 %v12375_v58, %s15234_s23 }
 0x827   :  { %v1249_v33 = vpop.xlane.xlu1 %1248 }
 0x828   :  { %11974 = vrcp.f32 %v1249_v33 }
 0x82b   :  { %v1252_v51 = vpop.xlane.xlu1 %1251 }
 0x82c   :  { %11976 = vrcp.f32 %v1252_v51 }
 0x82f   :  { %v1255_v37 = vpop.xlane.xlu1 %1254 }
 0x830   :  { %11978 = vrcp.f32 %v1255_v37 }
 0x832   :  { %v11975_v58 = vpop.eup %11974 }
 0x833   :  { %v1258_v52 = vpop.xlane.xlu0 %1257  ;;  %v11560_v30 = vpop.permute.xlu1 %11559  ;;  %v1267_v49 = vmul.f32 %v11975_v58, %v12691_v0 }
 0x834   :  { %v11562_v38 = vunpack.i.h.bf16 %v11560_v30  ;;  %v11561_v39 = vunpack.i.l.bf16 %v11560_v30  ;;  %11980 = vrcp.f32 %v1258_v52  ;;  %v12122_v30 = vld [vmem:[%s15212_s3] sm:$0xff] }
 0x836   :  { %v11399_v35 = vpack.c.bf16 %v11562_v38, %v11561_v39  ;;  %v11977_v50 = vpop.eup %11976 }
 0x837   :  { %v1281_v45 = vpop.permute.xlu0 %1280  ;;  %v1268_v56 = vmul.f32 %v11977_v50, %v12695_v2 }
 0x838   :  { %11400 = vmatpush3.bf16.msra.mxu0 %v11399_v35  ;;  %v12123_v35 = vld [vmem:[%s15212_s3 + $0x8] sm:$0xff] }
 0x839   :  { %11401 = vmatprep.subr.bf16.mxu0 %v12161_v4 }
 0x83a   :  { %v11979_v19 = vpop.eup %11978 }
 0x83b   :  { %v11570_v48 = vpop.permute.xlu0 %11569  ;;  %v1269_v0 = vmul.f32 %v11979_v19, %v12699_v6  ;;  %v12125_v19 = vld [vmem:[%s15212_s3 + $0x18] sm:$0xff] }
 0x83c   :  { %11403 = vmatpush3.bf16.msra.mxu0 %v11402_v47  ;;  %v11572_v55 = vunpack.i.h.bf16 %v11570_v48  ;;  %v11571_v57 = vunpack.i.l.bf16 %v11570_v48 }
 0x83d   :  { %10953 = vmatprep.subr.mxu0 %v12163_v7 }
 0x83e   :  { %v11405_v60 = vpack.c.bf16 %v11572_v55, %v11571_v57  ;;  %v11981_v1 = vpop.eup %11980 }
 0x83f   :  { %v11575_v62 = vpop.permute.xlu0 %11574  ;;  %v1270_v2 = vmul.f32 %v11981_v1, %v12703_v9 }
 0x840   :  { %10954 = vmatpush3.msk.msra.mxu0 %vm98_vm5, %v1281_v45  ;;  %v11577_v22 = vunpack.i.h.bf16 %v11575_v62  ;;  %v11576_v3 = vunpack.i.l.bf16 %v11575_v62 }
 0x841   :  { %10956 = vmatmul.mubr.msk.f32.vlgmr.msra.gmra.mrb[40].mxu0 %vm374_vm8, %v1267_v49  ;;  %11404 = vmatprep.subr.bf16.mxu0 %v12161_v4  ;;  %v12124_v49 = vld [vmem:[%s15212_s3 + $0x10] sm:$0xff] }
 0x842   :  { %10958 = vmatprep.mubr.msk.f32.mxu0 %vm12162_vm0, %v12163_v7  ;;  %v11409_v8 = vpack.c.bf16 %v11577_v22, %v11576_v3  ;;  %v12126_v22 = vld [vmem:[%s15212_s3 + $0x20] sm:$0xf] }
 0x843   :  { %v1524_v6 = vpop.permute.xlu0 %1523 }
 0x845   :  { %10959 = vmatmul.mubr.msk.f32.gmra.mrb[42].mxu0 %vm374_vm8, %v1268_v56 }
 0x846   :  { %10961 = vmatprep.mubr.msk.f32.mxu0 %vm12162_vm0, %v12163_v7 }
 0x847   :  { %11407 = vmatpush3.bf16.xpose.msk.msra.mxu0 %vm12391_vm7, %v11405_v60  ;;  %v1506_v16 = vpop.permute.xlu0 %1505 }
 0x848   :  { %11408 = vmatprep.subr.bf16.mxu0 %v12161_v4 }
 0x849   :  { %10962 = vmatmul.mubr.msk.f32.gmra.mrb[44].mxu0 %vm374_vm8, %v1269_v0 }
 0x84a   :  { %10964 = vmatprep.mubr.msk.f32.mxu0 %vm12162_vm0, %v12163_v7 }
 0x84b   :  { %v1508_v17 = vpop.permute.xlu0 %1507 }
 0x84d   :  { %10965 = vmatmul.mubr.msk.f32.gmra.mrb[46].mxu0 %vm374_vm8, %v1270_v2 }
 0x84e   :  { %10967 = vmatprep.mubr.msk.f32.mxu0 %vm12162_vm0, %v12163_v7 }
 0x84f   :  { %11411 = vmatpush3.bf16.xpose.msk.msra.mxu0 %vm12391_vm7, %v11409_v8  ;;  %v1512_v23 = vpop.permute.xlu0 %1511 }
 0x850   :  { %10995 = vmatprep.subr.mxu0 %v12163_v7 }
 0x853   :  { %v1514_v15 = vpop.permute.xlu0 %1513 }
 0x857   :  { %10996 = vmatpush3.xpose.msk.msra.mxu0 %vm263_vm6, %v1524_v6 }
 0x858   :  { %11412 = vmatprep.subr.bf16.mxu0 %v12161_v4 }
 0x864   :  { %v1261_v10 = vpop.xlane.xlu1 %1260 }
 0x865   :  { %11982 = vrcp.f32 %v1261_v10 }
 0x868   :  { %v1510_v11 = vpop.permute.xlu1 %1509 }
 0x86f   :  { %v11983_v13 = vpop.eup %11982 }
 0x870   :  { %v1271_v9 = vmul.f32 %v11983_v13, %v12730_v34 }
 0x872   :  { %10968 = vmatmul.mubr.msk.f32.gmra.mrb[48].mxu0 %vm374_vm8, %v1271_v9 }
 0x873   :  { %10997 = vmatprep.mubr.msk.f32.mxu0 %vm12162_vm0, %v12163_v7 }
 0x876   :  { %10998 = vmatmul.mubr.msk.f32.vlgmr.msra.gmra.mrb[50].mxu0 %vm263_vm6, %v1506_v16 }
 0x877   :  { %11000 = vmatprep.mubr.msk.f32.mxu0 %vm12162_vm0, %v12163_v7 }
 0x87a   :  { %11001 = vmatmul.mubr.msk.f32.gmra.mrb[52].mxu0 %vm263_vm6, %v1508_v17 }
 0x87b   :  { %11003 = vmatprep.mubr.msk.f32.mxu0 %vm12162_vm0, %v12163_v7 }
 0x87e   :  { %11004 = vmatmul.mubr.msk.f32.gmra.mrb[54].mxu0 %vm263_vm6, %v1510_v11 }
 0x87f   :  { %11006 = vmatprep.mubr.msk.f32.mxu0 %vm12162_vm0, %v12163_v7 }
 0x882   :  { %11007 = vmatmul.mubr.msk.f32.gmra.mrb[56].mxu0 %vm263_vm6, %v1512_v23 }
 0x883   :  { %11009 = vmatprep.mubr.msk.f32.mxu0 %vm12162_vm0, %v12163_v7 }
 0x886   :  { %11010 = vmatmul.mubr.msk.f32.gmra.mrb[58].mxu0 %vm263_vm6, %v1514_v15 }
 0x887   :  { %11022 = vmatprep.mubr.msk.f32.mxu0 %vm12162_vm0, %v12163_v7 }
 0x914   :  { %v1369_v26 = vpop.f32.mrb[40].mxu0 }
 0x915   :  { %v10957_v29 = vpop.f32.mrb[41].mxu0  ;;  %10973 = vmatmul.mubr.msk.f32.vlgmr.msra.gmra.mrb[40].mxu1 %vm263_vm6, %v1369_v26 }
 0x916   :  { %10975 = vmatprep.mubr.msk.f32.mxu1 %vm12162_vm0, %v12163_v7 }
 0x918   :  { %v1374_v28 = vpop.f32.mrb[42].mxu0 }
 0x919   :  { %v10960_v31 = vpop.f32.mrb[43].mxu0  ;;  %10976 = vmatmul.mubr.msk.f32.gmra.mrb[42].mxu1 %vm263_vm6, %v1374_v28 }
 0x91a   :  { %10978 = vmatprep.mubr.msk.f32.mxu1 %vm12162_vm0, %v12163_v7 }
 0x91c   :  { %v1379_v18 = vpop.f32.mrb[44].mxu0 }
 0x91d   :  { %v10963_v34 = vpop.f32.mrb[45].mxu0  ;;  %10979 = vmatmul.mubr.msk.f32.gmra.mrb[44].mxu1 %vm263_vm6, %v1379_v18 }
 0x91e   :  { %10981 = vmatprep.mubr.msk.f32.mxu1 %vm12162_vm0, %v12163_v7 }
 0x920   :  { %v1384_v40 = vpop.f32.mrb[46].mxu0 }
 0x921   :  { %v10966_v33 = vpop.f32.mrb[47].mxu0  ;;  %10982 = vmatmul.mubr.msk.f32.gmra.mrb[46].mxu1 %vm263_vm6, %v1384_v40 }
 0x922   :  { %10984 = vmatprep.mubr.msk.f32.mxu1 %vm12162_vm0, %v12163_v7 }
 0x945   :  { %v1389_v51 = vpop.f32.mrb[48].mxu0 }
 0x946   :  { %v10969_v24 = vpop.f32.mrb[49].mxu0  ;;  %10985 = vmatmul.mubr.msk.f32.gmra.mrb[48].mxu1 %vm263_vm6, %v1389_v51 }
 0x947   :  { %11025 = vmatprep.mubr.msk.f32.mxu1 %vm12162_vm0, %v12163_v7 }
 0x949   :  { %v1611_v37 = vpop.f32.mrb[50].mxu0 }
 0x94a   :  { %v10999_v52 = vpop.f32.mrb[51].mxu0  ;;  %v1612_v38 = vadd.f32 %v12122_v30, %v1611_v37 }
 0x94c   :  { %v1635_v39 = vsel %vm374_vm8, %v1612_v38, -inf }
 0x94d   :  { %1636 = vmax.xlane.f32.xlu0 %v1635_v39  ;;  %v1616_v59 = vpop.f32.mrb[52].mxu0 }
 0x94e   :  { %v11002_v42 = vpop.f32.mrb[53].mxu0  ;;  %v1617_v45 = vadd.f32 %v12123_v35, %v1616_v59 }
 0x950   :  { %v1638_v47 = vsel %vm374_vm8, %v1617_v45, -inf }
 0x951   :  { %1639 = vmax.xlane.f32.xlu1 %v1638_v47  ;;  %v1621_v58 = vpop.f32.mrb[54].mxu0 }
 0x952   :  { %v11005_v48 = vpop.f32.mrb[55].mxu0  ;;  %v1622_v50 = vadd.f32 %v12124_v49, %v1621_v58 }
 0x954   :  { %v1641_v55 = vsel %vm374_vm8, %v1622_v50, -inf }
 0x955   :  { %1642 = vmax.xlane.f32.xlu0 %v1641_v55  ;;  %v1626_v57 = vpop.f32.mrb[56].mxu0 }
 0x956   :  { %v11008_v56 = vpop.f32.mrb[57].mxu0  ;;  %v1627_v60 = vadd.f32 %v12125_v19, %v1626_v57 }
 0x958   :  { %v1644_v62 = vsel %vm374_vm8, %v1627_v60, -inf }
 0x959   :  { %1645 = vmax.xlane.f32.xlu0 %v1644_v62  ;;  %v1631_v0 = vpop.f32.mrb[58].mxu0 }
 0x95a   :  { %v11011_v1 = vpop.f32.mrb[59].mxu0  ;;  %v1632_v3 = vadd.f32 %v12126_v22, %v1631_v0 }
 0x95c   :  { %v1647_v2 = vsel %vm387_vm9, %v1632_v3, -inf }
 0x95d   :  { %1648 = vmax.xlane.f32.xlu0 %v1647_v2 }
 0x962   :  { %11579 = vrot.lane.b32.xlu1 %v12371_v54, %s15232_s20 }
 0x9da   :  { %v1637_v8 = vpop.xlane.xlu0 %1636 }
 0x9db   :  { %v1650_v6 = vsub.f32 %v1612_v38, %v1637_v8 }
 0x9dd   :  { %v1655_v10 = vmul.f32 1.442695, %v1650_v6 }
 0x9de   :  { %v1640_v13 = vpop.xlane.xlu1 %1639 }
 0x9df   :  { %11984 = vpow2.f32 %v1655_v10  ;;  %v1651_v9 = vsub.f32 %v1617_v45, %v1640_v13 }
 0x9e1   :  { %v1657_v16 = vmul.f32 1.442695, %v1651_v9 }
 0x9e2   :  { %v11580_v17 = vpop.permute.xlu1 %11579  ;;  %v1643_v11 = vpop.xlane.xlu0 %1642 }
 0x9e3   :  { %11986 = vpow2.f32 %v1657_v16  ;;  %v11582_v23 = vunpack.i.h.bf16 %v11580_v17  ;;  %v11581_v15 = vunpack.i.l.bf16 %v11580_v17  ;;  %v1652_v25 = vsub.f32 %v1622_v50, %v1643_v11 }
 0x9e5   :  { %v11413_v26 = vpack.c.bf16 %v11582_v23, %v11581_v15  ;;  %v1659_v29 = vmul.f32 1.442695, %v1652_v25  ;;  %v9061_v25 = vld [vmem:[%s15215_s6 + $0x18] sm:$0xff] }
 0x9e6   :  { %v1646_v28 = vpop.xlane.xlu0 %1645 }
 0x9e7   :  { %11988 = vpow2.f32 %v1659_v29  ;;  %v1653_v31 = vsub.f32 %v1627_v60, %v1646_v28  ;;  %11414 = vmatpush3.bf16.msra.mxu0 %v11413_v26  ;;  %11489 = vmatpush3.bf16.msra.mxu1 %v11413_v26 }
 0x9e8   :  { %v1476_v54 = vpop.f32.mrb[40].mxu1  ;;  %11415 = vmatprep.subr.bf16.mxu0 %v12161_v4  ;;  %11487 = vmatprep.subr.bf16.mxu1 %v12161_v4 }
 0x9e9   :  { %v11985_v18 = vpop.eup %11984  ;;  %v1661_v34 = vmul.f32 1.442695, %v1653_v31  ;;  %v12831_v40 = vadd.f32 %v1476_v54, %v12686_v43  ;;  %v10974_v33 = vpop.f32.mrb[41].mxu1 }
 0x9ea   :  { %v1665_v51 = vsel %vm374_vm8, %v11985_v18, 0.0  ;;  %v1649_v49 = vpop.xlane.xlu0 %1648 }
 0x9eb   :  { %11990 = vpow2.f32 %v1661_v34  ;;  %1666 = vadd.xlane.f32.xlu0 %v1665_v51 }
 0x9ec   :  { %v1481_v24 = vpop.f32.mrb[42].mxu1 }
 0x9ed   :  { %v11987_v37 = vpop.eup %11986  ;;  %v12835_v52 = vadd.f32 %v1481_v24, %v12689_v53  ;;  %v10977_v30 = vpop.f32.mrb[43].mxu1 }
 0x9ee   :  { %v1668_v38 = vsel %vm374_vm8, %v11987_v37, 0.0 }
 0x9ef   :  { %1669 = vadd.xlane.f32.xlu1 %v1668_v38 }
 0x9f0   :  { %v1486_v39 = vpop.f32.mrb[44].mxu1 }
 0x9f1   :  { %v11989_v59 = vpop.eup %11988  ;;  %v12839_v42 = vadd.f32 %v1486_v39, %v12714_v21  ;;  %v10980_v43 = vpop.f32.mrb[45].mxu1  ;;  %v1654_v21 = vsub.f32 %v1632_v3, %v1649_v49 }
 0x9f2   :  { %v1671_v35 = vsel %vm374_vm8, %v11989_v59, 0.0 }
 0x9f3   :  { %1672 = vadd.xlane.f32.xlu0 %v1671_v35  ;;  %v1663_v50 = vmul.f32 1.442695, %v1654_v21 }
 0x9f4   :  { %v1491_v45 = vpop.f32.mrb[46].mxu1 }
 0x9f5   :  { %v11991_v47 = vpop.eup %11990  ;;  %v12843_v58 = vadd.f32 %v1491_v45, %v12719_v14  ;;  %v10983_v53 = vpop.f32.mrb[47].mxu1  ;;  %11992 = vpow2.f32 %v1663_v50 }
 0x9f6   :  { %v1674_v48 = vsel %vm374_vm8, %v11991_v47, 0.0 }
 0x9f7   :  { %1675 = vadd.xlane.f32.xlu0 %v1674_v48 }
 0x9ff   :  { %v11993_v14 = vpop.eup %11992 }
 0xa00   :  { %1698 = vrot.lane.b32.xlu1 %v12385_v63, %s15232_s20  ;;  %v1677_v19 = vsel %vm387_vm9, %v11993_v14, 0.0 }
 0xa0d   :  { %11584 = vrot.lane.b32.xlu0 %v12381_v61, %s15232_s20 }
 0xa19   :  { %v1496_v55 = vpop.f32.mrb[48].mxu1 }
 0xa1a   :  { %v10986_v57 = vpop.f32.mrb[49].mxu1  ;;  %v12851_v56 = vadd.f32 %v1496_v55, %v12724_v32 }
 0xa24   :  { %1678 = vadd.xlane.f32.xlu1 %v1677_v19 }
 0xa78   :  { %v1667_v60 = vpop.xlane.xlu0 %1666 }
 0xa79   :  { %11994 = vrcp.f32 %v1667_v60 }
 0xa7c   :  { %v1670_v62 = vpop.xlane.xlu1 %1669 }
 0xa7d   :  { %11996 = vrcp.f32 %v1670_v62 }
 0xa80   :  { %v1673_v0 = vpop.xlane.xlu0 %1672  ;;  %v1699_v10 = vpop.permute.xlu1 %1698 }
 0xa81   :  { %11998 = vrcp.f32 %v1673_v0 }
 0xa83   :  { %v11995_v2 = vpop.eup %11994 }
 0xa84   :  { %v1676_v63 = vpop.xlane.xlu0 %1675  ;;  %v1685_v32 = vmul.f32 %v11995_v2, %v11985_v18 }
 0xa85   :  { %12000 = vrcp.f32 %v1676_v63 }
 0xa87   :  { %v11997_v8 = vpop.eup %11996 }
 0xa88   :  { %v11585_v61 = vpop.permute.xlu0 %11584  ;;  %v1686_v6 = vmul.f32 %v11997_v8, %v11987_v37 }
 0xa89   :  { %v11587_v1 = vunpack.i.h.bf16 %v11585_v61  ;;  %v11586_v22 = vunpack.i.l.bf16 %v11585_v61 }
 0xa8b   :  { %v11416_v3 = vpack.c.bf16 %v11587_v1, %v11586_v22  ;;  %v11999_v13 = vpop.eup %11998 }
 0xa8c   :  { %v1687_v9 = vmul.f32 %v11999_v13, %v11989_v59 }
 0xa8d   :  { %11417 = vmatpush3.bf16.msra.mxu0 %v11416_v3  ;;  %11490 = vmatpush3.bf16.msra.mxu1 %v11416_v3 }
 0xa8e   :  { %11020 = vmatprep.subr.mxu0 %v12163_v7  ;;  %11488 = vmatprep.subr.mxu1 %v12163_v7 }
 0xa8f   :  { %v12001_v16 = vpop.eup %12000 }
 0xa90   :  { %v1688_v17 = vmul.f32 %v12001_v16, %v11991_v47 }
 0xa91   :  { %11021 = vmatpush3.msk.msra.mxu0 %vm98_vm5, %v1699_v10  ;;  %11491 = vmatpush3.msk.msra.mxu1 %vm98_vm5, %v1699_v10 }
 0xa92   :  { %11023 = vmatmul.mubr.msk.f32.vlgmr.msra.gmra.mrb[60].mxu0 %vm374_vm8, %v1685_v32  ;;  %11026 = vmatmul.mubr.msk.f32.vlgmr.msra.gmra.mrb[50].mxu1 %vm374_vm8, %v1686_v6 }
 0xa93   :  { %11028 = vmatprep.mubr.msk.f32.mxu1 %vm12162_vm0, %v12163_v7  ;;  %11037 = vmatprep.subr.mxu0 %v12163_v7 }
 0xa94   :  { %11039 = vmatprep.mubr.msk.f32.mxu0 %vm12162_vm0, %v12163_v7  ;;  %11038 = vmatpush3.msra.mxu0 %v9061_v25 }
 0xa96   :  { %11029 = vmatmul.mubr.msk.f32.gmra.mrb[52].mxu1 %vm374_vm8, %v1687_v9 }
 0xa97   :  { %11031 = vmatprep.mubr.msk.f32.mxu1 %vm12162_vm0, %v12163_v7 }
 0xa9a   :  { %11032 = vmatmul.mubr.msk.f32.gmra.mrb[54].mxu1 %vm374_vm8, %v1688_v17 }
 0xa9b   :  { %11034 = vmatprep.mubr.msk.f32.mxu1 %vm12162_vm0, %v12163_v7 }
 0xab1   :  { %v1679_v11 = vpop.xlane.xlu1 %1678 }
 0xab2   :  { %12002 = vrcp.f32 %v1679_v11  ;;  %v2023_v11 = vld [vmem:[%s15217_s8] sm:$0xff] }
 0xabc   :  { %v12003_v23 = vpop.eup %12002 }
 0xabd   :  { %v1689_v15 = vmul.f32 %v12003_v23, %v11993_v14  ;;  %v2027_v23 = vld [vmem:[%s15217_s8 + $0x20] sm:$0xff] }
 0xabe   :  { %v9070_v25 = vcombine.high %v2023_v11, %v2027_v23 }
 0xabf   :  { %11035 = vmatmul.mubr.msk.f32.gmra.mrb[56].mxu1 %vm374_vm8, %v1689_v15  ;;  %v2024_v15 = vld [vmem:[%s15217_s8 + $0x8] sm:$0xff] }
 0xac0   :  { %2170 = vmatprep.subr.bf16.mxu1 %v9070_v25 }
 0xb65   :  { %v1787_v26 = vpop.f32.mrb[60].mxu0  ;;  %v1792_v29 = vpop.f32.mrb[50].mxu1 }
 0xb66   :  { %v11024_v28 = vpop.f32.mrb[61].mxu0  ;;  %v11027_v31 = vpop.f32.mrb[51].mxu1  ;;  %11040 = vmatmul.mubr.msk.f32.vlgmr.msra.gmra.mrb[62].mxu0 %vm263_vm6, %v1787_v26  ;;  %v2028_v26 = vld [vmem:[%s15217_s8 + $0x28] sm:$0xff] }
 0xb67   :  { %11042 = vmatprep.mubr.msk.f32.mxu0 %vm12162_vm0, %v12163_v7  ;;  %v9071_v28 = vcombine.low %v2024_v15, %v2028_v26  ;;  %v9072_v31 = vcombine.high %v2024_v15, %v2028_v26 }
 0xb69   :  { %v1797_v54 = vpop.f32.mrb[52].mxu1  ;;  %2231 = vmatprep.subr.bf16.mxu0 %v9072_v31 }
 0xb6a   :  { %v11030_v18 = vpop.f32.mrb[53].mxu1  ;;  %11043 = vmatmul.mubr.msk.f32.gmra.mrb[64].mxu0 %vm263_vm6, %v1792_v29  ;;  %v9069_v29 = vcombine.low %v2023_v11, %v2027_v23  ;;  %v2038_v11 = vld [vmem:[%s15217_s8 + $0x78] sm:$0xff] }
 0xb6b   :  { %11045 = vmatprep.mubr.msk.f32.mxu0 %vm12162_vm0, %v12163_v7  ;;  %v2035_v18 = vld [vmem:[%s15217_s8 + $0x60] sm:$0xff]  ;;  %2232 = vmatpush1.bf16.msra.mxu0 %v9071_v28 }
 0xb6c   :  { %2171 = vmatpush1.bf16.msra.mxu1 %v9069_v29 }
 0xb6d   :  { %v1802_v34 = vpop.f32.mrb[54].mxu1 }
 0xb6e   :  { %v11033_v33 = vpop.f32.mrb[55].mxu1  ;;  %11046 = vmatmul.mubr.msk.f32.gmra.mrb[66].mxu0 %vm263_vm6, %v1797_v54  ;;  %v2031_v54 = vld [vmem:[%s15217_s8 + $0x40] sm:$0xff] }
 0xb6f   :  { %11048 = vmatprep.mubr.msk.f32.mxu0 %vm12162_vm0, %v12163_v7  ;;  %v9078_v33 = vcombine.high %v2031_v54, %v2035_v18 }
 0xb71   :  { %2172 = vmatprep.subr.bf16.mxu1 %v9078_v33 }
 0xb72   :  { %11049 = vmatmul.mubr.msk.f32.gmra.mrb[68].mxu0 %vm263_vm6, %v1802_v34  ;;  %v2032_v34 = vld [vmem:[%s15217_s8 + $0x48] sm:$0xff] }
 0xb73   :  { %11051 = vmatprep.mubr.msk.f32.mxu0 %vm12162_vm0, %v12163_v7 }
 0xb92   :  { %v1807_v51 = vpop.f32.mrb[56].mxu1 }
 0xb93   :  { %v11036_v24 = vpop.f32.mrb[57].mxu1  ;;  %11052 = vmatmul.mubr.msk.f32.gmra.mrb[70].mxu0 %vm263_vm6, %v1807_v51  ;;  %v2036_v51 = vld [vmem:[%s15217_s8 + $0x68] sm:$0xff] }
 0xc39   :  { %v1894_v37 = vpop.f32.mrb[62].mxu0 }
 0xc3a   :  { %v1918_v30 = vadd.f32 %v1894_v37, %v12831_v40  ;;  %v11041_v38 = vpop.f32.mrb[63].mxu0  ;;  %v9077_v37 = vcombine.low %v2031_v54, %v2035_v18  ;;  %v11669_v18 = vld [vmem:[%s15219_s10 + $0xc0] sm:$0xff]  }
 0xc3b   :  { %v9080_v38 = vcombine.high %v2032_v34, %v2036_v51 }
 0xc3c   :  { %v1923_v39 = vadd.f32 %v1918_v30, %v12319_v27  ;;  %v9079_v30 = vcombine.low %v2032_v34, %v2036_v51  ;;  %2173 = vmatpush1.bf16.msra.mxu1 %v9077_v37 }
 0xc3d   :  { %v1899_v59 = vpop.f32.mrb[64].mxu0  ;;  %2233 = vmatprep.subr.bf16.mxu0 %v9080_v38 }
 0xc3e   :  { %v1919_v43 = vadd.f32 %v1899_v59, %v12835_v52  ;;  %v11044_v35 = vpop.f32.mrb[65].mxu0  ;;  %v1930_v45 = vsel %vm141_vm2, %v1923_v39, 0.0  ;;  %2234 = vmatpush1.bf16.msra.mxu0 %v9079_v30 }
 0xc3f   :  { %1931 = vadd.xlane.f32.xlu0 %v1930_v45 }
 0xc40   :  { %v1924_v47 = vadd.f32 %v1919_v43, %v12329_v36  ;;  %v12175_v43 = vmov 0  }
 0xc41   :  { %v1904_v53 = vpop.f32.mrb[66].mxu0  ;;  %2202 = vmatprep.mubr.bf16.mxu1 %v12175_v43  ;;  %2263 = vmatprep.mubr.bf16.mxu0 %v12175_v43 }
 0xc42   :  { %v1920_v48 = vadd.f32 %v1904_v53, %v12839_v42  ;;  %v11047_v49 = vpop.f32.mrb[67].mxu0  ;;  %v1933_v21 = vsel %vm141_vm2, %v1924_v47, 0.0  ;;  %v2029_v53 = vld [vmem:[%s15217_s8 + $0x30] sm:$0xff] }
 0xc43   :  { %1934 = vadd.xlane.f32.xlu1 %v1933_v21 }
 0xc44   :  { %v1925_v40 = vadd.f32 %v1920_v48, %v12339_v41  ;;  %v2026_v48 = vld [vmem:[%s15217_s8 + $0x18] sm:$0xff] }
 0xc45   :  { %v1909_v50 = vpop.f32.mrb[68].mxu0 }
 0xc46   :  { %v1921_v27 = vadd.f32 %v1909_v50, %v12843_v58  ;;  %v11050_v55 = vpop.f32.mrb[69].mxu0  ;;  %v1936_v52 = vsel %vm141_vm2, %v1925_v40, 0.0 }
 0xc47   :  { %1937 = vadd.xlane.f32.xlu0 %v1936_v52 }
 0xc48   :  { %v1926_v57 = vadd.f32 %v1921_v27, %v12347_v44 }
 0xc4a   :  { %v1939_v36 = vsel %vm141_vm2, %v1926_v57, 0.0 }
 0xc4b   :  { %1940 = vadd.xlane.f32.xlu1 %v1939_v36 }
 0xc66   :  { %v1914_v14 = vpop.f32.mrb[70].mxu0 }
 0xc67   :  { %v1922_v42 = vadd.f32 %v1914_v14, %v12851_v56  ;;  %v11053_v19 = vpop.f32.mrb[71].mxu0 }
 0xc69   :  { %v1927_v60 = vadd.f32 %v1922_v42, %v12354_v46 }
 0xc6b   :  { %v1943_v41 = vsel %vm1942_vm10, %v1927_v60, 0.0 }
 0xc6c   :  { %1944 = vadd.xlane.f32.xlu0 %v1943_v41 }
 0xccc   :  { %v1932_v58 = vpop.xlane.xlu0 %1931 }
 0xccd   :  { %v1947_v62 = vmul.f32 0.03125, %v1932_v58 }
 0xccf   :  { %v12903_v0 = vsub.f32 %v1923_v39, %v1947_v62 }
 0xcd0   :  { %v1935_v63 = vpop.xlane.xlu1 %1934 }
 0xcd1   :  { %v1948_v61 = vmul.f32 0.03125, %v1935_v63  ;;  %v1957_v44 = vmul.f32 %v12903_v0, %v12903_v0 }
 0xcd3   :  { %v12907_v1 = vsub.f32 %v1924_v47, %v1948_v61  ;;  %v1962_v56 = vsel %vm141_vm2, %v1957_v44, 0.0  ;;  %v2025_v47 = vld [vmem:[%s15217_s8 + $0x10] sm:$0xff] }
 0xcd4   :  { %v1938_v22 = vpop.xlane.xlu0 %1937  ;;  %1963 = vadd.xlane.f32.xlu1 %v1962_v56  ;;  %v9073_v49 = vcombine.low %v2025_v47, %v2029_v53  ;;  %v9074_v21 = vcombine.high %v2025_v47, %v2029_v53  ;;  %v9067_v56 = vld [vmem:[%s15221_s12] ss:$0 sm:$0xff] }
 0xcd5   :  { %v1949_v3 = vmul.f32 0.03125, %v1938_v22  ;;  %v1958_v46 = vmul.f32 %v12907_v1, %v12907_v1  ;;  %v11671_v53 = vld [vmem:[%s15219_s10 + $0x80] sm:$0xff]  }
 0xcd6   :  { %2292 = vmatprep.subr.bf16.mxu1 %v9074_v21  ;;  %v11674_v21 = vld [vmem:[%s15219_s10 + $0x8] sm:$0xff]  }
 0xcd7   :  { %v12912_v2 = vsub.f32 %v1925_v40, %v1949_v3  ;;  %v1965_v8 = vsel %vm141_vm2, %v1958_v46, 0.0  ;;  %v2030_v40 = vld [vmem:[%s15217_s8 + $0x38] sm:$0xff] }
 0xcd8   :  { %v1941_v32 = vpop.xlane.xlu1 %1940  ;;  %1966 = vadd.xlane.f32.xlu0 %v1965_v8  ;;  %v9075_v50 = vcombine.low %v2026_v48, %v2030_v40  ;;  %v9076_v27 = vcombine.high %v2026_v48, %v2030_v40  ;;  %v9068_v8 = vld [vmem:[%s15222_s13] ss:$0 sm:$0xff]  ;;  %v11672_v48 = vld [vmem:[%s15219_s10 + $0x48] sm:$0xff]  }
 0xcd9   :  { %v1950_v6 = vmul.f32 0.03125, %v1941_v32  ;;  %v1959_v10 = vmul.f32 %v12912_v2, %v12912_v2  ;;  %v11675_v40 = vld [vmem:[%s15219_s10 + $0x88] sm:$0xff]  }
 0xcda   :  { %2353 = vmatprep.subr.bf16.mxu0 %v9076_v27  ;;  %v11677_v27 = vld [vmem:[%s15219_s10 + $0xd0] sm:$0xff]  }
 0xcdb   :  { %v12917_v13 = vsub.f32 %v1926_v57, %v1950_v6  ;;  %v1968_v9 = vsel %vm141_vm2, %v1959_v10, 0.0  ;;  %v2033_v10 = vld [vmem:[%s15217_s8 + $0x50] sm:$0xff] }
 0xcdc   :  { %1969 = vadd.xlane.f32.xlu1 %v1968_v9 }
 0xcdd   :  { %v1960_v16 = vmul.f32 %v12917_v13, %v12917_v13 }
 0xcdf   :  { %v1971_v17 = vsel %vm141_vm2, %v1960_v16, 0.0 }
 0xce0   :  { %1972 = vadd.xlane.f32.xlu0 %v1971_v17  ;;  %v2034_v17 = vld [vmem:[%s15217_s8 + $0x58] sm:$0xff] }
 0xce1   :  { %v9084_v26 = vcombine.high %v2034_v17, %v2038_v11  ;;  %v9083_v54 = vcombine.low %v2034_v17, %v2038_v11  ;;  %v13148_v17 = vsub.s32 2, %v12296_v12  ;;  %v13153_v11 = vld [vmem:[%s15218_s9] sm:$0xff] }
 0xcf9   :  { %v1945_v24 = vpop.xlane.xlu0 %1944 }
 0xcfa   :  { %v1951_v39 = vmul.f32 0.03125, %v1945_v24 }
 0xcfc   :  { %v12947_v59 = vsub.f32 %v1927_v60, %v1951_v39 }
 0xcfe   :  { %v1961_v35 = vmul.f32 %v12947_v59, %v12947_v59 }
 0xd00   :  { %v1974_v45 = vsel %vm1942_vm10, %v1961_v35, 0.0 }
 0xd01   :  { %1975 = vadd.xlane.f32.xlu1 %v1974_v45 }
 0xd61   :  { %v1964_v55 = vpop.xlane.xlu1 %1963 }
 0xd62   :  { %v1977_v52 = vmul.f32 0.03125, %v1964_v55  ;;  %v11678_v55 = vld [vmem:[%s15219_s10 + $0x10] sm:$0xff]  }
 0xd64   :  { %v1982_v57 = vadd.f32 1e-05, %v1977_v52  ;;  %v11679_v52 = vld [vmem:[%s15219_s10 + $0x90] sm:$0xff]  }
 0xd65   :  { %v1967_v36 = vpop.xlane.xlu0 %1966 }
 0xd66   :  { %12004 = vrsqrt.f32 %v1982_v57  ;;  %v1978_v14 = vmul.f32 0.03125, %v1967_v36  ;;  %v11680_v57 = vld [vmem:[%s15219_s10 + $0x58] sm:$0xff]  }
 0xd67   :  { %v11681_v36 = vld [vmem:[%s15219_s10 + $0xd8] sm:$0xff]  }
 0xd68   :  { %v1983_v42 = vadd.f32 1e-05, %v1978_v14  ;;  %v11682_v14 = vld [vmem:[%s15219_s10 + $0x18] sm:$0xff]  }
 0xd69   :  { %v1970_v19 = vpop.xlane.xlu1 %1969 }
 0xd6a   :  { %12006 = vrsqrt.f32 %v1983_v42  ;;  %v1979_v60 = vmul.f32 0.03125, %v1970_v19  ;;  %v11683_v42 = vld [vmem:[%s15219_s10 + $0x98] sm:$0xff]   ;;  %v11684_v19 = vld [vmem:[%s15219_s10 + $0x60] sm:$0xff]  }
 0xd6c   :  { %v1984_v41 = vadd.f32 1e-05, %v1979_v60  ;;  %v11685_v60 = vld [vmem:[%s15219_s10 + $0xe0] sm:$0xff]  }
 0xd6d   :  { %v1973_v58 = vpop.xlane.xlu0 %1972 }
 0xd6e   :  { %12008 = vrsqrt.f32 %v1984_v41  ;;  %v1980_v62 = vmul.f32 0.03125, %v1973_v58  ;;  %v11686_v41 = vld [vmem:[%s15219_s10 + $0x20] sm:$0xff]  }
 0xd6f   :  { %v11687_v58 = vld [vmem:[%s15219_s10 + $0xa0] sm:$0xff]  }
 0xd70   :  { %v12005_v63 = vpop.eup %12004  ;;  %v1985_v61 = vadd.f32 1e-05, %v1980_v62  ;;  %v11688_v62 = vld [vmem:[%s15219_s10 + $0x68] sm:$0xff]  }
 0xd71   :  { %v1992_v44 = vmul.f32 %v12005_v63, %v12903_v0  ;;  %v11689_v63 = vld [vmem:[%s15219_s10 + $0xe8] sm:$0xff]  }
 0xd72   :  { %12010 = vrsqrt.f32 %v1985_v61  ;;  %v11690_v61 = vld [vmem:[%s15219_s10 + $0x28] sm:$0xff]  }
 0xd73   :  { %v2003_v3 = vmul.f32 %v9067_v56, %v1992_v44  ;;  %v11691_v44 = vld [vmem:[%s15219_s10 + $0xa8] sm:$0xff]  }
 0xd74   :  { %v12007_v22 = vpop.eup %12006 }
 0xd75   :  { %v1993_v46 = vmul.f32 %v12007_v22, %v12907_v1  ;;  %v12977_v0 = vadd.f32 %v9068_v8, %v2003_v3  ;;  %v2037_v1 = vld [vmem:[%s15217_s8 + $0x70] sm:$0xff] }
 0xd76   :  { %v9082_v25 = vcombine.high %v2033_v10, %v2037_v1  ;;  %v9081_v31 = vcombine.low %v2033_v10, %v2037_v1  ;;  %v11693_v22 = vld [vmem:[%s15219_s10 + $0xf0] sm:$0xff]   ;;  %v11699_v10 = vld [vmem:[%s15219_s10 + $0xb8] sm:$0xff]   ;;  %v11701_v1 = vld [vmem:[%s15219_s10 + $0x1c0] sm:$0xff]  }
 0xd77   :  { %v2004_v32 = vmul.f32 %v9067_v56, %v1993_v46  ;;  %v11694_v3 = vld [vmem:[%s15219_s10 + $0x30] sm:$0xff]  }
 0xd78   :  { %v12009_v6 = vpop.eup %12008  ;;  %v11695_v46 = vld [vmem:[%s15219_s10 + $0xb0] sm:$0xff]  }
 0xd79   :  { %v12979_v9 = vadd.f32 %v9068_v8, %v2004_v32  ;;  %v1994_v16 = vmul.f32 %v12009_v6, %v12912_v2  ;;  %v11697_v32 = vld [vmem:[%s15219_s10 + $0xf8] sm:$0xff]  }
 0xd7a   :  { %v11698_v6 = vld [vmem:[%s15219_s10 + $0x38] sm:$0xff]  }
 0xd7b   :  { %v12993_v23 = vpack.c.bf16 %v12979_v9, %v12977_v0  ;;  %v2005_v2 = vmul.f32 %v9067_v56, %v1994_v16  ;;  %v11700_v16 = vld [vmem:[%s15219_s10 + $0x140] sm:$0xff]  }
 0xd7c   :  { %v12011_v15 = vpop.eup %12010 }
 0xd7d   :  { %v1995_v29 = vmul.f32 %v12011_v15, %v12917_v13  ;;  %9085 = vmatmul.mubr.msk.bf16.vlgmr.msra.gmra.mrb[60].mxu1 %vm141_vm2, %v12993_v23  ;;  %9088 = vmatmul.mubr.msk.bf16.vlgmr.msra.gmra.mrb[72].mxu0 %vm141_vm2, %v12993_v23  ;;  %v11668_v13 = vld [vmem:[%s15219_s10 + $0x40] sm:$0xff]   ;;  %v13008_v34 = vadd.f32 %v9068_v8, %v2005_v2  ;;  %v13156_v15 = vsub.s32 1, %v12296_v12  ;;  %v13167_v2 = vrot.slane %v13153_v11, %v13148_v17 }
 0xd7e   :  { %2212 = vmatprep.mubr.bf16.mxu1 %v12175_v43  ;;  %2273 = vmatprep.mubr.bf16.mxu0 %v12175_v43 }
 0xd7f   :  { %v2006_v28 = vmul.f32 %v9067_v56, %v1995_v29  ;;  %2293 = vmatpush1.bf16.msra.mxu1 %v9073_v49  ;;  %2354 = vmatpush1.bf16.msra.mxu0 %v9075_v50  ;;  %v11673_v49 = vld [vmem:[%s15219_s10 + $0xc8] sm:$0xff]   ;;  %v11676_v50 = vld [vmem:[%s15219_s10 + $0x50] sm:$0xff]   ;;  %v13171_v29 = vrot.slane %v13153_v11, %v13156_v15 }
 0xd80   :  { %2294 = vmatprep.subr.bf16.mxu1 %v9082_v25  ;;  %2355 = vmatprep.subr.bf16.mxu0 %v9084_v26  ;;  %v13159_v25 = vsub.s32 3, %v12296_v12  ;;  %v13163_v26 = vrot.slane %v13153_v11, %v12315_v20 }
 0xd81   :  { %v13010_v33 = vadd.f32 %v9068_v8, %v2006_v28 }
 0xd82   :  { %v13175_v28 = vrot.slane %v13153_v11, %v13159_v25 }
 0xd83   :  { %v13014_v51 = vpack.c.bf16 %v13010_v33, %v13008_v34  ;;  %2295 = vmatpush1.bf16.msra.mxu1 %v9081_v31  ;;  %2356 = vmatpush1.bf16.msra.mxu0 %v9083_v54 }
 0xd84   :  { %10101 = vmatprep.subr.bf16.mxu1 %v11668_v13  ;;  %10135 = vmatprep.subr.bf16.mxu0 %v11669_v18 }
 0xd85   :  { %9086 = vmatmul.mubr.msk.bf16.gmra.mrb[64].mxu1 %vm141_vm2, %v13014_v51  ;;  %9089 = vmatmul.mubr.msk.bf16.gmra.mrb[76].mxu0 %vm141_vm2, %v13014_v51 }
 0xd86   :  { %2222 = vmatprep.mubr.bf16.mxu1 %v12175_v43  ;;  %2283 = vmatprep.mubr.bf16.mxu0 %v12175_v43 }
 0xd8e   :  { %v1976_v24 = vpop.xlane.xlu1 %1975 }
 0xd8f   :  { %v1981_v37 = vmul.f32 0.03125, %v1976_v24 }
 0xd91   :  { %v1986_v30 = vadd.f32 1e-05, %v1981_v37 }
 0xd93   :  { %12012 = vrsqrt.f32 %v1986_v30 }
 0xd9d   :  { %v12013_v38 = vpop.eup %12012 }
 0xd9e   :  { %v1996_v39 = vmul.f32 %v12013_v38, %v12947_v59  ;;  %v11670_v59 = vld [vmem:[%s15219_s10] sm:$0xff]  }
 0xda0   :  { %v2007_v35 = vmul.f32 %v9067_v56, %v1996_v39  ;;  %v11692_v56 = vld [vmem:[%s15219_s10 + $0x70] sm:$0xff]  }
 0xda2   :  { %v13023_v45 = vadd.f32 %v9068_v8, %v2007_v35  ;;  %v11696_v8 = vld [vmem:[%s15219_s10 + $0x78] sm:$0xff]  }
 0xda4   :  { %v13027_v47 = vpack.c.bf16 %v13023_v45, %v13023_v45 }
 0xda6   :  { %9087 = vmatmul.mubr.msk.bf16.gmra.mrb[68].mxu1 %vm141_vm2, %v13027_v47  ;;  %9090 = vmatmul.mubr.msk.bf16.gmra.mrb[80].mxu0 %vm141_vm2, %v13027_v47 }
 0xda7   :  { %2324 = vmatprep.mubr.bf16.mxu1 %v12175_v43  ;;  %2385 = vmatprep.mubr.bf16.mxu0 %v12175_v43 }
 0xdae   :  { %9091 = vmatmul.mubr.msk.bf16.vlgmr.msra.gmra.mrb[72].mxu1 %vm141_vm2, %v12993_v23  ;;  %9094 = vmatmul.mubr.msk.bf16.vlgmr.msra.gmra.mrb[84].mxu0 %vm141_vm2, %v12993_v23 }
 0xdaf   :  { %2334 = vmatprep.mubr.bf16.mxu1 %v12175_v43  ;;  %2395 = vmatprep.mubr.bf16.mxu0 %v12175_v43 }
 0xdb0   :  { %10102 = vmatpush3.bf16.msra.mxu1 %v11670_v59  ;;  %10136 = vmatpush3.bf16.msra.mxu0 %v11671_v53 }
 0xdb1   :  { %10103 = vmatprep.subr.bf16.mxu1 %v11672_v48  ;;  %10137 = vmatprep.subr.bf16.mxu0 %v11673_v49 }
 0xdb4   :  { %10104 = vmatpush3.bf16.msra.mxu1 %v11674_v21  ;;  %10138 = vmatpush3.bf16.msra.mxu0 %v11675_v40 }
 0xdb5   :  { %10105 = vmatprep.subr.bf16.mxu1 %v11676_v50  ;;  %10139 = vmatprep.subr.bf16.mxu0 %v11677_v27 }
 0xdb6   :  { %9092 = vmatmul.mubr.msk.bf16.gmra.mrb[76].mxu1 %vm141_vm2, %v13014_v51  ;;  %9095 = vmatmul.mubr.msk.bf16.gmra.mrb[88].mxu0 %vm141_vm2, %v13014_v51 }
 0xdb7   :  { %2344 = vmatprep.mubr.bf16.mxu1 %v12175_v43  ;;  %2405 = vmatprep.mubr.bf16.mxu0 %v12175_v43 }
 0xdb8   :  { %10106 = vmatpush3.bf16.msra.mxu1 %v11678_v55  ;;  %10140 = vmatpush3.bf16.msra.mxu0 %v11679_v52 }
 0xdb9   :  { %10107 = vmatprep.subr.bf16.mxu1 %v11680_v57  ;;  %10141 = vmatprep.subr.bf16.mxu0 %v11681_v36 }
 0xdbc   :  { %10108 = vmatpush3.bf16.msra.mxu1 %v11682_v14  ;;  %10142 = vmatpush3.bf16.msra.mxu0 %v11683_v42 }
 0xdbd   :  { %10109 = vmatprep.subr.bf16.mxu1 %v11684_v19  ;;  %10143 = vmatprep.subr.bf16.mxu0 %v11685_v60 }
 0xdbe   :  { %9093 = vmatmul.mubr.msk.bf16.gmra.mrb[80].mxu1 %vm141_vm2, %v13027_v47  ;;  %9096 = vmatmul.mubr.msk.bf16.gmra.mrb[92].mxu0 %vm141_vm2, %v13027_v47 }
 0xdc0   :  { %10110 = vmatpush3.bf16.msra.mxu1 %v11686_v41  ;;  %10144 = vmatpush3.bf16.msra.mxu0 %v11687_v58 }
 0xdc1   :  { %10111 = vmatprep.subr.bf16.mxu1 %v11688_v62  ;;  %10145 = vmatprep.subr.bf16.mxu0 %v11689_v63 }
 0xdc4   :  { %10112 = vmatpush3.bf16.msra.mxu1 %v11690_v61  ;;  %10146 = vmatpush3.bf16.msra.mxu0 %v11691_v44  ;;  %v11702_v61 = vld [vmem:[%s15219_s10 + $0x100] sm:$0xff]  }
 0xdc5   :  { %10113 = vmatprep.subr.bf16.mxu1 %v11692_v56  ;;  %10147 = vmatprep.subr.bf16.mxu0 %v11693_v22  ;;  %v11703_v44 = vld [vmem:[%s15219_s10 + $0x180] sm:$0xff]  }
 0xdc8   :  { %10114 = vmatpush3.bf16.msra.mxu1 %v11694_v3  ;;  %10148 = vmatpush3.bf16.msra.mxu0 %v11695_v46 }
 0xdc9   :  { %10115 = vmatprep.subr.bf16.mxu1 %v11696_v8  ;;  %10149 = vmatprep.subr.bf16.mxu0 %v11697_v32  ;;  %v11704_v8 = vld [vmem:[%s15219_s10 + $0x148] sm:$0xff]  }
 0xdca   :  { %v11705_v32 = vld [vmem:[%s15219_s10 + $0x1c8] sm:$0xff]  }
 0xdcc   :  { %10116 = vmatpush3.bf16.msra.mxu1 %v11698_v6  ;;  %10150 = vmatpush3.bf16.msra.mxu0 %v11699_v10 }
 0xdcd   :  { %10169 = vmatprep.subr.bf16.mxu1 %v11700_v16  ;;  %10203 = vmatprep.subr.bf16.mxu0 %v11701_v1 }
 0xe50   :  { %v2204_v31 = vpop.f32.mrb[60].mxu1  ;;  %v2265_v54 = vpop.f32.mrb[72].mxu0 }
 0xe51   :  { %v2205_v13 = vadd.f32 %v2204_v31, %v13163_v26  ;;  %v2266_v18 = vadd.f32 %v2265_v54, %v13167_v2  ;;  %v2206_v24 = vpop.f32.mrb[61].mxu1  ;;  %v2267_v37 = vpop.f32.mrb[73].mxu0 }
 0xe52   :  { %v2207_v30 = vadd.f32 %v2206_v24, %v13171_v29  ;;  %v2268_v38 = vadd.f32 %v2267_v37, %v13175_v28  ;;  %v2208_v39 = vpop.f32.mrb[62].mxu1  ;;  %v2269_v35 = vpop.f32.mrb[74].mxu0 }
 0xe53   :  { %v2209_v59 = vadd.f32 %v2208_v39, %v13163_v26  ;;  %v2270_v53 = vadd.f32 %v2269_v35, %v13167_v2  ;;  %v2210_v48 = vpop.f32.mrb[63].mxu1  ;;  %v2271_v49 = vpop.f32.mrb[75].mxu0  ;;  %v2414_v50 = vmax.f32 %v2205_v13, 0.0  ;;  %v2416_v27 = vmax.f32 %v2266_v18, 0.0 }
 0xe54   :  { %v2211_v21 = vadd.f32 %v2210_v48, %v13171_v29  ;;  %v2272_v40 = vadd.f32 %v2271_v49, %v13175_v28  ;;  %v2415_v57 = vmax.f32 %v2207_v30, 0.0  ;;  %v2417_v36 = vmax.f32 %v2268_v38, 0.0  ;;  %v11706_v30 = vld [vmem:[%s15219_s10 + $0x108] sm:$0xff]   ;;  %v11708_v48 = vld [vmem:[%s15219_s10 + $0x150] sm:$0xff]  }
 0xe55   :  { %v2422_v55 = vmax.f32 %v2209_v59, 0.0  ;;  %v2424_v52 = vmax.f32 %v2270_v53, 0.0  ;;  %v11707_v38 = vld [vmem:[%s15219_s10 + $0x188] sm:$0xff]   ;;  %v11709_v49 = vld [vmem:[%s15219_s10 + $0x1d0] sm:$0xff]  }
 0xe56   :  { %v2423_v14 = vmax.f32 %v2211_v21, 0.0  ;;  %v2425_v42 = vmax.f32 %v2272_v40, 0.0 }
 0xe57   :  { %v2454_v19 = vpack.c.bf16 %v2422_v55, %v2414_v50  ;;  %v2456_v60 = vpack.c.bf16 %v2424_v52, %v2416_v27 }
 0xe58   :  { %v2457_v41 = vpack.c.bf16 %v2425_v42, %v2417_v36  ;;  %v2214_v58 = vpop.f32.mrb[64].mxu1  ;;  %v2275_v62 = vpop.f32.mrb[76].mxu0  ;;  %v2455_v63 = vpack.c.bf16 %v2423_v14, %v2415_v57  ;;  %v11710_v14 = vld [vmem:[%s15219_s10 + $0x110] sm:$0xff]  }
 0xe59   :  { %v2215_v56 = vadd.f32 %v2214_v58, %v13163_v26  ;;  %v2276_v22 = vadd.f32 %v2275_v62, %v13167_v2  ;;  %v2216_v3 = vpop.f32.mrb[65].mxu1  ;;  %v2277_v46 = vpop.f32.mrb[77].mxu0  ;;  %v11711_v42 = vld [vmem:[%s15219_s10 + $0x190] sm:$0xff]   ;;  %v11715_v58 = vld [vmem:[%s15219_s10 + $0x198] sm:$0xff]   ;;  %v11716_v62 = vld [vmem:[%s15219_s10 + $0x160] sm:$0xff]  }
 0xe5a   :  { %v2217_v6 = vadd.f32 %v2216_v3, %v13171_v29  ;;  %v2278_v10 = vadd.f32 %v2277_v46, %v13175_v28  ;;  %v2218_v16 = vpop.f32.mrb[66].mxu1  ;;  %v2279_v1 = vpop.f32.mrb[78].mxu0  ;;  %3022 = vmatprep.mubr.bf16.mxu1 %v2455_v63  ;;  %3078 = vmatprep.mubr.bf16.mxu0 %v2457_v41  ;;  %v11714_v41 = vld [vmem:[%s15219_s10 + $0x118] sm:$0xff]   ;;  %v11717_v63 = vld [vmem:[%s15219_s10 + $0x1e0] sm:$0xff]   ;;  %v11722_v3 = vld [vmem:[%s15219_s10 + $0x128] sm:$0xff]  }
 0xe5b   :  { %v2219_v31 = vadd.f32 %v2218_v16, %v13163_v26  ;;  %v2280_v54 = vadd.f32 %v2279_v1, %v13167_v2  ;;  %v2220_v13 = vpop.f32.mrb[67].mxu1  ;;  %v2281_v18 = vpop.f32.mrb[79].mxu0  ;;  %3023 = vmatmul.mubr.bf16.vlgmr.msra.gmra.mrb[84].mxu1 %v2454_v19  ;;  %3079 = vmatmul.mubr.bf16.vlgmr.msra.gmra.mrb[96].mxu0 %v2456_v60  ;;  %v2430_v39 = vmax.f32 %v2215_v56, 0.0  ;;  %v2432_v35 = vmax.f32 %v2276_v22, 0.0  ;;  %v11712_v19 = vld [vmem:[%s15219_s10 + $0x158] sm:$0xff]   ;;  %v11720_v56 = vld [vmem:[%s15219_s10 + $0x168] sm:$0xff]  }
 0xe5c   :  { %v2221_v24 = vadd.f32 %v2220_v13, %v13171_v29  ;;  %v2282_v37 = vadd.f32 %v2281_v18, %v13175_v28  ;;  %10170 = vmatpush3.bf16.msra.mxu1 %v11702_v61  ;;  %10204 = vmatpush3.bf16.msra.mxu0 %v11703_v44  ;;  %v2431_v21 = vmax.f32 %v2217_v6, 0.0  ;;  %v2433_v40 = vmax.f32 %v2278_v10, 0.0  ;;  %v11713_v60 = vld [vmem:[%s15219_s10 + $0x1d8] sm:$0xff]   ;;  %v11718_v61 = vld [vmem:[%s15219_s10 + $0x120] sm:$0xff]   ;;  %v11721_v22 = vld [vmem:[%s15219_s10 + $0x1e8] sm:$0xff]  }
 0xe5d   :  { %v2438_v59 = vmax.f32 %v2219_v31, 0.0  ;;  %v2440_v53 = vmax.f32 %v2280_v54, 0.0  ;;  %10171 = vmatprep.subr.bf16.mxu1 %v11704_v8  ;;  %10205 = vmatprep.subr.bf16.mxu0 %v11705_v32  ;;  %v11719_v44 = vld [vmem:[%s15219_s10 + $0x1a0] sm:$0xff]   ;;  %v11723_v46 = vld [vmem:[%s15219_s10 + $0x1a8] sm:$0xff]   ;;  %v11724_v8 = vld [vmem:[%s15219_s10 + $0x170] sm:$0xff]  }
 0xe5e   :  { %v2439_v50 = vmax.f32 %v2221_v24, 0.0  ;;  %v2441_v27 = vmax.f32 %v2282_v37, 0.0  ;;  %v11725_v32 = vld [vmem:[%s15219_s10 + $0x1f0] sm:$0xff]   ;;  %v11728_v16 = vld [vmem:[%s15219_s10 + $0x178] sm:$0xff]   ;;  %v13280_v31 = vld [vmem:[%s15217_s8 + $0x80] sm:$0xff] }
 0xe5f   :  { %v2464_v55 = vpack.c.bf16 %v2440_v53, %v2432_v35  ;;  %v2462_v52 = vpack.c.bf16 %v2438_v59, %v2430_v39  ;;  %v11726_v6 = vld [vmem:[%s15219_s10 + $0x130] sm:$0xff]   ;;  %v11729_v1 = vld [vmem:[%s15219_s10 + $0x1f8] sm:$0xff]   ;;  %v13285_v54 = vld [vmem:[%s15217_s8 + $0xa0] sm:$0xff] }
 0xe60   :  { %v2465_v57 = vpack.c.bf16 %v2441_v27, %v2433_v40  ;;  %v2463_v36 = vpack.c.bf16 %v2439_v50, %v2431_v21  ;;  %10172 = vmatpush3.bf16.msra.mxu1 %v11706_v30  ;;  %10206 = vmatpush3.bf16.msra.mxu0 %v11707_v38  ;;  %v11727_v10 = vld [vmem:[%s15219_s10 + $0x1b0] sm:$0xff]   ;;  %v13290_v13 = vld [vmem:[%s15217_s8 + $0x88] sm:$0xff]  ;;  %v11730_v24 = vld [vmem:[%s15219_s10 + $0x138] sm:$0xff]   ;;  %v9180_v30 = vcombine.high %v13280_v31, %v13285_v54  ;;  %v13310_v21 = vsub.s32 4, %v12296_v12 }
 0xe61   :  { %10173 = vmatprep.subr.bf16.mxu1 %v11708_v48  ;;  %10207 = vmatprep.subr.bf16.mxu0 %v11709_v49  ;;  %v13295_v18 = vld [vmem:[%s15217_s8 + $0xa8] sm:$0xff]  ;;  %v11731_v37 = vld [vmem:[%s15219_s10 + $0x1b8] sm:$0xff]   ;;  %v13313_v40 = vsub.s32 6, %v12296_v12 }
 0xe62   :  { %3030 = vmatprep.mubr.bf16.mxu1 %v2463_v36  ;;  %3086 = vmatprep.mubr.bf16.mxu0 %v2465_v57  ;;  %v9182_v38 = vcombine.high %v13290_v13, %v13295_v18  ;;  %v13318_v57 = vsub.s32 5, %v12296_v12 }
 0xe63   :  { %3031 = vmatmul.mubr.bf16.gmra.mrb[88].mxu1 %v2462_v52  ;;  %3087 = vmatmul.mubr.bf16.gmra.mrb[100].mxu0 %v2464_v55 }
 0xe64   :  { %10174 = vmatpush3.bf16.msra.mxu1 %v11710_v14  ;;  %10208 = vmatpush3.bf16.msra.mxu0 %v11711_v42 }
 0xe65   :  { %10175 = vmatprep.subr.bf16.mxu1 %v11712_v19  ;;  %10209 = vmatprep.subr.bf16.mxu0 %v11713_v60 }
 0xe68   :  { %10176 = vmatpush3.bf16.msra.mxu1 %v11714_v41  ;;  %10210 = vmatpush3.bf16.msra.mxu0 %v11715_v58  ;;  %v13325_v41 = vrot.slane %v13153_v11, %v13310_v21 }
 0xe69   :  { %10177 = vmatprep.subr.bf16.mxu1 %v11716_v62  ;;  %10211 = vmatprep.subr.bf16.mxu0 %v11717_v63 }
 0xe6c   :  { %10178 = vmatpush3.bf16.msra.mxu1 %v11718_v61  ;;  %10212 = vmatpush3.bf16.msra.mxu0 %v11719_v44 }
 0xe6d   :  { %10179 = vmatprep.subr.bf16.mxu1 %v11720_v56  ;;  %10213 = vmatprep.subr.bf16.mxu0 %v11721_v22 }
 0xe70   :  { %10180 = vmatpush3.bf16.msra.mxu1 %v11722_v3  ;;  %10214 = vmatpush3.bf16.msra.mxu0 %v11723_v46 }
 0xe71   :  { %10181 = vmatprep.subr.bf16.mxu1 %v11724_v8  ;;  %10215 = vmatprep.subr.bf16.mxu0 %v11725_v32 }
 0xe74   :  { %10182 = vmatpush3.bf16.msra.mxu1 %v11726_v6  ;;  %10216 = vmatpush3.bf16.msra.mxu0 %v11727_v10 }
 0xe75   :  { %10183 = vmatprep.subr.bf16.mxu1 %v11728_v16  ;;  %10217 = vmatprep.subr.bf16.mxu0 %v11729_v1 }
 0xe78   :  { %10184 = vmatpush3.bf16.msra.mxu1 %v11730_v24  ;;  %10218 = vmatpush3.bf16.msra.mxu0 %v11731_v37 }
 0xe79   :  { %v2224_v39 = vpop.f32.mrb[68].mxu1  ;;  %v2285_v35 = vpop.f32.mrb[80].mxu0  ;;  %3365 = vmatprep.subr.bf16.mxu1 %v9180_v30  ;;  %3426 = vmatprep.subr.bf16.mxu0 %v9182_v38 }
 0xe7a   :  { %v2225_v59 = vadd.f32 %v2224_v39, %v13163_v26  ;;  %v2286_v53 = vadd.f32 %v2285_v35, %v13167_v2  ;;  %v2226_v48 = vpop.f32.mrb[69].mxu1  ;;  %v2287_v49 = vpop.f32.mrb[81].mxu0  ;;  %v13321_v26 = vsub.s32 7, %v12296_v12  ;;  %v13333_v12 = vrot.slane %v13153_v11, %v13318_v57 }
 0xe7b   :  { %v2227_v50 = vadd.f32 %v2226_v48, %v13171_v29  ;;  %v2288_v27 = vadd.f32 %v2287_v49, %v13175_v28  ;;  %v2228_v55 = vpop.f32.mrb[70].mxu1  ;;  %v2289_v52 = vpop.f32.mrb[82].mxu0  ;;  %v13329_v29 = vrot.slane %v13153_v11, %v13313_v40  ;;  %v9170_v48 = vld [vmem:[%s15217_s8 + $0xc0] sm:$0xff] }
 0xe7c   :  { %v2446_v2 = vmax.f32 %v2225_v59, 0.0  ;;  %v2448_v36 = vmax.f32 %v2286_v53, 0.0  ;;  %v2229_v14 = vpop.f32.mrb[71].mxu1  ;;  %v2290_v42 = vpop.f32.mrb[83].mxu0  ;;  %v13337_v62 = vrot.slane %v13153_v11, %v13321_v26  ;;  %v9174_v49 = vld [vmem:[%s15217_s8 + $0xe0] sm:$0xff] }
 0xe7d   :  { %v2447_v19 = vmax.f32 %v2227_v50, 0.0  ;;  %v2449_v60 = vmax.f32 %v2288_v27, 0.0 }
 0xe7e   :  { %v2470_v63 = vpack.c.bf16 %v2446_v2, %v2446_v2  ;;  %v2472_v61 = vpack.c.bf16 %v2448_v36, %v2448_v36  ;;  %v9171_v2 = vld [vmem:[%s15217_s8 + $0xc8] sm:$0xff] }
 0xe7f   :  { %v2471_v28 = vpack.c.bf16 %v2447_v19, %v2447_v19  ;;  %v2473_v58 = vpack.c.bf16 %v2449_v60, %v2449_v60  ;;  %v9175_v36 = vld [vmem:[%s15217_s8 + $0xe8] sm:$0xff]  ;;  %v9179_v19 = vcombine.low %v13280_v31, %v13285_v54 }
 0xe81   :  { %v2326_v44 = vpop.f32.mrb[72].mxu1  ;;  %v2387_v56 = vpop.f32.mrb[84].mxu0  ;;  %3038 = vmatprep.mubr.bf16.mxu1 %v2471_v28  ;;  %3094 = vmatprep.mubr.bf16.mxu0 %v2473_v58 }
 0xe82   :  { %v2327_v22 = vadd.f32 %v2326_v44, %v13325_v41  ;;  %v2388_v3 = vadd.f32 %v2387_v56, %v13329_v29  ;;  %v2328_v46 = vpop.f32.mrb[73].mxu1  ;;  %v2389_v8 = vpop.f32.mrb[85].mxu0  ;;  %3039 = vmatmul.mubr.bf16.gmra.mrb[92].mxu1 %v2470_v63  ;;  %3095 = vmatmul.mubr.bf16.gmra.mrb[104].mxu0 %v2472_v61  ;;  %v9181_v61 = vcombine.low %v13290_v13, %v13295_v18  ;;  %v13366_v56 = vld [vmem:[%s15217_s8 + $0x90] sm:$0xff]  ;;  %v13378_v13 = vld [vmem:[%s15217_s8 + $0x98] sm:$0xff] }
 0xe83   :  { %v2329_v32 = vadd.f32 %v2328_v46, %v13333_v12  ;;  %v2390_v6 = vadd.f32 %v2389_v8, %v13337_v62  ;;  %v2330_v11 = vpop.f32.mrb[74].mxu1  ;;  %v2391_v10 = vpop.f32.mrb[86].mxu0  ;;  %v9187_v44 = vcombine.low %v9170_v48, %v9174_v49  ;;  %v9188_v8 = vcombine.high %v9170_v48, %v9174_v49  ;;  %v13383_v18 = vld [vmem:[%s15217_s8 + $0xb8] sm:$0xff] }
 0xe84   :  { %v2331_v16 = vadd.f32 %v2330_v11, %v13325_v41  ;;  %v2392_v1 = vadd.f32 %v2391_v10, %v13329_v29  ;;  %v2332_v24 = vpop.f32.mrb[75].mxu1  ;;  %v2393_v37 = vpop.f32.mrb[87].mxu0  ;;  %v2418_v39 = vmax.f32 %v2327_v22, 0.0  ;;  %v2420_v35 = vmax.f32 %v2388_v3, 0.0  ;;  %v13371_v22 = vld [vmem:[%s15217_s8 + $0xb0] sm:$0xff] }
 0xe85   :  { %v2333_v30 = vadd.f32 %v2332_v24, %v13333_v12  ;;  %v2394_v38 = vadd.f32 %v2393_v37, %v13337_v62  ;;  %v2419_v50 = vmax.f32 %v2329_v32, 0.0  ;;  %v2421_v27 = vmax.f32 %v2390_v6, 0.0 }
 0xe86   :  { %v2426_v59 = vmax.f32 %v2331_v16, 0.0  ;;  %v2428_v53 = vmax.f32 %v2392_v1, 0.0  ;;  %v9190_v32 = vcombine.high %v9171_v2, %v9175_v36  ;;  %v9189_v1 = vcombine.low %v9171_v2, %v9175_v36 }
 0xe87   :  { %v2427_v55 = vmax.f32 %v2333_v30, 0.0  ;;  %v2429_v52 = vmax.f32 %v2394_v38, 0.0 }
 0xe88   :  { %v2458_v14 = vpack.c.bf16 %v2426_v59, %v2418_v39  ;;  %v2460_v42 = vpack.c.bf16 %v2428_v53, %v2420_v35  ;;  %v9184_v39 = vcombine.high %v13366_v56, %v13371_v22  ;;  %v9186_v53 = vcombine.high %v13378_v13, %v13383_v18 }
 0xe89   :  { %v2459_v60 = vpack.c.bf16 %v2427_v55, %v2419_v50  ;;  %v2461_v28 = vpack.c.bf16 %v2429_v52, %v2421_v27  ;;  %v2336_v58 = vpop.f32.mrb[76].mxu1  ;;  %v2397_v63 = vpop.f32.mrb[88].mxu0 }
 0xe8a   :  { %v2337_v31 = vadd.f32 %v2336_v58, %v13325_v41  ;;  %v2398_v54 = vadd.f32 %v2397_v63, %v13329_v29  ;;  %v2338_v3 = vpop.f32.mrb[77].mxu1  ;;  %v2399_v46 = vpop.f32.mrb[89].mxu0 }
 0xe8b   :  { %v2339_v6 = vadd.f32 %v2338_v3, %v13333_v12  ;;  %v2400_v11 = vadd.f32 %v2399_v46, %v13337_v62  ;;  %v2340_v10 = vpop.f32.mrb[78].mxu1  ;;  %v2401_v16 = vpop.f32.mrb[90].mxu0  ;;  %3134 = vmatprep.mubr.bf16.mxu1 %v2459_v60  ;;  %3190 = vmatprep.mubr.bf16.mxu0 %v2461_v28 }
 0xe8c   :  { %v2341_v24 = vadd.f32 %v2340_v10, %v13325_v41  ;;  %v2402_v37 = vadd.f32 %v2401_v16, %v13329_v29  ;;  %v2342_v30 = vpop.f32.mrb[79].mxu1  ;;  %v2403_v38 = vpop.f32.mrb[91].mxu0  ;;  %3135 = vmatmul.mubr.bf16.vlgmr.msra.gmra.mrb[96].mxu1 %v2458_v14  ;;  %3191 = vmatmul.mubr.bf16.vlgmr.msra.gmra.mrb[108].mxu0 %v2460_v42  ;;  %v2434_v48 = vmax.f32 %v2337_v31, 0.0  ;;  %v2436_v49 = vmax.f32 %v2398_v54, 0.0 }
 0xe8d   :  { %v2343_v35 = vadd.f32 %v2342_v30, %v13333_v12  ;;  %v2404_v59 = vadd.f32 %v2403_v38, %v13337_v62  ;;  %3366 = vmatpush1.bf16.msra.mxu1 %v9179_v19  ;;  %3427 = vmatpush1.bf16.msra.mxu0 %v9181_v61  ;;  %v2435_v55 = vmax.f32 %v2339_v6, 0.0  ;;  %v2437_v52 = vmax.f32 %v2400_v11, 0.0  ;;  %v9173_v30 = vld [vmem:[%s15217_s8 + $0xd8] sm:$0xff] }
 0xe8e   :  { %v2442_v50 = vmax.f32 %v2341_v24, 0.0  ;;  %v2444_v27 = vmax.f32 %v2402_v37, 0.0  ;;  %3367 = vmatprep.subr.bf16.mxu1 %v9188_v8  ;;  %3428 = vmatprep.subr.bf16.mxu0 %v9190_v32  ;;  %v9176_v37 = vld [vmem:[%s15217_s8 + $0xf0] sm:$0xff]  ;;  %v9177_v38 = vld [vmem:[%s15217_s8 + $0xf8] sm:$0xff] }
 0xe8f   :  { %v2443_v2 = vmax.f32 %v2343_v35, 0.0  ;;  %v2445_v36 = vmax.f32 %v2404_v59, 0.0  ;;  %v9185_v35 = vcombine.low %v13378_v13, %v13383_v18  ;;  %v11737_v13 = vld [vmem:[%s15219_s10 + $0x2c8] sm:$0xff]  }
 0xe90   :  { %v2466_v14 = vpack.c.bf16 %v2442_v50, %v2434_v48  ;;  %v2468_v42 = vpack.c.bf16 %v2444_v27, %v2436_v49  ;;  %v9193_v49 = vcombine.low %v9173_v30, %v9177_v38  ;;  %v11738_v18 = vld [vmem:[%s15219_s10 + $0x208] sm:$0xff]   ;;  %v11740_v27 = vld [vmem:[%s15219_s10 + $0x250] sm:$0xff]  }
 0xe91   :  { %v2467_v60 = vpack.c.bf16 %v2443_v2, %v2435_v55  ;;  %v2469_v28 = vpack.c.bf16 %v2445_v36, %v2437_v52  ;;  %v2346_v58 = vpop.f32.mrb[80].mxu1  ;;  %v2407_v19 = vpop.f32.mrb[92].mxu0  ;;  %3368 = vmatpush1.bf16.msra.mxu1 %v9187_v44  ;;  %3429 = vmatpush1.bf16.msra.mxu0 %v9189_v1  ;;  %v11739_v50 = vld [vmem:[%s15219_s10 + $0x288] sm:$0xff]   ;;  %v11741_v55 = vld [vmem:[%s15219_s10 + $0x2d0] sm:$0xff]   ;;  %v11744_v36 = vld [vmem:[%s15219_s10 + $0x258] sm:$0xff]  }
 0xe92   :  { %v2347_v63 = vadd.f32 %v2346_v58, %v13325_v41  ;;  %v2408_v61 = vadd.f32 %v2407_v19, %v13329_v29  ;;  %v2348_v31 = vpop.f32.mrb[81].mxu1  ;;  %v2409_v54 = vpop.f32.mrb[93].mxu0  ;;  %3487 = vmatprep.subr.bf16.mxu1 %v9184_v39  ;;  %3548 = vmatprep.subr.bf16.mxu0 %v9186_v53  ;;  %v9183_v39 = vcombine.low %v13366_v56, %v13371_v22  ;;  %v11733_v56 = vld [vmem:[%s15219_s10 + $0x2c0] sm:$0xff]   ;;  %v11742_v52 = vld [vmem:[%s15219_s10 + $0x210] sm:$0xff]  }
 0xe93   :  { %v2349_v3 = vadd.f32 %v2348_v31, %v13333_v12  ;;  %v2410_v46 = vadd.f32 %v2409_v54, %v13337_v62  ;;  %v2350_v8 = vpop.f32.mrb[82].mxu1  ;;  %v2411_v32 = vpop.f32.mrb[94].mxu0  ;;  %3142 = vmatprep.mubr.bf16.mxu1 %v2467_v60  ;;  %3198 = vmatprep.mubr.bf16.mxu0 %v2469_v28  ;;  %v9172_v62 = vld [vmem:[%s15217_s8 + $0xd0] sm:$0xff]  ;;  %v9194_v53 = vcombine.high %v9173_v30, %v9177_v38  ;;  %v11735_v22 = vld [vmem:[%s15219_s10 + $0x280] sm:$0xff]   ;;  %v11747_v60 = vld [vmem:[%s15219_s10 + $0x298] sm:$0xff]  }
 0xe94   :  { %v2351_v6 = vpop.f32.mrb[83].mxu1  ;;  %v2412_v11 = vpop.f32.mrb[95].mxu0  ;;  %3143 = vmatmul.mubr.bf16.gmra.mrb[100].mxu1 %v2466_v14  ;;  %3199 = vmatmul.mubr.bf16.gmra.mrb[112].mxu0 %v2468_v42  ;;  %v2450_v10 = vmax.f32 %v2347_v63, 0.0  ;;  %v2452_v29 = vmax.f32 %v2408_v61, 0.0  ;;  %v9192_v59 = vcombine.high %v9172_v62, %v9176_v37  ;;  %v9191_v48 = vcombine.low %v9172_v62, %v9176_v37  ;;  %v11743_v2 = vld [vmem:[%s15219_s10 + $0x290] sm:$0xff]   ;;  %v11745_v14 = vld [vmem:[%s15219_s10 + $0x2d8] sm:$0xff]  }
 0xe95   :  { %v2451_v44 = vmax.f32 %v2349_v3, 0.0  ;;  %v2453_v41 = vmax.f32 %v2410_v46, 0.0  ;;  %v11746_v42 = vld [vmem:[%s15219_s10 + $0x218] sm:$0xff]   ;;  %v11748_v28 = vld [vmem:[%s15219_s10 + $0x260] sm:$0xff]   ;;  %v11752_v61 = vld [vmem:[%s15219_s10 + $0x268] sm:$0xff]  }
 0xe96   :  { %v2474_v24 = vpack.c.bf16 %v2450_v10, %v2450_v10  ;;  %v2476_v12 = vpack.c.bf16 %v2452_v29, %v2452_v29  ;;  %v11749_v58 = vld [vmem:[%s15219_s10 + $0x2e0] sm:$0xff]   ;;  %v11753_v31 = vld [vmem:[%s15219_s10 + $0x2e8] sm:$0xff]   ;;  %v11756_v46 = vld [vmem:[%s15219_s10 + $0x270] sm:$0xff]  }
 0xe97   :  { %v2475_v16 = vpack.c.bf16 %v2451_v44, %v2451_v44  ;;  %v2477_v1 = vpack.c.bf16 %v2453_v41, %v2453_v41  ;;  %v11750_v19 = vld [vmem:[%s15219_s10 + $0x220] sm:$0xff]   ;;  %v11754_v54 = vld [vmem:[%s15219_s10 + $0x228] sm:$0xff]   ;;  %v11757_v8 = vld [vmem:[%s15219_s10 + $0x2f0] sm:$0xff]  }
 0xe98   :  { %v11751_v63 = vld [vmem:[%s15219_s10 + $0x2a0] sm:$0xff]   ;;  %v11755_v3 = vld [vmem:[%s15219_s10 + $0x2a8] sm:$0xff]   ;;  %v11758_v32 = vld [vmem:[%s15219_s10 + $0x230] sm:$0xff]  }
 0xe99   :  { %3150 = vmatprep.mubr.bf16.mxu1 %v2475_v16  ;;  %3206 = vmatprep.mubr.bf16.mxu0 %v2477_v1  ;;  %v11759_v6 = vld [vmem:[%s15219_s10 + $0x2b0] sm:$0xff]   ;;  %v11760_v11 = vld [vmem:[%s15219_s10 + $0x278] sm:$0xff]   ;;  %v11764_v29 = vld [vmem:[%s15219_s10 + $0x340] sm:$0xff]  }
 0xe9a   :  { %v11761_v44 = vld [vmem:[%s15219_s10 + $0x2f8] sm:$0xff]   ;;  %v11765_v16 = vld [vmem:[%s15219_s10 + $0x3c0] sm:$0xff]  }
 0xe9b   :  { %v11762_v41 = vld [vmem:[%s15219_s10 + $0x238] sm:$0xff]  }
 0xe9c   :  { %3151 = vmatmul.mubr.bf16.gmra.mrb[104].mxu1 %v2474_v24  ;;  %3207 = vmatmul.mubr.bf16.gmra.mrb[116].mxu0 %v2476_v12  ;;  %v11763_v10 = vld [vmem:[%s15219_s10 + $0x2b8] sm:$0xff]  }
 0xe9d   :  { %3397 = vmatprep.mubr.bf16.mxu1 %v12175_v43  ;;  %3458 = vmatprep.mubr.bf16.mxu0 %v12175_v43 }
 0xea4   :  { %9195 = vmatmul.mubr.msk.bf16.vlgmr.msra.gmra.mrb[108].mxu1 %vm141_vm2, %v12993_v23  ;;  %9198 = vmatmul.mubr.msk.bf16.vlgmr.msra.gmra.mrb[120].mxu0 %vm141_vm2, %v12993_v23 }
 0xea5   :  { %3407 = vmatprep.mubr.bf16.mxu1 %v12175_v43  ;;  %3468 = vmatprep.mubr.bf16.mxu0 %v12175_v43 }
 0xea6   :  { %3488 = vmatpush1.bf16.msra.mxu1 %v9183_v39  ;;  %3549 = vmatpush1.bf16.msra.mxu0 %v9185_v35 }
 0xea7   :  { %3489 = vmatprep.subr.bf16.mxu1 %v9192_v59  ;;  %3550 = vmatprep.subr.bf16.mxu0 %v9194_v53 }
 0xeaa   :  { %3490 = vmatpush1.bf16.msra.mxu1 %v9191_v48  ;;  %3551 = vmatpush1.bf16.msra.mxu0 %v9193_v49 }
 0xeab   :  { %10271 = vmatprep.subr.bf16.mxu0 %v11733_v56 }
 0xeac   :  { %9196 = vmatmul.mubr.msk.bf16.gmra.mrb[112].mxu1 %vm141_vm2, %v13014_v51  ;;  %9199 = vmatmul.mubr.msk.bf16.gmra.mrb[124].mxu0 %vm141_vm2, %v13014_v51 }
 0xead   :  { %3417 = vmatprep.mubr.bf16.mxu1 %v12175_v43  ;;  %3478 = vmatprep.mubr.bf16.mxu0 %v12175_v43 }
 0xeb4   :  { %9197 = vmatmul.mubr.msk.bf16.gmra.mrb[116].mxu1 %vm141_vm2, %v13027_v47  ;;  %9200 = vmatmul.mubr.msk.bf16.gmra.mrb[128].mxu0 %vm141_vm2, %v13027_v47 }
 0xeb5   :  { %3519 = vmatprep.mubr.bf16.mxu1 %v12175_v43  ;;  %3580 = vmatprep.mubr.bf16.mxu0 %v12175_v43 }
 0xebc   :  { %9201 = vmatmul.mubr.msk.bf16.vlgmr.msra.gmra.mrb[120].mxu1 %vm141_vm2, %v12993_v23  ;;  %9204 = vmatmul.mubr.msk.bf16.vlgmr.msra.gmra.mrb[132].mxu0 %vm141_vm2, %v12993_v23  ;;  %v11732_v23 = vld [vmem:[%s15219_s10 + $0x240] sm:$0xff]  }
 0xebd   :  { %3529 = vmatprep.mubr.bf16.mxu1 %v12175_v43  ;;  %3590 = vmatprep.mubr.bf16.mxu0 %v12175_v43 }
 0xebe   :  { %10237 = vmatprep.subr.bf16.mxu1 %v11732_v23  ;;  %10272 = vmatpush3.bf16.msra.mxu0 %v11735_v22 }
 0xebf   :  { %10273 = vmatprep.subr.bf16.mxu0 %v11737_v13 }
 0xec2   :  { %10274 = vmatpush3.bf16.msra.mxu0 %v11739_v50 }
 0xec3   :  { %10275 = vmatprep.subr.bf16.mxu0 %v11741_v55 }
 0xec4   :  { %9202 = vmatmul.mubr.msk.bf16.gmra.mrb[124].mxu1 %vm141_vm2, %v13014_v51  ;;  %9205 = vmatmul.mubr.msk.bf16.gmra.mrb[136].mxu0 %vm141_vm2, %v13014_v51  ;;  %v11734_v51 = vld [vmem:[%s15219_s10 + $0x200] sm:$0xff]  }
 0xec5   :  { %3539 = vmatprep.mubr.bf16.mxu1 %v12175_v43  ;;  %3600 = vmatprep.mubr.bf16.mxu0 %v12175_v43 }
 0xec6   :  { %10238 = vmatpush3.bf16.msra.mxu1 %v11734_v51  ;;  %10276 = vmatpush3.bf16.msra.mxu0 %v11743_v2 }
 0xec7   :  { %10277 = vmatprep.subr.bf16.mxu0 %v11745_v14 }
 0xeca   :  { %10278 = vmatpush3.bf16.msra.mxu0 %v11747_v60 }
 0xecb   :  { %10279 = vmatprep.subr.bf16.mxu0 %v11749_v58 }
 0xecc   :  { %9203 = vmatmul.mubr.msk.bf16.gmra.mrb[128].mxu1 %vm141_vm2, %v13027_v47  ;;  %9206 = vmatmul.mubr.msk.bf16.gmra.mrb[140].mxu0 %vm141_vm2, %v13027_v47  ;;  %v11736_v47 = vld [vmem:[%s15219_s10 + $0x248] sm:$0xff]  }
 0xecd   :  { %10239 = vmatprep.subr.bf16.mxu1 %v11736_v47 }
 0xece   :  { %10240 = vmatpush3.bf16.msra.mxu1 %v11738_v18  ;;  %10280 = vmatpush3.bf16.msra.mxu0 %v11751_v63 }
 0xecf   :  { %10241 = vmatprep.subr.bf16.mxu1 %v11740_v27  ;;  %10281 = vmatprep.subr.bf16.mxu0 %v11753_v31 }
 0xed2   :  { %10242 = vmatpush3.bf16.msra.mxu1 %v11742_v52  ;;  %10282 = vmatpush3.bf16.msra.mxu0 %v11755_v3 }
 0xed3   :  { %10243 = vmatprep.subr.bf16.mxu1 %v11744_v36  ;;  %10283 = vmatprep.subr.bf16.mxu0 %v11757_v8 }
 0xed6   :  { %10244 = vmatpush3.bf16.msra.mxu1 %v11746_v42  ;;  %10284 = vmatpush3.bf16.msra.mxu0 %v11759_v6 }
 0xed7   :  { %10245 = vmatprep.subr.bf16.mxu1 %v11748_v28  ;;  %10285 = vmatprep.subr.bf16.mxu0 %v11761_v44 }
 0xeda   :  { %10246 = vmatpush3.bf16.msra.mxu1 %v11750_v19  ;;  %10286 = vmatpush3.bf16.msra.mxu0 %v11763_v10 }
 0xedb   :  { %10247 = vmatprep.subr.bf16.mxu1 %v11752_v61  ;;  %10339 = vmatprep.subr.bf16.mxu0 %v11765_v16 }
 0xede   :  { %10248 = vmatpush3.bf16.msra.mxu1 %v11754_v54 }
 0xedf   :  { %10249 = vmatprep.subr.bf16.mxu1 %v11756_v46 }
 0xee2   :  { %10250 = vmatpush3.bf16.msra.mxu1 %v11758_v32 }
 0xee3   :  { %10251 = vmatprep.subr.bf16.mxu1 %v11760_v11 }
 0xee6   :  { %10252 = vmatpush3.bf16.msra.mxu1 %v11762_v41 }
 0xee7   :  { %10305 = vmatprep.subr.bf16.mxu1 %v11764_v29 }
 0xf2e   :  { %v10117_v1 = vpop.f32.mrb[84].mxu1  ;;  %v10151_v24 = vpop.f32.mrb[96].mxu0 }
 0xf2f   :  { %v10118_v12 = vpop.f32.mrb[85].mxu1  ;;  %v10152_v62 = vpop.f32.mrb[97].mxu0 }
 0xf30   :  { %v10119_v37 = vadd.f32 %v10118_v12, %v10117_v1  ;;  %v10153_v30 = vadd.f32 %v10152_v62, %v10151_v24  ;;  %v10120_v38 = vpop.f32.mrb[86].mxu1  ;;  %v10154_v39 = vpop.f32.mrb[98].mxu0 }
 0xf31   :  { %v10121_v35 = vpop.f32.mrb[87].mxu1  ;;  %v10155_v59 = vpop.f32.mrb[99].mxu0 }
 0xf32   :  { %v3081_v53 = vadd.f32 %v10153_v30, %v10119_v37  ;;  %v10122_v48 = vadd.f32 %v10121_v35, %v10120_v38  ;;  %v10156_v49 = vadd.f32 %v10155_v59, %v10154_v39 }
 0xf34   :  { %v3084_v23 = vadd.f32 %v10156_v49, %v10122_v48 }
 0xf36   :  { %v10123_v56 = vpop.f32.mrb[88].mxu1  ;;  %v10157_v51 = vpop.f32.mrb[100].mxu0 }
 0xf37   :  { %v10124_v22 = vpop.f32.mrb[89].mxu1  ;;  %v10158_v47 = vpop.f32.mrb[101].mxu0 }
 0xf38   :  { %v10125_v13 = vadd.f32 %v10124_v22, %v10123_v56  ;;  %v10159_v18 = vadd.f32 %v10158_v47, %v10157_v51  ;;  %v10126_v50 = vpop.f32.mrb[90].mxu1  ;;  %v10160_v27 = vpop.f32.mrb[102].mxu0 }
 0xf39   :  { %v10127_v55 = vpop.f32.mrb[91].mxu1  ;;  %v10161_v52 = vpop.f32.mrb[103].mxu0 }
 0xf3a   :  { %v3089_v2 = vadd.f32 %v10159_v18, %v10125_v13  ;;  %v10128_v36 = vadd.f32 %v10127_v55, %v10126_v50  ;;  %v10162_v14 = vadd.f32 %v10161_v52, %v10160_v27 }
 0xf3c   :  { %v3092_v42 = vadd.f32 %v10162_v14, %v10128_v36 }
 0xf55   :  { %v10129_v60 = vpop.f32.mrb[92].mxu1  ;;  %v10163_v28 = vpop.f32.mrb[104].mxu0 }
 0xf56   :  { %v10130_v58 = vpop.f32.mrb[93].mxu1  ;;  %v10164_v19 = vpop.f32.mrb[105].mxu0 }
 0xf57   :  { %v10131_v63 = vadd.f32 %v10130_v58, %v10129_v60  ;;  %v10165_v61 = vadd.f32 %v10164_v19, %v10163_v28  ;;  %v10132_v31 = vpop.f32.mrb[94].mxu1  ;;  %v10166_v54 = vpop.f32.mrb[106].mxu0 }
 0xf58   :  { %v10133_v3 = vpop.f32.mrb[95].mxu1  ;;  %v10167_v46 = vpop.f32.mrb[107].mxu0  ;;  %v13564_v31 = vld [vmem:[%s15218_s9 + $0x8] sm:$0xff] }
 0xf59   :  { %v3097_v8 = vadd.f32 %v10165_v61, %v10131_v63  ;;  %v13572_v46 = vrot.slane %v13564_v31, %v13148_v17 }
 0xf5f   :  { %v10185_v32 = vpop.f32.mrb[96].mxu1  ;;  %v10219_v6 = vpop.f32.mrb[108].mxu0 }
 0xf60   :  { %v10186_v11 = vpop.f32.mrb[97].mxu1  ;;  %v10220_v44 = vpop.f32.mrb[109].mxu0 }
 0xf61   :  { %v10187_v41 = vadd.f32 %v10186_v11, %v10185_v32  ;;  %v10221_v10 = vadd.f32 %v10220_v44, %v10219_v6  ;;  %v10188_v29 = vpop.f32.mrb[98].mxu1  ;;  %v10222_v16 = vpop.f32.mrb[110].mxu0  ;;  %v13578_v6 = vrot.slane %v13564_v31, %v13156_v15  ;;  %v13582_v11 = vrot.slane %v13564_v31, %v13159_v25 }
 0xf62   :  { %v10189_v1 = vpop.f32.mrb[99].mxu1  ;;  %v10223_v24 = vpop.f32.mrb[111].mxu0 }
 0xf63   :  { %v3137_v12 = vadd.f32 %v10187_v41, %v3081_v53  ;;  %v10190_v62 = vadd.f32 %v10189_v1, %v10188_v29  ;;  %v10224_v37 = vadd.f32 %v10223_v24, %v10222_v16 }
 0xf65   :  { %v13553_v30 = vadd.f32 %v10221_v10, %v3137_v12  ;;  %v3140_v38 = vadd.f32 %v10190_v62, %v3084_v23 }
 0xf67   :  { %v13555_v39 = vadd.f32 %v10224_v37, %v3140_v38  ;;  %v10191_v35 = vpop.f32.mrb[100].mxu1  ;;  %v10225_v59 = vpop.f32.mrb[112].mxu0 }
 0xf68   :  { %v10192_v48 = vpop.f32.mrb[101].mxu1  ;;  %v10226_v49 = vpop.f32.mrb[113].mxu0 }
 0xf69   :  { %v10193_v56 = vadd.f32 %v10192_v48, %v10191_v35  ;;  %v10227_v51 = vadd.f32 %v10226_v49, %v10225_v59  ;;  %v10194_v22 = vpop.f32.mrb[102].mxu1  ;;  %v10228_v47 = vpop.f32.mrb[114].mxu0 }
 0xf6a   :  { %v10195_v13 = vpop.f32.mrb[103].mxu1  ;;  %v10229_v18 = vpop.f32.mrb[115].mxu0 }
 0xf6b   :  { %v3145_v50 = vadd.f32 %v10193_v56, %v3089_v2  ;;  %v10196_v27 = vadd.f32 %v10195_v13, %v10194_v22  ;;  %v10230_v53 = vadd.f32 %v10229_v18, %v10228_v47 }
 0xf6d   :  { %v13557_v55 = vadd.f32 %v10227_v51, %v3145_v50  ;;  %v3148_v52 = vadd.f32 %v10196_v27, %v3092_v42  ;;  %v13568_v42 = vrot.slane %v13564_v31, %v12315_v20 }
 0xf6f   :  { %v13559_v36 = vadd.f32 %v10230_v53, %v3148_v52  ;;  %v10197_v23 = vpop.f32.mrb[104].mxu1  ;;  %v10231_v14 = vpop.f32.mrb[116].mxu0 }
 0xf70   :  { %v10198_v60 = vpop.f32.mrb[105].mxu1  ;;  %v10232_v28 = vpop.f32.mrb[117].mxu0 }
 0xf71   :  { %v10199_v58 = vadd.f32 %v10198_v60, %v10197_v23  ;;  %v10233_v19 = vadd.f32 %v10232_v28, %v10231_v14  ;;  %v10200_v63 = vpop.f32.mrb[106].mxu1  ;;  %v10234_v61 = vpop.f32.mrb[118].mxu0 }
 0xf72   :  { %v10201_v2 = vpop.f32.mrb[107].mxu1  ;;  %v10235_v54 = vpop.f32.mrb[119].mxu0 }
 0xf73   :  { %v3153_v3 = vadd.f32 %v10199_v58, %v3097_v8  ;;  %v11766_v58 = vld [vmem:[%s15219_s10 + $0x300] sm:$0xff]  }
 0xf75   :  { %v13574_v32 = vadd.f32 %v10233_v19, %v3153_v3  ;;  %v11767_v19 = vld [vmem:[%s15219_s10 + $0x380] sm:$0xff]   ;;  %v11768_v3 = vld [vmem:[%s15219_s10 + $0x348] sm:$0xff]  }
 0xf77   :  { %v3399_v44 = vpop.f32.mrb[108].mxu1  ;;  %v3460_v8 = vpop.f32.mrb[120].mxu0 }
 0xf78   :  { %v3400_v41 = vadd.f32 %v3399_v44, %v13568_v42  ;;  %v3461_v10 = vadd.f32 %v3460_v8, %v13572_v46  ;;  %v3401_v29 = vpop.f32.mrb[109].mxu1  ;;  %v3462_v16 = vpop.f32.mrb[121].mxu0  ;;  %v11769_v44 = vld [vmem:[%s15219_s10 + $0x3c8] sm:$0xff]  }
 0xf79   :  { %v3402_v1 = vadd.f32 %v3401_v29, %v13578_v6  ;;  %v3463_v24 = vadd.f32 %v3462_v16, %v13582_v11  ;;  %v3403_v12 = vpop.f32.mrb[110].mxu1  ;;  %v3464_v62 = vpop.f32.mrb[122].mxu0 }
 0xf7a   :  { %v3404_v37 = vadd.f32 %v3403_v12, %v13568_v42  ;;  %v3465_v38 = vadd.f32 %v3464_v62, %v13572_v46  ;;  %v3405_v35 = vpop.f32.mrb[111].mxu1  ;;  %v3466_v59 = vpop.f32.mrb[123].mxu0  ;;  %v3609_v56 = vmax.f32 %v3400_v41, 0.0  ;;  %v3611_v51 = vmax.f32 %v3461_v10, 0.0 }
 0xf7b   :  { %v3406_v48 = vadd.f32 %v3405_v35, %v13578_v6  ;;  %v3467_v49 = vadd.f32 %v3466_v59, %v13582_v11  ;;  %v3610_v13 = vmax.f32 %v3402_v1, 0.0  ;;  %v3612_v18 = vmax.f32 %v3463_v24, 0.0  ;;  %v11771_v35 = vld [vmem:[%s15219_s10 + $0x388] sm:$0xff]  }
 0xf7c   :  { %v3617_v22 = vmax.f32 %v3404_v37, 0.0  ;;  %v3619_v47 = vmax.f32 %v3465_v38, 0.0  ;;  %v11770_v38 = vld [vmem:[%s15219_s10 + $0x308] sm:$0xff]  }
 0xf7d   :  { %v3618_v50 = vmax.f32 %v3406_v48, 0.0  ;;  %v3620_v27 = vmax.f32 %v3467_v49, 0.0 }
 0xf7e   :  { %v3649_v53 = vpack.c.bf16 %v3617_v22, %v3609_v56  ;;  %v3651_v52 = vpack.c.bf16 %v3619_v47, %v3611_v51  ;;  %v11772_v51 = vld [vmem:[%s15219_s10 + $0x350] sm:$0xff]  }
 0xf7f   :  { %v3650_v23 = vpack.c.bf16 %v3618_v50, %v3610_v13  ;;  %v3652_v14 = vpack.c.bf16 %v3620_v27, %v3612_v18  ;;  %v3409_v60 = vpop.f32.mrb[112].mxu1  ;;  %v3470_v28 = vpop.f32.mrb[124].mxu0  ;;  %v11773_v22 = vld [vmem:[%s15219_s10 + $0x3d0] sm:$0xff]  }
 0xf80   :  { %v3410_v63 = vadd.f32 %v3409_v60, %v13568_v42  ;;  %v3471_v61 = vadd.f32 %v3470_v28, %v13572_v46  ;;  %v3411_v2 = vpop.f32.mrb[113].mxu1  ;;  %v3472_v54 = vpop.f32.mrb[125].mxu0  ;;  %v11774_v28 = vld [vmem:[%s15219_s10 + $0x310] sm:$0xff]  }
 0xf81   :  { %v3412_v8 = vadd.f32 %v3411_v2, %v13578_v6  ;;  %v3473_v41 = vadd.f32 %v3472_v54, %v13582_v11  ;;  %v3413_v10 = vpop.f32.mrb[114].mxu1  ;;  %v3474_v29 = vpop.f32.mrb[126].mxu0  ;;  %4218 = vmatprep.mubr.bf16.mxu1 %v3650_v23  ;;  %4274 = vmatprep.mubr.bf16.mxu0 %v3652_v14  ;;  %v11776_v54 = vld [vmem:[%s15219_s10 + $0x358] sm:$0xff]  }
 0xf82   :  { %v3414_v16 = vadd.f32 %v3413_v10, %v13568_v42  ;;  %v3475_v1 = vadd.f32 %v3474_v29, %v13572_v46  ;;  %v3415_v24 = vpop.f32.mrb[115].mxu1  ;;  %v3476_v12 = vpop.f32.mrb[127].mxu0  ;;  %4219 = vmatmul.mubr.bf16.vlgmr.msra.gmra.mrb[132].mxu1 %v3649_v53  ;;  %4275 = vmatmul.mubr.bf16.vlgmr.msra.gmra.mrb[144].mxu0 %v3651_v52  ;;  %v3625_v59 = vmax.f32 %v3410_v63, 0.0  ;;  %v3627_v48 = vmax.f32 %v3471_v61, 0.0 }
 0xf83   :  { %v3416_v62 = vadd.f32 %v3415_v24, %v13578_v6  ;;  %v3477_v37 = vadd.f32 %v3476_v12, %v13582_v11  ;;  %10306 = vmatpush3.bf16.msra.mxu1 %v11766_v58  ;;  %10340 = vmatpush3.bf16.msra.mxu0 %v11767_v19  ;;  %v3626_v47 = vmax.f32 %v3412_v8, 0.0  ;;  %v3628_v13 = vmax.f32 %v3473_v41, 0.0  ;;  %v11775_v58 = vld [vmem:[%s15219_s10 + $0x390] sm:$0xff]   ;;  %v11778_v24 = vld [vmem:[%s15219_s10 + $0x318] sm:$0xff]  }
 0xf84   :  { %v3633_v49 = vmax.f32 %v3414_v16, 0.0  ;;  %v3635_v56 = vmax.f32 %v3475_v1, 0.0  ;;  %10307 = vmatprep.subr.bf16.mxu1 %v11768_v3  ;;  %10341 = vmatprep.subr.bf16.mxu0 %v11769_v44  ;;  %v11777_v3 = vld [vmem:[%s15219_s10 + $0x3d8] sm:$0xff]   ;;  %v13648_v12 = vrot.slane %v13564_v31, %v13310_v21 }
 0xf85   :  { %v3634_v18 = vmax.f32 %v3416_v62, 0.0  ;;  %v3636_v50 = vmax.f32 %v3477_v37, 0.0  ;;  %v13652_v62 = vrot.slane %v13564_v31, %v13313_v40 }
 0xf86   :  { %v3657_v27 = vpack.c.bf16 %v3633_v49, %v3625_v59  ;;  %v3659_v53 = vpack.c.bf16 %v3635_v56, %v3627_v48  ;;  %v13660_v59 = vrot.slane %v13564_v31, %v13321_v26  ;;  %v11780_v48 = vld [vmem:[%s15219_s10 + $0x360] sm:$0xff]  }
 0xf87   :  { %v3658_v52 = vpack.c.bf16 %v3634_v18, %v3626_v47  ;;  %v3660_v23 = vpack.c.bf16 %v3636_v50, %v3628_v13  ;;  %10308 = vmatpush3.bf16.msra.mxu1 %v11770_v38  ;;  %10342 = vmatpush3.bf16.msra.mxu0 %v11771_v35  ;;  %v3419_v14 = vpop.f32.mrb[116].mxu1  ;;  %v3480_v60 = vpop.f32.mrb[128].mxu0  ;;  %v13656_v35 = vrot.slane %v13564_v31, %v13318_v57  ;;  %v11781_v49 = vld [vmem:[%s15219_s10 + $0x3e0] sm:$0xff]  }
 0xf88   :  { %v3420_v19 = vadd.f32 %v3419_v14, %v13568_v42  ;;  %v3481_v63 = vadd.f32 %v3480_v60, %v13572_v46  ;;  %v3421_v61 = vpop.f32.mrb[117].mxu1  ;;  %v3482_v2 = vpop.f32.mrb[129].mxu0  ;;  %10309 = vmatprep.subr.bf16.mxu1 %v11772_v51  ;;  %10343 = vmatprep.subr.bf16.mxu0 %v11773_v22  ;;  %v11782_v47 = vld [vmem:[%s15219_s10 + $0x320] sm:$0xff]  }
 0xf89   :  { %v3422_v44 = vadd.f32 %v3421_v61, %v13578_v6  ;;  %v3483_v8 = vadd.f32 %v3482_v2, %v13582_v11  ;;  %v3423_v41 = vpop.f32.mrb[118].mxu1  ;;  %v3484_v42 = vpop.f32.mrb[130].mxu0  ;;  %4226 = vmatprep.mubr.bf16.mxu1 %v3658_v52  ;;  %4282 = vmatprep.mubr.bf16.mxu0 %v3660_v23  ;;  %v11779_v6 = vld [vmem:[%s15219_s10 + $0x398] sm:$0xff]   ;;  %v11783_v31 = vld [vmem:[%s15219_s10 + $0x3a0] sm:$0xff]   ;;  %v11784_v52 = vld [vmem:[%s15219_s10 + $0x368] sm:$0xff]  }
 0xf8a   :  { %v3424_v46 = vpop.f32.mrb[119].mxu1  ;;  %v3485_v10 = vpop.f32.mrb[131].mxu0  ;;  %4227 = vmatmul.mubr.bf16.gmra.mrb[136].mxu1 %v3657_v27  ;;  %4283 = vmatmul.mubr.bf16.gmra.mrb[148].mxu0 %v3659_v53  ;;  %v3641_v29 = vmax.f32 %v3420_v19, 0.0  ;;  %v3643_v11 = vmax.f32 %v3481_v63, 0.0  ;;  %v11785_v23 = vld [vmem:[%s15219_s10 + $0x3e8] sm:$0xff]  }
 0xf8b   :  { %v3642_v16 = vmax.f32 %v3422_v44, 0.0  ;;  %v3644_v1 = vmax.f32 %v3483_v8, 0.0  ;;  %10310 = vmatpush3.bf16.msra.mxu1 %v11774_v28  ;;  %10344 = vmatpush3.bf16.msra.mxu0 %v11775_v58  ;;  %v11786_v44 = vld [vmem:[%s15219_s10 + $0x328] sm:$0xff]  }
 0xf8c   :  { %10311 = vmatprep.subr.bf16.mxu1 %v11776_v54  ;;  %10345 = vmatprep.subr.bf16.mxu0 %v11777_v3  ;;  %v3665_v56 = vpack.c.bf16 %v3641_v29, %v3641_v29  ;;  %v3667_v13 = vpack.c.bf16 %v3643_v11, %v3643_v11  ;;  %v11787_v8 = vld [vmem:[%s15219_s10 + $0x3a8] sm:$0xff]   ;;  %v11788_v29 = vld [vmem:[%s15219_s10 + $0x370] sm:$0xff]  }
 0xf8d   :  { %v3666_v37 = vpack.c.bf16 %v3642_v16, %v3642_v16  ;;  %v3668_v38 = vpack.c.bf16 %v3644_v1, %v3644_v1  ;;  %v11789_v16 = vld [vmem:[%s15219_s10 + $0x3f0] sm:$0xff]  }
 0xf8f   :  { %10312 = vmatpush3.bf16.msra.mxu1 %v11778_v24  ;;  %10346 = vmatpush3.bf16.msra.mxu0 %v11779_v6  ;;  %v3521_v51 = vpop.f32.mrb[120].mxu1  ;;  %v3582_v22 = vpop.f32.mrb[132].mxu0 }
 0xf90   :  { %v3522_v18 = vadd.f32 %v3521_v51, %v13648_v12  ;;  %v3583_v50 = vadd.f32 %v3582_v22, %v13652_v62  ;;  %4234 = vmatprep.mubr.bf16.mxu1 %v3666_v37  ;;  %4290 = vmatprep.mubr.bf16.mxu0 %v3668_v38  ;;  %v3523_v27 = vpop.f32.mrb[121].mxu1  ;;  %v3584_v53 = vpop.f32.mrb[133].mxu0  ;;  %v11790_v22 = vld [vmem:[%s15219_s10 + $0x330] sm:$0xff]  }
 0xf91   :  { %v3524_v14 = vadd.f32 %v3523_v27, %v13656_v35  ;;  %v3585_v60 = vadd.f32 %v3584_v53, %v13660_v59  ;;  %v3525_v28 = vpop.f32.mrb[122].mxu1  ;;  %v3586_v58 = vpop.f32.mrb[134].mxu0  ;;  %10313 = vmatprep.subr.bf16.mxu1 %v11780_v48  ;;  %10347 = vmatprep.subr.bf16.mxu0 %v11781_v49  ;;  %v11792_v27 = vld [vmem:[%s15219_s10 + $0x378] sm:$0xff]  }
 0xf92   :  { %v3526_v19 = vadd.f32 %v3525_v28, %v13648_v12  ;;  %v3587_v63 = vadd.f32 %v3586_v58, %v13652_v62  ;;  %v3527_v61 = vpop.f32.mrb[123].mxu1  ;;  %v3588_v2 = vpop.f32.mrb[135].mxu0  ;;  %4235 = vmatmul.mubr.bf16.gmra.mrb[140].mxu1 %v3665_v56  ;;  %4291 = vmatmul.mubr.bf16.gmra.mrb[152].mxu0 %v3667_v13  ;;  %v3613_v41 = vmax.f32 %v3522_v18, 0.0  ;;  %v3615_v42 = vmax.f32 %v3583_v50, 0.0  ;;  %v11793_v53 = vld [vmem:[%s15219_s10 + $0x3f8] sm:$0xff]  }
 0xf93   :  { %v3528_v54 = vadd.f32 %v3527_v61, %v13656_v35  ;;  %v3589_v3 = vadd.f32 %v3588_v2, %v13660_v59  ;;  %10314 = vmatpush3.bf16.msra.mxu1 %v11782_v47  ;;  %10348 = vmatpush3.bf16.msra.mxu0 %v11783_v31  ;;  %v3614_v1 = vmax.f32 %v3524_v14, 0.0  ;;  %v3616_v24 = vmax.f32 %v3585_v60, 0.0  ;;  %v11791_v47 = vld [vmem:[%s15219_s10 + $0x3b0] sm:$0xff]  }
 0xf94   :  { %v3621_v46 = vmax.f32 %v3526_v19, 0.0  ;;  %v3623_v10 = vmax.f32 %v3587_v63, 0.0  ;;  %10315 = vmatprep.subr.bf16.mxu1 %v11784_v52  ;;  %10349 = vmatprep.subr.bf16.mxu0 %v11785_v23 }
 0xf95   :  { %v3622_v6 = vmax.f32 %v3528_v54, 0.0  ;;  %v3624_v11 = vmax.f32 %v3589_v3, 0.0  ;;  %v11794_v54 = vld [vmem:[%s15219_s10 + $0x338] sm:$0xff]  }
 0xf96   :  { %v3653_v37 = vpack.c.bf16 %v3621_v46, %v3613_v41  ;;  %v3655_v38 = vpack.c.bf16 %v3623_v10, %v3615_v42  ;;  %v11795_v3 = vld [vmem:[%s15219_s10 + $0x3b8] sm:$0xff]  }
 0xf97   :  { %v3654_v48 = vpack.c.bf16 %v3622_v6, %v3614_v1  ;;  %v3656_v49 = vpack.c.bf16 %v3624_v11, %v3616_v24  ;;  %10316 = vmatpush3.bf16.msra.mxu1 %v11786_v44  ;;  %10350 = vmatpush3.bf16.msra.mxu0 %v11787_v8  ;;  %v3531_v56 = vpop.f32.mrb[124].mxu1  ;;  %v3592_v51 = vpop.f32.mrb[136].mxu0 }
 0xf98   :  { %v3532_v31 = vadd.f32 %v3531_v56, %v13648_v12  ;;  %v3593_v13 = vadd.f32 %v3592_v51, %v13652_v62  ;;  %v3533_v18 = vpop.f32.mrb[125].mxu1  ;;  %v3594_v50 = vpop.f32.mrb[137].mxu0  ;;  %10317 = vmatprep.subr.bf16.mxu1 %v11788_v29  ;;  %10351 = vmatprep.subr.bf16.mxu0 %v11789_v16 }
 0xf99   :  { %v3534_v52 = vadd.f32 %v3533_v18, %v13656_v35  ;;  %v3595_v23 = vadd.f32 %v3594_v50, %v13660_v59  ;;  %v3535_v14 = vpop.f32.mrb[126].mxu1  ;;  %v3596_v60 = vpop.f32.mrb[138].mxu0  ;;  %4330 = vmatprep.mubr.bf16.mxu1 %v3654_v48  ;;  %4386 = vmatprep.mubr.bf16.mxu0 %v3656_v49 }
 0xf9a   :  { %v3536_v28 = vadd.f32 %v3535_v14, %v13648_v12  ;;  %v3597_v58 = vadd.f32 %v3596_v60, %v13652_v62  ;;  %v3537_v19 = vpop.f32.mrb[127].mxu1  ;;  %v3598_v63 = vpop.f32.mrb[139].mxu0  ;;  %v3629_v44 = vmax.f32 %v3532_v31, 0.0  ;;  %v3631_v8 = vmax.f32 %v3593_v13, 0.0 }
 0xf9b   :  { %v3538_v61 = vadd.f32 %v3537_v19, %v13656_v35  ;;  %v3599_v2 = vadd.f32 %v3598_v63, %v13660_v59  ;;  %10318 = vmatpush3.bf16.msra.mxu1 %v11790_v22  ;;  %10352 = vmatpush3.bf16.msra.mxu0 %v11791_v47  ;;  %v3630_v46 = vmax.f32 %v3534_v52, 0.0  ;;  %v3632_v10 = vmax.f32 %v3595_v23, 0.0 }
 0xf9c   :  { %v3637_v41 = vmax.f32 %v3536_v28, 0.0  ;;  %v3639_v42 = vmax.f32 %v3597_v58, 0.0  ;;  %10319 = vmatprep.subr.bf16.mxu1 %v11792_v27  ;;  %10353 = vmatprep.subr.bf16.mxu0 %v11793_v53 }
 0xf9d   :  { %v3638_v29 = vmax.f32 %v3538_v61, 0.0  ;;  %v3640_v16 = vmax.f32 %v3599_v2, 0.0 }
 0xf9e   :  { %v3661_v1 = vpack.c.bf16 %v3637_v41, %v3629_v44  ;;  %v3663_v24 = vpack.c.bf16 %v3639_v42, %v3631_v8 }
 0xf9f   :  { %v3662_v6 = vpack.c.bf16 %v3638_v29, %v3630_v46  ;;  %v3664_v11 = vpack.c.bf16 %v3640_v16, %v3632_v10  ;;  %10320 = vmatpush3.bf16.msra.mxu1 %v11794_v54  ;;  %10354 = vmatpush3.bf16.msra.mxu0 %v11795_v3  ;;  %v3541_v48 = vpop.f32.mrb[128].mxu1  ;;  %v3602_v49 = vpop.f32.mrb[140].mxu0 }
 0xfa0   :  { %v3543_v56 = vpop.f32.mrb[129].mxu1  ;;  %v3604_v51 = vpop.f32.mrb[141].mxu0  ;;  %11418 = vmatprep.subr.bf16.mxu1 %v12161_v4  ;;  %11424 = vmatprep.subr.bf16.mxu0 %v12161_v4  ;;  %v3542_v52 = vadd.f32 %v3541_v48, %v13648_v12  ;;  %v3603_v23 = vadd.f32 %v3602_v49, %v13652_v62 }
 0xfa1   :  { %v3544_v22 = vadd.f32 %v3543_v56, %v13656_v35  ;;  %v3605_v47 = vadd.f32 %v3604_v51, %v13660_v59  ;;  %v3545_v31 = vpop.f32.mrb[130].mxu1  ;;  %v3606_v13 = vpop.f32.mrb[142].mxu0 }
 0xfa2   :  { %4331 = vmatmul.mubr.bf16.vlgmr.msra.gmra.mrb[144].mxu1 %v3653_v37  ;;  %4387 = vmatmul.mubr.bf16.vlgmr.msra.gmra.mrb[156].mxu0 %v3655_v38  ;;  %v3546_v18 = vpop.f32.mrb[131].mxu1  ;;  %v3607_v50 = vpop.f32.mrb[143].mxu0  ;;  %v3645_v35 = vmax.f32 %v3542_v52, 0.0  ;;  %v3647_v59 = vmax.f32 %v3603_v23, 0.0 }
 0xfa3   :  { %4338 = vmatprep.mubr.bf16.mxu1 %v3662_v6  ;;  %4394 = vmatprep.mubr.bf16.mxu0 %v3664_v11  ;;  %v3646_v27 = vmax.f32 %v3544_v22, 0.0  ;;  %v3648_v53 = vmax.f32 %v3605_v47, 0.0 }
 0xfa4   :  { %v3669_v37 = vpack.c.bf16 %v3645_v35, %v3645_v35  ;;  %v3671_v38 = vpack.c.bf16 %v3647_v59, %v3647_v59 }
 0xfa5   :  { %v3670_v14 = vpack.c.bf16 %v3646_v27, %v3646_v27  ;;  %v3672_v60 = vpack.c.bf16 %v3648_v53, %v3648_v53 }
 0xfaa   :  { %4339 = vmatmul.mubr.bf16.gmra.mrb[148].mxu1 %v3661_v1  ;;  %4395 = vmatmul.mubr.bf16.gmra.mrb[160].mxu0 %v3663_v24 }
 0xfab   :  { %4346 = vmatprep.mubr.bf16.mxu1 %v3670_v14  ;;  %4402 = vmatprep.mubr.bf16.mxu0 %v3672_v60 }
 0xfb2   :  { %4347 = vmatmul.mubr.bf16.gmra.mrb[152].mxu1 %v3669_v37  ;;  %4403 = vmatmul.mubr.bf16.gmra.mrb[164].mxu0 %v3671_v38 }
 0xfb3   :  { %11062 = vmatprep.mubr.msk.f32.mxu1 %vm12162_vm0, %v12163_v7  ;;  %11087 = vmatprep.mubr.msk.f32.mxu0 %vm12162_vm0, %v12163_v7 }
0x1055   :  { %v10253_v12 = vpop.f32.mrb[132].mxu1  ;;  %v10287_v62 = vpop.f32.mrb[144].mxu0 }
0x1056   :  { %v10254_v28 = vpop.f32.mrb[133].mxu1  ;;  %v10288_v58 = vpop.f32.mrb[145].mxu0 }
0x1057   :  { %v10255_v19 = vadd.f32 %v10254_v28, %v10253_v12  ;;  %v10289_v63 = vadd.f32 %v10288_v58, %v10287_v62  ;;  %v10256_v61 = vpop.f32.mrb[134].mxu1  ;;  %v10290_v2 = vpop.f32.mrb[146].mxu0 }
0x1058   :  { %v10257_v54 = vpop.f32.mrb[135].mxu1  ;;  %v10291_v3 = vpop.f32.mrb[147].mxu0 }
0x1059   :  { %v4277_v44 = vadd.f32 %v10289_v63, %v10255_v19  ;;  %v10258_v8 = vadd.f32 %v10257_v54, %v10256_v61  ;;  %v10292_v41 = vadd.f32 %v10291_v3, %v10290_v2  ;;  %v9161_v63 = vld [vmem:[%s15220_s11] ss:$0 sm:$0xff] }
0x105b   :  { %v4280_v42 = vadd.f32 %v10292_v41, %v10258_v8  ;;  %v3220_v41 = vadd.f32 %v9161_v63, %v13553_v30 }
0x105d   :  { %v10259_v46 = vpop.f32.mrb[136].mxu1  ;;  %v10293_v10 = vpop.f32.mrb[148].mxu0 }
0x105e   :  { %v10260_v29 = vpop.f32.mrb[137].mxu1  ;;  %v10294_v16 = vpop.f32.mrb[149].mxu0 }
0x105f   :  { %v10261_v1 = vadd.f32 %v10260_v29, %v10259_v46  ;;  %v10295_v24 = vadd.f32 %v10294_v16, %v10293_v10  ;;  %v10262_v6 = vpop.f32.mrb[138].mxu1  ;;  %v10296_v11 = vpop.f32.mrb[150].mxu0  ;;  %v3221_v29 = vadd.f32 %v9161_v63, %v13555_v39 }
0x1060   :  { %v10263_v48 = vpop.f32.mrb[139].mxu1  ;;  %v10297_v49 = vpop.f32.mrb[151].mxu0 }
0x1061   :  { %v4285_v56 = vadd.f32 %v10295_v24, %v10261_v1  ;;  %v10264_v51 = vadd.f32 %v10263_v48, %v10262_v6  ;;  %v10298_v22 = vadd.f32 %v10297_v49, %v10296_v11 }
0x1063   :  { %v4288_v47 = vadd.f32 %v10298_v22, %v10264_v51 }
0x1065   :  { %v10265_v31 = vpop.f32.mrb[140].mxu1  ;;  %v10299_v13 = vpop.f32.mrb[152].mxu0 }
0x1066   :  { %v10266_v18 = vpop.f32.mrb[141].mxu1  ;;  %v10300_v50 = vpop.f32.mrb[153].mxu0 }
0x1067   :  { %v10267_v27 = vadd.f32 %v10266_v18, %v10265_v31  ;;  %v10301_v53 = vadd.f32 %v10300_v50, %v10299_v13  ;;  %v10268_v52 = vpop.f32.mrb[142].mxu1  ;;  %v10302_v23 = vpop.f32.mrb[154].mxu0 }
0x1068   :  { %v10269_v14 = vpop.f32.mrb[143].mxu1  ;;  %v10303_v60 = vpop.f32.mrb[155].mxu0  ;;  %v3222_v52 = vadd.f32 %v9161_v63, %v13557_v55 }
0x1069   :  { %v4293_v35 = vadd.f32 %v10301_v53, %v10267_v27 }
0x1075   :  { %v10321_v59 = vpop.f32.mrb[144].mxu1  ;;  %v10355_v37 = vpop.f32.mrb[156].mxu0 }
0x1076   :  { %v10322_v38 = vpop.f32.mrb[145].mxu1  ;;  %v10356_v12 = vpop.f32.mrb[157].mxu0 }
0x1077   :  { %v10323_v62 = vadd.f32 %v10322_v38, %v10321_v59  ;;  %v10357_v28 = vadd.f32 %v10356_v12, %v10355_v37  ;;  %v10324_v58 = vpop.f32.mrb[146].mxu1  ;;  %v10358_v19 = vpop.f32.mrb[158].mxu0  ;;  %v3223_v59 = vadd.f32 %v9161_v63, %v13559_v36 }
0x1078   :  { %v10325_v61 = vpop.f32.mrb[147].mxu1  ;;  %v10359_v2 = vpop.f32.mrb[159].mxu0 }
0x1079   :  { %v4333_v54 = vadd.f32 %v10323_v62, %v4277_v44  ;;  %v10326_v3 = vadd.f32 %v10325_v61, %v10324_v58  ;;  %v10360_v8 = vadd.f32 %v10359_v2, %v10358_v19 }
0x107b   :  { %v4389_v46 = vadd.f32 %v10357_v28, %v4333_v54  ;;  %v4336_v10 = vadd.f32 %v10326_v3, %v4280_v42 }
0x107d   :  { %v4392_v16 = vadd.f32 %v10360_v8, %v4336_v10  ;;  %v10327_v1 = vpop.f32.mrb[148].mxu1  ;;  %v10361_v24 = vpop.f32.mrb[160].mxu0  ;;  %v4410_v6 = vadd.f32 %v4389_v46, %v3220_v41  ;;  %v3224_v8 = vadd.f32 %v9161_v63, %v13574_v32 }
0x107e   :  { %v10328_v11 = vpop.f32.mrb[149].mxu1  ;;  %v10362_v48 = vpop.f32.mrb[161].mxu0 }
0x107f   :  { %v10329_v49 = vadd.f32 %v10328_v11, %v10327_v1  ;;  %v10363_v51 = vadd.f32 %v10362_v48, %v10361_v24  ;;  %v10330_v22 = vpop.f32.mrb[150].mxu1  ;;  %v10364_v31 = vpop.f32.mrb[162].mxu0  ;;  %v4415_v44 = vadd.f32 %v4410_v6, %v12977_v0  ;;  %v4411_v13 = vadd.f32 %v4392_v16, %v3221_v29 }
0x1080   :  { %v10331_v18 = vpop.f32.mrb[151].mxu1  ;;  %v10365_v50 = vpop.f32.mrb[163].mxu0 }
0x1081   :  { %v4341_v30 = vadd.f32 %v10329_v49, %v4285_v56  ;;  %v10332_v27 = vadd.f32 %v10331_v18, %v10330_v22  ;;  %v10366_v42 = vadd.f32 %v10365_v50, %v10364_v31  ;;  %v4422_v39 = vsel %vm141_vm2, %v4415_v44, 0.0 }
0x1082   :  { %4423 = vadd.xlane.f32.xlu0 %v4422_v39  ;;  %v4416_v53 = vadd.f32 %v4411_v13, %v12979_v9 }
0x1083   :  { %v4397_v23 = vadd.f32 %v10363_v51, %v4341_v30  ;;  %v4344_v14 = vadd.f32 %v10332_v27, %v4288_v47 }
0x1084   :  { %v4425_v60 = vsel %vm141_vm2, %v4416_v53, 0.0 }
0x1085   :  { %v4400_v0 = vadd.f32 %v10366_v42, %v4344_v14  ;;  %4426 = vadd.xlane.f32.xlu1 %v4425_v60  ;;  %v10333_v37 = vpop.f32.mrb[152].mxu1  ;;  %v10367_v38 = vpop.f32.mrb[164].mxu0  ;;  %v4412_v56 = vadd.f32 %v4397_v23, %v3222_v52  ;;  %v9401_v23 = vld [vmem:[%s15213_s4 + $0x20] sm:$0xff]  ;;  %v9402_v14 = vld [vmem:[%s15213_s4 + $0x28] sm:$0xff] }
0x1086   :  { %v10334_v12 = vpop.f32.mrb[153].mxu1  ;;  %v10368_v62 = vpop.f32.mrb[165].mxu0  ;;  %v11419_v60 = vpack.c.bf16 %v9402_v14, %v9401_v23 }
0x1087   :  { %v10335_v28 = vadd.f32 %v10334_v12, %v10333_v37  ;;  %v10369_v58 = vadd.f32 %v10368_v62, %v10367_v38  ;;  %v10336_v19 = vpop.f32.mrb[154].mxu1  ;;  %v10370_v61 = vpop.f32.mrb[166].mxu0  ;;  %v4417_v9 = vadd.f32 %v4412_v56, %v13008_v34  ;;  %v4413_v55 = vadd.f32 %v4400_v0, %v3223_v59  ;;  %v9403_v59 = vld [vmem:[%s15213_s4 + $0x30] sm:$0xff]  ;;  %v9404_v0 = vld [vmem:[%s15213_s4 + $0x38] sm:$0xff] }
0x1088   :  { %v10337_v2 = vpop.f32.mrb[155].mxu1  ;;  %v10371_v47 = vpop.f32.mrb[167].mxu0  ;;  %11420 = vmatpush3.bf16.msra.mxu1 %v11419_v60  ;;  %v11422_v37 = vpack.c.bf16 %v9404_v0, %v9403_v59 }
0x1089   :  { %v4349_v54 = vadd.f32 %v10335_v28, %v4293_v35  ;;  %v4428_v3 = vsel %vm141_vm2, %v4417_v9, 0.0  ;;  %v4418_v36 = vadd.f32 %v4413_v55, %v13010_v33  ;;  %11421 = vmatprep.subr.bf16.mxu1 %v12161_v4 }
0x108a   :  { %4429 = vadd.xlane.f32.xlu0 %v4428_v3  ;;  %v9399_v3 = vld [vmem:[%s15223_s14] ss:$0 sm:$0xff] }
0x108b   :  { %v4405_v41 = vadd.f32 %v10369_v58, %v4349_v54  ;;  %v4431_v46 = vsel %vm141_vm2, %v4418_v36, 0.0 }
0x108c   :  { %4432 = vadd.xlane.f32.xlu1 %v4431_v46  ;;  %11423 = vmatpush3.bf16.msra.mxu1 %v11422_v37 }
0x108d   :  { %v4414_v10 = vadd.f32 %v4405_v41, %v3224_v8  ;;  %11432 = vmatprep.subr.bf16.mxu1 %v12161_v4  ;;  %v9400_v41 = vld [vmem:[%s15224_s15] ss:$0 sm:$0xff] }
0x108f   :  { %v4419_v29 = vadd.f32 %v4414_v10, %v13023_v45 }
0x1091   :  { %v4434_v34 = vsel %vm1942_vm10, %v4419_v29, 0.0 }
0x1092   :  { %4435 = vadd.xlane.f32.xlu0 %v4434_v34 }
0x110f   :  { %v4424_v16 = vpop.xlane.xlu0 %4423 }
0x1110   :  { %v4437_v1 = vmul.f32 0.03125, %v4424_v16 }
0x1112   :  { %v4442_v35 = vsub.f32 %v4415_v44, %v4437_v1  ;;  %v4427_v24 = vpop.xlane.xlu1 %4426 }
0x1113   :  { %v4438_v6 = vmul.f32 0.03125, %v4427_v24 }
0x1114   :  { %v4447_v11 = vmul.f32 %v4442_v35, %v4442_v35 }
0x1115   :  { %v4443_v33 = vsub.f32 %v4416_v53, %v4438_v6 }
0x1116   :  { %v4452_v48 = vsel %vm141_vm2, %v4447_v11, 0.0 }
0x1117   :  { %4453 = vadd.xlane.f32.xlu1 %v4452_v48  ;;  %v4430_v32 = vpop.xlane.xlu0 %4429  ;;  %v4448_v63 = vmul.f32 %v4443_v33, %v4443_v33 }
0x1118   :  { %v4439_v49 = vmul.f32 0.03125, %v4430_v32 }
0x1119   :  { %v4433_v51 = vpop.xlane.xlu1 %4432  ;;  %v4455_v22 = vsel %vm141_vm2, %v4448_v63, 0.0 }
0x111a   :  { %v4444_v45 = vsub.f32 %v4417_v9, %v4439_v49  ;;  %v4440_v31 = vmul.f32 0.03125, %v4433_v51  ;;  %4456 = vadd.xlane.f32.xlu0 %v4455_v22 }
0x111c   :  { %v4445_v13 = vsub.f32 %v4418_v36, %v4440_v31  ;;  %v4449_v18 = vmul.f32 %v4444_v45, %v4444_v45 }
0x111e   :  { %v4458_v44 = vsel %vm141_vm2, %v4449_v18, 0.0  ;;  %v4450_v50 = vmul.f32 %v4445_v13, %v4445_v13 }
0x111f   :  { %4459 = vadd.xlane.f32.xlu1 %v4458_v44  ;;  %v4436_v30 = vpop.xlane.xlu0 %4435 }
0x1120   :  { %v4441_v27 = vmul.f32 0.03125, %v4436_v30  ;;  %v4461_v42 = vsel %vm141_vm2, %v4450_v50, 0.0  ;;  %v9406_v50 = vld [vmem:[%s15214_s5 + $0x1] ss:$0 sm:$0xff] }
0x1121   :  { %4462 = vadd.xlane.f32.xlu0 %v4461_v42 }
0x1122   :  { %v4446_v39 = vsub.f32 %v4419_v29, %v4441_v27 }
0x1124   :  { %v4451_v53 = vmul.f32 %v4446_v39, %v4446_v39 }
0x1126   :  { %v4464_v52 = vsel %vm1942_vm10, %v4451_v53, 0.0 }
0x1127   :  { %4465 = vadd.xlane.f32.xlu1 %v4464_v52 }
0x11a4   :  { %v4454_v38 = vpop.xlane.xlu1 %4453 }
0x11a5   :  { %v4467_v56 = vmul.f32 0.03125, %v4454_v38 }
0x11a7   :  { %v4472_v12 = vadd.f32 1e-05, %v4467_v56  ;;  %v4457_v62 = vpop.xlane.xlu0 %4456 }
0x11a8   :  { %v4468_v28 = vmul.f32 0.03125, %v4457_v62 }
0x11a9   :  { %12014 = vrsqrt.f32 %v4472_v12 }
0x11aa   :  { %v4473_v58 = vadd.f32 1e-05, %v4468_v28 }
0x11ac   :  { %12016 = vrsqrt.f32 %v4473_v58  ;;  %v4460_v19 = vpop.xlane.xlu1 %4459 }
0x11ad   :  { %v4469_v61 = vmul.f32 0.03125, %v4460_v19 }
0x11ae   :  { %v4463_v9 = vpop.xlane.xlu0 %4462 }
0x11af   :  { %v4474_v55 = vadd.f32 1e-05, %v4469_v61  ;;  %v4470_v2 = vmul.f32 0.03125, %v4463_v9 }
0x11b1   :  { %12018 = vrsqrt.f32 %v4474_v55  ;;  %v4475_v47 = vadd.f32 1e-05, %v4470_v2 }
0x11b3   :  { %v12015_v54 = vpop.eup %12014  ;;  %12020 = vrsqrt.f32 %v4475_v47 }
0x11b4   :  { %v4482_v36 = vmul.f32 %v12015_v54, %v4442_v35  ;;  %v4466_v8 = vpop.xlane.xlu1 %4465 }
0x11b5   :  { %v4471_v46 = vmul.f32 0.03125, %v4466_v8 }
0x11b6   :  { %v12017_v10 = vpop.eup %12016  ;;  %v4493_v29 = vmul.f32 %v9399_v3, %v4482_v36 }
0x11b7   :  { %v4476_v34 = vadd.f32 1e-05, %v4471_v46  ;;  %v4483_v16 = vmul.f32 %v12017_v10, %v4443_v33  ;;  %v13874_v10 = vld [vmem:[%s15212_s3 + $0x8] sm:$0xff] }
0x11b8   :  { %v13779_v1 = vadd.f32 %v9400_v41, %v4493_v29 }
0x11b9   :  { %12022 = vrsqrt.f32 %v4476_v34  ;;  %v4494_v24 = vmul.f32 %v9399_v3, %v4483_v16 }
0x11ba   :  { %11063 = vmatmul.mubr.msk.f32.vlgmr.msra.gmra.mrb[58].mxu1 %vm141_vm2, %v13779_v1 }
0x11bb   :  { %v12019_v6 = vpop.eup %12018  ;;  %11065 = vmatprep.mubr.msk.f32.mxu1 %vm12162_vm0, %v12163_v7  ;;  %v13785_v35 = vadd.f32 %v9400_v41, %v4494_v24 }
0x11bc   :  { %v4484_v11 = vmul.f32 %v12019_v6, %v4444_v45  ;;  %v13881_v6 = vld [vmem:[%s15212_s3 + $0x10] sm:$0xff] }
0x11bd   :  { %v12021_v48 = vpop.eup %12020 }
0x11be   :  { %11066 = vmatmul.mubr.msk.f32.gmra.mrb[156].mxu1 %vm141_vm2, %v13785_v35  ;;  %v4495_v32 = vmul.f32 %v9399_v3, %v4484_v11  ;;  %v4485_v33 = vmul.f32 %v12021_v48, %v4445_v13 }
0x11bf   :  { %11068 = vmatprep.mubr.msk.f32.mxu1 %vm12162_vm0, %v12163_v7 }
0x11c0   :  { %v13791_v63 = vadd.f32 %v9400_v41, %v4495_v32  ;;  %v4496_v49 = vmul.f32 %v9399_v3, %v4485_v33 }
0x11c2   :  { %11069 = vmatmul.mubr.msk.f32.gmra.mrb[158].mxu1 %vm141_vm2, %v13791_v63  ;;  %v13797_v22 = vadd.f32 %v9400_v41, %v4496_v49  ;;  %v13888_v49 = vld [vmem:[%s15212_s3 + $0x18] sm:$0xff] }
0x11c3   :  { %v12023_v51 = vpop.eup %12022  ;;  %11071 = vmatprep.mubr.msk.f32.mxu1 %vm12162_vm0, %v12163_v7 }
0x11c4   :  { %v4486_v45 = vmul.f32 %v12023_v51, %v4446_v39 }
0x11c6   :  { %11072 = vmatmul.mubr.msk.f32.gmra.mrb[160].mxu1 %vm141_vm2, %v13797_v22  ;;  %v4497_v31 = vmul.f32 %v9399_v3, %v4486_v45  ;;  %v13867_v3 = vld [vmem:[%s15212_s3] sm:$0xff] }
0x11c7   :  { %11074 = vmatprep.mubr.msk.f32.mxu1 %vm12162_vm0, %v12163_v7 }
0x11c8   :  { %v13803_v13 = vadd.f32 %v9400_v41, %v4497_v31 }
0x11ca   :  { %11075 = vmatmul.mubr.msk.f32.gmra.mrb[162].mxu1 %vm141_vm2, %v13803_v13 }
0x11cb   :  { %11112 = vmatprep.mubr.msk.f32.mxu1 %vm12162_vm0, %v12163_v7 }
0x128d   :  { %v4603_v18 = vpop.f32.mrb[58].mxu1 }
0x128e   :  { %v11064_v44 = vpop.f32.mrb[59].mxu1  ;;  %v13812_v27 = vadd.f32 %v9406_v50, %v4603_v18 }
0x128f   :  { %v13895_v44 = vld [vmem:[%s15212_s3 + $0x20] sm:$0xf] }
0x1291   :  { %v4608_v30 = vpop.f32.mrb[156].mxu1 }
0x1292   :  { %v13814_v42 = vadd.f32 %v9406_v50, %v4608_v30  ;;  %v11067_v39 = vpop.f32.mrb[157].mxu1 }
0x1294   :  { %v13818_v53 = vpack.i.bf16 %v13814_v42, %v13812_v27 }
0x1295   :  { %v4613_v52 = vpop.f32.mrb[158].mxu1 }
0x1296   :  { %11589 = vrot.lane.b32.xlu0 %v13818_v53, %s12164_s24  ;;  %v11070_v23 = vpop.f32.mrb[159].mxu1  ;;  %v13822_v60 = vadd.f32 %v9406_v50, %v4613_v52 }
0x1299   :  { %v4618_v14 = vpop.f32.mrb[160].mxu1 }
0x129a   :  { %v13824_v59 = vadd.f32 %v9406_v50, %v4618_v14  ;;  %v11073_v0 = vpop.f32.mrb[161].mxu1 }
0x129c   :  { %v13828_v37 = vpack.i.bf16 %v13824_v59, %v13822_v60 }
0x129d   :  { %v4623_v38 = vpop.f32.mrb[162].mxu1 }
0x129e   :  { %11594 = vrot.lane.b32.xlu1 %v13828_v37, %s12164_s24  ;;  %v11076_v56 = vpop.f32.mrb[163].mxu1  ;;  %v13832_v12 = vadd.f32 %v9406_v50, %v4623_v38 }
0x12a2   :  { %4642 = vrot.lane.b32.xlu1 %v13832_v12, %s12164_s24  ;;  %s15252_s24 = smov 48  }
0x1308   :  { %v11590_v62 = vpop.permute.xlu0 %11589 }
0x1309   :  { %v11592_v28 = vunpack.i.h.bf16 %v11590_v62  ;;  %v11591_v58 = vunpack.i.l.bf16 %v11590_v62 }
0x130b   :  { %v11425_v19 = vpack.c.bf16 %v11592_v28, %v11591_v58 }
0x130d   :  { %11427 = vmatpush3.bf16.xpose.msk.msra.mxu0 %vm12391_vm7, %v11425_v19 }
0x130e   :  { %11428 = vmatprep.subr.bf16.mxu0 %v12161_v4 }
0x1310   :  { %v11595_v61 = vpop.permute.xlu1 %11594 }
0x1311   :  { %v11597_v9 = vunpack.i.h.bf16 %v11595_v61  ;;  %v11596_v55 = vunpack.i.l.bf16 %v11595_v61 }
0x1313   :  { %v11429_v2 = vpack.c.bf16 %v11597_v9, %v11596_v55 }
0x1314   :  { %v4643_v47 = vpop.permute.xlu1 %4642 }
0x1315   :  { %11431 = vmatpush3.bf16.xpose.msk.msra.mxu0 %vm12391_vm7, %v11429_v2 }
0x1316   :  { %11085 = vmatprep.subr.mxu0 %v12163_v7 }
0x131d   :  { %11086 = vmatpush3.xpose.msk.msra.mxu0 %vm263_vm6, %v4643_v47 }
0x131e   :  { %11127 = vmatprep.subr.mxu0 %v12163_v7 }
0x1320   :  { %11088 = vmatmul.mubr.msk.f32.vlgmr.msra.gmra.mrb[168].mxu0 %vm263_vm6, %v13812_v27 }
0x1321   :  { %11090 = vmatprep.mubr.msk.f32.mxu0 %vm12162_vm0, %v12163_v7 }
0x1324   :  { %11091 = vmatmul.mubr.msk.f32.gmra.mrb[170].mxu0 %vm263_vm6, %v13814_v42 }
0x1325   :  { %11093 = vmatprep.mubr.msk.f32.mxu0 %vm12162_vm0, %v12163_v7 }
0x1328   :  { %11094 = vmatmul.mubr.msk.f32.gmra.mrb[172].mxu0 %vm263_vm6, %v13822_v60 }
0x1329   :  { %11096 = vmatprep.mubr.msk.f32.mxu0 %vm12162_vm0, %v12163_v7 }
0x132c   :  { %11097 = vmatmul.mubr.msk.f32.gmra.mrb[174].mxu0 %vm263_vm6, %v13824_v59 }
0x132d   :  { %11099 = vmatprep.mubr.msk.f32.mxu0 %vm12162_vm0, %v12163_v7 }
0x1330   :  { %11100 = vmatmul.mubr.msk.f32.gmra.mrb[176].mxu0 %vm263_vm6, %v13832_v12 }
0x1331   :  { %11129 = vmatprep.mubr.msk.f32.mxu0 %vm12162_vm0, %v12163_v7 }
0x13f3   :  { %v4730_v54 = vpop.f32.mrb[168].mxu0 }
0x13f4   :  { %v4731_v36 = vadd.f32 %v13867_v3, %v4730_v54  ;;  %v11089_v8 = vpop.f32.mrb[169].mxu0 }
0x13f6   :  { %v4754_v41 = vsel %vm374_vm8, %v4731_v36, -inf }
0x13f7   :  { %4755 = vmax.xlane.f32.xlu0 %v4754_v41  ;;  %v4735_v46 = vpop.f32.mrb[170].mxu0 }
0x13f8   :  { %v4736_v29 = vadd.f32 %v13874_v10, %v4735_v46  ;;  %v11092_v34 = vpop.f32.mrb[171].mxu0 }
0x13fa   :  { %v4757_v16 = vsel %vm374_vm8, %v4736_v29, -inf }
0x13fb   :  { %4758 = vmax.xlane.f32.xlu1 %v4757_v16  ;;  %v4740_v24 = vpop.f32.mrb[172].mxu0 }
0x13fc   :  { %v4741_v11 = vadd.f32 %v13881_v6, %v4740_v24  ;;  %v11095_v48 = vpop.f32.mrb[173].mxu0 }
0x13fe   :  { %v4760_v32 = vsel %vm374_vm8, %v4741_v11, -inf }
0x13ff   :  { %4761 = vmax.xlane.f32.xlu0 %v4760_v32  ;;  %v4745_v33 = vpop.f32.mrb[174].mxu0 }
0x1400   :  { %v4746_v51 = vadd.f32 %v13888_v49, %v4745_v33  ;;  %v11098_v45 = vpop.f32.mrb[175].mxu0 }
0x1402   :  { %v4763_v31 = vsel %vm374_vm8, %v4746_v51, -inf }
0x1403   :  { %4764 = vmax.xlane.f32.xlu0 %v4763_v31  ;;  %v4750_v18 = vpop.f32.mrb[176].mxu0 }
0x1404   :  { %v4751_v50 = vadd.f32 %v13895_v44, %v4750_v18  ;;  %v11101_v30 = vpop.f32.mrb[177].mxu0 }
0x1406   :  { %v4766_v39 = vsel %vm387_vm9, %v4751_v50, -inf }
0x1407   :  { %4767 = vmax.xlane.f32.xlu1 %v4766_v39 }
0x1484   :  { %v4756_v52 = vpop.xlane.xlu0 %4755 }
0x1485   :  { %v4769_v23 = vsub.f32 %v4731_v36, %v4756_v52 }
0x1487   :  { %v4774_v14 = vmul.f32 1.442695, %v4769_v23 }
0x1488   :  { %v4759_v0 = vpop.xlane.xlu1 %4758 }
0x1489   :  { %12024 = vpow2.f32 %v4774_v14  ;;  %v4770_v38 = vsub.f32 %v4736_v29, %v4759_v0 }
0x148b   :  { %v4776_v56 = vmul.f32 1.442695, %v4770_v38 }
0x148c   :  { %v4762_v61 = vpop.xlane.xlu0 %4761 }
0x148d   :  { %12026 = vpow2.f32 %v4776_v56  ;;  %v4771_v9 = vsub.f32 %v4741_v11, %v4762_v61 }
0x148f   :  { %v4778_v54 = vmul.f32 1.442695, %v4771_v9 }
0x1490   :  { %v4765_v55 = vpop.xlane.xlu0 %4764 }
0x1491   :  { %v4772_v47 = vsub.f32 %v4746_v51, %v4765_v55  ;;  %12028 = vpow2.f32 %v4778_v54 }
0x1493   :  { %v12025_v62 = vpop.eup %12024  ;;  %v4780_v8 = vmul.f32 1.442695, %v4772_v47 }
0x1494   :  { %v4784_v28 = vsel %vm374_vm8, %v12025_v62, 0.0  ;;  %v4768_v2 = vpop.xlane.xlu1 %4767 }
0x1495   :  { %4785 = vadd.xlane.f32.xlu0 %v4784_v28  ;;  %v4773_v36 = vsub.f32 %v4751_v50, %v4768_v2  ;;  %12030 = vpow2.f32 %v4780_v8 }
0x1497   :  { %v13900_v58 = vpop.eup %12026  ;;  %v4782_v41 = vmul.f32 1.442695, %v4773_v36 }
0x1498   :  { %v4787_v19 = vsel %vm374_vm8, %v13900_v58, 0.0 }
0x1499   :  { %4788 = vadd.xlane.f32.xlu1 %v4787_v19  ;;  %12032 = vpow2.f32 %v4782_v41 }
0x149b   :  { %v12029_v46 = vpop.eup %12028 }
0x149c   :  { %v4790_v34 = vsel %vm374_vm8, %v12029_v46, 0.0 }
0x149f   :  { %v13908_v29 = vpop.eup %12030 }
0x14a0   :  { %v4793_v24 = vsel %vm374_vm8, %v13908_v29, 0.0 }
0x14a3   :  { %v13911_v16 = vpop.eup %12032 }
0x14a4   :  { %v4796_v11 = vsel %vm387_vm9, %v13911_v16, 0.0 }
0x14aa   :  { %11599 = vrot.lane.b32.xlu1 %v13818_v53, %s12165_s21 }
0x14ab   :  { %11604 = vrot.lane.b32.xlu0 %v13828_v37, %s12165_s21 }
0x14ca   :  { %4791 = vadd.xlane.f32.xlu0 %v4790_v34 }
0x14ce   :  { %4794 = vadd.xlane.f32.xlu0 %v4793_v24  ;;  %4797 = vadd.xlane.f32.xlu1 %v4796_v11 }
0x14df   :  { %5054 = vrot.lane.b32.xlu1 %v13824_v59, %s12167_s2 }
0x14e4   :  { %4817 = vrot.lane.b32.xlu0 %v13832_v12, %s12165_s21 }
0x14e8   :  { %11609 = vrot.lane.b32.xlu0 %v13818_v53, %s12166_s22 }
0x14ec   :  { %11614 = vrot.lane.b32.xlu0 %v13828_v37, %s12166_s22 }
0x14f0   :  { %5066 = vrot.lane.b32.xlu0 %v13832_v12, %s12166_s22 }
0x14f4   :  { %5048 = vrot.lane.b32.xlu0 %v13812_v27, %s12167_s2 }
0x14f8   :  { %5050 = vrot.lane.b32.xlu0 %v13814_v42, %s12167_s2 }
0x14fc   :  { %5052 = vrot.lane.b32.xlu0 %v13822_v60, %s12167_s2 }
0x1500   :  { %5056 = vrot.lane.b32.xlu0 %v13832_v12, %s12167_s2  ;;  %s15250_s2 = smov 112  }
0x1522   :  { %v4786_v48 = vpop.xlane.xlu0 %4785 }
0x1523   :  { %12034 = vrcp.f32 %v4786_v48 }
0x1526   :  { %v4789_v32 = vpop.xlane.xlu1 %4788  ;;  %v11605_v33 = vpop.permute.xlu0 %11604 }
0x1527   :  { %v11607_v18 = vunpack.i.h.bf16 %v11605_v33  ;;  %v11606_v50 = vunpack.i.l.bf16 %v11605_v33  ;;  %12036 = vrcp.f32 %v4789_v32 }
0x1529   :  { %v11436_v39 = vpack.c.bf16 %v11607_v18, %v11606_v50 }
0x152a   :  { %v11600_v51 = vpop.permute.xlu1 %11599 }
0x152b   :  { %v11602_v45 = vunpack.i.h.bf16 %v11600_v51  ;;  %v11601_v31 = vunpack.i.l.bf16 %v11600_v51  ;;  %v9429_v51 = vld [vmem:[%s15215_s6 + $0x20] sm:$0xff] }
0x152c   :  { %11128 = vmatpush3.msra.mxu0 %v9429_v51 }
0x152d   :  { %v11433_v30 = vpack.c.bf16 %v11602_v45, %v11601_v31  ;;  %v12035_v14 = vpop.eup %12034  ;;  %11446 = vmatprep.subr.bf16.mxu0 %v12161_v4 }
0x152e   :  { %v4804_v0 = vmul.f32 %v12035_v14, %v12025_v62 }
0x152f   :  { %11434 = vmatpush3.bf16.msra.mxu1 %v11433_v30 }
0x1530   :  { %11435 = vmatprep.subr.bf16.mxu1 %v12161_v4 }
0x1531   :  { %v12037_v28 = vpop.eup %12036 }
0x1532   :  { %v4805_v61 = vmul.f32 %v12037_v28, %v13900_v58 }
0x1533   :  { %11437 = vmatpush3.bf16.msra.mxu1 %v11436_v39 }
0x1534   :  { %11110 = vmatprep.subr.mxu1 %v12163_v7 }
0x1557   :  { %v4792_v52 = vpop.xlane.xlu0 %4791 }
0x1558   :  { %12038 = vrcp.f32 %v4792_v52 }
0x155b   :  { %v4795_v23 = vpop.xlane.xlu0 %4794  ;;  %v4798_v38 = vpop.xlane.xlu1 %4797 }
0x155c   :  { %12040 = vrcp.f32 %v4795_v23 }
0x155d   :  { %12042 = vrcp.f32 %v4798_v38 }
0x155f   :  { %v4818_v56 = vpop.permute.xlu0 %4817  ;;  %v5055_v32 = vpop.permute.xlu1 %5054 }
0x1560   :  { %11111 = vmatpush3.msk.msra.mxu1 %vm98_vm5, %v4818_v56 }
0x1561   :  { %11113 = vmatmul.mubr.msk.f32.vlgmr.msra.gmra.mrb[164].mxu1 %vm374_vm8, %v4804_v0  ;;  %11438 = vmatprep.subr.bf16.mxu1 %v12161_v4 }
0x1562   :  { %11115 = vmatprep.mubr.msk.f32.mxu1 %vm12162_vm0, %v12163_v7  ;;  %v12039_v9 = vpop.eup %12038 }
0x1563   :  { %v11610_v19 = vpop.permute.xlu0 %11609  ;;  %v4806_v54 = vmul.f32 %v12039_v9, %v12029_v46 }
0x1564   :  { %v11612_v55 = vunpack.i.h.bf16 %v11610_v19  ;;  %v11611_v2 = vunpack.i.l.bf16 %v11610_v19 }
0x1565   :  { %11116 = vmatmul.mubr.msk.f32.gmra.mrb[166].mxu1 %vm374_vm8, %v4805_v61 }
0x1566   :  { %v11439_v62 = vpack.c.bf16 %v11612_v55, %v11611_v2  ;;  %11118 = vmatprep.mubr.msk.f32.mxu1 %vm12162_vm0, %v12163_v7  ;;  %v12041_v36 = vpop.eup %12040 }
0x1567   :  { %v11615_v47 = vpop.permute.xlu0 %11614  ;;  %v4807_v41 = vmul.f32 %v12041_v36, %v13908_v29  ;;  %v12043_v34 = vpop.eup %12042 }
0x1568   :  { %11441 = vmatpush3.bf16.xpose.msk.msra.mxu1 %vm12391_vm7, %v11439_v62  ;;  %v11617_v58 = vunpack.i.h.bf16 %v11615_v47  ;;  %v11616_v8 = vunpack.i.l.bf16 %v11615_v47  ;;  %v4808_v46 = vmul.f32 %v12043_v34, %v13911_v16 }
0x1569   :  { %11119 = vmatmul.mubr.msk.f32.gmra.mrb[168].mxu1 %vm374_vm8, %v4806_v54  ;;  %11442 = vmatprep.subr.bf16.mxu1 %v12161_v4 }
0x156a   :  { %11121 = vmatprep.mubr.msk.f32.mxu1 %vm12162_vm0, %v12163_v7  ;;  %v11443_v24 = vpack.c.bf16 %v11617_v58, %v11616_v8 }
0x156b   :  { %v5067_v11 = vpop.permute.xlu0 %5066 }
0x156d   :  { %11122 = vmatmul.mubr.msk.f32.gmra.mrb[170].mxu1 %vm374_vm8, %v4807_v41 }
0x156e   :  { %11124 = vmatprep.mubr.msk.f32.mxu1 %vm12162_vm0, %v12163_v7 }
0x156f   :  { %v5049_v29 = vpop.permute.xlu0 %5048 }
0x1570   :  { %11445 = vmatpush3.bf16.xpose.msk.msra.mxu1 %vm12391_vm7, %v11443_v24 }
0x1571   :  { %11125 = vmatmul.mubr.msk.f32.gmra.mrb[172].mxu1 %vm374_vm8, %v4808_v46  ;;  %11152 = vmatprep.subr.mxu1 %v12163_v7 }
0x1572   :  { %11154 = vmatprep.mubr.msk.f32.mxu1 %vm12162_vm0, %v12163_v7 }
0x1573   :  { %v5051_v48 = vpop.permute.xlu0 %5050 }
0x1577   :  { %v5053_v16 = vpop.permute.xlu0 %5052 }
0x1578   :  { %11153 = vmatpush3.xpose.msk.msra.mxu1 %vm263_vm6, %v5067_v11 }
0x1579   :  { %11194 = vmatprep.subr.mxu1 %v12163_v7 }
0x157b   :  { %11155 = vmatmul.mubr.msk.f32.vlgmr.msra.gmra.mrb[174].mxu1 %vm263_vm6, %v5049_v29  ;;  %v5057_v33 = vpop.permute.xlu0 %5056 }
0x157c   :  { %11157 = vmatprep.mubr.msk.f32.mxu1 %vm12162_vm0, %v12163_v7 }
0x157f   :  { %11158 = vmatmul.mubr.msk.f32.gmra.mrb[176].mxu1 %vm263_vm6, %v5051_v48 }
0x1580   :  { %11160 = vmatprep.mubr.msk.f32.mxu1 %vm12162_vm0, %v12163_v7 }
0x1583   :  { %11161 = vmatmul.mubr.msk.f32.gmra.mrb[178].mxu1 %vm263_vm6, %v5053_v16 }
0x1584   :  { %11163 = vmatprep.mubr.msk.f32.mxu1 %vm12162_vm0, %v12163_v7 }
0x1587   :  { %11164 = vmatmul.mubr.msk.f32.gmra.mrb[180].mxu1 %vm263_vm6, %v5055_v32 }
0x1588   :  { %11166 = vmatprep.mubr.msk.f32.mxu1 %vm12162_vm0, %v12163_v7 }
0x158b   :  { %11167 = vmatmul.mubr.msk.f32.gmra.mrb[182].mxu1 %vm263_vm6, %v5057_v33 }
0x158c   :  { %11196 = vmatprep.mubr.msk.f32.mxu1 %vm12162_vm0, %v12163_v7 }
0x1634   :  { %v4906_v45 = vpop.f32.mrb[164].mxu1 }
0x1635   :  { %v11114_v31 = vpop.f32.mrb[165].mxu1  ;;  %11130 = vmatmul.mubr.msk.f32.vlgmr.msra.gmra.mrb[178].mxu0 %vm263_vm6, %v4906_v45 }
0x1636   :  { %11132 = vmatprep.mubr.msk.f32.mxu0 %vm12162_vm0, %v12163_v7 }
0x1638   :  { %v4911_v18 = vpop.f32.mrb[166].mxu1 }
0x1639   :  { %v11117_v50 = vpop.f32.mrb[167].mxu1  ;;  %11133 = vmatmul.mubr.msk.f32.gmra.mrb[180].mxu0 %vm263_vm6, %v4911_v18 }
0x163a   :  { %11135 = vmatprep.mubr.msk.f32.mxu0 %vm12162_vm0, %v12163_v7 }
0x163c   :  { %v4916_v30 = vpop.f32.mrb[168].mxu1 }
0x163d   :  { %v11120_v39 = vpop.f32.mrb[169].mxu1  ;;  %11136 = vmatmul.mubr.msk.f32.gmra.mrb[182].mxu0 %vm263_vm6, %v4916_v30 }
0x163e   :  { %11138 = vmatprep.mubr.msk.f32.mxu0 %vm12162_vm0, %v12163_v7 }
0x1640   :  { %v4921_v52 = vpop.f32.mrb[170].mxu1 }
0x1641   :  { %v11123_v23 = vpop.f32.mrb[171].mxu1  ;;  %11139 = vmatmul.mubr.msk.f32.gmra.mrb[184].mxu0 %vm263_vm6, %v4921_v52 }
0x1642   :  { %11141 = vmatprep.mubr.msk.f32.mxu0 %vm12162_vm0, %v12163_v7 }
0x1644   :  { %v4926_v14 = vpop.f32.mrb[172].mxu1 }
0x1645   :  { %v11126_v0 = vpop.f32.mrb[173].mxu1  ;;  %11142 = vmatmul.mubr.msk.f32.gmra.mrb[186].mxu0 %vm263_vm6, %v4926_v14 }
0x1646   :  { %11179 = vmatprep.mubr.msk.f32.mxu0 %vm12162_vm0, %v12163_v7 }
0x164e   :  { %v5154_v38 = vpop.f32.mrb[174].mxu1 }
0x164f   :  { %v5155_v56 = vadd.f32 %v13867_v3, %v5154_v38  ;;  %v11156_v28 = vpop.f32.mrb[175].mxu1 }
0x1651   :  { %v5178_v19 = vsel %vm374_vm8, %v5155_v56, -inf }
0x1652   :  { %5179 = vmax.xlane.f32.xlu0 %v5178_v19  ;;  %v5159_v61 = vpop.f32.mrb[176].mxu1 }
0x1653   :  { %v5160_v9 = vadd.f32 %v13874_v10, %v5159_v61  ;;  %v11159_v55 = vpop.f32.mrb[177].mxu1 }
0x1655   :  { %v5181_v2 = vsel %vm374_vm8, %v5160_v9, -inf }
0x1656   :  { %5182 = vmax.xlane.f32.xlu1 %v5181_v2  ;;  %v5164_v62 = vpop.f32.mrb[178].mxu1 }
0x1657   :  { %v5165_v47 = vadd.f32 %v13881_v6, %v5164_v62  ;;  %v11162_v54 = vpop.f32.mrb[179].mxu1 }
0x1659   :  { %v5184_v36 = vsel %vm374_vm8, %v5165_v47, -inf }
0x165a   :  { %5185 = vmax.xlane.f32.xlu0 %v5184_v36  ;;  %v5169_v58 = vpop.f32.mrb[180].mxu1 }
0x165b   :  { %v5170_v8 = vadd.f32 %v13888_v49, %v5169_v58  ;;  %v11165_v41 = vpop.f32.mrb[181].mxu1 }
0x165d   :  { %v5187_v34 = vsel %vm374_vm8, %v5170_v8, -inf }
0x165e   :  { %5188 = vmax.xlane.f32.xlu0 %v5187_v34  ;;  %v5174_v24 = vpop.f32.mrb[182].mxu1 }
0x165f   :  { %v5175_v46 = vadd.f32 %v13895_v44, %v5174_v24  ;;  %v11168_v11 = vpop.f32.mrb[183].mxu1 }
0x1661   :  { %v5190_v29 = vsel %vm387_vm9, %v5175_v46, -inf }
0x1662   :  { %5191 = vmax.xlane.f32.xlu0 %v5190_v29 }
0x16df   :  { %v5180_v48 = vpop.xlane.xlu0 %5179 }
0x16e0   :  { %v5193_v16 = vsub.f32 %v5155_v56, %v5180_v48 }
0x16e2   :  { %v5198_v32 = vmul.f32 1.442695, %v5193_v16 }
0x16e3   :  { %v5183_v33 = vpop.xlane.xlu1 %5182 }
0x16e4   :  { %12044 = vpow2.f32 %v5198_v32  ;;  %v5194_v51 = vsub.f32 %v5160_v9, %v5183_v33 }
0x16e6   :  { %v5200_v45 = vmul.f32 1.442695, %v5194_v51 }
0x16e7   :  { %v5186_v39 = vpop.xlane.xlu0 %5185 }
0x16e8   :  { %12046 = vpow2.f32 %v5200_v45  ;;  %v5195_v56 = vsub.f32 %v5165_v47, %v5186_v39 }
0x16ea   :  { %v5202_v55 = vmul.f32 1.442695, %v5195_v56 }
0x16eb   :  { %v5189_v14 = vpop.xlane.xlu0 %5188 }
0x16ec   :  { %v5196_v9 = vsub.f32 %v5170_v8, %v5189_v14  ;;  %12048 = vpow2.f32 %v5202_v55 }
0x16ee   :  { %v14009_v31 = vpop.eup %12044  ;;  %v5204_v36 = vmul.f32 1.442695, %v5196_v9 }
0x16ef   :  { %v5208_v18 = vsel %vm374_vm8, %v14009_v31, 0.0  ;;  %v5192_v28 = vpop.xlane.xlu0 %5191 }
0x16f0   :  { %5209 = vadd.xlane.f32.xlu0 %v5208_v18  ;;  %v5197_v2 = vsub.f32 %v5175_v46, %v5192_v28  ;;  %12050 = vpow2.f32 %v5204_v36 }
0x16f2   :  { %v14013_v50 = vpop.eup %12046  ;;  %v5206_v58 = vmul.f32 1.442695, %v5197_v2 }
0x16f3   :  { %v5211_v30 = vsel %vm374_vm8, %v14013_v50, 0.0 }
0x16f4   :  { %5212 = vadd.xlane.f32.xlu1 %v5211_v30  ;;  %12052 = vpow2.f32 %v5206_v58 }
0x16f6   :  { %v12049_v24 = vpop.eup %12048 }
0x16f7   :  { %v5214_v11 = vsel %vm374_vm8, %v12049_v24, 0.0 }
0x16fa   :  { %v14031_v47 = vpop.eup %12050 }
0x16fb   :  { %v5217_v8 = vsel %vm374_vm8, %v14031_v47, 0.0 }
0x16fe   :  { %v14034_v29 = vpop.eup %12052 }
0x16ff   :  { %v5220_v46 = vsel %vm387_vm9, %v14034_v29, 0.0 }
0x1705   :  { %11619 = vrot.lane.b32.xlu1 %v13818_v53, %s12168_s26 }
0x1706   :  { %11624 = vrot.lane.b32.xlu0 %v13828_v37, %s12168_s26 }
0x1708   :  { %v14021_v52 = vpop.f32.mrb[178].mxu0 }
0x1709   :  { %v11131_v23 = vpop.f32.mrb[179].mxu0 }
0x170c   :  { %v14023_v0 = vpop.f32.mrb[180].mxu0 }
0x170d   :  { %v11134_v38 = vpop.f32.mrb[181].mxu0 }
0x1710   :  { %v14025_v19 = vpop.f32.mrb[182].mxu0 }
0x1711   :  { %v11137_v61 = vpop.f32.mrb[183].mxu0 }
0x1714   :  { %v14027_v62 = vpop.f32.mrb[184].mxu0 }
0x1715   :  { %v11140_v54 = vpop.f32.mrb[185].mxu0 }
0x1718   :  { %v14029_v41 = vpop.f32.mrb[186].mxu0 }
0x1719   :  { %v11143_v34 = vpop.f32.mrb[187].mxu0 }
0x1725   :  { %5215 = vadd.xlane.f32.xlu0 %v5214_v11 }
0x1729   :  { %5218 = vadd.xlane.f32.xlu0 %v5217_v8  ;;  %5221 = vadd.xlane.f32.xlu1 %v5220_v46 }
0x173a   :  { %5472 = vrot.lane.b32.xlu1 %v13824_v59, %s15250_s2 }
0x173f   :  { %5241 = vrot.lane.b32.xlu0 %v13832_v12, %s12168_s26 }
0x1743   :  { %11629 = vrot.lane.b32.xlu0 %v13818_v53, %s15251_s25 }
0x1747   :  { %11634 = vrot.lane.b32.xlu0 %v13828_v37, %s15251_s25 }
0x174b   :  { %5484 = vrot.lane.b32.xlu0 %v13832_v12, %s15251_s25 }
0x174f   :  { %5466 = vrot.lane.b32.xlu0 %v13812_v27, %s15250_s2 }
0x1753   :  { %5468 = vrot.lane.b32.xlu0 %v13814_v42, %s15250_s2 }
0x1757   :  { %5470 = vrot.lane.b32.xlu0 %v13822_v60, %s15250_s2 }
0x175b   :  { %5474 = vrot.lane.b32.xlu0 %v13832_v12, %s15250_s2 }
0x177d   :  { %v5210_v48 = vpop.xlane.xlu0 %5209 }
0x177e   :  { %12054 = vrcp.f32 %v5210_v48 }
0x1781   :  { %v5213_v16 = vpop.xlane.xlu1 %5212  ;;  %v11625_v32 = vpop.permute.xlu0 %11624 }
0x1782   :  { %v11627_v18 = vunpack.i.h.bf16 %v11625_v32  ;;  %v11626_v30 = vunpack.i.l.bf16 %v11625_v32  ;;  %12056 = vrcp.f32 %v5213_v16 }
0x1784   :  { %v11450_v23 = vpack.c.bf16 %v11627_v18, %v11626_v30 }
0x1785   :  { %v11620_v33 = vpop.permute.xlu1 %11619 }
0x1786   :  { %v11622_v51 = vunpack.i.h.bf16 %v11620_v33  ;;  %v11621_v45 = vunpack.i.l.bf16 %v11620_v33 }
0x1788   :  { %v11447_v39 = vpack.c.bf16 %v11622_v51, %v11621_v45  ;;  %v12055_v56 = vpop.eup %12054 }
0x1789   :  { %v5228_v28 = vmul.f32 %v12055_v56, %v14009_v31 }
0x178a   :  { %11448 = vmatpush3.bf16.msra.mxu0 %v11447_v39  ;;  %v9452_v39 = vld [vmem:[%s15215_s6 + $0x28] sm:$0xff] }
0x178b   :  { %11449 = vmatprep.subr.bf16.mxu0 %v12161_v4  ;;  %11195 = vmatpush3.msra.mxu1 %v9452_v39 }
0x178c   :  { %v12057_v55 = vpop.eup %12056  ;;  %11460 = vmatprep.subr.bf16.mxu1 %v12161_v4 }
0x178d   :  { %v5229_v54 = vmul.f32 %v12057_v55, %v14013_v50 }
0x178e   :  { %11451 = vmatpush3.bf16.msra.mxu0 %v11450_v23 }
0x178f   :  { %11177 = vmatprep.subr.mxu0 %v12163_v7 }
0x17b2   :  { %v5216_v14 = vpop.xlane.xlu0 %5215 }
0x17b3   :  { %12058 = vrcp.f32 %v5216_v14 }
0x17b6   :  { %v5219_v38 = vpop.xlane.xlu0 %5218  ;;  %v5222_v61 = vpop.xlane.xlu1 %5221 }
0x17b7   :  { %12060 = vrcp.f32 %v5219_v38 }
0x17b8   :  { %12062 = vrcp.f32 %v5222_v61 }
0x17ba   :  { %v5242_v9 = vpop.permute.xlu0 %5241  ;;  %v5473_v18 = vpop.permute.xlu1 %5472 }
0x17bb   :  { %11178 = vmatpush3.msk.msra.mxu0 %vm98_vm5, %v5242_v9 }
0x17bc   :  { %11180 = vmatmul.mubr.msk.f32.vlgmr.msra.gmra.mrb[188].mxu0 %vm374_vm8, %v5228_v28  ;;  %11452 = vmatprep.subr.bf16.mxu0 %v12161_v4 }
0x17bd   :  { %11182 = vmatprep.mubr.msk.f32.mxu0 %vm12162_vm0, %v12163_v7  ;;  %v12059_v36 = vpop.eup %12058 }
0x17be   :  { %v11630_v2 = vpop.permute.xlu0 %11629  ;;  %v5230_v8 = vmul.f32 %v12059_v36, %v12049_v24 }
0x17bf   :  { %v11632_v58 = vunpack.i.h.bf16 %v11630_v2  ;;  %v11631_v34 = vunpack.i.l.bf16 %v11630_v2 }
0x17c0   :  { %11183 = vmatmul.mubr.msk.f32.gmra.mrb[190].mxu0 %vm374_vm8, %v5229_v54 }
0x17c1   :  { %v11453_v31 = vpack.c.bf16 %v11632_v58, %v11631_v34  ;;  %11185 = vmatprep.mubr.msk.f32.mxu0 %vm12162_vm0, %v12163_v7  ;;  %v12061_v46 = vpop.eup %12060 }
0x17c2   :  { %v11635_v11 = vpop.permute.xlu0 %11634  ;;  %v5231_v16 = vmul.f32 %v12061_v46, %v14031_v47  ;;  %v12063_v32 = vpop.eup %12062 }
0x17c3   :  { %11455 = vmatpush3.bf16.xpose.msk.msra.mxu0 %vm12391_vm7, %v11453_v31  ;;  %v11637_v50 = vunpack.i.h.bf16 %v11635_v11  ;;  %v11636_v48 = vunpack.i.l.bf16 %v11635_v11  ;;  %v5232_v24 = vmul.f32 %v12063_v32, %v14034_v29 }
0x17c4   :  { %11186 = vmatmul.mubr.msk.f32.gmra.mrb[192].mxu0 %vm374_vm8, %v5230_v8  ;;  %11456 = vmatprep.subr.bf16.mxu0 %v12161_v4 }
0x17c5   :  { %11188 = vmatprep.mubr.msk.f32.mxu0 %vm12162_vm0, %v12163_v7  ;;  %v11457_v33 = vpack.c.bf16 %v11637_v50, %v11636_v48 }
0x17c6   :  { %v5485_v51 = vpop.permute.xlu0 %5484 }
0x17c8   :  { %11189 = vmatmul.mubr.msk.f32.gmra.mrb[194].mxu0 %vm374_vm8, %v5231_v16 }
0x17c9   :  { %11191 = vmatprep.mubr.msk.f32.mxu0 %vm12162_vm0, %v12163_v7 }
0x17ca   :  { %v5467_v47 = vpop.permute.xlu0 %5466 }
0x17cb   :  { %11459 = vmatpush3.bf16.xpose.msk.msra.mxu0 %vm12391_vm7, %v11457_v33 }
0x17cc   :  { %11192 = vmatmul.mubr.msk.f32.gmra.mrb[196].mxu0 %vm374_vm8, %v5232_v24  ;;  %11219 = vmatprep.subr.mxu0 %v12163_v7 }
0x17cd   :  { %11221 = vmatprep.mubr.msk.f32.mxu0 %vm12162_vm0, %v12163_v7 }
0x17ce   :  { %v5469_v45 = vpop.permute.xlu0 %5468 }
0x17d2   :  { %v5471_v29 = vpop.permute.xlu0 %5470 }
0x17d3   :  { %11220 = vmatpush3.xpose.msk.msra.mxu0 %vm263_vm6, %v5485_v51 }
0x17d4   :  { %11261 = vmatprep.subr.mxu0 %v12163_v7 }
0x17d6   :  { %11222 = vmatmul.mubr.msk.f32.vlgmr.msra.gmra.mrb[198].mxu0 %vm263_vm6, %v5467_v47  ;;  %v5475_v30 = vpop.permute.xlu0 %5474 }
0x17d7   :  { %11224 = vmatprep.mubr.msk.f32.mxu0 %vm12162_vm0, %v12163_v7 }
0x17da   :  { %11225 = vmatmul.mubr.msk.f32.gmra.mrb[200].mxu0 %vm263_vm6, %v5469_v45 }
0x17db   :  { %11227 = vmatprep.mubr.msk.f32.mxu0 %vm12162_vm0, %v12163_v7 }
0x17de   :  { %11228 = vmatmul.mubr.msk.f32.gmra.mrb[202].mxu0 %vm263_vm6, %v5471_v29 }
0x17df   :  { %11230 = vmatprep.mubr.msk.f32.mxu0 %vm12162_vm0, %v12163_v7 }
0x17e2   :  { %11231 = vmatmul.mubr.msk.f32.gmra.mrb[204].mxu0 %vm263_vm6, %v5473_v18 }
0x17e3   :  { %11233 = vmatprep.mubr.msk.f32.mxu0 %vm12162_vm0, %v12163_v7 }
0x17e6   :  { %11234 = vmatmul.mubr.msk.f32.gmra.mrb[206].mxu0 %vm263_vm6, %v5475_v30 }
0x17e7   :  { %11263 = vmatprep.mubr.msk.f32.mxu0 %vm12162_vm0, %v12163_v7 }
0x188f   :  { %v5330_v23 = vpop.f32.mrb[188].mxu0 }
0x1890   :  { %v11181_v14 = vpop.f32.mrb[189].mxu0  ;;  %11197 = vmatmul.mubr.msk.f32.vlgmr.msra.gmra.mrb[184].mxu1 %vm263_vm6, %v5330_v23 }
0x1891   :  { %11199 = vmatprep.mubr.msk.f32.mxu1 %vm12162_vm0, %v12163_v7 }
0x1893   :  { %v5335_v38 = vpop.f32.mrb[190].mxu0 }
0x1894   :  { %v11184_v56 = vpop.f32.mrb[191].mxu0  ;;  %11200 = vmatmul.mubr.msk.f32.gmra.mrb[186].mxu1 %vm263_vm6, %v5335_v38 }
0x1895   :  { %11202 = vmatprep.mubr.msk.f32.mxu1 %vm12162_vm0, %v12163_v7 }
0x1897   :  { %v5340_v28 = vpop.f32.mrb[192].mxu0 }
0x1898   :  { %v11187_v61 = vpop.f32.mrb[193].mxu0  ;;  %11203 = vmatmul.mubr.msk.f32.gmra.mrb[188].mxu1 %vm263_vm6, %v5340_v28 }
0x1899   :  { %11205 = vmatprep.mubr.msk.f32.mxu1 %vm12162_vm0, %v12163_v7  ;;  %v9435_v61 = vld [vmem:[%s15216_s7 + $0x1] ss:$0 sm:$0xff]  ;;  %s15253_s7 = smov 104  }
0x189b   :  { %v5345_v9 = vpop.f32.mrb[194].mxu0 }
0x189c   :  { %v11190_v55 = vpop.f32.mrb[195].mxu0  ;;  %11206 = vmatmul.mubr.msk.f32.gmra.mrb[190].mxu1 %vm263_vm6, %v5345_v9 }
0x189d   :  { %11208 = vmatprep.mubr.msk.f32.mxu1 %vm12162_vm0, %v12163_v7  ;;  %v5043_v55 = vadd.f32 %v9435_v61, %v14021_v52 }
0x189f   :  { %v5350_v2 = vpop.f32.mrb[196].mxu0 }
0x18a0   :  { %v11193_v54 = vpop.f32.mrb[197].mxu0  ;;  %11209 = vmatmul.mubr.msk.f32.gmra.mrb[192].mxu1 %vm263_vm6, %v5350_v2 }
0x18a1   :  { %11246 = vmatprep.mubr.msk.f32.mxu1 %vm12162_vm0, %v12163_v7 }
0x18a9   :  { %v5572_v36 = vpop.f32.mrb[198].mxu0 }
0x18aa   :  { %v5573_v58 = vadd.f32 %v13867_v3, %v5572_v36  ;;  %v11223_v34 = vpop.f32.mrb[199].mxu0 }
0x18ab   :  { %v5044_v34 = vadd.f32 %v9435_v61, %v14023_v0 }
0x18ac   :  { %v5596_v31 = vsel %vm374_vm8, %v5573_v58, -inf }
0x18ad   :  { %5597 = vmax.xlane.f32.xlu0 %v5596_v31  ;;  %v5577_v11 = vpop.f32.mrb[200].mxu0 }
0x18ae   :  { %v5578_v8 = vadd.f32 %v13874_v10, %v5577_v11  ;;  %v11226_v46 = vpop.f32.mrb[201].mxu0 }
0x18af   :  { %v5045_v46 = vadd.f32 %v9435_v61, %v14025_v19 }
0x18b0   :  { %v5599_v50 = vsel %vm374_vm8, %v5578_v8, -inf }
0x18b1   :  { %5600 = vmax.xlane.f32.xlu1 %v5599_v50  ;;  %v5582_v48 = vpop.f32.mrb[202].mxu0 }
0x18b2   :  { %v5583_v16 = vadd.f32 %v13881_v6, %v5582_v48  ;;  %v11229_v32 = vpop.f32.mrb[203].mxu0 }
0x18b4   :  { %v5602_v33 = vsel %vm374_vm8, %v5583_v16, -inf }
0x18b5   :  { %5603 = vmax.xlane.f32.xlu0 %v5602_v33  ;;  %v5587_v24 = vpop.f32.mrb[204].mxu0 }
0x18b6   :  { %v5588_v3 = vadd.f32 %v13888_v49, %v5587_v24  ;;  %v11232_v51 = vpop.f32.mrb[205].mxu0 }
0x18b7   :  { %v5046_v51 = vadd.f32 %v9435_v61, %v14027_v62 }
0x18b8   :  { %v5605_v47 = vsel %vm374_vm8, %v5588_v3, -inf }
0x18b9   :  { %5606 = vmax.xlane.f32.xlu0 %v5605_v47  ;;  %v5592_v45 = vpop.f32.mrb[206].mxu0 }
0x18ba   :  { %v5593_v10 = vadd.f32 %v13895_v44, %v5592_v45  ;;  %v11235_v29 = vpop.f32.mrb[207].mxu0 }
0x18bc   :  { %v5608_v18 = vsel %vm387_vm9, %v5593_v10, -inf }
0x18bd   :  { %5609 = vmax.xlane.f32.xlu0 %v5608_v18 }
0x193a   :  { %v5598_v30 = vpop.xlane.xlu0 %5597 }
0x193b   :  { %v5611_v6 = vsub.f32 %v5573_v58, %v5598_v30 }
0x193d   :  { %v5616_v39 = vmul.f32 1.442695, %v5611_v6  ;;  %v5047_v6 = vadd.f32 %v9435_v61, %v14029_v41 }
0x193e   :  { %v5601_v23 = vpop.xlane.xlu1 %5600 }
0x193f   :  { %12064 = vpow2.f32 %v5616_v39  ;;  %v5612_v14 = vsub.f32 %v5578_v8, %v5601_v23 }
0x1941   :  { %v5618_v38 = vmul.f32 1.442695, %v5612_v14 }
0x1942   :  { %v5604_v9 = vpop.xlane.xlu0 %5603 }
0x1943   :  { %12066 = vpow2.f32 %v5618_v38  ;;  %v5613_v50 = vsub.f32 %v5583_v16, %v5604_v9 }
0x1945   :  { %v5620_v47 = vmul.f32 1.442695, %v5613_v50 }
0x1946   :  { %v5607_v58 = vpop.xlane.xlu0 %5606 }
0x1947   :  { %v5614_v52 = vsub.f32 %v5588_v3, %v5607_v58  ;;  %12068 = vpow2.f32 %v5620_v47 }
0x1949   :  { %v14133_v49 = vpop.eup %12064  ;;  %v5622_v30 = vmul.f32 1.442695, %v5614_v52 }
0x194a   :  { %v5626_v56 = vsel %vm374_vm8, %v14133_v49, 0.0  ;;  %v5610_v48 = vpop.xlane.xlu0 %5609 }
0x194b   :  { %5627 = vadd.xlane.f32.xlu0 %v5626_v56  ;;  %v5615_v45 = vsub.f32 %v5593_v10, %v5610_v48  ;;  %12070 = vpow2.f32 %v5622_v30 }
0x194d   :  { %v14137_v28 = vpop.eup %12066  ;;  %v5624_v19 = vmul.f32 1.442695, %v5615_v45 }
0x194e   :  { %v5629_v44 = vsel %vm374_vm8, %v14137_v28, 0.0 }
0x194f   :  { %5630 = vadd.xlane.f32.xlu1 %v5629_v44  ;;  %12072 = vpow2.f32 %v5624_v19 }
0x1951   :  { %v12069_v3 = vpop.eup %12068 }
0x1952   :  { %v5632_v62 = vsel %vm374_vm8, %v12069_v3, 0.0 }
0x1955   :  { %v14163_v14 = vpop.eup %12070 }
0x1956   :  { %v5635_v38 = vsel %vm374_vm8, %v14163_v14, 0.0 }
0x1959   :  { %v14166_v10 = vpop.eup %12072 }
0x195a   :  { %v5638_v41 = vsel %vm387_vm9, %v14166_v10, 0.0 }
0x1960   :  { %11639 = vrot.lane.b32.xlu1 %v13818_v53, %s15252_s24 }
0x1961   :  { %11644 = vrot.lane.b32.xlu0 %v13828_v37, %s15252_s24 }
0x1963   :  { %v5437_v2 = vpop.f32.mrb[184].mxu1 }
0x1964   :  { %v14149_v54 = vadd.f32 %v5437_v2, %v5043_v55  ;;  %v11198_v36 = vpop.f32.mrb[185].mxu1 }
0x1967   :  { %v5442_v31 = vpop.f32.mrb[186].mxu1 }
0x1968   :  { %v14152_v11 = vadd.f32 %v5442_v31, %v5044_v34  ;;  %v11201_v8 = vpop.f32.mrb[187].mxu1 }
0x196b   :  { %v5447_v32 = vpop.f32.mrb[188].mxu1 }
0x196c   :  { %v14155_v33 = vadd.f32 %v5447_v32, %v5045_v46  ;;  %v11204_v24 = vpop.f32.mrb[189].mxu1 }
0x196f   :  { %v5452_v29 = vpop.f32.mrb[190].mxu1 }
0x1970   :  { %v14158_v18 = vadd.f32 %v5452_v29, %v5046_v51  ;;  %v11207_v0 = vpop.f32.mrb[191].mxu1 }
0x1973   :  { %v5457_v16 = vpop.f32.mrb[192].mxu1 }
0x1974   :  { %v14161_v39 = vadd.f32 %v5457_v16, %v5047_v6  ;;  %v11210_v23 = vpop.f32.mrb[193].mxu1 }
0x1980   :  { %5633 = vadd.xlane.f32.xlu0 %v5632_v62 }
0x1984   :  { %5636 = vadd.xlane.f32.xlu0 %v5635_v38  ;;  %5639 = vadd.xlane.f32.xlu1 %v5638_v41  ;;  %v9474_v38 = vld [vmem:[%s15215_s6 + $0x30] sm:$0xff] }
0x1985   :  { %11262 = vmatpush3.msra.mxu0 %v9474_v38 }
0x1986   :  { %11474 = vmatprep.subr.bf16.mxu0 %v12161_v4 }
0x1995   :  { %5890 = vrot.lane.b32.xlu1 %v13824_v59, %s15253_s7 }
0x199a   :  { %5659 = vrot.lane.b32.xlu0 %v13832_v12, %s15252_s24 }
0x199e   :  { %11649 = vrot.lane.b32.xlu0 %v13818_v53, %s15254_s30 }
0x19a2   :  { %11654 = vrot.lane.b32.xlu0 %v13828_v37, %s15254_s30 }
0x19a6   :  { %5902 = vrot.lane.b32.xlu0 %v13832_v12, %s15254_s30 }
0x19aa   :  { %5884 = vrot.lane.b32.xlu0 %v13812_v27, %s15253_s7 }
0x19ae   :  { %5886 = vrot.lane.b32.xlu0 %v13814_v42, %s15253_s7 }
0x19b2   :  { %5888 = vrot.lane.b32.xlu0 %v13822_v60, %s15253_s7 }
0x19b6   :  { %5892 = vrot.lane.b32.xlu0 %v13832_v12, %s15253_s7 }
0x19d8   :  { %v5628_v59 = vpop.xlane.xlu0 %5627 }
0x19d9   :  { %12074 = vrcp.f32 %v5628_v59 }
0x19dc   :  { %v5631_v56 = vpop.xlane.xlu1 %5630  ;;  %v11645_v44 = vpop.permute.xlu0 %11644 }
0x19dd   :  { %v11647_v2 = vunpack.i.h.bf16 %v11645_v44  ;;  %v11646_v36 = vunpack.i.l.bf16 %v11645_v44  ;;  %12076 = vrcp.f32 %v5631_v56 }
0x19df   :  { %v11464_v27 = vpack.c.bf16 %v11647_v2, %v11646_v36 }
0x19e0   :  { %v11640_v61 = vpop.permute.xlu1 %11639 }
0x19e1   :  { %v11642_v9 = vunpack.i.h.bf16 %v11640_v61  ;;  %v11641_v55 = vunpack.i.l.bf16 %v11640_v61 }
0x19e3   :  { %v11461_v58 = vpack.c.bf16 %v11642_v9, %v11641_v55  ;;  %v12075_v34 = vpop.eup %12074 }
0x19e4   :  { %v5646_v31 = vmul.f32 %v12075_v34, %v14133_v49 }
0x19e5   :  { %11462 = vmatpush3.bf16.msra.mxu1 %v11461_v58 }
0x19e6   :  { %11463 = vmatprep.subr.bf16.mxu1 %v12161_v4 }
0x19e7   :  { %v12077_v50 = vpop.eup %12076 }
0x19e8   :  { %v5647_v32 = vmul.f32 %v12077_v50, %v14137_v28 }
0x19e9   :  { %11465 = vmatpush3.bf16.msra.mxu1 %v11464_v27 }
0x19ea   :  { %11244 = vmatprep.subr.mxu1 %v12163_v7 }
0x1a0d   :  { %v5634_v42 = vpop.xlane.xlu0 %5633 }
0x1a0e   :  { %12078 = vrcp.f32 %v5634_v42  ;;  %v12132_v42 = vld [vmem:[%s15212_s3] sm:$0xff] }
0x1a11   :  { %v5637_v60 = vpop.xlane.xlu0 %5636  ;;  %v5640_v8 = vpop.xlane.xlu1 %5639 }
0x1a12   :  { %12080 = vrcp.f32 %v5637_v60 }
0x1a13   :  { %12082 = vrcp.f32 %v5640_v8 }
0x1a15   :  { %v5660_v46 = vpop.permute.xlu0 %5659  ;;  %v5891_v62 = vpop.permute.xlu1 %5890 }
0x1a16   :  { %11245 = vmatpush3.msk.msra.mxu1 %vm98_vm5, %v5660_v46  ;;  %v12133_v46 = vld [vmem:[%s15212_s3 + $0x8] sm:$0xff] }
0x1a17   :  { %11247 = vmatmul.mubr.msk.f32.vlgmr.msra.gmra.mrb[194].mxu1 %vm374_vm8, %v5646_v31  ;;  %11466 = vmatprep.subr.bf16.mxu1 %v12161_v4 }
0x1a18   :  { %11249 = vmatprep.mubr.msk.f32.mxu1 %vm12162_vm0, %v12163_v7  ;;  %v12079_v24 = vpop.eup %12078 }
0x1a19   :  { %v11650_v48 = vpop.permute.xlu0 %11649  ;;  %v5648_v45 = vmul.f32 %v12079_v24, %v12069_v3 }
0x1a1a   :  { %v11652_v52 = vunpack.i.h.bf16 %v11650_v48  ;;  %v11651_v51 = vunpack.i.l.bf16 %v11650_v48 }
0x1a1b   :  { %11250 = vmatmul.mubr.msk.f32.gmra.mrb[196].mxu1 %vm374_vm8, %v5647_v32 }
0x1a1c   :  { %v11467_v49 = vpack.c.bf16 %v11652_v52, %v11651_v51  ;;  %11252 = vmatprep.mubr.msk.f32.mxu1 %vm12162_vm0, %v12163_v7  ;;  %v12081_v29 = vpop.eup %12080  ;;  %v12134_v52 = vld [vmem:[%s15212_s3 + $0x10] sm:$0xff] }
0x1a1d   :  { %v11655_v47 = vpop.permute.xlu0 %11654  ;;  %v5649_v30 = vmul.f32 %v12081_v29, %v14163_v14  ;;  %v12083_v6 = vpop.eup %12082  ;;  %v12135_v29 = vld [vmem:[%s15212_s3 + $0x18] sm:$0xff] }
0x1a1e   :  { %11469 = vmatpush3.bf16.xpose.msk.msra.mxu1 %vm12391_vm7, %v11467_v49  ;;  %v11657_v28 = vunpack.i.h.bf16 %v11655_v47  ;;  %v11656_v0 = vunpack.i.l.bf16 %v11655_v47  ;;  %v5650_v16 = vmul.f32 %v12083_v6, %v14166_v10 }
0x1a1f   :  { %11253 = vmatmul.mubr.msk.f32.gmra.mrb[198].mxu1 %vm374_vm8, %v5648_v45  ;;  %11470 = vmatprep.subr.bf16.mxu1 %v12161_v4 }
0x1a20   :  { %11255 = vmatprep.mubr.msk.f32.mxu1 %vm12162_vm0, %v12163_v7  ;;  %v11471_v19 = vpack.c.bf16 %v11657_v28, %v11656_v0 }
0x1a21   :  { %v5903_v23 = vpop.permute.xlu0 %5902 }
0x1a23   :  { %11256 = vmatmul.mubr.msk.f32.gmra.mrb[200].mxu1 %vm374_vm8, %v5649_v30 }
0x1a24   :  { %11258 = vmatprep.mubr.msk.f32.mxu1 %vm12162_vm0, %v12163_v7 }
0x1a25   :  { %v5885_v3 = vpop.permute.xlu0 %5884 }
0x1a26   :  { %11473 = vmatpush3.bf16.xpose.msk.msra.mxu1 %vm12391_vm7, %v11471_v19  ;;  %v12136_v19 = vld [vmem:[%s15212_s3 + $0x20] sm:$0xf] }
0x1a27   :  { %11259 = vmatmul.mubr.msk.f32.gmra.mrb[202].mxu1 %vm374_vm8, %v5650_v16  ;;  %11286 = vmatprep.subr.mxu1 %v12163_v7 }
0x1a28   :  { %11288 = vmatprep.mubr.msk.f32.mxu1 %vm12162_vm0, %v12163_v7 }
0x1a29   :  { %v5887_v14 = vpop.permute.xlu0 %5886 }
0x1a2d   :  { %v5889_v5 = vpop.permute.xlu0 %5888 }
0x1a2e   :  { %11287 = vmatpush3.xpose.msk.msra.mxu1 %vm263_vm6, %v5903_v23 }
0x1a2f   :  { %11328 = vmatprep.subr.mxu1 %v12163_v7 }
0x1a31   :  { %11289 = vmatmul.mubr.msk.f32.vlgmr.msra.gmra.mrb[204].mxu1 %vm263_vm6, %v5885_v3  ;;  %v5893_v10 = vpop.permute.xlu0 %5892 }
0x1a32   :  { %11291 = vmatprep.mubr.msk.f32.mxu1 %vm12162_vm0, %v12163_v7 }
0x1a35   :  { %11292 = vmatmul.mubr.msk.f32.gmra.mrb[206].mxu1 %vm263_vm6, %v5887_v14 }
0x1a36   :  { %11294 = vmatprep.mubr.msk.f32.mxu1 %vm12162_vm0, %v12163_v7 }
0x1a39   :  { %11295 = vmatmul.mubr.msk.f32.gmra.mrb[208].mxu1 %vm263_vm6, %v5889_v5 }
0x1a3a   :  { %11297 = vmatprep.mubr.msk.f32.mxu1 %vm12162_vm0, %v12163_v7 }
0x1a3d   :  { %11298 = vmatmul.mubr.msk.f32.gmra.mrb[210].mxu1 %vm263_vm6, %v5891_v62 }
0x1a3e   :  { %11300 = vmatprep.mubr.msk.f32.mxu1 %vm12162_vm0, %v12163_v7 }
0x1a41   :  { %11301 = vmatmul.mubr.msk.f32.gmra.mrb[212].mxu1 %vm263_vm6, %v5893_v10 }
0x1a42   :  { %11330 = vmatprep.mubr.msk.f32.mxu1 %vm12162_vm0, %v12163_v7 }
0x1aea   :  { %v5748_v41 = vpop.f32.mrb[194].mxu1 }
0x1aeb   :  { %v11248_v59 = vpop.f32.mrb[195].mxu1  ;;  %11264 = vmatmul.mubr.msk.f32.vlgmr.msra.gmra.mrb[208].mxu0 %vm263_vm6, %v5748_v41 }
0x1aec   :  { %11266 = vmatprep.mubr.msk.f32.mxu0 %vm12162_vm0, %v12163_v7 }
0x1aee   :  { %v5753_v56 = vpop.f32.mrb[196].mxu1 }
0x1aef   :  { %v11251_v44 = vpop.f32.mrb[197].mxu1  ;;  %11267 = vmatmul.mubr.msk.f32.gmra.mrb[210].mxu0 %vm263_vm6, %v5753_v56 }
0x1af0   :  { %11269 = vmatprep.mubr.msk.f32.mxu0 %vm12162_vm0, %v12163_v7 }
0x1af2   :  { %v5758_v61 = vpop.f32.mrb[198].mxu1 }
0x1af3   :  { %v11254_v9 = vpop.f32.mrb[199].mxu1  ;;  %11270 = vmatmul.mubr.msk.f32.gmra.mrb[212].mxu0 %vm263_vm6, %v5758_v61 }
0x1af4   :  { %11272 = vmatprep.mubr.msk.f32.mxu0 %vm12162_vm0, %v12163_v7 }
0x1af6   :  { %v5763_v55 = vpop.f32.mrb[200].mxu1 }
0x1af7   :  { %v11257_v2 = vpop.f32.mrb[201].mxu1  ;;  %11273 = vmatmul.mubr.msk.f32.gmra.mrb[214].mxu0 %vm263_vm6, %v5763_v55 }
0x1af8   :  { %11275 = vmatprep.mubr.msk.f32.mxu0 %vm12162_vm0, %v12163_v7 }
0x1afa   :  { %v5768_v36 = vpop.f32.mrb[202].mxu1 }
0x1afb   :  { %v11260_v58 = vpop.f32.mrb[203].mxu1  ;;  %11276 = vmatmul.mubr.msk.f32.gmra.mrb[216].mxu0 %vm263_vm6, %v5768_v36 }
0x1afc   :  { %11313 = vmatprep.mubr.msk.f32.mxu0 %vm12162_vm0, %v12163_v7 }
0x1b04   :  { %v5990_v27 = vpop.f32.mrb[204].mxu1 }
0x1b05   :  { %v5991_v60 = vadd.f32 %v12132_v42, %v5990_v27  ;;  %v11290_v34 = vpop.f32.mrb[205].mxu1 }
0x1b07   :  { %v6014_v31 = vsel %vm374_vm8, %v5991_v60, -inf }
0x1b08   :  { %6015 = vmax.xlane.f32.xlu0 %v6014_v31  ;;  %v5995_v8 = vpop.f32.mrb[206].mxu1 }
0x1b09   :  { %v5996_v50 = vadd.f32 %v12133_v46, %v5995_v8  ;;  %v11293_v48 = vpop.f32.mrb[207].mxu1 }
0x1b0b   :  { %v6017_v32 = vsel %vm374_vm8, %v5996_v50, -inf }
0x1b0c   :  { %6018 = vmax.xlane.f32.xlu1 %v6017_v32  ;;  %v6000_v24 = vpop.f32.mrb[208].mxu1 }
0x1b0d   :  { %v6001_v51 = vadd.f32 %v12134_v52, %v6000_v24  ;;  %v11296_v49 = vpop.f32.mrb[209].mxu1 }
0x1b0f   :  { %v6020_v47 = vsel %vm374_vm8, %v6001_v51, -inf }
0x1b10   :  { %6021 = vmax.xlane.f32.xlu0 %v6020_v47  ;;  %v6005_v45 = vpop.f32.mrb[210].mxu1 }
0x1b11   :  { %v6006_v28 = vadd.f32 %v12135_v29, %v6005_v45  ;;  %v11299_v0 = vpop.f32.mrb[211].mxu1 }
0x1b13   :  { %v6023_v30 = vsel %vm374_vm8, %v6006_v28, -inf }
0x1b14   :  { %6024 = vmax.xlane.f32.xlu0 %v6023_v30  ;;  %v6010_v6 = vpop.f32.mrb[212].mxu1 }
0x1b15   :  { %v6011_v16 = vadd.f32 %v12136_v19, %v6010_v6  ;;  %v11302_v23 = vpop.f32.mrb[213].mxu1 }
0x1b17   :  { %v6026_v3 = vsel %vm387_vm9, %v6011_v16, -inf }
0x1b18   :  { %6027 = vmax.xlane.f32.xlu0 %v6026_v3 }
0x1b1d   :  { %11664 = vrot.lane.b32.xlu1 %v13828_v37, %s15255_s29 }
0x1b95   :  { %v6016_v14 = vpop.xlane.xlu0 %6015 }
0x1b96   :  { %v6029_v5 = vsub.f32 %v5991_v60, %v6016_v14 }
0x1b98   :  { %v6034_v62 = vmul.f32 1.442695, %v6029_v5 }
0x1b99   :  { %v6019_v10 = vpop.xlane.xlu1 %6018 }
0x1b9a   :  { %12084 = vpow2.f32 %v6034_v62  ;;  %v6030_v38 = vsub.f32 %v5996_v50, %v6019_v10 }
0x1b9c   :  { %v6036_v41 = vmul.f32 1.442695, %v6030_v38 }
0x1b9d   :  { %v6022_v59 = vpop.xlane.xlu0 %6021  ;;  %v11665_v6 = vpop.permute.xlu1 %11664 }
0x1b9e   :  { %12086 = vpow2.f32 %v6036_v41  ;;  %v6031_v56 = vsub.f32 %v6001_v51, %v6022_v59  ;;  %v11667_v14 = vunpack.i.h.bf16 %v11665_v6  ;;  %v11666_v5 = vunpack.i.l.bf16 %v11665_v6 }
0x1ba0   :  { %v6038_v44 = vmul.f32 1.442695, %v6031_v56  ;;  %v11478_v10 = vpack.c.bf16 %v11667_v14, %v11666_v5 }
0x1ba1   :  { %v6025_v61 = vpop.xlane.xlu0 %6024 }
0x1ba2   :  { %12088 = vpow2.f32 %v6038_v44  ;;  %v6032_v9 = vsub.f32 %v6006_v28, %v6025_v61 }
0x1ba4   :  { %v12085_v55 = vpop.eup %12084  ;;  %v6040_v2 = vmul.f32 1.442695, %v6032_v9 }
0x1ba5   :  { %v6044_v36 = vsel %vm374_vm8, %v12085_v55, 0.0  ;;  %v6028_v24 = vpop.xlane.xlu0 %6027 }
0x1ba6   :  { %12090 = vpow2.f32 %v6040_v2  ;;  %6045 = vadd.xlane.f32.xlu0 %v6044_v36 }
0x1ba8   :  { %v12087_v37 = vpop.eup %12086 }
0x1ba9   :  { %v6047_v58 = vsel %vm374_vm8, %v12087_v37, 0.0 }
0x1baa   :  { %6048 = vadd.xlane.f32.xlu0 %v6047_v58 }
0x1bac   :  { %v12089_v27 = vpop.eup %12088 }
0x1bad   :  { %v6050_v42 = vsel %vm374_vm8, %v12089_v27, 0.0 }
0x1bae   :  { %6051 = vadd.xlane.f32.xlu1 %v6050_v42 }
0x1bb0   :  { %v12091_v60 = vpop.eup %12090 }
0x1bb1   :  { %v6053_v34 = vsel %vm374_vm8, %v12091_v60, 0.0 }
0x1bb2   :  { %6054 = vadd.xlane.f32.xlu1 %v6053_v34 }
0x1bbe   :  { %v5855_v31 = vpop.f32.mrb[208].mxu0 }
0x1bbf   :  { %v14282_v8 = vadd.f32 %v5855_v31, %v14149_v54  ;;  %v11265_v46 = vpop.f32.mrb[209].mxu0  ;;  %v6033_v54 = vsub.f32 %v6011_v16, %v6028_v24 }
0x1bc0   :  { %11659 = vrot.lane.b32.xlu0 %v13818_v53, %s15255_s29 }
0x1bc1   :  { %v6042_v29 = vmul.f32 1.442695, %v6033_v54 }
0x1bc2   :  { %v5860_v50 = vpop.f32.mrb[210].mxu0 }
0x1bc3   :  { %v14287_v48 = vadd.f32 %v5860_v50, %v14152_v11  ;;  %6077 = vrot.lane.b32.xlu1 %v13832_v12, %s15255_s29  ;;  %v11268_v32 = vpop.f32.mrb[211].mxu0  ;;  %12092 = vpow2.f32 %v6042_v29 }
0x1bc6   :  { %v5865_v52 = vpop.f32.mrb[212].mxu0 }
0x1bc7   :  { %v14292_v51 = vadd.f32 %v5865_v52, %v14155_v33  ;;  %v11271_v49 = vpop.f32.mrb[213].mxu0 }
0x1bca   :  { %v5870_v47 = vpop.f32.mrb[214].mxu0 }
0x1bcb   :  { %v14295_v45 = vadd.f32 %v5870_v47, %v14158_v18  ;;  %v11274_v53 = vpop.f32.mrb[215].mxu0 }
0x1bcd   :  { %v12093_v12 = vpop.eup %12092 }
0x1bce   :  { %v5875_v28 = vpop.f32.mrb[216].mxu0  ;;  %v6056_v30 = vsel %vm387_vm9, %v12093_v12, 0.0 }
0x1bcf   :  { %v14298_v11 = vadd.f32 %v5875_v28, %v14161_v39  ;;  %v11277_v0 = vpop.f32.mrb[217].mxu0 }
0x1bdf   :  { %6057 = vadd.xlane.f32.xlu0 %v6056_v30 }
0x1c33   :  { %v6046_v33 = vpop.xlane.xlu0 %6045 }
0x1c34   :  { %12094 = vrcp.f32 %v6046_v33 }
0x1c37   :  { %v6049_v19 = vpop.xlane.xlu0 %6048 }
0x1c38   :  { %12096 = vrcp.f32 %v6049_v19 }
0x1c3b   :  { %v6052_v16 = vpop.xlane.xlu1 %6051  ;;  %v11660_v23 = vpop.permute.xlu0 %11659 }
0x1c3c   :  { %v11662_v18 = vunpack.i.h.bf16 %v11660_v23  ;;  %v11661_v3 = vunpack.i.l.bf16 %v11660_v23  ;;  %12098 = vrcp.f32 %v6052_v16 }
0x1c3e   :  { %v11475_v62 = vpack.c.bf16 %v11662_v18, %v11661_v3  ;;  %v12095_v38 = vpop.eup %12094 }
0x1c3f   :  { %v6055_v39 = vpop.xlane.xlu1 %6054  ;;  %v6064_v41 = vmul.f32 %v12095_v38, %v12085_v55 }
0x1c40   :  { %11476 = vmatpush3.bf16.msra.mxu0 %v11475_v62  ;;  %12100 = vrcp.f32 %v6055_v39 }
0x1c41   :  { %11477 = vmatprep.subr.bf16.mxu0 %v12161_v4 }
0x1c42   :  { %v12097_v56 = vpop.eup %12096 }
0x1c43   :  { %v6078_v59 = vpop.permute.xlu1 %6077  ;;  %v6065_v44 = vmul.f32 %v12097_v56, %v12087_v37 }
0x1c44   :  { %11479 = vmatpush3.bf16.msra.mxu0 %v11478_v10 }
0x1c45   :  { %11311 = vmatprep.subr.mxu0 %v12163_v7 }
0x1c46   :  { %v12099_v61 = vpop.eup %12098 }
0x1c47   :  { %v6066_v9 = vmul.f32 %v12099_v61, %v12089_v27  ;;  %v9496_v27 = vld [vmem:[%s15215_s6 + $0x38] sm:$0xff] }
0x1c48   :  { %11312 = vmatpush3.msk.msra.mxu0 %vm98_vm5, %v6078_v59  ;;  %11329 = vmatpush3.msra.mxu1 %v9496_v27 }
0x1c49   :  { %11314 = vmatmul.mubr.msk.f32.vlgmr.msra.gmra.mrb[218].mxu0 %vm374_vm8, %v6064_v41 }
0x1c4a   :  { %11316 = vmatprep.mubr.msk.f32.mxu0 %vm12162_vm0, %v12163_v7  ;;  %v12101_v2 = vpop.eup %12100 }
0x1c4b   :  { %v6067_v55 = vmul.f32 %v12101_v2, %v12091_v60 }
0x1c4d   :  { %11317 = vmatmul.mubr.msk.f32.gmra.mrb[220].mxu0 %vm374_vm8, %v6065_v44 }
0x1c4e   :  { %11319 = vmatprep.mubr.msk.f32.mxu0 %vm12162_vm0, %v12163_v7 }
0x1c51   :  { %11320 = vmatmul.mubr.msk.f32.gmra.mrb[222].mxu0 %vm374_vm8, %v6066_v9 }
0x1c52   :  { %11322 = vmatprep.mubr.msk.f32.mxu0 %vm12162_vm0, %v12163_v7 }
0x1c55   :  { %11323 = vmatmul.mubr.msk.f32.gmra.mrb[224].mxu0 %vm374_vm8, %v6067_v55 }
0x1c56   :  { %11325 = vmatprep.mubr.msk.f32.mxu0 %vm12162_vm0, %v12163_v7 }
0x1c6c   :  { %v6058_v36 = vpop.xlane.xlu0 %6057 }
0x1c6d   :  { %12102 = vrcp.f32 %v6058_v36 }
0x1c77   :  { %v12103_v37 = vpop.eup %12102 }
0x1c78   :  { %v6068_v58 = vmul.f32 %v12103_v37, %v12093_v12 }
0x1c7a   :  { %11326 = vmatmul.mubr.msk.f32.gmra.mrb[226].mxu0 %vm374_vm8, %v6068_v58 }
0x1c7b   :  { %6584 = vmatprep.mubr.bf16.mxu0 %v12175_v43 }
0x1d1c   :  { %v6166_v42 = vpop.f32.mrb[218].mxu0 }
0x1d1d   :  { %v11315_v60 = vpop.f32.mrb[219].mxu0  ;;  %11331 = vmatmul.mubr.msk.f32.vlgmr.msra.gmra.mrb[214].mxu1 %vm263_vm6, %v6166_v42 }
0x1d1e   :  { %11333 = vmatprep.mubr.msk.f32.mxu1 %vm12162_vm0, %v12163_v7 }
0x1d20   :  { %v6171_v34 = vpop.f32.mrb[220].mxu0 }
0x1d21   :  { %v11318_v31 = vpop.f32.mrb[221].mxu0  ;;  %11334 = vmatmul.mubr.msk.f32.gmra.mrb[216].mxu1 %vm263_vm6, %v6171_v34  ;;  %v9507_v34 = vld [vmem:[%s15217_s8 + $0x100] sm:$0xff] }
0x1d22   :  { %11336 = vmatprep.mubr.msk.f32.mxu1 %vm12162_vm0, %v12163_v7  ;;  %v9511_v31 = vld [vmem:[%s15217_s8 + $0x120] sm:$0xff] }
0x1d24   :  { %v6176_v46 = vpop.f32.mrb[222].mxu0 }
0x1d25   :  { %v11321_v50 = vpop.f32.mrb[223].mxu0  ;;  %11337 = vmatmul.mubr.msk.f32.gmra.mrb[218].mxu1 %vm263_vm6, %v6176_v46  ;;  %v9508_v46 = vld [vmem:[%s15217_s8 + $0x108] sm:$0xff] }
0x1d26   :  { %11339 = vmatprep.mubr.msk.f32.mxu1 %vm12162_vm0, %v12163_v7  ;;  %v9525_v50 = vcombine.high %v9507_v34, %v9511_v31 }
0x1d28   :  { %v6181_v32 = vpop.f32.mrb[224].mxu0  ;;  %6552 = vmatprep.subr.bf16.mxu0 %v9525_v50 }
0x1d29   :  { %v11324_v24 = vpop.f32.mrb[225].mxu0  ;;  %11340 = vmatmul.mubr.msk.f32.gmra.mrb[220].mxu1 %vm263_vm6, %v6181_v32  ;;  %v9512_v32 = vld [vmem:[%s15217_s8 + $0x128] sm:$0xff] }
0x1d2a   :  { %11342 = vmatprep.mubr.msk.f32.mxu1 %vm12162_vm0, %v12163_v7  ;;  %v9524_v24 = vcombine.low %v9507_v34, %v9511_v31  ;;  %v9517_v31 = vld [vmem:[%s15217_s8 + $0x150] sm:$0xff] }
0x1d2c   :  { %6553 = vmatpush1.bf16.msra.mxu0 %v9524_v24  ;;  %v9522_v24 = vld [vmem:[%s15217_s8 + $0x178] sm:$0xff] }
0x1d4d   :  { %v6186_v52 = vpop.f32.mrb[226].mxu0 }
0x1d4e   :  { %v11327_v49 = vpop.f32.mrb[227].mxu0  ;;  %11343 = vmatmul.mubr.msk.f32.gmra.mrb[222].mxu1 %vm263_vm6, %v6186_v52  ;;  %v9526_v52 = vcombine.low %v9508_v46, %v9512_v32 }
0x1d4f   :  { %6645 = vmatprep.mubr.bf16.mxu1 %v12175_v43  ;;  %v9527_v49 = vcombine.high %v9508_v46, %v9512_v32  ;;  %v9518_v32 = vld [vmem:[%s15217_s8 + $0x158] sm:$0xff] }
0x1d51   :  { %6613 = vmatprep.subr.bf16.mxu1 %v9527_v49 }
0x1d52   :  { %6614 = vmatpush1.bf16.msra.mxu1 %v9526_v52 }
0x1df0   :  { %v6273_v54 = vpop.f32.mrb[214].mxu1 }
0x1df1   :  { %v6297_v47 = vadd.f32 %v6273_v54, %v14282_v8  ;;  %v11332_v53 = vpop.f32.mrb[215].mxu1  ;;  %v9515_v54 = vld [vmem:[%s15217_s8 + $0x140] sm:$0xff] }
0x1df2   :  { %v9516_v53 = vld [vmem:[%s15217_s8 + $0x148] sm:$0xff] }
0x1df3   :  { %v6302_v29 = vadd.f32 %v6297_v47, %v13779_v1  ;;  %v9519_v47 = vld [vmem:[%s15217_s8 + $0x160] sm:$0xff] }
0x1df4   :  { %v6278_v28 = vpop.f32.mrb[216].mxu1 }
0x1df5   :  { %v6298_v0 = vadd.f32 %v6278_v28, %v14287_v48  ;;  %v11335_v12 = vpop.f32.mrb[217].mxu1  ;;  %v6311_v30 = vsel %vm141_vm2, %v6302_v29, 0.0  ;;  %v9520_v28 = vld [vmem:[%s15217_s8 + $0x168] sm:$0xff] }
0x1df6   :  { %6312 = vadd.xlane.f32.xlu1 %v6311_v30  ;;  %v9534_v12 = vcombine.low %v9516_v53, %v9520_v28  ;;  %v9535_v30 = vcombine.high %v9516_v53, %v9520_v28 }
0x1df7   :  { %v6303_v33 = vadd.f32 %v6298_v0, %v13785_v35  ;;  %v9532_v0 = vcombine.low %v9515_v54, %v9519_v47 }
0x1df8   :  { %v6283_v6 = vpop.f32.mrb[218].mxu1  ;;  %6615 = vmatprep.subr.bf16.mxu1 %v9535_v30 }
0x1df9   :  { %v6299_v19 = vadd.f32 %v6283_v6, %v14292_v51  ;;  %v11338_v16 = vpop.f32.mrb[219].mxu1  ;;  %v6314_v23 = vsel %vm141_vm2, %v6303_v33, 0.0  ;;  %6616 = vmatpush1.bf16.msra.mxu1 %v9534_v12  ;;  %v11797_v12 = vld [vmem:[%s15219_s10 + $0x4c0] sm:$0xff]  }
0x1dfa   :  { %6315 = vadd.xlane.f32.xlu0 %v6314_v23 }
0x1dfb   :  { %v6304_v8 = vadd.f32 %v6299_v19, %v13791_v63 }
0x1dfc   :  { %v6288_v18 = vpop.f32.mrb[220].mxu1 }
0x1dfd   :  { %v6300_v1 = vadd.f32 %v6288_v18, %v14295_v45  ;;  %v11341_v3 = vpop.f32.mrb[221].mxu1  ;;  %v6317_v48 = vsel %vm141_vm2, %v6304_v8, 0.0  ;;  %v9513_v18 = vld [vmem:[%s15217_s8 + $0x130] sm:$0xff] }
0x1dfe   :  { %6318 = vadd.xlane.f32.xlu0 %v6317_v48 }
0x1dff   :  { %v6305_v14 = vadd.f32 %v6300_v1, %v13797_v22  ;;  %v9510_v1 = vld [vmem:[%s15217_s8 + $0x118] sm:$0xff] }
0x1e01   :  { %v6320_v35 = vsel %vm141_vm2, %v6305_v14, 0.0 }
0x1e02   :  { %6321 = vadd.xlane.f32.xlu0 %v6320_v35 }
0x1e21   :  { %v6293_v5 = vpop.f32.mrb[222].mxu1 }
0x1e22   :  { %v6301_v51 = vadd.f32 %v6293_v5, %v14298_v11  ;;  %v11344_v62 = vpop.f32.mrb[223].mxu1 }
0x1e24   :  { %v6306_v39 = vadd.f32 %v6301_v51, %v13803_v13 }
0x1e26   :  { %v6323_v63 = vsel %vm1942_vm10, %v6306_v39, 0.0 }
0x1e27   :  { %6324 = vadd.xlane.f32.xlu1 %v6323_v63 }
0x1e83   :  { %v6313_v10 = vpop.xlane.xlu1 %6312 }
0x1e84   :  { %v6326_v45 = vmul.f32 0.03125, %v6313_v10 }
0x1e86   :  { %v14350_v38 = vsub.f32 %v6302_v29, %v6326_v45  ;;  %v9533_v29 = vcombine.high %v9515_v54, %v9519_v47  ;;  %v9539_v47 = vcombine.high %v9518_v32, %v9522_v24 }
0x1e87   :  { %v6316_v41 = vpop.xlane.xlu0 %6315 }
0x1e88   :  { %v6327_v59 = vmul.f32 0.03125, %v6316_v41  ;;  %v6336_v22 = vmul.f32 %v14350_v38, %v14350_v38  ;;  %6554 = vmatprep.subr.bf16.mxu0 %v9533_v29 }
0x1e89   :  { %6555 = vmatpush1.bf16.msra.mxu0 %v9532_v0  ;;  %v9538_v0 = vcombine.low %v9518_v32, %v9522_v24  ;;  %v11825_v32 = vld [vmem:[%s15219_s10 + $0x4f8] sm:$0xff]  }
0x1e8a   :  { %v14354_v56 = vsub.f32 %v6303_v33, %v6327_v59  ;;  %v6341_v44 = vsel %vm141_vm2, %v6336_v22, 0.0  ;;  %v11826_v24 = vld [vmem:[%s15219_s10 + $0x438] sm:$0xff]  }
0x1e8b   :  { %v6319_v11 = vpop.xlane.xlu0 %6318  ;;  %6342 = vadd.xlane.f32.xlu0 %v6341_v44 }
0x1e8c   :  { %v6328_v61 = vmul.f32 0.03125, %v6319_v11  ;;  %v6337_v13 = vmul.f32 %v14354_v56, %v14354_v56 }
0x1e8e   :  { %v14359_v9 = vsub.f32 %v6304_v8, %v6328_v61  ;;  %v6344_v2 = vsel %vm141_vm2, %v6337_v13, 0.0  ;;  %v9509_v8 = vld [vmem:[%s15217_s8 + $0x110] sm:$0xff] }
0x1e8f   :  { %v6322_v55 = vpop.xlane.xlu0 %6321  ;;  %6345 = vadd.xlane.f32.xlu1 %v6344_v2  ;;  %v9528_v3 = vcombine.low %v9509_v8, %v9513_v18  ;;  %v9529_v48 = vcombine.high %v9509_v8, %v9513_v18 }
0x1e90   :  { %v6329_v36 = vmul.f32 0.03125, %v6322_v55  ;;  %v6338_v37 = vmul.f32 %v14359_v9, %v14359_v9  ;;  %v9504_v55 = vld [vmem:[%s15221_s12 + $0x1] ss:$0 sm:$0xff] }
0x1e91   :  { %6674 = vmatprep.subr.bf16.mxu0 %v9529_v48 }
0x1e92   :  { %v14364_v58 = vsub.f32 %v6305_v14, %v6329_v36  ;;  %v6347_v27 = vsel %vm141_vm2, %v6338_v37, 0.0  ;;  %v9514_v14 = vld [vmem:[%s15217_s8 + $0x138] sm:$0xff] }
0x1e93   :  { %6348 = vadd.xlane.f32.xlu0 %v6347_v27  ;;  %v9530_v35 = vcombine.low %v9510_v1, %v9514_v14  ;;  %v9531_v5 = vcombine.high %v9510_v1, %v9514_v14 }
0x1e94   :  { %v6339_v42 = vmul.f32 %v14364_v58, %v14364_v58 }
0x1e95   :  { %6735 = vmatprep.subr.bf16.mxu1 %v9531_v5  ;;  %v11800_v5 = vld [vmem:[%s15219_s10 + $0x448] sm:$0xff]  }
0x1e96   :  { %v6350_v60 = vsel %vm141_vm2, %v6339_v42, 0.0  ;;  %v9505_v42 = vld [vmem:[%s15222_s13 + $0x1] ss:$0 sm:$0xff] }
0x1e97   :  { %6351 = vadd.xlane.f32.xlu1 %v6350_v60 }
0x1eb4   :  { %v6325_v33 = vpop.xlane.xlu1 %6324 }
0x1eb5   :  { %v6330_v6 = vmul.f32 0.03125, %v6325_v33 }
0x1eb7   :  { %v14394_v19 = vsub.f32 %v6306_v39, %v6330_v6 }
0x1eb9   :  { %v6340_v16 = vmul.f32 %v14394_v19, %v14394_v19 }
0x1ebb   :  { %v6353_v23 = vsel %vm1942_vm10, %v6340_v16, 0.0 }
0x1ebc   :  { %6354 = vadd.xlane.f32.xlu0 %v6353_v23 }
0x1f18   :  { %v6343_v51 = vpop.xlane.xlu0 %6342 }
0x1f19   :  { %v6356_v62 = vmul.f32 0.03125, %v6343_v51  ;;  %v11801_v51 = vld [vmem:[%s15219_s10 + $0x4c8] sm:$0xff]  }
0x1f1b   :  { %v6361_v39 = vadd.f32 1e-05, %v6356_v62  ;;  %v11802_v62 = vld [vmem:[%s15219_s10 + $0x408] sm:$0xff]  }
0x1f1c   :  { %v6346_v63 = vpop.xlane.xlu1 %6345 }
0x1f1d   :  { %12104 = vrsqrt.f32 %v6361_v39  ;;  %v6357_v10 = vmul.f32 0.03125, %v6346_v63  ;;  %v11803_v39 = vld [vmem:[%s15219_s10 + $0x488] sm:$0xff]   ;;  %v11804_v63 = vld [vmem:[%s15219_s10 + $0x450] sm:$0xff]  }
0x1f1f   :  { %v6362_v45 = vadd.f32 1e-05, %v6357_v10  ;;  %v11805_v10 = vld [vmem:[%s15219_s10 + $0x4d0] sm:$0xff]  }
0x1f20   :  { %v6349_v41 = vpop.xlane.xlu0 %6348 }
0x1f21   :  { %12106 = vrsqrt.f32 %v6362_v45  ;;  %v6358_v59 = vmul.f32 0.03125, %v6349_v41  ;;  %v11806_v45 = vld [vmem:[%s15219_s10 + $0x410] sm:$0xff]  }
0x1f22   :  { %v11807_v41 = vld [vmem:[%s15219_s10 + $0x490] sm:$0xff]  }
0x1f23   :  { %v6363_v22 = vadd.f32 1e-05, %v6358_v59  ;;  %v11808_v59 = vld [vmem:[%s15219_s10 + $0x458] sm:$0xff]  }
0x1f24   :  { %v6352_v44 = vpop.xlane.xlu1 %6351 }
0x1f25   :  { %12108 = vrsqrt.f32 %v6363_v22  ;;  %v6359_v11 = vmul.f32 0.03125, %v6352_v44  ;;  %v11809_v22 = vld [vmem:[%s15219_s10 + $0x4d8] sm:$0xff]  }
0x1f26   :  { %v11810_v44 = vld [vmem:[%s15219_s10 + $0x418] sm:$0xff]  }
0x1f27   :  { %v12105_v61 = vpop.eup %12104  ;;  %v6364_v13 = vadd.f32 1e-05, %v6359_v11  ;;  %v11811_v11 = vld [vmem:[%s15219_s10 + $0x498] sm:$0xff]  }
0x1f28   :  { %v6371_v2 = vmul.f32 %v12105_v61, %v14350_v38  ;;  %v11812_v61 = vld [vmem:[%s15219_s10 + $0x460] sm:$0xff]  }
0x1f29   :  { %12110 = vrsqrt.f32 %v6364_v13  ;;  %v11813_v13 = vld [vmem:[%s15219_s10 + $0x4e0] sm:$0xff]  }
0x1f2a   :  { %v6382_v37 = vmul.f32 %v9504_v55, %v6371_v2  ;;  %v11814_v2 = vld [vmem:[%s15219_s10 + $0x420] sm:$0xff]  }
0x1f2b   :  { %v12107_v36 = vpop.eup %12106 }
0x1f2c   :  { %v6372_v27 = vmul.f32 %v12107_v36, %v14354_v56  ;;  %v14422_v38 = vadd.f32 %v9505_v42, %v6382_v37  ;;  %v9521_v56 = vld [vmem:[%s15217_s8 + $0x170] sm:$0xff]  ;;  %v11816_v36 = vld [vmem:[%s15219_s10 + $0x468] sm:$0xff]  }
0x1f2d   :  { %v9537_v54 = vcombine.high %v9517_v31, %v9521_v56  ;;  %v9536_v28 = vcombine.low %v9517_v31, %v9521_v56  ;;  %v11817_v37 = vld [vmem:[%s15219_s10 + $0x4e8] sm:$0xff]   ;;  %v11822_v31 = vld [vmem:[%s15219_s10 + $0x430] sm:$0xff]   ;;  %v11824_v56 = vld [vmem:[%s15219_s10 + $0x478] sm:$0xff]  }
0x1f2e   :  { %v6383_v60 = vmul.f32 %v9504_v55, %v6372_v27  ;;  %v11818_v27 = vld [vmem:[%s15219_s10 + $0x428] sm:$0xff]  }
0x1f2f   :  { %v12109_v34 = vpop.eup %12108 }
0x1f30   :  { %v14424_v46 = vadd.f32 %v9505_v42, %v6383_v60  ;;  %v6373_v50 = vmul.f32 %v12109_v34, %v14359_v9  ;;  %v11820_v60 = vld [vmem:[%s15219_s10 + $0x470] sm:$0xff]  }
0x1f31   :  { %v11821_v34 = vld [vmem:[%s15219_s10 + $0x4f0] sm:$0xff]  }
0x1f32   :  { %v14438_v52 = vpack.c.bf16 %v14424_v46, %v14422_v38  ;;  %v6384_v9 = vmul.f32 %v9504_v55, %v6373_v50  ;;  %v11823_v50 = vld [vmem:[%s15219_s10 + $0x4b0] sm:$0xff]  }
0x1f33   :  { %v12111_v49 = vpop.eup %12110 }
0x1f34   :  { %v6374_v53 = vmul.f32 %v12111_v49, %v14364_v58  ;;  %9540 = vmatmul.mubr.msk.bf16.vlgmr.msra.gmra.mrb[228].mxu0 %vm141_vm2, %v14438_v52  ;;  %9543 = vmatmul.mubr.msk.bf16.vlgmr.msra.gmra.mrb[224].mxu1 %vm141_vm2, %v14438_v52  ;;  %v11796_v58 = vld [vmem:[%s15219_s10 + $0x440] sm:$0xff]   ;;  %v14453_v30 = vadd.f32 %v9505_v42, %v6384_v9  ;;  %v11827_v49 = vld [vmem:[%s15219_s10 + $0x4b8] sm:$0xff]   ;;  %v14591_v9 = vld [vmem:[%s15218_s9 + $0x10] sm:$0xff] }
0x1f35   :  { %6594 = vmatprep.mubr.bf16.mxu0 %v12175_v43  ;;  %6655 = vmatprep.mubr.bf16.mxu1 %v12175_v43 }
0x1f36   :  { %v6385_v29 = vmul.f32 %v9504_v55, %v6374_v53  ;;  %6675 = vmatpush1.bf16.msra.mxu0 %v9528_v3  ;;  %6736 = vmatpush1.bf16.msra.mxu1 %v9530_v35  ;;  %v11798_v35 = vld [vmem:[%s15219_s10 + $0x400] sm:$0xff]   ;;  %v14595_v53 = vrot.slane %v14591_v9, %v12315_v20 }
0x1f37   :  { %6676 = vmatprep.subr.bf16.mxu0 %v9537_v54  ;;  %6737 = vmatprep.subr.bf16.mxu1 %v9539_v47  ;;  %v11828_v54 = vld [vmem:[%s15219_s10 + $0x540] sm:$0xff]  }
0x1f38   :  { %v14455_v33 = vadd.f32 %v9505_v42, %v6385_v29  ;;  %v11829_v47 = vld [vmem:[%s15219_s10 + $0x5c0] sm:$0xff]   ;;  %v14599_v29 = vrot.slane %v14591_v9, %v13148_v17 }
0x1f3a   :  { %v14459_v6 = vpack.c.bf16 %v14455_v33, %v14453_v30  ;;  %6677 = vmatpush1.bf16.msra.mxu0 %v9536_v28  ;;  %6738 = vmatpush1.bf16.msra.mxu1 %v9538_v0  ;;  %v14603_v28 = vrot.slane %v14591_v9, %v13156_v15  ;;  %v14607_v0 = vrot.slane %v14591_v9, %v13159_v25 }
0x1f3b   :  { %10486 = vmatprep.subr.bf16.mxu0 %v11796_v58  ;;  %10520 = vmatprep.subr.bf16.mxu1 %v11797_v12 }
0x1f3c   :  { %9541 = vmatmul.mubr.msk.bf16.gmra.mrb[232].mxu0 %vm141_vm2, %v14459_v6  ;;  %9544 = vmatmul.mubr.msk.bf16.gmra.mrb[228].mxu1 %vm141_vm2, %v14459_v6 }
0x1f3d   :  { %6604 = vmatprep.mubr.bf16.mxu0 %v12175_v43  ;;  %6665 = vmatprep.mubr.bf16.mxu1 %v12175_v43 }
0x1f49   :  { %v6355_v16 = vpop.xlane.xlu0 %6354 }
0x1f4a   :  { %v6360_v23 = vmul.f32 0.03125, %v6355_v16 }
0x1f4c   :  { %v6365_v8 = vadd.f32 1e-05, %v6360_v23 }
0x1f4e   :  { %12112 = vrsqrt.f32 %v6365_v8 }
0x1f58   :  { %v12113_v18 = vpop.eup %12112 }
0x1f59   :  { %v6375_v1 = vmul.f32 %v12113_v18, %v14394_v19  ;;  %v11799_v19 = vld [vmem:[%s15219_s10 + $0x480] sm:$0xff]  }
0x1f5b   :  { %v6386_v3 = vmul.f32 %v9504_v55, %v6375_v1  ;;  %v11815_v55 = vld [vmem:[%s15219_s10 + $0x4a0] sm:$0xff]  }
0x1f5d   :  { %v6397_v48 = vadd.f32 %v9505_v42, %v6386_v3  ;;  %v11819_v42 = vld [vmem:[%s15219_s10 + $0x4a8] sm:$0xff]  }
0x1f5f   :  { %v14468_v14 = vpack.c.bf16 %v6397_v48, %v6397_v48 }
0x1f61   :  { %9542 = vmatmul.mubr.msk.bf16.gmra.mrb[236].mxu0 %vm141_vm2, %v14468_v14  ;;  %9545 = vmatmul.mubr.msk.bf16.gmra.mrb[232].mxu1 %vm141_vm2, %v14468_v14 }
0x1f62   :  { %6706 = vmatprep.mubr.bf16.mxu0 %v12175_v43  ;;  %6767 = vmatprep.mubr.bf16.mxu1 %v12175_v43 }
0x1f69   :  { %9546 = vmatmul.mubr.msk.bf16.vlgmr.msra.gmra.mrb[240].mxu0 %vm141_vm2, %v14438_v52  ;;  %9549 = vmatmul.mubr.msk.bf16.vlgmr.msra.gmra.mrb[236].mxu1 %vm141_vm2, %v14438_v52 }
0x1f6a   :  { %6716 = vmatprep.mubr.bf16.mxu0 %v12175_v43  ;;  %6777 = vmatprep.mubr.bf16.mxu1 %v12175_v43 }
0x1f6b   :  { %10487 = vmatpush3.bf16.msra.mxu0 %v11798_v35  ;;  %10521 = vmatpush3.bf16.msra.mxu1 %v11799_v19 }
0x1f6c   :  { %10488 = vmatprep.subr.bf16.mxu0 %v11800_v5  ;;  %10522 = vmatprep.subr.bf16.mxu1 %v11801_v51 }
0x1f6f   :  { %10489 = vmatpush3.bf16.msra.mxu0 %v11802_v62  ;;  %10523 = vmatpush3.bf16.msra.mxu1 %v11803_v39 }
0x1f70   :  { %10490 = vmatprep.subr.bf16.mxu0 %v11804_v63  ;;  %10524 = vmatprep.subr.bf16.mxu1 %v11805_v10 }
0x1f71   :  { %9547 = vmatmul.mubr.msk.bf16.gmra.mrb[244].mxu0 %vm141_vm2, %v14459_v6  ;;  %9550 = vmatmul.mubr.msk.bf16.gmra.mrb[240].mxu1 %vm141_vm2, %v14459_v6 }
0x1f72   :  { %6726 = vmatprep.mubr.bf16.mxu0 %v12175_v43  ;;  %6787 = vmatprep.mubr.bf16.mxu1 %v12175_v43 }
0x1f73   :  { %10491 = vmatpush3.bf16.msra.mxu0 %v11806_v45  ;;  %10525 = vmatpush3.bf16.msra.mxu1 %v11807_v41 }
0x1f74   :  { %10492 = vmatprep.subr.bf16.mxu0 %v11808_v59  ;;  %10526 = vmatprep.subr.bf16.mxu1 %v11809_v22 }
0x1f77   :  { %10493 = vmatpush3.bf16.msra.mxu0 %v11810_v44  ;;  %10527 = vmatpush3.bf16.msra.mxu1 %v11811_v11 }
0x1f78   :  { %10494 = vmatprep.subr.bf16.mxu0 %v11812_v61  ;;  %10528 = vmatprep.subr.bf16.mxu1 %v11813_v13 }
0x1f79   :  { %9548 = vmatmul.mubr.msk.bf16.gmra.mrb[248].mxu0 %vm141_vm2, %v14468_v14  ;;  %9551 = vmatmul.mubr.msk.bf16.gmra.mrb[244].mxu1 %vm141_vm2, %v14468_v14 }
0x1f7b   :  { %10495 = vmatpush3.bf16.msra.mxu0 %v11814_v2  ;;  %10529 = vmatpush3.bf16.msra.mxu1 %v11815_v55 }
0x1f7c   :  { %10496 = vmatprep.subr.bf16.mxu0 %v11816_v36  ;;  %10530 = vmatprep.subr.bf16.mxu1 %v11817_v37 }
0x1f7f   :  { %10497 = vmatpush3.bf16.msra.mxu0 %v11818_v27  ;;  %10531 = vmatpush3.bf16.msra.mxu1 %v11819_v42  ;;  %v11830_v42 = vld [vmem:[%s15219_s10 + $0x500] sm:$0xff]  }
0x1f80   :  { %10498 = vmatprep.subr.bf16.mxu0 %v11820_v60  ;;  %10532 = vmatprep.subr.bf16.mxu1 %v11821_v34  ;;  %v11831_v60 = vld [vmem:[%s15219_s10 + $0x580] sm:$0xff]  }
0x1f83   :  { %10499 = vmatpush3.bf16.msra.mxu0 %v11822_v31  ;;  %10533 = vmatpush3.bf16.msra.mxu1 %v11823_v50 }
0x1f84   :  { %10500 = vmatprep.subr.bf16.mxu0 %v11824_v56  ;;  %10534 = vmatprep.subr.bf16.mxu1 %v11825_v32  ;;  %v11832_v32 = vld [vmem:[%s15219_s10 + $0x548] sm:$0xff]  }
0x1f87   :  { %10501 = vmatpush3.bf16.msra.mxu0 %v11826_v24  ;;  %10535 = vmatpush3.bf16.msra.mxu1 %v11827_v49  ;;  %v11833_v24 = vld [vmem:[%s15219_s10 + $0x5c8] sm:$0xff]  }
0x1f88   :  { %10554 = vmatprep.subr.bf16.mxu0 %v11828_v54  ;;  %10588 = vmatprep.subr.bf16.mxu1 %v11829_v47 }
0x2007   :  { %v6586_v58 = vpop.f32.mrb[228].mxu0  ;;  %v6647_v12 = vpop.f32.mrb[224].mxu1 }
0x2008   :  { %v6587_v16 = vadd.f32 %v6586_v58, %v14595_v53  ;;  %v6648_v23 = vadd.f32 %v6647_v12, %v14599_v29  ;;  %v6588_v8 = vpop.f32.mrb[229].mxu0  ;;  %v6649_v18 = vpop.f32.mrb[225].mxu1 }
0x2009   :  { %v6589_v1 = vadd.f32 %v6588_v8, %v14603_v28  ;;  %v6650_v3 = vadd.f32 %v6649_v18, %v14607_v0  ;;  %v6590_v48 = vpop.f32.mrb[230].mxu0  ;;  %v6651_v35 = vpop.f32.mrb[226].mxu1 }
0x200a   :  { %v6591_v19 = vadd.f32 %v6590_v48, %v14595_v53  ;;  %v6652_v5 = vadd.f32 %v6651_v35, %v14599_v29  ;;  %v6592_v51 = vpop.f32.mrb[231].mxu0  ;;  %v6653_v62 = vpop.f32.mrb[227].mxu1  ;;  %v6796_v10 = vmax.f32 %v6587_v16, 0.0  ;;  %v6798_v45 = vmax.f32 %v6648_v23, 0.0  ;;  %v11835_v48 = vld [vmem:[%s15219_s10 + $0x588] sm:$0xff]  }
0x200b   :  { %v6593_v39 = vadd.f32 %v6592_v51, %v14603_v28  ;;  %v6654_v63 = vadd.f32 %v6653_v62, %v14607_v0  ;;  %v6797_v22 = vmax.f32 %v6589_v1, 0.0  ;;  %v6799_v44 = vmax.f32 %v6650_v3, 0.0  ;;  %v11834_v3 = vld [vmem:[%s15219_s10 + $0x508] sm:$0xff]   ;;  %v11836_v62 = vld [vmem:[%s15219_s10 + $0x550] sm:$0xff]  }
0x200c   :  { %v6804_v41 = vmax.f32 %v6591_v19, 0.0  ;;  %v6806_v59 = vmax.f32 %v6652_v5, 0.0 }
0x200d   :  { %v6805_v11 = vmax.f32 %v6593_v39, 0.0  ;;  %v6807_v61 = vmax.f32 %v6654_v63, 0.0  ;;  %v11837_v39 = vld [vmem:[%s15219_s10 + $0x5d0] sm:$0xff]  }
0x200e   :  { %v6836_v13 = vpack.c.bf16 %v6804_v41, %v6796_v10  ;;  %v6838_v2 = vpack.c.bf16 %v6806_v59, %v6798_v45 }
0x200f   :  { %v6837_v55 = vpack.c.bf16 %v6805_v11, %v6797_v22  ;;  %v6839_v36 = vpack.c.bf16 %v6807_v61, %v6799_v44  ;;  %v6596_v37 = vpop.f32.mrb[232].mxu0  ;;  %v6657_v27 = vpop.f32.mrb[228].mxu1  ;;  %v11838_v61 = vld [vmem:[%s15219_s10 + $0x510] sm:$0xff]  }
0x2010   :  { %v6597_v34 = vadd.f32 %v6596_v37, %v14595_v53  ;;  %v6658_v31 = vadd.f32 %v6657_v27, %v14599_v29  ;;  %v6598_v50 = vpop.f32.mrb[233].mxu0  ;;  %v6659_v56 = vpop.f32.mrb[229].mxu1  ;;  %v11843_v37 = vld [vmem:[%s15219_s10 + $0x598] sm:$0xff]   ;;  %v11844_v27 = vld [vmem:[%s15219_s10 + $0x560] sm:$0xff]  }
0x2011   :  { %v6599_v49 = vadd.f32 %v6598_v50, %v14603_v28  ;;  %v6660_v54 = vadd.f32 %v6659_v56, %v14607_v0  ;;  %v6600_v47 = vpop.f32.mrb[234].mxu0  ;;  %v6661_v58 = vpop.f32.mrb[230].mxu1  ;;  %7405 = vmatprep.mubr.bf16.mxu0 %v6837_v55  ;;  %7460 = vmatprep.mubr.bf16.mxu1 %v6839_v36  ;;  %v11841_v55 = vld [vmem:[%s15219_s10 + $0x5d8] sm:$0xff]   ;;  %v11849_v50 = vld [vmem:[%s15219_s10 + $0x5e8] sm:$0xff]  }
0x2012   :  { %v6601_v12 = vadd.f32 %v6600_v47, %v14595_v53  ;;  %v6662_v16 = vadd.f32 %v6661_v58, %v14599_v29  ;;  %v6602_v23 = vpop.f32.mrb[235].mxu0  ;;  %v6663_v8 = vpop.f32.mrb[231].mxu1  ;;  %7406 = vmatmul.mubr.bf16.vlgmr.msra.gmra.mrb[252].mxu0 %v6836_v13  ;;  %7461 = vmatmul.mubr.bf16.vlgmr.msra.gmra.mrb[248].mxu1 %v6838_v2  ;;  %v6812_v35 = vmax.f32 %v6597_v34, 0.0  ;;  %v6814_v19 = vmax.f32 %v6658_v31, 0.0  ;;  %v11839_v13 = vld [vmem:[%s15219_s10 + $0x590] sm:$0xff]   ;;  %v11840_v2 = vld [vmem:[%s15219_s10 + $0x558] sm:$0xff]  }
0x2013   :  { %v6603_v18 = vadd.f32 %v6602_v23, %v14603_v28  ;;  %v6664_v1 = vadd.f32 %v6663_v8, %v14607_v0  ;;  %10555 = vmatpush3.bf16.msra.mxu0 %v11830_v42  ;;  %10589 = vmatpush3.bf16.msra.mxu1 %v11831_v60  ;;  %v6813_v63 = vmax.f32 %v6599_v49, 0.0  ;;  %v6815_v10 = vmax.f32 %v6660_v54, 0.0  ;;  %v11842_v36 = vld [vmem:[%s15219_s10 + $0x518] sm:$0xff]   ;;  %v11845_v42 = vld [vmem:[%s15219_s10 + $0x5e0] sm:$0xff]   ;;  %v11848_v31 = vld [vmem:[%s15219_s10 + $0x568] sm:$0xff]  }
0x2014   :  { %v6820_v5 = vmax.f32 %v6601_v12, 0.0  ;;  %v6822_v51 = vmax.f32 %v6662_v16, 0.0  ;;  %10556 = vmatprep.subr.bf16.mxu0 %v11832_v32  ;;  %10590 = vmatprep.subr.bf16.mxu1 %v11833_v24  ;;  %v11846_v60 = vld [vmem:[%s15219_s10 + $0x520] sm:$0xff]   ;;  %v11850_v56 = vld [vmem:[%s15219_s10 + $0x528] sm:$0xff]   ;;  %v11852_v24 = vld [vmem:[%s15219_s10 + $0x570] sm:$0xff]  }
0x2015   :  { %v6821_v45 = vmax.f32 %v6603_v18, 0.0  ;;  %v6823_v41 = vmax.f32 %v6664_v1, 0.0  ;;  %v11847_v34 = vld [vmem:[%s15219_s10 + $0x5a0] sm:$0xff]   ;;  %v11851_v32 = vld [vmem:[%s15219_s10 + $0x5a8] sm:$0xff]   ;;  %v11853_v49 = vld [vmem:[%s15219_s10 + $0x5f0] sm:$0xff]  }
0x2016   :  { %v6844_v59 = vpack.c.bf16 %v6820_v5, %v6812_v35  ;;  %v6846_v22 = vpack.c.bf16 %v6822_v51, %v6814_v19  ;;  %v11854_v54 = vld [vmem:[%s15219_s10 + $0x530] sm:$0xff]   ;;  %v11856_v58 = vld [vmem:[%s15219_s10 + $0x578] sm:$0xff]   ;;  %v14712_v16 = vld [vmem:[%s15217_s8 + $0x180] sm:$0xff] }
0x2017   :  { %v6845_v44 = vpack.c.bf16 %v6821_v45, %v6813_v63  ;;  %v6847_v11 = vpack.c.bf16 %v6823_v41, %v6815_v10  ;;  %10557 = vmatpush3.bf16.msra.mxu0 %v11834_v3  ;;  %10591 = vmatpush3.bf16.msra.mxu1 %v11835_v48  ;;  %v11855_v47 = vld [vmem:[%s15219_s10 + $0x5b0] sm:$0xff]   ;;  %v11857_v12 = vld [vmem:[%s15219_s10 + $0x5f8] sm:$0xff]   ;;  %v14717_v23 = vld [vmem:[%s15217_s8 + $0x1a0] sm:$0xff] }
0x2018   :  { %10558 = vmatprep.subr.bf16.mxu0 %v11836_v62  ;;  %10592 = vmatprep.subr.bf16.mxu1 %v11837_v39  ;;  %v14722_v8 = vld [vmem:[%s15217_s8 + $0x188] sm:$0xff]  ;;  %v11858_v1 = vld [vmem:[%s15219_s10 + $0x538] sm:$0xff]   ;;  %v9763_v48 = vcombine.high %v14712_v16, %v14717_v23 }
0x2019   :  { %7413 = vmatprep.mubr.bf16.mxu0 %v6845_v44  ;;  %7468 = vmatprep.mubr.bf16.mxu1 %v6847_v11  ;;  %v14727_v18 = vld [vmem:[%s15217_s8 + $0x1a8] sm:$0xff]  ;;  %v11859_v3 = vld [vmem:[%s15219_s10 + $0x5b8] sm:$0xff]  }
0x201a   :  { %7414 = vmatmul.mubr.bf16.gmra.mrb[0].mxu0 %v6844_v59  ;;  %7469 = vmatmul.mubr.bf16.gmra.mrb[252].mxu1 %v6846_v22  ;;  %v9765_v35 = vcombine.high %v14722_v8, %v14727_v18 }
0x201b   :  { %10559 = vmatpush3.bf16.msra.mxu0 %v11838_v61  ;;  %10593 = vmatpush3.bf16.msra.mxu1 %v11839_v13 }
0x201c   :  { %10560 = vmatprep.subr.bf16.mxu0 %v11840_v2  ;;  %10594 = vmatprep.subr.bf16.mxu1 %v11841_v55  ;;  %v14745_v55 = vrot.slane %v14591_v9, %v13310_v21 }
0x201f   :  { %10561 = vmatpush3.bf16.msra.mxu0 %v11842_v36  ;;  %10595 = vmatpush3.bf16.msra.mxu1 %v11843_v37  ;;  %v14757_v36 = vrot.slane %v14591_v9, %v13321_v26 }
0x2020   :  { %10562 = vmatprep.subr.bf16.mxu0 %v11844_v27  ;;  %10596 = vmatprep.subr.bf16.mxu1 %v11845_v42 }
0x2023   :  { %10563 = vmatpush3.bf16.msra.mxu0 %v11846_v60  ;;  %10597 = vmatpush3.bf16.msra.mxu1 %v11847_v34 }
0x2024   :  { %10564 = vmatprep.subr.bf16.mxu0 %v11848_v31  ;;  %10598 = vmatprep.subr.bf16.mxu1 %v11849_v50 }
0x2027   :  { %10565 = vmatpush3.bf16.msra.mxu0 %v11850_v56  ;;  %10599 = vmatpush3.bf16.msra.mxu1 %v11851_v32 }
0x2028   :  { %10566 = vmatprep.subr.bf16.mxu0 %v11852_v24  ;;  %10600 = vmatprep.subr.bf16.mxu1 %v11853_v49 }
0x202b   :  { %10567 = vmatpush3.bf16.msra.mxu0 %v11854_v54  ;;  %10601 = vmatpush3.bf16.msra.mxu1 %v11855_v47 }
0x202c   :  { %10568 = vmatprep.subr.bf16.mxu0 %v11856_v58  ;;  %10602 = vmatprep.subr.bf16.mxu1 %v11857_v12 }
0x202f   :  { %10569 = vmatpush3.bf16.msra.mxu0 %v11858_v1  ;;  %10603 = vmatpush3.bf16.msra.mxu1 %v11859_v3 }
0x2030   :  { %7743 = vmatprep.subr.bf16.mxu0 %v9763_v48  ;;  %7804 = vmatprep.subr.bf16.mxu1 %v9765_v35 }
0x2034   :  { %v6606_v19 = vpop.f32.mrb[236].mxu0  ;;  %v6667_v5 = vpop.f32.mrb[232].mxu1 }
0x2035   :  { %v6607_v51 = vadd.f32 %v6606_v19, %v14595_v53  ;;  %v6668_v62 = vadd.f32 %v6667_v5, %v14599_v29  ;;  %v6608_v39 = vpop.f32.mrb[237].mxu0  ;;  %v6669_v63 = vpop.f32.mrb[233].mxu1  ;;  %v14749_v53 = vrot.slane %v14591_v9, %v13313_v40 }
0x2036   :  { %v6609_v10 = vadd.f32 %v6608_v39, %v14603_v28  ;;  %v6670_v45 = vadd.f32 %v6669_v63, %v14607_v0  ;;  %v6610_v41 = vpop.f32.mrb[238].mxu0  ;;  %v6671_v59 = vpop.f32.mrb[234].mxu1  ;;  %v14753_v0 = vrot.slane %v14591_v9, %v13318_v57 }
0x2037   :  { %v6828_v22 = vmax.f32 %v6607_v51, 0.0  ;;  %v6830_v44 = vmax.f32 %v6668_v62, 0.0  ;;  %v6611_v11 = vpop.f32.mrb[239].mxu0  ;;  %v6672_v61 = vpop.f32.mrb[235].mxu1  ;;  %v9753_v51 = vld [vmem:[%s15217_s8 + $0x1c0] sm:$0xff]  ;;  %v9754_v41 = vld [vmem:[%s15217_s8 + $0x1c8] sm:$0xff] }
0x2038   :  { %v6829_v13 = vmax.f32 %v6609_v10, 0.0  ;;  %v6831_v2 = vmax.f32 %v6670_v45, 0.0  ;;  %v9757_v62 = vld [vmem:[%s15217_s8 + $0x1e0] sm:$0xff]  ;;  %v9758_v59 = vld [vmem:[%s15217_s8 + $0x1e8] sm:$0xff]  ;;  %v9762_v11 = vcombine.low %v14712_v16, %v14717_v23 }
0x2039   :  { %v6852_v37 = vpack.c.bf16 %v6828_v22, %v6828_v22  ;;  %v6854_v27 = vpack.c.bf16 %v6830_v44, %v6830_v44 }
0x203a   :  { %v6853_v29 = vpack.c.bf16 %v6829_v13, %v6829_v13  ;;  %v6855_v28 = vpack.c.bf16 %v6831_v2, %v6831_v2 }
0x203c   :  { %v6708_v42 = vpop.f32.mrb[240].mxu0  ;;  %v6769_v60 = vpop.f32.mrb[236].mxu1  ;;  %7421 = vmatprep.mubr.bf16.mxu0 %v6853_v29  ;;  %7476 = vmatprep.mubr.bf16.mxu1 %v6855_v28  ;;  %v9764_v28 = vcombine.low %v14722_v8, %v14727_v18  ;;  %v14798_v8 = vld [vmem:[%s15217_s8 + $0x198] sm:$0xff] }
0x203d   :  { %v6709_v34 = vadd.f32 %v6708_v42, %v14745_v55  ;;  %v6770_v31 = vadd.f32 %v6769_v60, %v14749_v53  ;;  %v6710_v50 = vpop.f32.mrb[241].mxu0  ;;  %v6771_v56 = vpop.f32.mrb[237].mxu1  ;;  %7422 = vmatmul.mubr.bf16.gmra.mrb[4].mxu0 %v6852_v37  ;;  %7477 = vmatmul.mubr.bf16.gmra.mrb[0].mxu1 %v6854_v27  ;;  %v9770_v37 = vcombine.low %v9753_v51, %v9757_v62  ;;  %v14786_v27 = vld [vmem:[%s15217_s8 + $0x190] sm:$0xff]  ;;  %v14803_v18 = vld [vmem:[%s15217_s8 + $0x1b8] sm:$0xff] }
0x203e   :  { %v6711_v32 = vadd.f32 %v6710_v50, %v14753_v0  ;;  %v6772_v24 = vadd.f32 %v6771_v56, %v14757_v36  ;;  %v6712_v9 = vpop.f32.mrb[242].mxu0  ;;  %v6773_v49 = vpop.f32.mrb[238].mxu1  ;;  %v14791_v42 = vld [vmem:[%s15217_s8 + $0x1b0] sm:$0xff]  ;;  %v9773_v50 = vcombine.high %v9754_v41, %v9758_v59 }
0x203f   :  { %v6713_v54 = vadd.f32 %v6712_v9, %v14745_v55  ;;  %v6774_v47 = vadd.f32 %v6773_v49, %v14749_v53  ;;  %v6714_v58 = vpop.f32.mrb[243].mxu0  ;;  %v6775_v12 = vpop.f32.mrb[239].mxu1  ;;  %v6800_v48 = vmax.f32 %v6709_v34, 0.0  ;;  %v6802_v35 = vmax.f32 %v6770_v31, 0.0 }
0x2040   :  { %v6715_v1 = vadd.f32 %v6714_v58, %v14753_v0  ;;  %v6776_v3 = vadd.f32 %v6775_v12, %v14757_v36  ;;  %v6801_v39 = vmax.f32 %v6711_v32, 0.0  ;;  %v6803_v63 = vmax.f32 %v6772_v24, 0.0 }
0x2041   :  { %v6808_v19 = vmax.f32 %v6713_v54, 0.0  ;;  %v6810_v5 = vmax.f32 %v6774_v47, 0.0  ;;  %v9771_v31 = vcombine.high %v9753_v51, %v9757_v62  ;;  %v9772_v49 = vcombine.low %v9754_v41, %v9758_v59 }
0x2042   :  { %v6809_v10 = vmax.f32 %v6715_v1, 0.0  ;;  %v6811_v45 = vmax.f32 %v6776_v3, 0.0  ;;  %v9767_v1 = vcombine.high %v14786_v27, %v14791_v42 }
0x2043   :  { %v6840_v22 = vpack.c.bf16 %v6808_v19, %v6800_v48  ;;  %v6842_v44 = vpack.c.bf16 %v6810_v5, %v6802_v35  ;;  %v9769_v35 = vcombine.high %v14798_v8, %v14803_v18 }
0x2044   :  { %v6841_v61 = vpack.c.bf16 %v6809_v10, %v6801_v39  ;;  %v6843_v13 = vpack.c.bf16 %v6811_v45, %v6803_v63  ;;  %v6718_v2 = vpop.f32.mrb[244].mxu0  ;;  %v6779_v29 = vpop.f32.mrb[240].mxu1 }
0x2045   :  { %v6719_v16 = vadd.f32 %v6718_v2, %v14745_v55  ;;  %v6780_v23 = vadd.f32 %v6779_v29, %v14749_v53  ;;  %v6720_v60 = vpop.f32.mrb[245].mxu0  ;;  %v6781_v34 = vpop.f32.mrb[241].mxu1 }
0x2046   :  { %v6721_v56 = vadd.f32 %v6720_v60, %v14753_v0  ;;  %v6782_v32 = vadd.f32 %v6781_v34, %v14757_v36  ;;  %v6722_v24 = vpop.f32.mrb[246].mxu0  ;;  %v6783_v9 = vpop.f32.mrb[242].mxu1  ;;  %7515 = vmatprep.mubr.bf16.mxu0 %v6841_v61  ;;  %7570 = vmatprep.mubr.bf16.mxu1 %v6843_v13 }
0x2047   :  { %v6723_v54 = vadd.f32 %v6722_v24, %v14745_v55  ;;  %v6784_v47 = vadd.f32 %v6783_v9, %v14749_v53  ;;  %v6724_v58 = vpop.f32.mrb[247].mxu0  ;;  %v6785_v12 = vpop.f32.mrb[243].mxu1  ;;  %7516 = vmatmul.mubr.bf16.vlgmr.msra.gmra.mrb[8].mxu0 %v6840_v22  ;;  %7571 = vmatmul.mubr.bf16.vlgmr.msra.gmra.mrb[4].mxu1 %v6842_v44  ;;  %v6816_v19 = vmax.f32 %v6719_v16, 0.0  ;;  %v6818_v5 = vmax.f32 %v6780_v23, 0.0 }
0x2048   :  { %v6725_v3 = vadd.f32 %v6724_v58, %v14753_v0  ;;  %v6786_v48 = vadd.f32 %v6785_v12, %v14757_v36  ;;  %7744 = vmatpush1.bf16.msra.mxu0 %v9762_v11  ;;  %7805 = vmatpush1.bf16.msra.mxu1 %v9764_v28  ;;  %v6817_v39 = vmax.f32 %v6721_v56, 0.0  ;;  %v6819_v63 = vmax.f32 %v6782_v32, 0.0 }
0x2049   :  { %v6824_v51 = vmax.f32 %v6723_v54, 0.0  ;;  %v6826_v62 = vmax.f32 %v6784_v47, 0.0  ;;  %7745 = vmatprep.subr.bf16.mxu0 %v9771_v31  ;;  %7806 = vmatprep.subr.bf16.mxu1 %v9773_v50  ;;  %v9756_v54 = vld [vmem:[%s15217_s8 + $0x1d8] sm:$0xff]  ;;  %v9766_v58 = vcombine.low %v14786_v27, %v14791_v42  ;;  %v9768_v12 = vcombine.low %v14798_v8, %v14803_v18  ;;  %v11861_v27 = vld [vmem:[%s15219_s10 + $0x6c0] sm:$0xff]   ;;  %v11865_v42 = vld [vmem:[%s15219_s10 + $0x6c8] sm:$0xff]  }
0x204a   :  { %v6825_v10 = vmax.f32 %v6725_v3, 0.0  ;;  %v6827_v45 = vmax.f32 %v6786_v48, 0.0  ;;  %v9760_v47 = vld [vmem:[%s15217_s8 + $0x1f8] sm:$0xff]  ;;  %v11866_v8 = vld [vmem:[%s15219_s10 + $0x608] sm:$0xff]  }
0x204b   :  { %v6848_v41 = vpack.c.bf16 %v6824_v51, %v6816_v19  ;;  %v6850_v59 = vpack.c.bf16 %v6826_v62, %v6818_v5  ;;  %v9777_v3 = vcombine.high %v9756_v54, %v9760_v47  ;;  %v11867_v18 = vld [vmem:[%s15219_s10 + $0x688] sm:$0xff]   ;;  %v11868_v19 = vld [vmem:[%s15219_s10 + $0x650] sm:$0xff]  }
0x204c   :  { %v6849_v22 = vpack.c.bf16 %v6825_v10, %v6817_v39  ;;  %v6851_v44 = vpack.c.bf16 %v6827_v45, %v6819_v63  ;;  %v6728_v61 = vpop.f32.mrb[248].mxu0  ;;  %v6789_v11 = vpop.f32.mrb[244].mxu1  ;;  %7746 = vmatpush1.bf16.msra.mxu0 %v9770_v37  ;;  %7807 = vmatpush1.bf16.msra.mxu1 %v9772_v49  ;;  %v9759_v49 = vld [vmem:[%s15217_s8 + $0x1f0] sm:$0xff]  ;;  %v11872_v39 = vld [vmem:[%s15219_s10 + $0x658] sm:$0xff]  }
0x204d   :  { %v6729_v13 = vadd.f32 %v6728_v61, %v14745_v55  ;;  %v6790_v2 = vadd.f32 %v6789_v11, %v14749_v53  ;;  %v6730_v29 = vpop.f32.mrb[249].mxu0  ;;  %v6791_v28 = vpop.f32.mrb[245].mxu1  ;;  %7865 = vmatprep.subr.bf16.mxu0 %v9767_v1  ;;  %7926 = vmatprep.subr.bf16.mxu1 %v9769_v35  ;;  %v9776_v35 = vcombine.low %v9756_v54, %v9760_v47  ;;  %v11869_v5 = vld [vmem:[%s15219_s10 + $0x6d0] sm:$0xff]   ;;  %v11873_v63 = vld [vmem:[%s15219_s10 + $0x6d8] sm:$0xff]   ;;  %v11880_v61 = vld [vmem:[%s15219_s10 + $0x668] sm:$0xff]  }
0x204e   :  { %v6731_v16 = vadd.f32 %v6730_v29, %v14753_v0  ;;  %v6792_v23 = vadd.f32 %v6791_v28, %v14757_v36  ;;  %v6732_v60 = vpop.f32.mrb[250].mxu0  ;;  %v6793_v34 = vpop.f32.mrb[246].mxu1  ;;  %7523 = vmatprep.mubr.bf16.mxu0 %v6849_v22  ;;  %7578 = vmatprep.mubr.bf16.mxu1 %v6851_v44  ;;  %v9755_v36 = vld [vmem:[%s15217_s8 + $0x1d0] sm:$0xff]  ;;  %v11874_v10 = vld [vmem:[%s15219_s10 + $0x618] sm:$0xff]   ;;  %v11878_v22 = vld [vmem:[%s15219_s10 + $0x620] sm:$0xff]  }
0x204f   :  { %v6733_v31 = vpop.f32.mrb[251].mxu0  ;;  %v6794_v50 = vpop.f32.mrb[247].mxu1  ;;  %7524 = vmatmul.mubr.bf16.gmra.mrb[12].mxu0 %v6848_v41  ;;  %7579 = vmatmul.mubr.bf16.gmra.mrb[8].mxu1 %v6850_v59  ;;  %v6832_v56 = vmax.f32 %v6729_v13, 0.0  ;;  %v6834_v53 = vmax.f32 %v6790_v2, 0.0  ;;  %v9775_v1 = vcombine.high %v9755_v36, %v9759_v49  ;;  %v9774_v48 = vcombine.low %v9755_v36, %v9759_v49  ;;  %v11870_v51 = vld [vmem:[%s15219_s10 + $0x610] sm:$0xff]   ;;  %v11875_v45 = vld [vmem:[%s15219_s10 + $0x698] sm:$0xff]  }
0x2050   :  { %v6833_v37 = vmax.f32 %v6731_v16, 0.0  ;;  %v6835_v55 = vmax.f32 %v6792_v23, 0.0  ;;  %v11871_v62 = vld [vmem:[%s15219_s10 + $0x690] sm:$0xff]   ;;  %v11876_v41 = vld [vmem:[%s15219_s10 + $0x660] sm:$0xff]   ;;  %v11881_v11 = vld [vmem:[%s15219_s10 + $0x6e8] sm:$0xff]  }
0x2051   :  { %v6856_v9 = vpack.c.bf16 %v6832_v56, %v6832_v56  ;;  %v6858_v0 = vpack.c.bf16 %v6834_v53, %v6834_v53  ;;  %v11877_v59 = vld [vmem:[%s15219_s10 + $0x6e0] sm:$0xff]   ;;  %v11882_v13 = vld [vmem:[%s15219_s10 + $0x628] sm:$0xff]   ;;  %v11884_v29 = vld [vmem:[%s15219_s10 + $0x670] sm:$0xff]  }
0x2052   :  { %v6857_v32 = vpack.c.bf16 %v6833_v37, %v6833_v37  ;;  %v6859_v24 = vpack.c.bf16 %v6835_v55, %v6835_v55  ;;  %v11879_v44 = vld [vmem:[%s15219_s10 + $0x6a0] sm:$0xff]   ;;  %v11883_v2 = vld [vmem:[%s15219_s10 + $0x6a8] sm:$0xff]   ;;  %v11885_v28 = vld [vmem:[%s15219_s10 + $0x6f0] sm:$0xff]  }
0x2053   :  { %v11886_v16 = vld [vmem:[%s15219_s10 + $0x630] sm:$0xff]   ;;  %v11888_v60 = vld [vmem:[%s15219_s10 + $0x678] sm:$0xff]   ;;  %v11892_v37 = vld [vmem:[%s15219_s10 + $0x740] sm:$0xff]  }
0x2054   :  { %7531 = vmatprep.mubr.bf16.mxu0 %v6857_v32  ;;  %7586 = vmatprep.mubr.bf16.mxu1 %v6859_v24  ;;  %v11887_v23 = vld [vmem:[%s15219_s10 + $0x6b0] sm:$0xff]   ;;  %v11889_v34 = vld [vmem:[%s15219_s10 + $0x6f8] sm:$0xff]   ;;  %v11893_v55 = vld [vmem:[%s15219_s10 + $0x7c0] sm:$0xff]  }
0x2055   :  { %v11890_v31 = vld [vmem:[%s15219_s10 + $0x638] sm:$0xff]  }
0x2056   :  { %v11891_v50 = vld [vmem:[%s15219_s10 + $0x6b8] sm:$0xff]  }
0x2057   :  { %7532 = vmatmul.mubr.bf16.gmra.mrb[16].mxu0 %v6856_v9  ;;  %7587 = vmatmul.mubr.bf16.gmra.mrb[12].mxu1 %v6858_v0 }
0x2058   :  { %7775 = vmatprep.mubr.bf16.mxu0 %v12175_v43  ;;  %7836 = vmatprep.mubr.bf16.mxu1 %v12175_v43 }
0x205f   :  { %9778 = vmatmul.mubr.msk.bf16.vlgmr.msra.gmra.mrb[20].mxu0 %vm141_vm2, %v14438_v52  ;;  %9781 = vmatmul.mubr.msk.bf16.vlgmr.msra.gmra.mrb[16].mxu1 %vm141_vm2, %v14438_v52 }
0x2060   :  { %7785 = vmatprep.mubr.bf16.mxu0 %v12175_v43  ;;  %7846 = vmatprep.mubr.bf16.mxu1 %v12175_v43 }
0x2061   :  { %7866 = vmatpush1.bf16.msra.mxu0 %v9766_v58  ;;  %7927 = vmatpush1.bf16.msra.mxu1 %v9768_v12 }
0x2062   :  { %7867 = vmatprep.subr.bf16.mxu0 %v9775_v1  ;;  %7928 = vmatprep.subr.bf16.mxu1 %v9777_v3 }
0x2065   :  { %7868 = vmatpush1.bf16.msra.mxu0 %v9774_v48  ;;  %7929 = vmatpush1.bf16.msra.mxu1 %v9776_v35 }
0x2066   :  { %10656 = vmatprep.subr.bf16.mxu1 %v11861_v27 }
0x2067   :  { %9779 = vmatmul.mubr.msk.bf16.gmra.mrb[24].mxu0 %vm141_vm2, %v14459_v6  ;;  %9782 = vmatmul.mubr.msk.bf16.gmra.mrb[20].mxu1 %vm141_vm2, %v14459_v6 }
0x2068   :  { %7795 = vmatprep.mubr.bf16.mxu0 %v12175_v43  ;;  %7856 = vmatprep.mubr.bf16.mxu1 %v12175_v43 }
0x206f   :  { %9780 = vmatmul.mubr.msk.bf16.gmra.mrb[28].mxu0 %vm141_vm2, %v14468_v14  ;;  %9783 = vmatmul.mubr.msk.bf16.gmra.mrb[24].mxu1 %vm141_vm2, %v14468_v14 }
0x2070   :  { %7897 = vmatprep.mubr.bf16.mxu0 %v12175_v43  ;;  %7958 = vmatprep.mubr.bf16.mxu1 %v12175_v43 }
0x2077   :  { %9784 = vmatmul.mubr.msk.bf16.vlgmr.msra.gmra.mrb[32].mxu0 %vm141_vm2, %v14438_v52  ;;  %9787 = vmatmul.mubr.msk.bf16.vlgmr.msra.gmra.mrb[28].mxu1 %vm141_vm2, %v14438_v52  ;;  %v11860_v52 = vld [vmem:[%s15219_s10 + $0x640] sm:$0xff]  }
0x2078   :  { %7907 = vmatprep.mubr.bf16.mxu0 %v12175_v43  ;;  %7968 = vmatprep.mubr.bf16.mxu1 %v12175_v43 }
0x2079   :  { %10622 = vmatprep.subr.bf16.mxu0 %v11860_v52 }
0x207f   :  { %9785 = vmatmul.mubr.msk.bf16.gmra.mrb[36].mxu0 %vm141_vm2, %v14459_v6  ;;  %9788 = vmatmul.mubr.msk.bf16.gmra.mrb[32].mxu1 %vm141_vm2, %v14459_v6  ;;  %v11862_v6 = vld [vmem:[%s15219_s10 + $0x600] sm:$0xff]  }
0x2080   :  { %7917 = vmatprep.mubr.bf16.mxu0 %v12175_v43  ;;  %7978 = vmatprep.mubr.bf16.mxu1 %v12175_v43  ;;  %v11863_v43 = vld [vmem:[%s15219_s10 + $0x680] sm:$0xff]  }
0x2081   :  { %10623 = vmatpush3.bf16.msra.mxu0 %v11862_v6  ;;  %10657 = vmatpush3.bf16.msra.mxu1 %v11863_v43 }
0x2082   :  { %10658 = vmatprep.subr.bf16.mxu1 %v11865_v42 }
0x2085   :  { %10659 = vmatpush3.bf16.msra.mxu1 %v11867_v18 }
0x2086   :  { %10660 = vmatprep.subr.bf16.mxu1 %v11869_v5 }
0x2087   :  { %9786 = vmatmul.mubr.msk.bf16.gmra.mrb[40].mxu0 %vm141_vm2, %v14468_v14  ;;  %9789 = vmatmul.mubr.msk.bf16.gmra.mrb[36].mxu1 %vm141_vm2, %v14468_v14  ;;  %v11864_v14 = vld [vmem:[%s15219_s10 + $0x648] sm:$0xff]  }
0x2088   :  { %10624 = vmatprep.subr.bf16.mxu0 %v11864_v14 }
0x2089   :  { %10625 = vmatpush3.bf16.msra.mxu0 %v11866_v8  ;;  %10661 = vmatpush3.bf16.msra.mxu1 %v11871_v62 }
0x208a   :  { %10626 = vmatprep.subr.bf16.mxu0 %v11868_v19  ;;  %10662 = vmatprep.subr.bf16.mxu1 %v11873_v63 }
0x208d   :  { %10627 = vmatpush3.bf16.msra.mxu0 %v11870_v51  ;;  %10663 = vmatpush3.bf16.msra.mxu1 %v11875_v45 }
0x208e   :  { %10628 = vmatprep.subr.bf16.mxu0 %v11872_v39  ;;  %10664 = vmatprep.subr.bf16.mxu1 %v11877_v59 }
0x2091   :  { %10629 = vmatpush3.bf16.msra.mxu0 %v11874_v10  ;;  %10665 = vmatpush3.bf16.msra.mxu1 %v11879_v44 }
0x2092   :  { %10630 = vmatprep.subr.bf16.mxu0 %v11876_v41  ;;  %10666 = vmatprep.subr.bf16.mxu1 %v11881_v11 }
0x2095   :  { %10631 = vmatpush3.bf16.msra.mxu0 %v11878_v22  ;;  %10667 = vmatpush3.bf16.msra.mxu1 %v11883_v2 }
0x2096   :  { %10632 = vmatprep.subr.bf16.mxu0 %v11880_v61  ;;  %10668 = vmatprep.subr.bf16.mxu1 %v11885_v28 }
0x2099   :  { %10633 = vmatpush3.bf16.msra.mxu0 %v11882_v13  ;;  %10669 = vmatpush3.bf16.msra.mxu1 %v11887_v23 }
0x209a   :  { %10634 = vmatprep.subr.bf16.mxu0 %v11884_v29  ;;  %10670 = vmatprep.subr.bf16.mxu1 %v11889_v34 }
0x209d   :  { %10635 = vmatpush3.bf16.msra.mxu0 %v11886_v16  ;;  %10671 = vmatpush3.bf16.msra.mxu1 %v11891_v50 }
0x209e   :  { %10636 = vmatprep.subr.bf16.mxu0 %v11888_v60  ;;  %10724 = vmatprep.subr.bf16.mxu1 %v11893_v55 }
0x20a1   :  { %10637 = vmatpush3.bf16.msra.mxu0 %v11890_v31 }
0x20a2   :  { %10690 = vmatprep.subr.bf16.mxu0 %v11892_v37 }
0x20e5   :  { %v10502_v56 = vpop.f32.mrb[252].mxu0  ;;  %v10536_v53 = vpop.f32.mrb[248].mxu1 }
0x20e6   :  { %v10503_v32 = vpop.f32.mrb[253].mxu0  ;;  %v10537_v24 = vpop.f32.mrb[249].mxu1 }
0x20e7   :  { %v10504_v9 = vadd.f32 %v10503_v32, %v10502_v56  ;;  %v10538_v0 = vadd.f32 %v10537_v24, %v10536_v53  ;;  %v10505_v36 = vpop.f32.mrb[254].mxu0  ;;  %v10539_v49 = vpop.f32.mrb[250].mxu1 }
0x20e8   :  { %v10506_v54 = vpop.f32.mrb[255].mxu0  ;;  %v10540_v47 = vpop.f32.mrb[251].mxu1 }
0x20e9   :  { %v7463_v58 = vadd.f32 %v10538_v0, %v10504_v9  ;;  %v10507_v12 = vadd.f32 %v10506_v54, %v10505_v36  ;;  %v10541_v1 = vadd.f32 %v10540_v47, %v10539_v49 }
0x20eb   :  { %v7466_v3 = vadd.f32 %v10541_v1, %v10507_v12 }
0x20ed   :  { %v10508_v48 = vpop.f32.mrb[0].mxu0  ;;  %v10542_v35 = vpop.f32.mrb[252].mxu1 }
0x20ee   :  { %v10509_v52 = vpop.f32.mrb[1].mxu0  ;;  %v10543_v27 = vpop.f32.mrb[253].mxu1 }
0x20ef   :  { %v10510_v6 = vadd.f32 %v10509_v52, %v10508_v48  ;;  %v10544_v43 = vadd.f32 %v10543_v27, %v10542_v35  ;;  %v10511_v14 = vpop.f32.mrb[2].mxu0  ;;  %v10545_v42 = vpop.f32.mrb[254].mxu1 }
0x20f0   :  { %v10512_v8 = vpop.f32.mrb[3].mxu0  ;;  %v10546_v18 = vpop.f32.mrb[255].mxu1 }
0x20f1   :  { %v7471_v19 = vadd.f32 %v10544_v43, %v10510_v6  ;;  %v10513_v5 = vadd.f32 %v10512_v8, %v10511_v14  ;;  %v10547_v51 = vadd.f32 %v10546_v18, %v10545_v42 }
0x20f3   :  { %v7474_v62 = vadd.f32 %v10547_v51, %v10513_v5  ;;  %v14984_v5 = vld [vmem:[%s15218_s9 + $0x18] sm:$0xff] }
0x2110   :  { %v10514_v39 = vpop.f32.mrb[4].mxu0  ;;  %v10548_v63 = vpop.f32.mrb[0].mxu1 }
0x2111   :  { %v10515_v10 = vpop.f32.mrb[5].mxu0  ;;  %v10549_v45 = vpop.f32.mrb[1].mxu1  ;;  %v14988_v39 = vrot.slane %v14984_v5, %v12315_v20  ;;  %v14996_v63 = vrot.slane %v14984_v5, %v13156_v15 }
0x2112   :  { %v10517_v41 = vpop.f32.mrb[6].mxu0  ;;  %v10551_v59 = vpop.f32.mrb[2].mxu1  ;;  %v15000_v10 = vrot.slane %v14984_v5, %v13159_v25 }
0x2113   :  { %v10518_v22 = vpop.f32.mrb[7].mxu0  ;;  %v10552_v44 = vpop.f32.mrb[3].mxu1 }
0x211a   :  { %v10570_v61 = vpop.f32.mrb[8].mxu0  ;;  %v10604_v11 = vpop.f32.mrb[4].mxu1 }
0x211b   :  { %v10571_v13 = vpop.f32.mrb[9].mxu0  ;;  %v10605_v2 = vpop.f32.mrb[5].mxu1 }
0x211c   :  { %v10572_v29 = vadd.f32 %v10571_v13, %v10570_v61  ;;  %v10606_v28 = vadd.f32 %v10605_v2, %v10604_v11  ;;  %v10573_v16 = vpop.f32.mrb[10].mxu0  ;;  %v10607_v23 = vpop.f32.mrb[6].mxu1 }
0x211d   :  { %v10574_v60 = vpop.f32.mrb[11].mxu0  ;;  %v10608_v34 = vpop.f32.mrb[7].mxu1 }
0x211e   :  { %v7518_v31 = vadd.f32 %v10572_v29, %v7463_v58  ;;  %v10575_v50 = vadd.f32 %v10574_v60, %v10573_v16  ;;  %v10609_v37 = vadd.f32 %v10608_v34, %v10607_v23 }
0x2120   :  { %v14973_v55 = vadd.f32 %v10606_v28, %v7518_v31  ;;  %v7521_v56 = vadd.f32 %v10575_v50, %v7466_v3 }
0x2122   :  { %v14975_v53 = vadd.f32 %v10609_v37, %v7521_v56  ;;  %v10576_v32 = vpop.f32.mrb[12].mxu0  ;;  %v10610_v24 = vpop.f32.mrb[8].mxu1 }
0x2123   :  { %v10577_v9 = vpop.f32.mrb[13].mxu0  ;;  %v10611_v0 = vpop.f32.mrb[9].mxu1 }
0x2124   :  { %v10578_v36 = vadd.f32 %v10577_v9, %v10576_v32  ;;  %v10612_v49 = vadd.f32 %v10611_v0, %v10610_v24  ;;  %v10579_v54 = vpop.f32.mrb[14].mxu0  ;;  %v10613_v47 = vpop.f32.mrb[10].mxu1 }
0x2125   :  { %v10580_v12 = vpop.f32.mrb[15].mxu0  ;;  %v10614_v1 = vpop.f32.mrb[11].mxu1 }
0x2126   :  { %v7526_v48 = vadd.f32 %v10578_v36, %v7471_v19  ;;  %v10581_v35 = vadd.f32 %v10580_v12, %v10579_v54  ;;  %v10615_v58 = vadd.f32 %v10614_v1, %v10613_v47  ;;  %v11894_v47 = vld [vmem:[%s15219_s10 + $0x700] sm:$0xff]  }
0x2127   :  { %v11895_v12 = vld [vmem:[%s15219_s10 + $0x780] sm:$0xff]  }
0x2128   :  { %v14977_v52 = vadd.f32 %v10612_v49, %v7526_v48  ;;  %v7529_v27 = vadd.f32 %v10581_v35, %v7474_v62  ;;  %v14992_v62 = vrot.slane %v14984_v5, %v13148_v17 }
0x212a   :  { %v14979_v6 = vadd.f32 %v10615_v58, %v7529_v27  ;;  %v10582_v3 = vpop.f32.mrb[16].mxu0  ;;  %v10616_v43 = vpop.f32.mrb[12].mxu1  ;;  %v11896_v27 = vld [vmem:[%s15219_s10 + $0x748] sm:$0xff]  }
0x212b   :  { %v10583_v14 = vpop.f32.mrb[17].mxu0  ;;  %v10617_v42 = vpop.f32.mrb[13].mxu1  ;;  %v11897_v3 = vld [vmem:[%s15219_s10 + $0x7c8] sm:$0xff]  }
0x212c   :  { %v10585_v8 = vpop.f32.mrb[18].mxu0  ;;  %v10619_v18 = vpop.f32.mrb[14].mxu1 }
0x212d   :  { %v10586_v51 = vpop.f32.mrb[19].mxu0  ;;  %v10620_v19 = vpop.f32.mrb[15].mxu1 }
0x2132   :  { %v7777_v45 = vpop.f32.mrb[20].mxu0  ;;  %v7838_v41 = vpop.f32.mrb[16].mxu1 }
0x2133   :  { %v7778_v59 = vadd.f32 %v7777_v45, %v14988_v39  ;;  %v7839_v22 = vadd.f32 %v7838_v41, %v14992_v62  ;;  %v7779_v20 = vpop.f32.mrb[21].mxu0  ;;  %v7840_v44 = vpop.f32.mrb[17].mxu1 }
0x2134   :  { %v7780_v61 = vadd.f32 %v7779_v20, %v14996_v63  ;;  %v7841_v17 = vadd.f32 %v7840_v44, %v15000_v10  ;;  %v7781_v11 = vpop.f32.mrb[22].mxu0  ;;  %v7842_v13 = vpop.f32.mrb[18].mxu1  ;;  %v11899_v20 = vld [vmem:[%s15219_s10 + $0x788] sm:$0xff]  }
0x2135   :  { %v7782_v15 = vadd.f32 %v7781_v11, %v14988_v39  ;;  %v7843_v2 = vadd.f32 %v7842_v13, %v14992_v62  ;;  %v7783_v25 = vpop.f32.mrb[23].mxu0  ;;  %v7844_v29 = vpop.f32.mrb[19].mxu1  ;;  %v7987_v23 = vmax.f32 %v7778_v59, 0.0  ;;  %v7989_v60 = vmax.f32 %v7839_v22, 0.0  ;;  %v11898_v22 = vld [vmem:[%s15219_s10 + $0x708] sm:$0xff]   ;;  %v11900_v13 = vld [vmem:[%s15219_s10 + $0x750] sm:$0xff]  }
0x2136   :  { %v7784_v28 = vadd.f32 %v7783_v25, %v14996_v63  ;;  %v7845_v16 = vadd.f32 %v7844_v29, %v15000_v10  ;;  %v7988_v50 = vmax.f32 %v7780_v61, 0.0  ;;  %v7990_v37 = vmax.f32 %v7841_v17, 0.0 }
0x2137   :  { %v7995_v34 = vmax.f32 %v7782_v15, 0.0  ;;  %v7997_v31 = vmax.f32 %v7843_v2, 0.0  ;;  %v11901_v15 = vld [vmem:[%s15219_s10 + $0x7d0] sm:$0xff]  }
0x2138   :  { %v7996_v56 = vmax.f32 %v7784_v28, 0.0  ;;  %v7998_v32 = vmax.f32 %v7845_v16, 0.0 }
0x2139   :  { %v8027_v24 = vpack.c.bf16 %v7995_v34, %v7987_v23  ;;  %v8029_v9 = vpack.c.bf16 %v7997_v31, %v7989_v60 }
0x213a   :  { %v8028_v0 = vpack.c.bf16 %v7996_v56, %v7988_v50  ;;  %v8030_v36 = vpack.c.bf16 %v7998_v32, %v7990_v37  ;;  %v7787_v49 = vpop.f32.mrb[24].mxu0  ;;  %v7848_v54 = vpop.f32.mrb[20].mxu1  ;;  %v11902_v37 = vld [vmem:[%s15219_s10 + $0x710] sm:$0xff]  }
0x213b   :  { %v7788_v1 = vadd.f32 %v7787_v49, %v14988_v39  ;;  %v7849_v48 = vadd.f32 %v7848_v54, %v14992_v62  ;;  %v7789_v35 = vpop.f32.mrb[25].mxu0  ;;  %v7850_v58 = vpop.f32.mrb[21].mxu1  ;;  %v11903_v56 = vld [vmem:[%s15219_s10 + $0x790] sm:$0xff]   ;;  %v11905_v49 = vld [vmem:[%s15219_s10 + $0x7d8] sm:$0xff]  }
0x213c   :  { %v7790_v43 = vadd.f32 %v7789_v35, %v14996_v63  ;;  %v7851_v14 = vadd.f32 %v7850_v58, %v15000_v10  ;;  %v7791_v42 = vpop.f32.mrb[26].mxu0  ;;  %v7852_v8 = vpop.f32.mrb[22].mxu1  ;;  %8596 = vmatprep.mubr.bf16.mxu0 %v8028_v0  ;;  %8651 = vmatprep.mubr.bf16.mxu1 %v8030_v36  ;;  %v11904_v36 = vld [vmem:[%s15219_s10 + $0x758] sm:$0xff]  }
0x213d   :  { %v7792_v18 = vadd.f32 %v7791_v42, %v14988_v39  ;;  %v7853_v51 = vadd.f32 %v7852_v8, %v14992_v62  ;;  %v7793_v19 = vpop.f32.mrb[27].mxu0  ;;  %v7854_v45 = vpop.f32.mrb[23].mxu1  ;;  %8597 = vmatmul.mubr.bf16.vlgmr.msra.gmra.mrb[44].mxu0 %v8027_v24  ;;  %8652 = vmatmul.mubr.bf16.vlgmr.msra.gmra.mrb[40].mxu1 %v8029_v9  ;;  %v8003_v44 = vmax.f32 %v7788_v1, 0.0  ;;  %v8005_v61 = vmax.f32 %v7849_v48, 0.0 }
0x213e   :  { %v7794_v41 = vadd.f32 %v7793_v19, %v14996_v63  ;;  %v7855_v59 = vadd.f32 %v7854_v45, %v15000_v10  ;;  %10691 = vmatpush3.bf16.msra.mxu0 %v11894_v47  ;;  %10725 = vmatpush3.bf16.msra.mxu1 %v11895_v12  ;;  %v8004_v2 = vmax.f32 %v7790_v43, 0.0  ;;  %v8006_v25 = vmax.f32 %v7851_v14, 0.0 }
0x213f   :  { %v8011_v17 = vmax.f32 %v7792_v18, 0.0  ;;  %v8013_v11 = vmax.f32 %v7853_v51, 0.0  ;;  %10692 = vmatprep.subr.bf16.mxu0 %v11896_v27  ;;  %10726 = vmatprep.subr.bf16.mxu1 %v11897_v3  ;;  %v11906_v27 = vld [vmem:[%s15219_s10 + $0x718] sm:$0xff]   ;;  %v15066_v3 = vrot.slane %v14984_v5, %v13310_v21  ;;  %v15070_v43 = vrot.slane %v14984_v5, %v13313_v40  ;;  %v11908_v51 = vld [vmem:[%s15219_s10 + $0x760] sm:$0xff]  }
0x2140   :  { %v8012_v29 = vmax.f32 %v7794_v41, 0.0  ;;  %v8014_v28 = vmax.f32 %v7855_v59, 0.0  ;;  %v15074_v8 = vrot.slane %v14984_v5, %v13318_v57  ;;  %v15078_v18 = vrot.slane %v14984_v5, %v13321_v26  ;;  %v11909_v21 = vld [vmem:[%s15219_s10 + $0x7e0] sm:$0xff]  }
0x2141   :  { %v8035_v16 = vpack.c.bf16 %v8011_v17, %v8003_v44  ;;  %v8037_v23 = vpack.c.bf16 %v8013_v11, %v8005_v61  ;;  %v11910_v57 = vld [vmem:[%s15219_s10 + $0x720] sm:$0xff]   ;;  %v11912_v44 = vld [vmem:[%s15219_s10 + $0x768] sm:$0xff]  }
0x2142   :  { %v8036_v60 = vpack.c.bf16 %v8012_v29, %v8004_v2  ;;  %v8038_v34 = vpack.c.bf16 %v8014_v28, %v8006_v25  ;;  %10693 = vmatpush3.bf16.msra.mxu0 %v11898_v22  ;;  %10727 = vmatpush3.bf16.msra.mxu1 %v11899_v20  ;;  %v7797_v31 = vpop.f32.mrb[28].mxu0  ;;  %v7858_v50 = vpop.f32.mrb[24].mxu1  ;;  %v11911_v26 = vld [vmem:[%s15219_s10 + $0x7a0] sm:$0xff]   ;;  %v11913_v61 = vld [vmem:[%s15219_s10 + $0x7e8] sm:$0xff]  }
0x2143   :  { %v7798_v32 = vadd.f32 %v7797_v31, %v14988_v39  ;;  %v7859_v24 = vadd.f32 %v7858_v50, %v14992_v62  ;;  %v7799_v9 = vpop.f32.mrb[29].mxu0  ;;  %v7860_v0 = vpop.f32.mrb[25].mxu1  ;;  %10694 = vmatprep.subr.bf16.mxu0 %v11900_v13  ;;  %10728 = vmatprep.subr.bf16.mxu1 %v11901_v15 }
0x2144   :  { %v7800_v54 = vadd.f32 %v7799_v9, %v14996_v63  ;;  %v7861_v47 = vadd.f32 %v7860_v0, %v15000_v10  ;;  %v7801_v12 = vpop.f32.mrb[30].mxu0  ;;  %v7862_v39 = vpop.f32.mrb[26].mxu1  ;;  %8604 = vmatprep.mubr.bf16.mxu0 %v8036_v60  ;;  %8659 = vmatprep.mubr.bf16.mxu1 %v8038_v34  ;;  %v11907_v63 = vld [vmem:[%s15219_s10 + $0x798] sm:$0xff]   ;;  %v11914_v60 = vld [vmem:[%s15219_s10 + $0x728] sm:$0xff]  }
0x2145   :  { %v7802_v62 = vpop.f32.mrb[31].mxu0  ;;  %v7863_v1 = vpop.f32.mrb[27].mxu1  ;;  %8605 = vmatmul.mubr.bf16.gmra.mrb[48].mxu0 %v8035_v16  ;;  %8660 = vmatmul.mubr.bf16.gmra.mrb[44].mxu1 %v8037_v23  ;;  %v8019_v48 = vmax.f32 %v7798_v32, 0.0  ;;  %v8021_v10 = vmax.f32 %v7859_v24, 0.0  ;;  %v11915_v34 = vld [vmem:[%s15219_s10 + $0x7a8] sm:$0xff]   ;;  %v11916_v32 = vld [vmem:[%s15219_s10 + $0x770] sm:$0xff]  }
0x2146   :  { %v8020_v35 = vmax.f32 %v7800_v54, 0.0  ;;  %v8022_v58 = vmax.f32 %v7861_v47, 0.0  ;;  %10695 = vmatpush3.bf16.msra.mxu0 %v11902_v37  ;;  %10729 = vmatpush3.bf16.msra.mxu1 %v11903_v56  ;;  %v11917_v24 = vld [vmem:[%s15219_s10 + $0x7f0] sm:$0xff]  }
0x2147   :  { %10696 = vmatprep.subr.bf16.mxu0 %v11904_v36  ;;  %10730 = vmatprep.subr.bf16.mxu1 %v11905_v49  ;;  %v8043_v40 = vpack.c.bf16 %v8019_v48, %v8019_v48  ;;  %v8045_v5 = vpack.c.bf16 %v8021_v10, %v8021_v10  ;;  %v11918_v48 = vld [vmem:[%s15219_s10 + $0x730] sm:$0xff]  }
0x2148   :  { %v8044_v14 = vpack.c.bf16 %v8020_v35, %v8020_v35  ;;  %v8046_v42 = vpack.c.bf16 %v8022_v58, %v8022_v58  ;;  %v11919_v35 = vld [vmem:[%s15219_s10 + $0x7b0] sm:$0xff]  }
0x214a   :  { %10697 = vmatpush3.bf16.msra.mxu0 %v11906_v27  ;;  %10731 = vmatpush3.bf16.msra.mxu1 %v11907_v63  ;;  %v7899_v19 = vpop.f32.mrb[32].mxu0  ;;  %v7960_v45 = vpop.f32.mrb[28].mxu1 }
0x214b   :  { %v7900_v41 = vadd.f32 %v7899_v19, %v15066_v3  ;;  %v7961_v59 = vadd.f32 %v7960_v45, %v15070_v43  ;;  %8612 = vmatprep.mubr.bf16.mxu0 %v8044_v14  ;;  %8667 = vmatprep.mubr.bf16.mxu1 %v8046_v42  ;;  %v7901_v22 = vpop.f32.mrb[33].mxu0  ;;  %v7962_v20 = vpop.f32.mrb[29].mxu1  ;;  %v11920_v14 = vld [vmem:[%s15219_s10 + $0x778] sm:$0xff]  }
0x214c   :  { %v7902_v17 = vadd.f32 %v7901_v22, %v15074_v8  ;;  %v7963_v11 = vadd.f32 %v7962_v20, %v15078_v18  ;;  %v7903_v13 = vpop.f32.mrb[34].mxu0  ;;  %v7964_v15 = vpop.f32.mrb[30].mxu1  ;;  %10698 = vmatprep.subr.bf16.mxu0 %v11908_v51  ;;  %10732 = vmatprep.subr.bf16.mxu1 %v11909_v21  ;;  %v11921_v42 = vld [vmem:[%s15219_s10 + $0x7f8] sm:$0xff]  }
0x214d   :  { %v7904_v2 = vadd.f32 %v7903_v13, %v15066_v3  ;;  %v7965_v25 = vadd.f32 %v7964_v15, %v15070_v43  ;;  %v7905_v29 = vpop.f32.mrb[35].mxu0  ;;  %v7966_v28 = vpop.f32.mrb[31].mxu1  ;;  %8613 = vmatmul.mubr.bf16.gmra.mrb[52].mxu0 %v8043_v40  ;;  %8668 = vmatmul.mubr.bf16.gmra.mrb[48].mxu1 %v8045_v5  ;;  %v7991_v31 = vmax.f32 %v7900_v41, 0.0  ;;  %v7993_v50 = vmax.f32 %v7961_v59, 0.0  ;;  %v11922_v22 = vld [vmem:[%s15219_s10 + $0x738] sm:$0xff]  }
0x214e   :  { %v7906_v16 = vadd.f32 %v7905_v29, %v15074_v8  ;;  %v7967_v23 = vadd.f32 %v7966_v28, %v15078_v18  ;;  %10699 = vmatpush3.bf16.msra.mxu0 %v11910_v57  ;;  %10733 = vmatpush3.bf16.msra.mxu1 %v11911_v26  ;;  %v7992_v9 = vmax.f32 %v7902_v17, 0.0  ;;  %v7994_v0 = vmax.f32 %v7963_v11, 0.0  ;;  %v11923_v20 = vld [vmem:[%s15219_s10 + $0x7b8] sm:$0xff]  }
0x214f   :  { %v7999_v37 = vmax.f32 %v7904_v2, 0.0  ;;  %v8001_v56 = vmax.f32 %v7965_v25, 0.0  ;;  %10700 = vmatprep.subr.bf16.mxu0 %v11912_v44  ;;  %10734 = vmatprep.subr.bf16.mxu1 %v11913_v61 }
0x2150   :  { %v8000_v36 = vmax.f32 %v7906_v16, 0.0  ;;  %v8002_v49 = vmax.f32 %v7967_v23, 0.0 }
0x2151   :  { %v8031_v54 = vpack.c.bf16 %v7999_v37, %v7991_v31  ;;  %v8033_v47 = vpack.c.bf16 %v8001_v56, %v7993_v50 }
0x2152   :  { %v8032_v12 = vpack.c.bf16 %v8000_v36, %v7992_v9  ;;  %v8034_v39 = vpack.c.bf16 %v8002_v49, %v7994_v0  ;;  %10701 = vmatpush3.bf16.msra.mxu0 %v11914_v60  ;;  %10735 = vmatpush3.bf16.msra.mxu1 %v11915_v34  ;;  %v7909_v62 = vpop.f32.mrb[36].mxu0  ;;  %v7970_v1 = vpop.f32.mrb[32].mxu1 }
0x2153   :  { %v7910_v58 = vadd.f32 %v7909_v62, %v15066_v3  ;;  %v7971_v27 = vadd.f32 %v7970_v1, %v15070_v43  ;;  %v7911_v63 = vpop.f32.mrb[37].mxu0  ;;  %v7972_v10 = vpop.f32.mrb[33].mxu1  ;;  %10702 = vmatprep.subr.bf16.mxu0 %v11916_v32  ;;  %10736 = vmatprep.subr.bf16.mxu1 %v11917_v24 }
0x2154   :  { %v7912_v51 = vadd.f32 %v7911_v63, %v15074_v8  ;;  %v7973_v21 = vadd.f32 %v7972_v10, %v15078_v18  ;;  %v7913_v40 = vpop.f32.mrb[38].mxu0  ;;  %v7974_v19 = vpop.f32.mrb[34].mxu1  ;;  %8706 = vmatprep.mubr.bf16.mxu0 %v8032_v12  ;;  %8761 = vmatprep.mubr.bf16.mxu1 %v8034_v39 }
0x2155   :  { %v7914_v45 = vadd.f32 %v7913_v40, %v15066_v3  ;;  %v7975_v57 = vadd.f32 %v7974_v19, %v15070_v43  ;;  %v7915_v26 = vpop.f32.mrb[39].mxu0  ;;  %v7976_v5 = vpop.f32.mrb[35].mxu1  ;;  %v8007_v44 = vmax.f32 %v7910_v58, 0.0  ;;  %v8009_v61 = vmax.f32 %v7971_v27, 0.0 }
0x2156   :  { %v7916_v41 = vadd.f32 %v7915_v26, %v15074_v8  ;;  %v7977_v59 = vadd.f32 %v7976_v5, %v15078_v18  ;;  %10703 = vmatpush3.bf16.msra.mxu0 %v11918_v48  ;;  %10737 = vmatpush3.bf16.msra.mxu1 %v11919_v35  ;;  %v8008_v13 = vmax.f32 %v7912_v51, 0.0  ;;  %v8010_v15 = vmax.f32 %v7973_v21, 0.0 }
0x2157   :  { %v8015_v17 = vmax.f32 %v7914_v45, 0.0  ;;  %v8017_v11 = vmax.f32 %v7975_v57, 0.0  ;;  %10704 = vmatprep.subr.bf16.mxu0 %v11920_v14  ;;  %10738 = vmatprep.subr.bf16.mxu1 %v11921_v42 }
0x2158   :  { %v8016_v2 = vmax.f32 %v7916_v41, 0.0  ;;  %v8018_v25 = vmax.f32 %v7977_v59, 0.0 }
0x2159   :  { %v8039_v29 = vpack.c.bf16 %v8015_v17, %v8007_v44  ;;  %v8041_v28 = vpack.c.bf16 %v8017_v11, %v8009_v61 }
0x215a   :  { %v8040_v16 = vpack.c.bf16 %v8016_v2, %v8008_v13  ;;  %v8042_v23 = vpack.c.bf16 %v8018_v25, %v8010_v15  ;;  %10705 = vmatpush3.bf16.msra.mxu0 %v11922_v22  ;;  %10739 = vmatpush3.bf16.msra.mxu1 %v11923_v20  ;;  %v7919_v60 = vpop.f32.mrb[40].mxu0  ;;  %v7980_v34 = vpop.f32.mrb[36].mxu1 }
0x215b   :  { %v7921_v31 = vpop.f32.mrb[41].mxu0  ;;  %v7982_v50 = vpop.f32.mrb[37].mxu1  ;;  %11480 = vmatprep.subr.bf16.mxu0 %v12161_v4  ;;  %v7920_v12 = vadd.f32 %v7919_v60, %v15066_v3  ;;  %v7981_v39 = vadd.f32 %v7980_v34, %v15070_v43 }
0x215c   :  { %v7922_v37 = vadd.f32 %v7921_v31, %v15074_v8  ;;  %v7983_v56 = vadd.f32 %v7982_v50, %v15078_v18  ;;  %v7923_v32 = vpop.f32.mrb[42].mxu0  ;;  %v7984_v24 = vpop.f32.mrb[38].mxu1 }
0x215d   :  { %8707 = vmatmul.mubr.bf16.vlgmr.msra.gmra.mrb[56].mxu0 %v8031_v54  ;;  %8762 = vmatmul.mubr.bf16.vlgmr.msra.gmra.mrb[52].mxu1 %v8033_v47  ;;  %v7924_v9 = vpop.f32.mrb[43].mxu0  ;;  %v7985_v0 = vpop.f32.mrb[39].mxu1  ;;  %v8023_v8 = vmax.f32 %v7920_v12, 0.0  ;;  %v8025_v18 = vmax.f32 %v7981_v39, 0.0 }
0x215e   :  { %8714 = vmatprep.mubr.bf16.mxu0 %v8040_v16  ;;  %8769 = vmatprep.mubr.bf16.mxu1 %v8042_v23  ;;  %v8024_v36 = vmax.f32 %v7922_v37, 0.0  ;;  %v8026_v49 = vmax.f32 %v7983_v56, 0.0  ;;  %v9744_v0 = vld [vmem:[%s15220_s11 + $0x1] ss:$0 sm:$0xff] }
0x215f   :  { %v8047_v54 = vpack.c.bf16 %v8023_v8, %v8023_v8  ;;  %v8049_v47 = vpack.c.bf16 %v8025_v18, %v8025_v18 }
0x2160   :  { %v8048_v62 = vpack.c.bf16 %v8024_v36, %v8024_v36  ;;  %v8050_v1 = vpack.c.bf16 %v8026_v49, %v8026_v49 }
0x2165   :  { %8715 = vmatmul.mubr.bf16.gmra.mrb[60].mxu0 %v8039_v29  ;;  %8770 = vmatmul.mubr.bf16.gmra.mrb[60].mxu1 %v8041_v28 }
0x2166   :  { %8722 = vmatprep.mubr.bf16.mxu0 %v8048_v62  ;;  %8777 = vmatprep.mubr.bf16.mxu1 %v8050_v1  ;;  %v7599_v1 = vadd.f32 %v9744_v0, %v14973_v55 }
0x216d   :  { %8723 = vmatmul.mubr.bf16.gmra.mrb[64].mxu0 %v8047_v54  ;;  %8778 = vmatmul.mubr.bf16.gmra.mrb[64].mxu1 %v8049_v47  ;;  %v7600_v54 = vadd.f32 %v9744_v0, %v14975_v53 }
0x216e   :  { %11353 = vmatprep.mubr.msk.f32.mxu0 %vm12162_vm0, %v12163_v7 }
0x2210   :  { %v10638_v48 = vpop.f32.mrb[44].mxu0  ;;  %v10672_v35 = vpop.f32.mrb[40].mxu1 }
0x2211   :  { %v10639_v3 = vpop.f32.mrb[45].mxu0  ;;  %v10673_v58 = vpop.f32.mrb[41].mxu1 }
0x2212   :  { %v10640_v43 = vadd.f32 %v10639_v3, %v10638_v48  ;;  %v10674_v27 = vadd.f32 %v10673_v58, %v10672_v35  ;;  %v10641_v63 = vpop.f32.mrb[46].mxu0  ;;  %v10675_v10 = vpop.f32.mrb[42].mxu1 }
0x2213   :  { %v10642_v14 = vpop.f32.mrb[47].mxu0  ;;  %v10676_v42 = vpop.f32.mrb[43].mxu1 }
0x2214   :  { %v8654_v51 = vadd.f32 %v10674_v27, %v10640_v43  ;;  %v10643_v21 = vadd.f32 %v10642_v14, %v10641_v63  ;;  %v10677_v40 = vadd.f32 %v10676_v42, %v10675_v10 }
0x2216   :  { %v8657_v19 = vadd.f32 %v10677_v40, %v10643_v21 }
0x2218   :  { %v10644_v45 = vpop.f32.mrb[48].mxu0  ;;  %v10678_v57 = vpop.f32.mrb[44].mxu1 }
0x2219   :  { %v10645_v26 = vpop.f32.mrb[49].mxu0  ;;  %v10679_v5 = vpop.f32.mrb[45].mxu1 }
0x221a   :  { %v10646_v41 = vadd.f32 %v10645_v26, %v10644_v45  ;;  %v10680_v7 = vadd.f32 %v10679_v5, %v10678_v57  ;;  %v10647_v59 = vpop.f32.mrb[50].mxu0  ;;  %v10681_v22 = vpop.f32.mrb[46].mxu1  ;;  %v7601_v26 = vadd.f32 %v9744_v0, %v14977_v52 }
0x221b   :  { %v10648_v20 = vpop.f32.mrb[51].mxu0  ;;  %v10682_v44 = vpop.f32.mrb[47].mxu1 }
0x221c   :  { %v8662_v61 = vadd.f32 %v10680_v7, %v10646_v41  ;;  %v10649_v17 = vadd.f32 %v10648_v20, %v10647_v59  ;;  %v10683_v11 = vadd.f32 %v10682_v44, %v10681_v22  ;;  %v7602_v59 = vadd.f32 %v9744_v0, %v14979_v6 }
0x221e   :  { %v8665_v13 = vadd.f32 %v10683_v11, %v10649_v17 }
0x2220   :  { %v10650_v15 = vpop.f32.mrb[52].mxu0  ;;  %v10684_v2 = vpop.f32.mrb[48].mxu1 }
0x2221   :  { %v10651_v25 = vpop.f32.mrb[53].mxu0  ;;  %v10685_v29 = vpop.f32.mrb[49].mxu1 }
0x2222   :  { %v10653_v28 = vpop.f32.mrb[54].mxu0  ;;  %v10687_v16 = vpop.f32.mrb[50].mxu1 }
0x2223   :  { %v10654_v23 = vpop.f32.mrb[55].mxu0  ;;  %v10688_v60 = vpop.f32.mrb[51].mxu1 }
0x2230   :  { %v10706_v34 = vpop.f32.mrb[56].mxu0  ;;  %v10740_v31 = vpop.f32.mrb[52].mxu1 }
0x2231   :  { %v10707_v50 = vpop.f32.mrb[57].mxu0  ;;  %v10741_v37 = vpop.f32.mrb[53].mxu1 }
0x2232   :  { %v10708_v56 = vadd.f32 %v10707_v50, %v10706_v34  ;;  %v10742_v32 = vadd.f32 %v10741_v37, %v10740_v31  ;;  %v10709_v24 = vpop.f32.mrb[58].mxu0  ;;  %v10743_v9 = vpop.f32.mrb[54].mxu1 }
0x2233   :  { %v10710_v36 = vpop.f32.mrb[59].mxu0  ;;  %v10744_v49 = vpop.f32.mrb[55].mxu1 }
0x2234   :  { %v8709_v12 = vadd.f32 %v10708_v56, %v8654_v51  ;;  %v10711_v39 = vadd.f32 %v10710_v36, %v10709_v24  ;;  %v10745_v62 = vadd.f32 %v10744_v49, %v10743_v9 }
0x2236   :  { %v8764_v8 = vadd.f32 %v10742_v32, %v8709_v12  ;;  %v8712_v18 = vadd.f32 %v10711_v39, %v8657_v19 }
0x2238   :  { %v8784_v47 = vadd.f32 %v8764_v8, %v7599_v1  ;;  %v8767_v48 = vadd.f32 %v10745_v62, %v8712_v18  ;;  %v10712_v35 = vpop.f32.mrb[60].mxu0  ;;  %v10746_v3 = vpop.f32.mrb[60].mxu1  ;;  %v8871_v1 = vld [vmem:[%s15225_s16] sm:$0xff]  ;;  %v8872_v8 = vld [vmem:[%s15225_s16 + $0x8] sm:$0xff] }
0x2239   :  { %v10713_v58 = vpop.f32.mrb[61].mxu0  ;;  %v10747_v43 = vpop.f32.mrb[61].mxu1  ;;  %v11481_v18 = vpack.c.bf16 %v8872_v8, %v8871_v1 }
0x223a   :  { %v8785_v27 = vadd.f32 %v8767_v48, %v7600_v54  ;;  %v10714_v63 = vadd.f32 %v10713_v58, %v10712_v35  ;;  %v10748_v10 = vadd.f32 %v10747_v43, %v10746_v3  ;;  %v10715_v14 = vpop.f32.mrb[62].mxu0  ;;  %v10749_v42 = vpop.f32.mrb[62].mxu1  ;;  %v8788_v51 = vadd.f32 %v8784_v47, %v14422_v38  ;;  %v8873_v54 = vld [vmem:[%s15225_s16 + $0x10] sm:$0xff]  ;;  %v8874_v47 = vld [vmem:[%s15225_s16 + $0x18] sm:$0xff] }
0x223b   :  { %v10716_v21 = vpop.f32.mrb[63].mxu0  ;;  %v10750_v40 = vpop.f32.mrb[63].mxu1  ;;  %11482 = vmatpush3.bf16.msra.mxu0 %v11481_v18  ;;  %v11484_v48 = vpack.c.bf16 %v8874_v47, %v8873_v54 }
0x223c   :  { %v8717_v55 = vadd.f32 %v10714_v63, %v8662_v61  ;;  %v10717_v45 = vadd.f32 %v10716_v21, %v10715_v14  ;;  %v10751_v19 = vadd.f32 %v10750_v40, %v10749_v42  ;;  %v8796_v53 = vsel %vm141_vm2, %v8788_v51, 0.0  ;;  %11483 = vmatprep.subr.bf16.mxu0 %v12161_v4 }
0x223d   :  { %8797 = vadd.xlane.f32.xlu1 %v8796_v53  ;;  %v8789_v57 = vadd.f32 %v8785_v27, %v14424_v46  ;;  %v9984_v53 = vld [vmem:[%s15223_s14 + $0x1] ss:$0 sm:$0xff] }
0x223e   :  { %v8772_v5 = vadd.f32 %v10748_v10, %v8717_v55  ;;  %v8720_v41 = vadd.f32 %v10717_v45, %v8665_v13 }
0x223f   :  { %v8799_v7 = vsel %vm141_vm2, %v8789_v57, 0.0  ;;  %11485 = vmatpush3.bf16.msra.mxu0 %v11484_v48 }
0x2240   :  { %v8786_v22 = vadd.f32 %v8772_v5, %v7601_v26  ;;  %v8775_v38 = vadd.f32 %v10751_v19, %v8720_v41  ;;  %8800 = vadd.xlane.f32.xlu0 %v8799_v7  ;;  %v10718_v20 = vpop.f32.mrb[64].mxu0  ;;  %v10752_v44 = vpop.f32.mrb[64].mxu1  ;;  %v9985_v41 = vld [vmem:[%s15224_s15 + $0x1] ss:$0 sm:$0xff]  ;;  %s12176_s15 = smov [#allocation2]  }
0x2241   :  { %v10719_v61 = vpop.f32.mrb[65].mxu0  ;;  %v10753_v17 = vpop.f32.mrb[65].mxu1  ;;  %s8962_s9 = sshll.u32 %s12176_s15, 4  ;;  %s8963_s9 = int_to_ptr.vmem [resolvable:$true] %s8962_s9 }
0x2242   :  { %v8787_v11 = vadd.f32 %v8775_v38, %v7602_v59  ;;  %v10721_v15 = vpop.f32.mrb[66].mxu0  ;;  %v10755_v2 = vpop.f32.mrb[66].mxu1  ;;  %v8790_v46 = vadd.f32 %v8786_v22, %v14453_v30  ;;  %s12137_s24 = scalar_lea.vmem %s8963_s9, 64  ;;  %p12142_p1 = scmp.lt.s32.totalorder %s8963_s9, %s8963_s9 }
0x2243   :  { %v10722_v25 = vpop.f32.mrb[67].mxu0  ;;  %v10756_v52 = vpop.f32.mrb[67].mxu1  ;;  %p12138_p0 = scmp.ne.s32.totalorder %s8963_s9, %s12137_s24  ;;  %p12143_p2 = scmp.lt.s32.totalorder %s12137_s24, %s12137_s24 }
0x2244   :  { %v8802_v13 = vsel %vm141_vm2, %v8790_v46, 0.0  ;;  %v8791_v29 = vadd.f32 %v8787_v11, %v14455_v33  ;;  %v9986_v25 = vld [vmem:[%s15226_s17] ss:$0 sm:$0xff] }
0x2245   :  { %8803 = vadd.xlane.f32.xlu1 %v8802_v13  ;;  %p12144_p3 = por %p12143_p2, %p12142_p1 }
0x2246   :  { %v8805_v6 = vsel %vm141_vm2, %v8791_v29, 0.0 }
0x2247   :  { %8806 = vadd.xlane.f32.xlu0 %v8805_v6  ;;  %p12145_p4 = pnand %p12144_p3, %p12138_p0 }
0x22ca   :  { %v8798_v28 = vpop.xlane.xlu1 %8797 }
0x22cb   :  { %v8808_v16 = vmul.f32 0.03125, %v8798_v28 }
0x22cd   :  { %v8812_v23 = vsub.f32 %v8788_v51, %v8808_v16  ;;  %v8801_v60 = vpop.xlane.xlu0 %8800 }
0x22ce   :  { %v8809_v34 = vmul.f32 0.03125, %v8801_v60 }
0x22cf   :  { %v8816_v31 = vmul.f32 %v8812_v23, %v8812_v23 }
0x22d0   :  { %v8813_v50 = vsub.f32 %v8789_v57, %v8809_v34 }
0x22d1   :  { %v8820_v37 = vsel %vm141_vm2, %v8816_v31, 0.0 }
0x22d2   :  { %8821 = vadd.xlane.f32.xlu1 %v8820_v37  ;;  %v8804_v30 = vpop.xlane.xlu1 %8803  ;;  %v8817_v56 = vmul.f32 %v8813_v50, %v8813_v50 }
0x22d3   :  { %v8810_v32 = vmul.f32 0.03125, %v8804_v30 }
0x22d4   :  { %v8823_v24 = vsel %vm141_vm2, %v8817_v56, 0.0  ;;  %v8807_v33 = vpop.xlane.xlu0 %8806 }
0x22d5   :  { %v8814_v9 = vsub.f32 %v8790_v46, %v8810_v32  ;;  %8824 = vadd.xlane.f32.xlu0 %v8823_v24  ;;  %v8811_v0 = vmul.f32 0.03125, %v8807_v33 }
0x22d7   :  { %v8815_v36 = vsub.f32 %v8791_v29, %v8811_v0  ;;  %v8818_v49 = vmul.f32 %v8814_v9, %v8814_v9 }
0x22d9   :  { %v8826_v12 = vsel %vm141_vm2, %v8818_v49, 0.0  ;;  %v8819_v39 = vmul.f32 %v8815_v36, %v8815_v36 }
0x22da   :  { %8827 = vadd.xlane.f32.xlu1 %v8826_v12 }
0x22db   :  { %v8829_v62 = vsel %vm141_vm2, %v8819_v39, 0.0 }
0x22dc   :  { %8830 = vadd.xlane.f32.xlu0 %v8829_v62 }
0x235f   :  { %v8822_v35 = vpop.xlane.xlu1 %8821 }
0x2360   :  { %v8832_v3 = vmul.f32 0.03125, %v8822_v35 }
0x2362   :  { %v8836_v58 = vadd.f32 1e-05, %v8832_v3  ;;  %v8825_v43 = vpop.xlane.xlu0 %8824 }
0x2363   :  { %v8833_v27 = vmul.f32 0.03125, %v8825_v43 }
0x2364   :  { %12114 = vrsqrt.f32 %v8836_v58 }
0x2365   :  { %v8837_v63 = vadd.f32 1e-05, %v8833_v27 }
0x2367   :  { %12116 = vrsqrt.f32 %v8837_v63  ;;  %v8828_v10 = vpop.xlane.xlu1 %8827 }
0x2368   :  { %v8834_v4 = vmul.f32 0.03125, %v8828_v10 }
0x2369   :  { %v8831_v14 = vpop.xlane.xlu0 %8830 }
0x236a   :  { %v8838_v42 = vadd.f32 1e-05, %v8834_v4  ;;  %v8835_v51 = vmul.f32 0.03125, %v8831_v14 }
0x236c   :  { %12118 = vrsqrt.f32 %v8838_v42  ;;  %v8839_v21 = vadd.f32 1e-05, %v8835_v51 }
0x236e   :  { %12120 = vrsqrt.f32 %v8839_v21  ;;  %v12115_v40 = vpop.eup %12114 }
0x236f   :  { %v8844_v45 = vmul.f32 %v12115_v40, %v8812_v23 }
0x2371   :  { %v12117_v55 = vpop.eup %12116  ;;  %v8854_v5 = vmul.f32 %v9984_v53, %v8844_v45 }
0x2372   :  { %v8845_v19 = vmul.f32 %v12117_v55, %v8813_v50 }
0x2373   :  { %v8864_v44 = vadd.f32 %v9985_v41, %v8854_v5 }
0x2374   :  { %v8855_v57 = vmul.f32 %v9984_v53, %v8845_v19 }
0x2376   :  { %v12119_v26 = vpop.eup %12118  ;;  %v8865_v22 = vadd.f32 %v9985_v41, %v8855_v57 }
0x2377   :  { %v8846_v7 = vmul.f32 %v12119_v26, %v8814_v9 }
0x2378   :  { %v12121_v59 = vpop.eup %12120  ;;  %v8868_v11 = vsel %vm89_vm1, %v8864_v44, %v8865_v22 }
0x2379   :  { %v8856_v38 = vmul.f32 %v9984_v53, %v8846_v7  ;;  %v8847_v20 = vmul.f32 %v12121_v59, %v8815_v36 }
0x237b   :  { %v8866_v61 = vadd.f32 %v9985_v41, %v8856_v38  ;;  %v8857_v17 = vmul.f32 %v9984_v53, %v8847_v20 }
0x237d   :  { %v8867_v15 = vadd.f32 %v9985_v41, %v8857_v17  ;;  %v8869_v2 = vsel %vm92_vm3, %v8868_v11, %v8866_v61 }
0x237f   :  { %v8870_v46 = vsel %vm95_vm4, %v8869_v2, %v8867_v15 }
0x2380   :  { %11354 = vmatmul.mubr.msk.f32.vlgmr.msra.gmra.mrb[68].mxu0 %vm141_vm2, %v8870_v46 }
0x2453   :  { %v8951_v52 = vpop.f32.mrb[68].mxu0 }
0x2454   :  { %v8952_v13 = vadd.f32 %v9986_v25, %v8951_v52  ;;  %v11355_v29 = vpop.f32.mrb[69].mxu0 }
0x2456   :  { %8955 = vst.msk [vmem:[#allocation2] sm:$0xf] %vm1942_vm10, %v8952_v13 }
0x2457   :  { %12148 = shalt.err (!%p12145_p4)
}
0x2458   :  { %s12149_s27 = scalar_lea.hbm %s15227_s18, 64 }
0x2459   :  { %p12150_p5 = scmp.ne.s32.totalorder %s15227_s18, %s12149_s27  ;;  %p12153_p6 = scmp.lt.u32.totalorder %s12149_s27, %s15227_s18 }
0x245b   :  { %p12155_p7 = pnand %p12153_p6, %p12150_p5 }
0x245d   :  { %12158 = shalt.err (!%p12155_p7)
}
0x245e   :  { %8965 = dma.vmem_to_hbm [thread:$0]  %s8963_s9, 64, %s15227_s18, [#allocation3]  }
0x245f   :  { %12159 = dma.done.wait [#allocation3], 64  }
0x2460   :  { %12160 = vsyncadd [#allocation3], 4294967232 }
0x2461   :  { %8969 = vsyncpa [#allocation3], 1 }

</bundles_post_ra>
